<compile_context>
chip_gen: v6e
topology: v6e:2x2x1
jax: 0.10.0
libtpu: 0.0.40
codegen_flags: <defaults>
</compile_context>

<pallas_src>
import functools

import jax
import jax.numpy as jnp
from jax import lax
from jax.experimental import pallas as pl
from jax.experimental.pallas import tpu as pltpu


def _triple(v):
    if isinstance(v, (tuple, list)):
        assert len(v) == 3
        return tuple(int(i) for i in v)
    return (int(v),) * 3


def _round_up(x, m):
    return ((x + m - 1) // m) * m


def _conv3d_gemm_kernel(x_ref, w_ref, b_ref, o_ref, xcol_ref, *,
                        offsets, cinp, lout):
    # x_ref:    (1, CinP, Lin)    zero-padded volume, spatial flattened to lanes
    # w_ref:    (CoutP, K3*CinP)  weight matrix, tap-major / channel-minor
    # b_ref:    (CoutP, 1)        bias column
    # o_ref:    (1, CoutP, Lout)  stride-1 conv output in padded-flat coords
    # xcol_ref: (K3*CinP, Lout)   VMEM scratch: implicit im2col columns
    for t, off in enumerate(offsets):
        # Static tap offset -> static shifted view of the flat padded volume.
        # Sublane start (t*CinP) is a multiple of 8 and Lout is a multiple of
        # 128, so these stores are fully unmasked.
        xcol_ref[pl.ds(t * cinp, cinp), :] = x_ref[0, :, pl.ds(off, lout)]
    y = jnp.dot(w_ref[...], xcol_ref[...], preferred_element_type=jnp.float32)
    o_ref[...] = (y + b_ref[...])[None].astype(o_ref.dtype)


@functools.partial(jax.jit, static_argnames=("stride", "padding", "groups"))
def conv3d_pallas(x, weight, bias, *, stride=1, padding=0, groups=1):
    """3-D convolution (NCDHW input, OIDHW weight) matching nn.Conv3d forward."""
    N, Cin, D, H, W = x.shape
    Cout = weight.shape[0]
    Kd, Kh, Kw = (int(k) for k in weight.shape[2:])
    sd, sh, sw = _triple(stride)
    pd, ph, pw = _triple(padding)

    assert Cin % groups == 0 and Cout % groups == 0
    assert weight.shape[1] == Cin // groups

    # Expand grouped weight to dense (Cout, Cin, Kd, Kh, Kw) connectivity
    # (zeros outside each group's channel block) so one GEMM covers all groups.
    if groups == 1:
        w_dense = weight.astype(jnp.float32)
    else:
        w_dense = jnp.zeros((Cout, Cin, Kd, Kh, Kw), jnp.float32)
        opg, ipg = Cout // groups, Cin // groups
        for gi in range(groups):
            w_dense = w_dense.at[gi * opg:(gi + 1) * opg,
                                 gi * ipg:(gi + 1) * ipg].set(
                weight[gi * opg:(gi + 1) * opg].astype(jnp.float32))

    # Padded extents and stride-1 ("full-lattice") output extents.
    Dp, Hp, Wp = D + 2 * pd, H + 2 * ph, W + 2 * pw
    Do1, Ho1, Wo1 = Dp - Kd + 1, Hp - Kh + 1, Wp - Kw + 1
    assert Do1 > 0 and Ho1 > 0 and Wo1 > 0, "kernel larger than padded input"
    Do = (D + 2 * pd - Kd) // sd + 1
    Ho = (H + 2 * ph - Kh) // sh + 1
    Wo = (W + 2 * pw - Kw) // sw + 1

    Lp = Dp * Hp * Wp
    # Flat span covering every stride-1 output position.  By construction
    # max_off + L == Lp.
    L = (Do1 - 1) * Hp * Wp + (Ho1 - 1) * Wp + Wo1
    max_off = (Kd - 1) * Hp * Wp + (Kh - 1) * Wp + (Kw - 1)

    # Alignment padding: channels to multiples of 8 (sublanes), flat spans to
    # multiples of 128 (lanes) -> unmasked stores / lane-dense DMAs.
    CinP = _round_up(Cin, 8)
    CoutP = _round_up(Cout, 8)
    K3 = Kd * Kh * Kw
    Lout = _round_up(L, 128)              # kernel output / scratch lane extent
    Lin = _round_up(Lout + max_off, 128)  # input slab lane extent (>= Lp)

    xf = x.astype(jnp.float32)
    x_pad = jnp.pad(xf, ((0, 0), (0, CinP - Cin), (pd, pd), (ph, ph), (pw, pw)))
    x_flat = x_pad.reshape(N, CinP, Lp)
    x_flat = jnp.pad(x_flat, ((0, 0), (0, 0), (0, Lin - Lp)))

    wp = jnp.zeros((CoutP, CinP, Kd, Kh, Kw), jnp.float32).at[:Cout, :Cin].set(w_dense)
    # Row order of the GEMM contraction: (kd, kh, kw) major, channel minor.
    w_mat = jnp.transpose(wp, (0, 2, 3, 4, 1)).reshape(CoutP, K3 * CinP)
    b_col = jnp.zeros((CoutP, 1), jnp.float32).at[:Cout, 0].set(
        bias.astype(jnp.float32))

    offsets = tuple(kd * Hp * Wp + kh * Wp + kw
                    for kd in range(Kd) for kh in range(Kh) for kw in range(Kw))

    kernel = functools.partial(_conv3d_gemm_kernel,
                               offsets=offsets, cinp=CinP, lout=Lout)

    # VMEM budget: double-buffered blocks + single scratch (+1 MiB headroom),
    # clamped to a range valid on v5e/v6e/v7x.
    vmem_need = 4 * (2 * CinP * Lin + 2 * CoutP * K3 * CinP + 2 * CoutP
                     + 2 * CoutP * Lout + K3 * CinP * Lout) + (1 << 20)
    vmem_limit = int(min(max(vmem_need, 16 << 20), 64 << 20))

    y = pl.pallas_call(
        kernel,
        out_shape=jax.ShapeDtypeStruct((N, CoutP, Lout), jnp.float32),
        grid_spec=pltpu.PrefetchScalarGridSpec(
            num_scalar_prefetch=0,
            grid=(N,),
            in_specs=[
                pl.BlockSpec((1, CinP, Lin), lambda n: (n, 0, 0)),
                pl.BlockSpec((CoutP, K3 * CinP), lambda n: (0, 0)),
                pl.BlockSpec((CoutP, 1), lambda n: (0, 0)),
            ],
            out_specs=pl.BlockSpec((1, CoutP, Lout), lambda n: (n, 0, 0)),
            scratch_shapes=[pltpu.VMEM((K3 * CinP, Lout), jnp.float32)],
        ),
        compiler_params=pltpu.CompilerParams(
            dimension_semantics=("parallel",),
            vmem_limit_bytes=vmem_limit,
        ),
    )(x_flat, w_mat, b_col)

    # Un-flatten: drop channel padding, bring the flat span to exactly Lp,
    # reshape to the padded grid, and pick the strided output lattice
    # (stride handled here; the kernel computes the stride-1 lattice).
    y = y[:, :Cout]
    if Lout >= Lp:
        y = y[:, :, :Lp]
    else:
        y = jnp.pad(y, ((0, 0), (0, 0), (0, Lp - Lout)))
    y = y.reshape(N, Cout, Dp, Hp, Wp)
    y = y[:, :,
          0:(Do - 1) * sd + 1:sd,
          0:(Ho - 1) * sh + 1:sh,
          0:(Wo - 1) * sw + 1:sw]
    return y


class ConvBlockPallas:
    """Pallas equivalent of Conv_Block: out = Conv3d(x)."""

    def __init__(self, in_channels, out_channels, kernel_size, stride, padding,
                 groups=1, *, key):
        kd, kh, kw = _triple(kernel_size)
        k1, k2 = jax.random.split(key)
        fan_in = (in_channels // groups) * kd * kh * kw
        bound = 1.0 / (fan_in ** 0.5)
        self.weight = jax.random.uniform(
            k1, (out_channels, in_channels // groups, kd, kh, kw),
            jnp.float32, -bound, bound)
        self.bias = jax.random.uniform(k2, (out_channels,), jnp.float32,
                                       -bound, bound)
        # Keep hyper-params hashable (they are static args of the jitted fn).
        self.stride = _triple(stride)
        self.padding = _triple(padding)
        self.groups = int(groups)

    def __call__(self, x):
        return conv3d_pallas(x, self.weight, self.bias,
                             stride=self.stride, padding=self.padding,
                             groups=self.groups)


def conv3d_reference(x, weight, bias, *, stride=1, padding=0, groups=1):
    """Pure-JAX reference mirroring torch.nn.Conv3d forward."""
    sd, sh, sw = _triple(stride)
    pd, ph, pw = _triple(padding)
    out = lax.conv_general_dilated(
        x.astype(jnp.float32), weight.astype(jnp.float32),
        window_strides=(sd, sh, sw),
        padding=[(pd, pd), (ph, ph), (pw, pw)],
        dimension_numbers=("NCDHW", "OIDHW", "NCDHW"),
        feature_group_count=groups,
        precision=lax.Precision.HIGHEST)
    return out + bias.reshape(1, -1, 1, 1, 1)


if __name__ == "__main__":
    key = jax.random.PRNGKey(0)
    kx, kp = jax.random.split(key)

    N, Cin, D, H, W = 2, 4, 16, 16, 16
    Cout, K, stride, padding, groups = 8, 3, 1, 1, 1

    x = jax.random.normal(kx, (N, Cin, D, H, W), dtype=jnp.float32)
    block = ConvBlockPallas(Cin, Cout, K, stride, padding, groups, key=kp)

    out = jax.block_until_ready(block(x))
    ref = jax.block_until_ready(
        conv3d_reference(x, block.weight, block.bias,
                         stride=stride, padding=padding, groups=groups))

    assert out.shape == ref.shape, (out.shape, ref.shape)
    assert bool(jnp.all(jnp.isfinite(out)))
    # MXU f32 matmul vs HIGHEST-precision conv: tiny accumulation-order diffs.
    assert jnp.allclose(out, ref, rtol=2e-2, atol=2e-3), \
        float(jnp.max(jnp.abs(out - ref)))
    print("KERNEL_OK")
</pallas_src>

<mosaic_0001>
module attributes {stable_mosaic.version = 11 : i64} {
  func.func @_conv3d_gemm_kernel(%arg0: i32, %arg1: memref<1x8x6016xf32, #tpu.memory_space<vmem>>, %arg2: memref<8x216xf32, #tpu.memory_space<vmem>>, %arg3: memref<8x1xf32, #tpu.memory_space<vmem>>, %arg4: memref<1x8x5248xf32, #tpu.memory_space<vmem>>, %arg5: memref<216x5248xf32, #tpu.memory_space<vmem>>) attributes {dimension_semantics = [#tpu.dimension_semantics<parallel>], iteration_bounds = array<i64: 2>, scalar_prefetch = 0 : i64, scratch_operands = 1 : i64, tpu.core_type = #tpu.core_type<tc>, window_params = [{transform_indices = @transform_0, window_bounds = array<i64: 1, 8, 6016>}, {pipeline_mode = #tpu.pipeline_mode<synchronous>, transform_indices = @transform_1, window_bounds = array<i64: 8, 216>}, {pipeline_mode = #tpu.pipeline_mode<synchronous>, transform_indices = @transform_2, window_bounds = array<i64: 8, 1>}, {transform_indices = @transform_3, window_bounds = array<i64: 1, 8, 5248>}]} {
    %c0 = arith.constant 0 : index
    %c0_0 = arith.constant 0 : index
    %c0_1 = arith.constant 0 : index
    %0 = vector.load %arg1[%c0, %c0_0, %c0_1] : memref<1x8x6016xf32, #tpu.memory_space<vmem>>, vector<1x8x5248xf32>
    %1 = vector.shape_cast %0 : vector<1x8x5248xf32> to vector<8x5248xf32>
    %c0_2 = arith.constant 0 : index
    %c0_3 = arith.constant 0 : index
    %2 = vector.load %arg5[%c0_2, %c0_3] : memref<216x5248xf32, #tpu.memory_space<vmem>>, vector<8x5248xf32>
    tpu.vector_store %arg5[%c0_2, %c0_3], %1 {strides = array<i32>} : memref<216x5248xf32, #tpu.memory_space<vmem>>, vector<8x5248xf32>,
    %c0_4 = arith.constant 0 : index
    %c0_5 = arith.constant 0 : index
    %c1 = arith.constant 1 : index
    %3 = vector.load %arg1[%c0_4, %c0_5, %c1] : memref<1x8x6016xf32, #tpu.memory_space<vmem>>, vector<1x8x5248xf32>
    %4 = vector.shape_cast %3 : vector<1x8x5248xf32> to vector<8x5248xf32>
    %c8 = arith.constant 8 : index
    %c0_6 = arith.constant 0 : index
    %5 = vector.load %arg5[%c8, %c0_6] : memref<216x5248xf32, #tpu.memory_space<vmem>>, vector<8x5248xf32>
    tpu.vector_store %arg5[%c8, %c0_6], %4 {strides = array<i32>} : memref<216x5248xf32, #tpu.memory_space<vmem>>, vector<8x5248xf32>,
    %c0_7 = arith.constant 0 : index
    %c0_8 = arith.constant 0 : index
    %c2 = arith.constant 2 : index
    %6 = vector.load %arg1[%c0_7, %c0_8, %c2] : memref<1x8x6016xf32, #tpu.memory_space<vmem>>, vector<1x8x5248xf32>
    %7 = vector.shape_cast %6 : vector<1x8x5248xf32> to vector<8x5248xf32>
    %c16 = arith.constant 16 : index
    %c0_9 = arith.constant 0 : index
    %8 = vector.load %arg5[%c16, %c0_9] : memref<216x5248xf32, #tpu.memory_space<vmem>>, vector<8x5248xf32>
    tpu.vector_store %arg5[%c16, %c0_9], %7 {strides = array<i32>} : memref<216x5248xf32, #tpu.memory_space<vmem>>, vector<8x5248xf32>,
    %c0_10 = arith.constant 0 : index
    %c0_11 = arith.constant 0 : index
    %c18 = arith.constant 18 : index
    %9 = vector.load %arg1[%c0_10, %c0_11, %c18] : memref<1x8x6016xf32, #tpu.memory_space<vmem>>, vector<1x8x5248xf32>
    %10 = vector.shape_cast %9 : vector<1x8x5248xf32> to vector<8x5248xf32>
    %c24 = arith.constant 24 : index
    %c0_12 = arith.constant 0 : index
    %11 = vector.load %arg5[%c24, %c0_12] : memref<216x5248xf32, #tpu.memory_space<vmem>>, vector<8x5248xf32>
    tpu.vector_store %arg5[%c24, %c0_12], %10 {strides = array<i32>} : memref<216x5248xf32, #tpu.memory_space<vmem>>, vector<8x5248xf32>,
    %c0_13 = arith.constant 0 : index
    %c0_14 = arith.constant 0 : index
    %c19 = arith.constant 19 : index
    %12 = vector.load %arg1[%c0_13, %c0_14, %c19] : memref<1x8x6016xf32, #tpu.memory_space<vmem>>, vector<1x8x5248xf32>
    %13 = vector.shape_cast %12 : vector<1x8x5248xf32> to vector<8x5248xf32>
    %c32 = arith.constant 32 : index
    %c0_15 = arith.constant 0 : index
    %14 = vector.load %arg5[%c32, %c0_15] : memref<216x5248xf32, #tpu.memory_space<vmem>>, vector<8x5248xf32>
    tpu.vector_store %arg5[%c32, %c0_15], %13 {strides = array<i32>} : memref<216x5248xf32, #tpu.memory_space<vmem>>, vector<8x5248xf32>,
    %c0_16 = arith.constant 0 : index
    %c0_17 = arith.constant 0 : index
    %c20 = arith.constant 20 : index
    %15 = vector.load %arg1[%c0_16, %c0_17, %c20] : memref<1x8x6016xf32, #tpu.memory_space<vmem>>, vector<1x8x5248xf32>
    %16 = vector.shape_cast %15 : vector<1x8x5248xf32> to vector<8x5248xf32>
    %c40 = arith.constant 40 : index
    %c0_18 = arith.constant 0 : index
    %17 = vector.load %arg5[%c40, %c0_18] : memref<216x5248xf32, #tpu.memory_space<vmem>>, vector<8x5248xf32>
    tpu.vector_store %arg5[%c40, %c0_18], %16 {strides = array<i32>} : memref<216x5248xf32, #tpu.memory_space<vmem>>, vector<8x5248xf32>,
    %c0_19 = arith.constant 0 : index
    %c0_20 = arith.constant 0 : index
    %c36 = arith.constant 36 : index
    %18 = vector.load %arg1[%c0_19, %c0_20, %c36] : memref<1x8x6016xf32, #tpu.memory_space<vmem>>, vector<1x8x5248xf32>
    %19 = vector.shape_cast %18 : vector<1x8x5248xf32> to vector<8x5248xf32>
    %c48 = arith.constant 48 : index
    %c0_21 = arith.constant 0 : index
    %20 = vector.load %arg5[%c48, %c0_21] : memref<216x5248xf32, #tpu.memory_space<vmem>>, vector<8x5248xf32>
    tpu.vector_store %arg5[%c48, %c0_21], %19 {strides = array<i32>} : memref<216x5248xf32, #tpu.memory_space<vmem>>, vector<8x5248xf32>,
    %c0_22 = arith.constant 0 : index
    %c0_23 = arith.constant 0 : index
    %c37 = arith.constant 37 : index
    %21 = vector.load %arg1[%c0_22, %c0_23, %c37] : memref<1x8x6016xf32, #tpu.memory_space<vmem>>, vector<1x8x5248xf32>
    %22 = vector.shape_cast %21 : vector<1x8x5248xf32> to vector<8x5248xf32>
    %c56 = arith.constant 56 : index
    %c0_24 = arith.constant 0 : index
    %23 = vector.load %arg5[%c56, %c0_24] : memref<216x5248xf32, #tpu.memory_space<vmem>>, vector<8x5248xf32>
    tpu.vector_store %arg5[%c56, %c0_24], %22 {strides = array<i32>} : memref<216x5248xf32, #tpu.memory_space<vmem>>, vector<8x5248xf32>,
    %c0_25 = arith.constant 0 : index
    %c0_26 = arith.constant 0 : index
    %c38 = arith.constant 38 : index
    %24 = vector.load %arg1[%c0_25, %c0_26, %c38] : memref<1x8x6016xf32, #tpu.memory_space<vmem>>, vector<1x8x5248xf32>
    %25 = vector.shape_cast %24 : vector<1x8x5248xf32> to vector<8x5248xf32>
    %c64 = arith.constant 64 : index
    %c0_27 = arith.constant 0 : index
    %26 = vector.load %arg5[%c64, %c0_27] : memref<216x5248xf32, #tpu.memory_space<vmem>>, vector<8x5248xf32>
    tpu.vector_store %arg5[%c64, %c0_27], %25 {strides = array<i32>} : memref<216x5248xf32, #tpu.memory_space<vmem>>, vector<8x5248xf32>,
    %c0_28 = arith.constant 0 : index
    %c0_29 = arith.constant 0 : index
    %c324 = arith.constant 324 : index
    %27 = vector.load %arg1[%c0_28, %c0_29, %c324] : memref<1x8x6016xf32, #tpu.memory_space<vmem>>, vector<1x8x5248xf32>
    %28 = vector.shape_cast %27 : vector<1x8x5248xf32> to vector<8x5248xf32>
    %c72 = arith.constant 72 : index
    %c0_30 = arith.constant 0 : index
    %29 = vector.load %arg5[%c72, %c0_30] : memref<216x5248xf32, #tpu.memory_space<vmem>>, vector<8x5248xf32>
    tpu.vector_store %arg5[%c72, %c0_30], %28 {strides = array<i32>} : memref<216x5248xf32, #tpu.memory_space<vmem>>, vector<8x5248xf32>,
    %c0_31 = arith.constant 0 : index
    %c0_32 = arith.constant 0 : index
    %c325 = arith.constant 325 : index
    %30 = vector.load %arg1[%c0_31, %c0_32, %c325] : memref<1x8x6016xf32, #tpu.memory_space<vmem>>, vector<1x8x5248xf32>
    %31 = vector.shape_cast %30 : vector<1x8x5248xf32> to vector<8x5248xf32>
    %c80 = arith.constant 80 : index
    %c0_33 = arith.constant 0 : index
    %32 = vector.load %arg5[%c80, %c0_33] : memref<216x5248xf32, #tpu.memory_space<vmem>>, vector<8x5248xf32>
    tpu.vector_store %arg5[%c80, %c0_33], %31 {strides = array<i32>} : memref<216x5248xf32, #tpu.memory_space<vmem>>, vector<8x5248xf32>,
    %c0_34 = arith.constant 0 : index
    %c0_35 = arith.constant 0 : index
    %c326 = arith.constant 326 : index
    %33 = vector.load %arg1[%c0_34, %c0_35, %c326] : memref<1x8x6016xf32, #tpu.memory_space<vmem>>, vector<1x8x5248xf32>
    %34 = vector.shape_cast %33 : vector<1x8x5248xf32> to vector<8x5248xf32>
    %c88 = arith.constant 88 : index
    %c0_36 = arith.constant 0 : index
    %35 = vector.load %arg5[%c88, %c0_36] : memref<216x5248xf32, #tpu.memory_space<vmem>>, vector<8x5248xf32>
    tpu.vector_store %arg5[%c88, %c0_36], %34 {strides = array<i32>} : memref<216x5248xf32, #tpu.memory_space<vmem>>, vector<8x5248xf32>,
    %c0_37 = arith.constant 0 : index
    %c0_38 = arith.constant 0 : index
    %c342 = arith.constant 342 : index
    %36 = vector.load %arg1[%c0_37, %c0_38, %c342] : memref<1x8x6016xf32, #tpu.memory_space<vmem>>, vector<1x8x5248xf32>
    %37 = vector.shape_cast %36 : vector<1x8x5248xf32> to vector<8x5248xf32>
    %c96 = arith.constant 96 : index
    %c0_39 = arith.constant 0 : index
    %38 = vector.load %arg5[%c96, %c0_39] : memref<216x5248xf32, #tpu.memory_space<vmem>>, vector<8x5248xf32>
    tpu.vector_store %arg5[%c96, %c0_39], %37 {strides = array<i32>} : memref<216x5248xf32, #tpu.memory_space<vmem>>, vector<8x5248xf32>,
    %c0_40 = arith.constant 0 : index
    %c0_41 = arith.constant 0 : index
    %c343 = arith.constant 343 : index
    %39 = vector.load %arg1[%c0_40, %c0_41, %c343] : memref<1x8x6016xf32, #tpu.memory_space<vmem>>, vector<1x8x5248xf32>
    %40 = vector.shape_cast %39 : vector<1x8x5248xf32> to vector<8x5248xf32>
    %c104 = arith.constant 104 : index
    %c0_42 = arith.constant 0 : index
    %41 = vector.load %arg5[%c104, %c0_42] : memref<216x5248xf32, #tpu.memory_space<vmem>>, vector<8x5248xf32>
    tpu.vector_store %arg5[%c104, %c0_42], %40 {strides = array<i32>} : memref<216x5248xf32, #tpu.memory_space<vmem>>, vector<8x5248xf32>,
    %c0_43 = arith.constant 0 : index
    %c0_44 = arith.constant 0 : index
    %c344 = arith.constant 344 : index
    %42 = vector.load %arg1[%c0_43, %c0_44, %c344] : memref<1x8x6016xf32, #tpu.memory_space<vmem>>, vector<1x8x5248xf32>
    %43 = vector.shape_cast %42 : vector<1x8x5248xf32> to vector<8x5248xf32>
    %c112 = arith.constant 112 : index
    %c0_45 = arith.constant 0 : index
    %44 = vector.load %arg5[%c112, %c0_45] : memref<216x5248xf32, #tpu.memory_space<vmem>>, vector<8x5248xf32>
    tpu.vector_store %arg5[%c112, %c0_45], %43 {strides = array<i32>} : memref<216x5248xf32, #tpu.memory_space<vmem>>, vector<8x5248xf32>,
    %c0_46 = arith.constant 0 : index
    %c0_47 = arith.constant 0 : index
    %c360 = arith.constant 360 : index
    %45 = vector.load %arg1[%c0_46, %c0_47, %c360] : memref<1x8x6016xf32, #tpu.memory_space<vmem>>, vector<1x8x5248xf32>
    %46 = vector.shape_cast %45 : vector<1x8x5248xf32> to vector<8x5248xf32>
    %c120 = arith.constant 120 : index
    %c0_48 = arith.constant 0 : index
    %47 = vector.load %arg5[%c120, %c0_48] : memref<216x5248xf32, #tpu.memory_space<vmem>>, vector<8x5248xf32>
    tpu.vector_store %arg5[%c120, %c0_48], %46 {strides = array<i32>} : memref<216x5248xf32, #tpu.memory_space<vmem>>, vector<8x5248xf32>,
    %c0_49 = arith.constant 0 : index
    %c0_50 = arith.constant 0 : index
    %c361 = arith.constant 361 : index
    %48 = vector.load %arg1[%c0_49, %c0_50, %c361] : memref<1x8x6016xf32, #tpu.memory_space<vmem>>, vector<1x8x5248xf32>
    %49 = vector.shape_cast %48 : vector<1x8x5248xf32> to vector<8x5248xf32>
    %c128 = arith.constant 128 : index
    %c0_51 = arith.constant 0 : index
    %50 = vector.load %arg5[%c128, %c0_51] : memref<216x5248xf32, #tpu.memory_space<vmem>>, vector<8x5248xf32>
    tpu.vector_store %arg5[%c128, %c0_51], %49 {strides = array<i32>} : memref<216x5248xf32, #tpu.memory_space<vmem>>, vector<8x5248xf32>,
    %c0_52 = arith.constant 0 : index
    %c0_53 = arith.constant 0 : index
    %c362 = arith.constant 362 : index
    %51 = vector.load %arg1[%c0_52, %c0_53, %c362] : memref<1x8x6016xf32, #tpu.memory_space<vmem>>, vector<1x8x5248xf32>
    %52 = vector.shape_cast %51 : vector<1x8x5248xf32> to vector<8x5248xf32>
    %c136 = arith.constant 136 : index
    %c0_54 = arith.constant 0 : index
    %53 = vector.load %arg5[%c136, %c0_54] : memref<216x5248xf32, #tpu.memory_space<vmem>>, vector<8x5248xf32>
    tpu.vector_store %arg5[%c136, %c0_54], %52 {strides = array<i32>} : memref<216x5248xf32, #tpu.memory_space<vmem>>, vector<8x5248xf32>,
    %c0_55 = arith.constant 0 : index
    %c0_56 = arith.constant 0 : index
    %c648 = arith.constant 648 : index
    %54 = vector.load %arg1[%c0_55, %c0_56, %c648] : memref<1x8x6016xf32, #tpu.memory_space<vmem>>, vector<1x8x5248xf32>
    %55 = vector.shape_cast %54 : vector<1x8x5248xf32> to vector<8x5248xf32>
    %c144 = arith.constant 144 : index
    %c0_57 = arith.constant 0 : index
    %56 = vector.load %arg5[%c144, %c0_57] : memref<216x5248xf32, #tpu.memory_space<vmem>>, vector<8x5248xf32>
    tpu.vector_store %arg5[%c144, %c0_57], %55 {strides = array<i32>} : memref<216x5248xf32, #tpu.memory_space<vmem>>, vector<8x5248xf32>,
    %c0_58 = arith.constant 0 : index
    %c0_59 = arith.constant 0 : index
    %c649 = arith.constant 649 : index
    %57 = vector.load %arg1[%c0_58, %c0_59, %c649] : memref<1x8x6016xf32, #tpu.memory_space<vmem>>, vector<1x8x5248xf32>
    %58 = vector.shape_cast %57 : vector<1x8x5248xf32> to vector<8x5248xf32>
    %c152 = arith.constant 152 : index
    %c0_60 = arith.constant 0 : index
    %59 = vector.load %arg5[%c152, %c0_60] : memref<216x5248xf32, #tpu.memory_space<vmem>>, vector<8x5248xf32>
    tpu.vector_store %arg5[%c152, %c0_60], %58 {strides = array<i32>} : memref<216x5248xf32, #tpu.memory_space<vmem>>, vector<8x5248xf32>,
    %c0_61 = arith.constant 0 : index
    %c0_62 = arith.constant 0 : index
    %c650 = arith.constant 650 : index
    %60 = vector.load %arg1[%c0_61, %c0_62, %c650] : memref<1x8x6016xf32, #tpu.memory_space<vmem>>, vector<1x8x5248xf32>
    %61 = vector.shape_cast %60 : vector<1x8x5248xf32> to vector<8x5248xf32>
    %c160 = arith.constant 160 : index
    %c0_63 = arith.constant 0 : index
    %62 = vector.load %arg5[%c160, %c0_63] : memref<216x5248xf32, #tpu.memory_space<vmem>>, vector<8x5248xf32>
    tpu.vector_store %arg5[%c160, %c0_63], %61 {strides = array<i32>} : memref<216x5248xf32, #tpu.memory_space<vmem>>, vector<8x5248xf32>,
    %c0_64 = arith.constant 0 : index
    %c0_65 = arith.constant 0 : index
    %c666 = arith.constant 666 : index
    %63 = vector.load %arg1[%c0_64, %c0_65, %c666] : memref<1x8x6016xf32, #tpu.memory_space<vmem>>, vector<1x8x5248xf32>
    %64 = vector.shape_cast %63 : vector<1x8x5248xf32> to vector<8x5248xf32>
    %c168 = arith.constant 168 : index
    %c0_66 = arith.constant 0 : index
    %65 = vector.load %arg5[%c168, %c0_66] : memref<216x5248xf32, #tpu.memory_space<vmem>>, vector<8x5248xf32>
    tpu.vector_store %arg5[%c168, %c0_66], %64 {strides = array<i32>} : memref<216x5248xf32, #tpu.memory_space<vmem>>, vector<8x5248xf32>,
    %c0_67 = arith.constant 0 : index
    %c0_68 = arith.constant 0 : index
    %c667 = arith.constant 667 : index
    %66 = vector.load %arg1[%c0_67, %c0_68, %c667] : memref<1x8x6016xf32, #tpu.memory_space<vmem>>, vector<1x8x5248xf32>
    %67 = vector.shape_cast %66 : vector<1x8x5248xf32> to vector<8x5248xf32>
    %c176 = arith.constant 176 : index
    %c0_69 = arith.constant 0 : index
    %68 = vector.load %arg5[%c176, %c0_69] : memref<216x5248xf32, #tpu.memory_space<vmem>>, vector<8x5248xf32>
    tpu.vector_store %arg5[%c176, %c0_69], %67 {strides = array<i32>} : memref<216x5248xf32, #tpu.memory_space<vmem>>, vector<8x5248xf32>,
    %c0_70 = arith.constant 0 : index
    %c0_71 = arith.constant 0 : index
    %c668 = arith.constant 668 : index
    %69 = vector.load %arg1[%c0_70, %c0_71, %c668] : memref<1x8x6016xf32, #tpu.memory_space<vmem>>, vector<1x8x5248xf32>
    %70 = vector.shape_cast %69 : vector<1x8x5248xf32> to vector<8x5248xf32>
    %c184 = arith.constant 184 : index
    %c0_72 = arith.constant 0 : index
    %71 = vector.load %arg5[%c184, %c0_72] : memref<216x5248xf32, #tpu.memory_space<vmem>>, vector<8x5248xf32>
    tpu.vector_store %arg5[%c184, %c0_72], %70 {strides = array<i32>} : memref<216x5248xf32, #tpu.memory_space<vmem>>, vector<8x5248xf32>,
    %c0_73 = arith.constant 0 : index
    %c0_74 = arith.constant 0 : index
    %c684 = arith.constant 684 : index
    %72 = vector.load %arg1[%c0_73, %c0_74, %c684] : memref<1x8x6016xf32, #tpu.memory_space<vmem>>, vector<1x8x5248xf32>
    %73 = vector.shape_cast %72 : vector<1x8x5248xf32> to vector<8x5248xf32>
    %c192 = arith.constant 192 : index
    %c0_75 = arith.constant 0 : index
    %74 = vector.load %arg5[%c192, %c0_75] : memref<216x5248xf32, #tpu.memory_space<vmem>>, vector<8x5248xf32>
    tpu.vector_store %arg5[%c192, %c0_75], %73 {strides = array<i32>} : memref<216x5248xf32, #tpu.memory_space<vmem>>, vector<8x5248xf32>,
    %c0_76 = arith.constant 0 : index
    %c0_77 = arith.constant 0 : index
    %c685 = arith.constant 685 : index
    %75 = vector.load %arg1[%c0_76, %c0_77, %c685] : memref<1x8x6016xf32, #tpu.memory_space<vmem>>, vector<1x8x5248xf32>
    %76 = vector.shape_cast %75 : vector<1x8x5248xf32> to vector<8x5248xf32>
    %c200 = arith.constant 200 : index
    %c0_78 = arith.constant 0 : index
    %77 = vector.load %arg5[%c200, %c0_78] : memref<216x5248xf32, #tpu.memory_space<vmem>>, vector<8x5248xf32>
    tpu.vector_store %arg5[%c200, %c0_78], %76 {strides = array<i32>} : memref<216x5248xf32, #tpu.memory_space<vmem>>, vector<8x5248xf32>,
    %c0_79 = arith.constant 0 : index
    %c0_80 = arith.constant 0 : index
    %c686 = arith.constant 686 : index
    %78 = vector.load %arg1[%c0_79, %c0_80, %c686] : memref<1x8x6016xf32, #tpu.memory_space<vmem>>, vector<1x8x5248xf32>
    %79 = vector.shape_cast %78 : vector<1x8x5248xf32> to vector<8x5248xf32>
    %c208 = arith.constant 208 : index
    %c0_81 = arith.constant 0 : index
    %80 = vector.load %arg5[%c208, %c0_81] : memref<216x5248xf32, #tpu.memory_space<vmem>>, vector<8x5248xf32>
    tpu.vector_store %arg5[%c208, %c0_81], %79 {strides = array<i32>} : memref<216x5248xf32, #tpu.memory_space<vmem>>, vector<8x5248xf32>,
    %c0_82 = arith.constant 0 : index
    %c0_83 = arith.constant 0 : index
    %81 = vector.load %arg2[%c0_82, %c0_83] : memref<8x216xf32, #tpu.memory_space<vmem>>, vector<8x216xf32>
    %c0_84 = arith.constant 0 : index
    %c0_85 = arith.constant 0 : index
    %82 = vector.load %arg5[%c0_84, %c0_85] : memref<216x5248xf32, #tpu.memory_space<vmem>>, vector<216x5248xf32>
    %cst = arith.constant dense<0.000000e+00> : vector<8x5248xf32>
    %83 = tpu.matmul %81, %82, %cst {dimension_numbers = #tpu.dot_dimension_numbers<[1], [0], [0], [1], [0, 0, 1, 1], [], []>} : vector<8x216xf32>, vector<216x5248xf32>, vector<8x5248xf32> -> vector<8x5248xf32>
    %c0_86 = arith.constant 0 : index
    %c0_87 = arith.constant 0 : index
    %84 = vector.load %arg3[%c0_86, %c0_87] : memref<8x1xf32, #tpu.memory_space<vmem>>, vector<8x1xf32>
    %85 = vector.broadcast %84 : vector<8x1xf32> to vector<8x5248xf32>
    %86 = arith.addf %83, %85 : vector<8x5248xf32>
    %87 = vector.shape_cast %86 : vector<8x5248xf32> to vector<1x8x5248xf32>
    %c0_88 = arith.constant 0 : index
    %c0_89 = arith.constant 0 : index
    %c0_90 = arith.constant 0 : index
    %88 = vector.load %arg4[%c0_88, %c0_89, %c0_90] : memref<1x8x5248xf32, #tpu.memory_space<vmem>>, vector<1x8x5248xf32>
    tpu.vector_store %arg4[%c0_88, %c0_89, %c0_90], %87 {strides = array<i32>} : memref<1x8x5248xf32, #tpu.memory_space<vmem>>, vector<1x8x5248xf32>,
    return
  }
  func.func @transform_0(%arg0: i32) -> (i32, i32, i32) {
    %c0_i32 = arith.constant 0 : i32
    %c0_i32_0 = arith.constant 0 : i32
    %c0_i32_1 = arith.constant 0 : i32
    return %arg0, %c0_i32, %c0_i32_0 : i32, i32, i32
  }
  func.func @transform_1(%arg0: i32) -> (i32, i32) {
    %c0_i32 = arith.constant 0 : i32
    %c0_i32_0 = arith.constant 0 : i32
    %c0_i32_1 = arith.constant 0 : i32
    return %c0_i32, %c0_i32_0 : i32, i32
  }
  func.func @transform_2(%arg0: i32) -> (i32, i32) {
    %c0_i32 = arith.constant 0 : i32
    %c0_i32_0 = arith.constant 0 : i32
    %c0_i32_1 = arith.constant 0 : i32
    return %c0_i32, %c0_i32_0 : i32, i32
  }
  func.func @transform_3(%arg0: i32) -> (i32, i32, i32) {
    %c0_i32 = arith.constant 0 : i32
    %c0_i32_0 = arith.constant 0 : i32
    %c0_i32_1 = arith.constant 0 : i32
    return %arg0, %c0_i32, %c0_i32_0 : i32, i32, i32
  }
}

</mosaic_0001>

<bundles_post_ra>
// kernel: conv3d_pallas.1
= control target key start
LH: loop header
LB: loop body
LE: loop exit
PB: predicated region body
PF: predicated region fallthrough
CT: control target
= control target key end

     0   :  { %s10685_s12 = smov 0   ;;  %s18499_s0 = inlined_call_operand.vmem [shape: f32[2,8,6016], index: 0, kind: input, shape index: {}]   ;;  %s18500_s1 = inlined_call_operand.vmem [shape: f32[8,216], index: 1, kind: input, shape index: {}]   ;;  %s18501_s2 = inlined_call_operand.vmem [shape: f32[8,1], index: 2, kind: input, shape index: {}]   ;;  %s18502_s3 = inlined_call_operand.vmem [shape: f32[2,8,5248], index: 3, kind: output, shape index: {}]  }
   0x1 LB: > { %s10550_s13 = sadd.s32 4294967295, %s10635_s12   ;;  %p10554_p0 = scmp.ge.s32.totalorder %s10635_s12, 1  ;;  %s10635_s12 = sphi %s10685_s12, %s13_s12  }
   0x2   : > { %p137_p1 = scmp.lt.s32.totalorder %s10635_s12, 3 }
   0x4   : > { %p138_p2 = pnand %p10554_p0, %p137_p1 }
   0x6   : > { %141 = sbr.rel (%p138_p2) target bundleno = 2566 (0xa06), region = 32 }
   0xb   : > { %p161_p3 = scmp.lt.s32.totalorder %s10550_s13, 1  ;;  %s10637_s18 = smov 127   ;;  %vm4509_vm0 = vcmask 195584   ;;  %vm4217_vm1 = vcmask 326656   ;;  %vm3925_vm2 = vcmask 334848   ;;  %vm3633_vm3 = vcmask 343040  }
   0xc   : > { %s10638_s19 = smov 126   ;;  %s10639_s20 = smov 110   ;;  %vm3341_vm4 = vcmask 474112   ;;  %vm19125_vm5 = vcmask 482304   ;;  %vm19122_vm6 = vcmask 490496   ;;  %vm19121_vm7 = vcmask 736256  }
   0xd   : > { %s20981_s13 = smov (!%p161_p3, %s10550_s13), 1  ;;  %s10640_s21 = smov 109   ;;  %vm19123_vm8 = vcmask 744448   ;;  %vm19117_vm9 = vcmask 752640   ;;  %vm19108_vm10 = vcmask 883712   ;;  %vm19107_vm11 = vcmask 891904  }
   0xe   : > { %s10580_s14 = smul.u32 376, %s20981_s13  ;;  %s10641_s22 = smov 108   ;;  %vm19106_vm12 = vcmask 900096   ;;  %vm19102_vm13 = vcmask 1031168   ;;  %vm19096_vm14 = vcmask 1039360   ;;  %vm19120_vm15 = vcmask 719872  }
   0xf   : > { %s10642_s23 = smov 92   ;;  %s10643_s24 = smov 91  }
  0x10   : > { %s10699_s17 = scalar_lea.vmem %s18499_s0, %s10580_s14  ;;  %s10644_s25 = smov 90  }
  0x11   : > { %v10702_v0 = vld [vmem:[%s10699_s17 + $0x10] sm:$0xff]  ;;  %v10705_v1 = vld [vmem:[%s10699_s17] sm:$0xff]  ;;  %v10712_v2 = vld [vmem:[%s10699_s17 + $0x18] sm:$0xff]  ;;  %s10645_s26 = smov 60   ;;  %s10646_s27 = smov 59  }
  0x12   : > { %341 = vrot.lane.b32.xlu1 %v10702_v0, %s10637_s18  ;;  %337 = vrot.lane.b32.xlu0 %v10705_v1, %s10637_s18  ;;  %v10715_v3 = vld [vmem:[%s10699_s17 + $0x8] sm:$0xff]  ;;  %v10725_v5 = vld [vmem:[%s10699_s17 + $0x20] sm:$0xff]  ;;  %s10647_s28 = smov 58   ;;  %s10648_s29 = smov 42  }
  0x13   : > { %v10722_v4 = vld [vmem:[%s10699_s17 + $0x28] sm:$0xff]  ;;  %v10732_v6 = vld [vmem:[%s10699_s17 + $0x38] sm:$0xff]  ;;  %v10735_v7 = vld [vmem:[%s10699_s17 + $0x30] sm:$0xff]  ;;  %s10649_s30 = smov 41   ;;  %s10650_s4 = smov 40  }
  0x14   : > { %v10742_v8 = vld [vmem:[%s10699_s17 + $0x48] sm:$0xff]  ;;  %v10745_v9 = vld [vmem:[%s10699_s17 + $0x40] sm:$0xff]  ;;  %v10752_v10 = vld [vmem:[%s10699_s17 + $0x58] sm:$0xff]  ;;  %s10651_s5 = smov 24   ;;  %s10652_s6 = smov 23  }
  0x15   : > { %v10755_v11 = vld [vmem:[%s10699_s17 + $0x50] sm:$0xff]  ;;  %v10762_v12 = vld [vmem:[%s10699_s17 + $0x68] sm:$0xff]  ;;  %v10765_v13 = vld [vmem:[%s10699_s17 + $0x60] sm:$0xff]  ;;  %s10653_s7 = smov 22   ;;  %s10654_s8 = smov 82  }
  0x16   : > { %343 = vrot.lane.b32.xlu1 %v10712_v2, %s10637_s18  ;;  %339 = vrot.lane.b32.xlu0 %v10715_v3, %s10637_s18  ;;  %v10772_v14 = vld [vmem:[%s10699_s17 + $0x78] sm:$0xff]  ;;  %v10775_v15 = vld [vmem:[%s10699_s17 + $0x70] sm:$0xff]  ;;  %s10655_s9 = smov 83   ;;  %s10656_s10 = smov 84  }
  0x17   : > { %v10782_v16 = vld [vmem:[%s10699_s17 + $0x88] sm:$0xff]  ;;  %v10785_v17 = vld [vmem:[%s10699_s17 + $0x80] sm:$0xff]  ;;  %v10792_v18 = vld [vmem:[%s10699_s17 + $0x98] sm:$0xff]  ;;  %s10657_s11 = smov 100   ;;  %s10658_s14 = smov 101  }
  0x18   : > { %v10795_v19 = vld [vmem:[%s10699_s17 + $0x90] sm:$0xff]  ;;  %v10802_v20 = vld [vmem:[%s10699_s17 + $0xa8] sm:$0xff]  ;;  %v10805_v21 = vld [vmem:[%s10699_s17 + $0xa0] sm:$0xff]  ;;  %s10659_s15 = smov 102   ;;  %s10660_s16 = smov 118  }
  0x19   : > { %v10812_v22 = vld [vmem:[%s10699_s17 + $0xb8] sm:$0xff]  ;;  %v10815_v23 = vld [vmem:[%s10699_s17 + $0xb0] sm:$0xff]  ;;  %v10822_v24 = vld [vmem:[%s10699_s17 + $0xc8] sm:$0xff] }
  0x1a   : > { %347 = vrot.lane.b32.xlu1 %v10722_v4, %s10637_s18  ;;  %345 = vrot.lane.b32.xlu0 %v10725_v5, %s10637_s18  ;;  %v10825_v25 = vld [vmem:[%s10699_s17 + $0xc0] sm:$0xff]  ;;  %v10832_v26 = vld [vmem:[%s10699_s17 + $0xd8] sm:$0xff] }
  0x1b   : > { %v10835_v27 = vld [vmem:[%s10699_s17 + $0xd0] sm:$0xff]  ;;  %v10842_v28 = vld [vmem:[%s10699_s17 + $0xe8] sm:$0xff]  ;;  %v10845_v29 = vld [vmem:[%s10699_s17 + $0xe0] sm:$0xff] }
  0x1c   : > { %v10852_v30 = vld [vmem:[%s10699_s17 + $0xf8] sm:$0xff]  ;;  %v10855_v31 = vld [vmem:[%s10699_s17 + $0xf0] sm:$0xff]  ;;  %v10862_v32 = vld [vmem:[%s10699_s17 + $0x108] sm:$0xff] }
  0x1d   : > { %v10865_v33 = vld [vmem:[%s10699_s17 + $0x100] sm:$0xff]  ;;  %v10872_v34 = vld [vmem:[%s10699_s17 + $0x118] sm:$0xff]  ;;  %v10875_v35 = vld [vmem:[%s10699_s17 + $0x110] sm:$0xff] }
  0x1e   : > { %351 = vrot.lane.b32.xlu1 %v10732_v6, %s10637_s18  ;;  %349 = vrot.lane.b32.xlu0 %v10735_v7, %s10637_s18  ;;  %v10882_v36 = vld [vmem:[%s10699_s17 + $0x128] sm:$0xff]  ;;  %v10885_v37 = vld [vmem:[%s10699_s17 + $0x120] sm:$0xff] }
  0x1f   : > { %v10892_v38 = vld [vmem:[%s10699_s17 + $0x138] sm:$0xff]  ;;  %v10895_v39 = vld [vmem:[%s10699_s17 + $0x130] sm:$0xff]  ;;  %v10902_v40 = vld [vmem:[%s10699_s17 + $0x148] sm:$0xff] }
  0x20   : > { %v10905_v41 = vld [vmem:[%s10699_s17 + $0x140] sm:$0xff] }
  0x22   : > { %355 = vrot.lane.b32.xlu1 %v10742_v8, %s10637_s18  ;;  %353 = vrot.lane.b32.xlu0 %v10745_v9, %s10637_s18 }
  0x26   : > { %359 = vrot.lane.b32.xlu1 %v10752_v10, %s10637_s18  ;;  %357 = vrot.lane.b32.xlu0 %v10755_v11, %s10637_s18 }
  0x2a   : > { %363 = vrot.lane.b32.xlu1 %v10762_v12, %s10637_s18  ;;  %361 = vrot.lane.b32.xlu0 %v10765_v13, %s10637_s18 }
  0x2e   : > { %367 = vrot.lane.b32.xlu1 %v10772_v14, %s10637_s18  ;;  %365 = vrot.lane.b32.xlu0 %v10775_v15, %s10637_s18 }
  0x32   : > { %371 = vrot.lane.b32.xlu1 %v10782_v16, %s10637_s18  ;;  %369 = vrot.lane.b32.xlu0 %v10785_v17, %s10637_s18 }
  0x36   : > { %375 = vrot.lane.b32.xlu1 %v10792_v18, %s10637_s18  ;;  %373 = vrot.lane.b32.xlu0 %v10795_v19, %s10637_s18 }
  0x3a   : > { %379 = vrot.lane.b32.xlu1 %v10802_v20, %s10637_s18  ;;  %377 = vrot.lane.b32.xlu0 %v10805_v21, %s10637_s18 }
  0x3e   : > { %383 = vrot.lane.b32.xlu1 %v10812_v22, %s10637_s18  ;;  %381 = vrot.lane.b32.xlu0 %v10815_v23, %s10637_s18 }
  0x42   : > { %387 = vrot.lane.b32.xlu1 %v10822_v24, %s10637_s18  ;;  %385 = vrot.lane.b32.xlu0 %v10825_v25, %s10637_s18 }
  0x46   : > { %391 = vrot.lane.b32.xlu1 %v10832_v26, %s10637_s18  ;;  %389 = vrot.lane.b32.xlu0 %v10835_v27, %s10637_s18 }
  0x4a   : > { %395 = vrot.lane.b32.xlu1 %v10842_v28, %s10637_s18  ;;  %393 = vrot.lane.b32.xlu0 %v10845_v29, %s10637_s18 }
  0x4e   : > { %399 = vrot.lane.b32.xlu1 %v10852_v30, %s10637_s18  ;;  %397 = vrot.lane.b32.xlu0 %v10855_v31, %s10637_s18 }
  0x52   : > { %403 = vrot.lane.b32.xlu1 %v10862_v32, %s10637_s18  ;;  %401 = vrot.lane.b32.xlu0 %v10865_v33, %s10637_s18 }
  0x56   : > { %407 = vrot.lane.b32.xlu1 %v10872_v34, %s10637_s18  ;;  %405 = vrot.lane.b32.xlu0 %v10875_v35, %s10637_s18 }
  0x5a   : > { %411 = vrot.lane.b32.xlu1 %v10882_v36, %s10637_s18  ;;  %409 = vrot.lane.b32.xlu0 %v10885_v37, %s10637_s18 }
  0x5e   : > { %415 = vrot.lane.b32.xlu1 %v10892_v38, %s10637_s18  ;;  %413 = vrot.lane.b32.xlu0 %v10895_v39, %s10637_s18 }
  0x62   : > { %419 = vrot.lane.b32.xlu1 %v10902_v40, %s10637_s18  ;;  %417 = vrot.lane.b32.xlu0 %v10905_v41, %s10637_s18  ;;  %s10661_s18 = smov 119  }
  0x66   : > { %631 = vrot.lane.b32.xlu1 %v10715_v3, %s10638_s19  ;;  %629 = vrot.lane.b32.xlu0 %v10705_v1, %s10638_s19 }
  0x6a   : > { %635 = vrot.lane.b32.xlu1 %v10712_v2, %s10638_s19  ;;  %633 = vrot.lane.b32.xlu0 %v10702_v0, %s10638_s19 }
  0x6e   : > { %639 = vrot.lane.b32.xlu1 %v10722_v4, %s10638_s19  ;;  %637 = vrot.lane.b32.xlu0 %v10725_v5, %s10638_s19 }
  0x72   : > { %643 = vrot.lane.b32.xlu1 %v10732_v6, %s10638_s19  ;;  %641 = vrot.lane.b32.xlu0 %v10735_v7, %s10638_s19 }
  0x76   : > { %647 = vrot.lane.b32.xlu1 %v10742_v8, %s10638_s19  ;;  %645 = vrot.lane.b32.xlu0 %v10745_v9, %s10638_s19 }
  0x7a   : > { %651 = vrot.lane.b32.xlu1 %v10752_v10, %s10638_s19  ;;  %649 = vrot.lane.b32.xlu0 %v10755_v11, %s10638_s19 }
  0x7e   : > { %655 = vrot.lane.b32.xlu1 %v10762_v12, %s10638_s19  ;;  %653 = vrot.lane.b32.xlu0 %v10765_v13, %s10638_s19 }
  0x82   : > { %659 = vrot.lane.b32.xlu1 %v10772_v14, %s10638_s19  ;;  %657 = vrot.lane.b32.xlu0 %v10775_v15, %s10638_s19 }
  0x84   : > { %v10943_v42 = vpop.permute.xlu1 %341  ;;  %v10945_v43 = vpop.permute.xlu0 %337 }
  0x85   : > { %19127 = vst [vmem:[#allocation3_spill] sm:$0xff] %v10943_v42  ;;  %19128 = vst [vmem:[#allocation4_spill] sm:$0xff] %v10945_v43 }
  0x86   : > { %663 = vrot.lane.b32.xlu1 %v10782_v16, %s10638_s19  ;;  %661 = vrot.lane.b32.xlu0 %v10785_v17, %s10638_s19 }
  0x88   : > { %v10951_v44 = vpop.permute.xlu1 %343  ;;  %v10953_v45 = vpop.permute.xlu0 %339 }
  0x89   : > { %19129 = vst [vmem:[#allocation5_spill] sm:$0xff] %v10951_v44  ;;  %19130 = vst [vmem:[#allocation6_spill] sm:$0xff] %v10953_v45 }
  0x8a   : > { %667 = vrot.lane.b32.xlu1 %v10792_v18, %s10638_s19  ;;  %665 = vrot.lane.b32.xlu0 %v10795_v19, %s10638_s19 }
  0x8c   : > { %v10959_v46 = vpop.permute.xlu1 %347  ;;  %v10961_v47 = vpop.permute.xlu0 %345 }
  0x8d   : > { %19131 = vst [vmem:[#allocation7_spill] sm:$0xff] %v10959_v46  ;;  %19132 = vst [vmem:[#allocation8_spill] sm:$0xff] %v10961_v47 }
  0x8e   : > { %671 = vrot.lane.b32.xlu1 %v10802_v20, %s10638_s19  ;;  %669 = vrot.lane.b32.xlu0 %v10805_v21, %s10638_s19 }
  0x90   : > { %v10967_v48 = vpop.permute.xlu1 %351  ;;  %v10969_v49 = vpop.permute.xlu0 %349 }
  0x91   : > { %19133 = vst [vmem:[#allocation9_spill] sm:$0xff] %v10967_v48  ;;  %19134 = vst [vmem:[#allocation10_spill] sm:$0xff] %v10969_v49 }
  0x92   : > { %675 = vrot.lane.b32.xlu1 %v10812_v22, %s10638_s19  ;;  %673 = vrot.lane.b32.xlu0 %v10815_v23, %s10638_s19 }
  0x94   : > { %v10975_v50 = vpop.permute.xlu1 %355  ;;  %v10977_v51 = vpop.permute.xlu0 %353 }
  0x95   : > { %19135 = vst [vmem:[#allocation11_spill] sm:$0xff] %v10975_v50  ;;  %19136 = vst [vmem:[#allocation12_spill] sm:$0xff] %v10977_v51 }
  0x96   : > { %679 = vrot.lane.b32.xlu1 %v10822_v24, %s10638_s19  ;;  %677 = vrot.lane.b32.xlu0 %v10825_v25, %s10638_s19 }
  0x98   : > { %v10983_v52 = vpop.permute.xlu1 %359  ;;  %v10985_v53 = vpop.permute.xlu0 %357 }
  0x99   : > { %19137 = vst [vmem:[#allocation13_spill] sm:$0xff] %v10983_v52  ;;  %19138 = vst [vmem:[#allocation14_spill] sm:$0xff] %v10985_v53 }
  0x9a   : > { %683 = vrot.lane.b32.xlu1 %v10832_v26, %s10638_s19  ;;  %681 = vrot.lane.b32.xlu0 %v10835_v27, %s10638_s19 }
  0x9c   : > { %v10991_v54 = vpop.permute.xlu1 %363  ;;  %v10993_v55 = vpop.permute.xlu0 %361 }
  0x9d   : > { %19139 = vst [vmem:[#allocation15_spill] sm:$0xff] %v10991_v54  ;;  %19140 = vst [vmem:[#allocation16_spill] sm:$0xff] %v10993_v55 }
  0x9e   : > { %687 = vrot.lane.b32.xlu1 %v10842_v28, %s10638_s19  ;;  %685 = vrot.lane.b32.xlu0 %v10845_v29, %s10638_s19 }
  0xa0   : > { %v10999_v56 = vpop.permute.xlu1 %367  ;;  %v11001_v57 = vpop.permute.xlu0 %365 }
  0xa1   : > { %19141 = vst [vmem:[#allocation17_spill] sm:$0xff] %v10999_v56  ;;  %19142 = vst [vmem:[#allocation18_spill] sm:$0xff] %v11001_v57 }
  0xa2   : > { %691 = vrot.lane.b32.xlu1 %v10852_v30, %s10638_s19  ;;  %689 = vrot.lane.b32.xlu0 %v10855_v31, %s10638_s19 }
  0xa4   : > { %v11007_v58 = vpop.permute.xlu1 %371  ;;  %v11009_v59 = vpop.permute.xlu0 %369 }
  0xa5   : > { %19143 = vst [vmem:[#allocation19_spill] sm:$0xff] %v11007_v58  ;;  %19144 = vst [vmem:[#allocation20_spill] sm:$0xff] %v11009_v59 }
  0xa6   : > { %695 = vrot.lane.b32.xlu1 %v10862_v32, %s10638_s19  ;;  %693 = vrot.lane.b32.xlu0 %v10865_v33, %s10638_s19 }
  0xa8   : > { %v11015_v60 = vpop.permute.xlu1 %375  ;;  %v11017_v61 = vpop.permute.xlu0 %373 }
  0xa9   : > { %19145 = vst [vmem:[#allocation21_spill] sm:$0xff] %v11015_v60  ;;  %19146 = vst [vmem:[#allocation22_spill] sm:$0xff] %v11017_v61 }
  0xaa   : > { %699 = vrot.lane.b32.xlu1 %v10872_v34, %s10638_s19  ;;  %697 = vrot.lane.b32.xlu0 %v10875_v35, %s10638_s19 }
  0xac   : > { %v11023_v62 = vpop.permute.xlu1 %379  ;;  %v11025_v63 = vpop.permute.xlu0 %377 }
  0xad   : > { %19147 = vst [vmem:[#allocation23_spill] sm:$0xff] %v11023_v62  ;;  %19148 = vst [vmem:[#allocation24_spill] sm:$0xff] %v11025_v63 }
  0xae   : > { %703 = vrot.lane.b32.xlu1 %v10882_v36, %s10638_s19  ;;  %701 = vrot.lane.b32.xlu0 %v10885_v37, %s10638_s19 }
  0xb0   : > { %v11031_v58 = vpop.permute.xlu1 %383  ;;  %v11033_v60 = vpop.permute.xlu0 %381 }
  0xb1   : > { %19149 = vst [vmem:[#allocation25_spill] sm:$0xff] %v11031_v58  ;;  %19150 = vst [vmem:[#allocation26_spill] sm:$0xff] %v11033_v60 }
  0xb2   : > { %707 = vrot.lane.b32.xlu1 %v10892_v38, %s10638_s19  ;;  %705 = vrot.lane.b32.xlu0 %v10895_v39, %s10638_s19 }
  0xb4   : > { %v11039_v61 = vpop.permute.xlu1 %387  ;;  %v11041_v62 = vpop.permute.xlu0 %385 }
  0xb5   : > { %19151 = vst [vmem:[#allocation27_spill] sm:$0xff] %v11039_v61  ;;  %19152 = vst [vmem:[#allocation28_spill] sm:$0xff] %v11041_v62 }
  0xb6   : > { %711 = vrot.lane.b32.xlu1 %v10902_v40, %s10638_s19  ;;  %709 = vrot.lane.b32.xlu0 %v10905_v41, %s10638_s19 }
  0xb8   : > { %v11047_v63 = vpop.permute.xlu1 %391  ;;  %v11049_v58 = vpop.permute.xlu0 %389 }
  0xb9   : > { %19153 = vst [vmem:[#allocation29_spill] sm:$0xff] %v11047_v63  ;;  %19154 = vst [vmem:[#allocation30_spill] sm:$0xff] %v11049_v58 }
  0xba   : > { %923 = vrot.lane.b32.xlu1 %v10715_v3, %s10639_s20  ;;  %921 = vrot.lane.b32.xlu0 %v10705_v1, %s10639_s20 }
  0xbc   : > { %v11055_v61 = vpop.permute.xlu1 %395  ;;  %v11057_v62 = vpop.permute.xlu0 %393 }
  0xbd   : > { %19155 = vst [vmem:[#allocation31_spill] sm:$0xff] %v11055_v61  ;;  %19156 = vst [vmem:[#allocation32_spill] sm:$0xff] %v11057_v62 }
  0xbe   : > { %927 = vrot.lane.b32.xlu1 %v10712_v2, %s10639_s20  ;;  %925 = vrot.lane.b32.xlu0 %v10702_v0, %s10639_s20 }
  0xc0   : > { %v11063_v63 = vpop.permute.xlu1 %399  ;;  %v11065_v58 = vpop.permute.xlu0 %397 }
  0xc1   : > { %19157 = vst [vmem:[#allocation33_spill] sm:$0xff] %v11063_v63  ;;  %19158 = vst [vmem:[#allocation34_spill] sm:$0xff] %v11065_v58 }
  0xc2   : > { %931 = vrot.lane.b32.xlu1 %v10722_v4, %s10639_s20  ;;  %929 = vrot.lane.b32.xlu0 %v10725_v5, %s10639_s20 }
  0xc4   : > { %v11071_v60 = vpop.permute.xlu1 %403  ;;  %v11073_v61 = vpop.permute.xlu0 %401 }
  0xc5   : > { %19159 = vst [vmem:[#allocation35_spill] sm:$0xff] %v11071_v60  ;;  %19160 = vst [vmem:[#allocation36_spill] sm:$0xff] %v11073_v61 }
  0xc6   : > { %935 = vrot.lane.b32.xlu1 %v10732_v6, %s10639_s20  ;;  %933 = vrot.lane.b32.xlu0 %v10735_v7, %s10639_s20 }
  0xc8   : > { %v11079_v62 = vpop.permute.xlu1 %407  ;;  %v11081_v63 = vpop.permute.xlu0 %405 }
  0xc9   : > { %19161 = vst [vmem:[#allocation37_spill] sm:$0xff] %v11079_v62  ;;  %19162 = vst [vmem:[#allocation38_spill] sm:$0xff] %v11081_v63 }
  0xca   : > { %939 = vrot.lane.b32.xlu1 %v10742_v8, %s10639_s20  ;;  %937 = vrot.lane.b32.xlu0 %v10745_v9, %s10639_s20 }
  0xcc   : > { %v11087_v58 = vpop.permute.xlu1 %411  ;;  %v11089_v60 = vpop.permute.xlu0 %409 }
  0xcd   : > { %19163 = vst [vmem:[#allocation39_spill] sm:$0xff] %v11087_v58  ;;  %19164 = vst [vmem:[#allocation40_spill] sm:$0xff] %v11089_v60 }
  0xce   : > { %943 = vrot.lane.b32.xlu1 %v10752_v10, %s10639_s20  ;;  %941 = vrot.lane.b32.xlu0 %v10755_v11, %s10639_s20 }
  0xd0   : > { %v11095_v61 = vpop.permute.xlu1 %415  ;;  %v11097_v62 = vpop.permute.xlu0 %413 }
  0xd1   : > { %19165 = vst [vmem:[#allocation41_spill] sm:$0xff] %v11095_v61  ;;  %19166 = vst [vmem:[#allocation42_spill] sm:$0xff] %v11097_v62 }
  0xd2   : > { %947 = vrot.lane.b32.xlu1 %v10762_v12, %s10639_s20  ;;  %945 = vrot.lane.b32.xlu0 %v10765_v13, %s10639_s20 }
  0xd4   : > { %v11103_v63 = vpop.permute.xlu1 %419  ;;  %v11105_v58 = vpop.permute.xlu0 %417 }
  0xd5   : > { %19167 = vst [vmem:[#allocation43_spill] sm:$0xff] %v11103_v63  ;;  %19168 = vst [vmem:[#allocation44_spill] sm:$0xff] %v11105_v58 }
  0xd6   : > { %951 = vrot.lane.b32.xlu1 %v10772_v14, %s10639_s20  ;;  %949 = vrot.lane.b32.xlu0 %v10775_v15, %s10639_s20 }
  0xd8   : > { %v11111_v60 = vpop.permute.xlu1 %631  ;;  %v11113_v61 = vpop.permute.xlu0 %629 }
  0xd9   : > { %19169 = vst [vmem:[#allocation45_spill] sm:$0xff] %v11111_v60  ;;  %19170 = vst [vmem:[#allocation46_spill] sm:$0xff] %v11113_v61 }
  0xda   : > { %955 = vrot.lane.b32.xlu1 %v10782_v16, %s10639_s20  ;;  %953 = vrot.lane.b32.xlu0 %v10785_v17, %s10639_s20 }
  0xdc   : > { %v11119_v62 = vpop.permute.xlu1 %635  ;;  %v11121_v63 = vpop.permute.xlu0 %633 }
  0xdd   : > { %19171 = vst [vmem:[#allocation47_spill] sm:$0xff] %v11119_v62  ;;  %19172 = vst [vmem:[#allocation48_spill] sm:$0xff] %v11121_v63 }
  0xde   : > { %959 = vrot.lane.b32.xlu1 %v10792_v18, %s10639_s20  ;;  %957 = vrot.lane.b32.xlu0 %v10795_v19, %s10639_s20 }
  0xe0   : > { %v11127_v58 = vpop.permute.xlu1 %639  ;;  %v11129_v56 = vpop.permute.xlu0 %637 }
  0xe1   : > { %19173 = vst [vmem:[#allocation49_spill] sm:$0xff] %v11127_v58  ;;  %19174 = vst [vmem:[#allocation50_spill] sm:$0xff] %v11129_v56 }
  0xe2   : > { %963 = vrot.lane.b32.xlu1 %v10802_v20, %s10639_s20  ;;  %961 = vrot.lane.b32.xlu0 %v10805_v21, %s10639_s20 }
  0xe4   : > { %v11135_v59 = vpop.permute.xlu1 %643  ;;  %v11137_v54 = vpop.permute.xlu0 %641 }
  0xe5   : > { %19175 = vst [vmem:[#allocation51_spill] sm:$0xff] %v11135_v59  ;;  %19176 = vst [vmem:[#allocation52_spill] sm:$0xff] %v11137_v54 }
  0xe6   : > { %967 = vrot.lane.b32.xlu1 %v10812_v22, %s10639_s20  ;;  %965 = vrot.lane.b32.xlu0 %v10815_v23, %s10639_s20 }
  0xe8   : > { %v11143_v57 = vpop.permute.xlu1 %647  ;;  %v11145_v52 = vpop.permute.xlu0 %645 }
  0xe9   : > { %19177 = vst [vmem:[#allocation53_spill] sm:$0xff] %v11143_v57  ;;  %19178 = vst [vmem:[#allocation54_spill] sm:$0xff] %v11145_v52 }
  0xea   : > { %971 = vrot.lane.b32.xlu1 %v10822_v24, %s10639_s20  ;;  %969 = vrot.lane.b32.xlu0 %v10825_v25, %s10639_s20 }
  0xec   : > { %v11151_v55 = vpop.permute.xlu1 %651  ;;  %v11153_v50 = vpop.permute.xlu0 %649 }
  0xed   : > { %19179 = vst [vmem:[#allocation55_spill] sm:$0xff] %v11151_v55  ;;  %19180 = vst [vmem:[#allocation56_spill] sm:$0xff] %v11153_v50 }
  0xee   : > { %975 = vrot.lane.b32.xlu1 %v10832_v26, %s10639_s20  ;;  %973 = vrot.lane.b32.xlu0 %v10835_v27, %s10639_s20 }
  0xf0   : > { %v11159_v53 = vpop.permute.xlu1 %655  ;;  %v11161_v57 = vpop.permute.xlu0 %653 }
  0xf1   : > { %19181 = vst [vmem:[#allocation57_spill] sm:$0xff] %v11159_v53  ;;  %19182 = vst [vmem:[#allocation58_spill] sm:$0xff] %v11161_v57 }
  0xf2   : > { %979 = vrot.lane.b32.xlu1 %v10842_v28, %s10639_s20  ;;  %977 = vrot.lane.b32.xlu0 %v10845_v29, %s10639_s20 }
  0xf4   : > { %v11167_v48 = vpop.permute.xlu1 %659  ;;  %v11169_v55 = vpop.permute.xlu0 %657 }
  0xf5   : > { %19183 = vst [vmem:[#allocation59_spill] sm:$0xff] %v11167_v48  ;;  %19184 = vst [vmem:[#allocation60_spill] sm:$0xff] %v11169_v55 }
  0xf6   : > { %983 = vrot.lane.b32.xlu1 %v10852_v30, %s10639_s20  ;;  %981 = vrot.lane.b32.xlu0 %v10855_v31, %s10639_s20 }
  0xf8   : > { %v11175_v50 = vpop.permute.xlu1 %663  ;;  %v11177_v53 = vpop.permute.xlu0 %661 }
  0xf9   : > { %19185 = vst [vmem:[#allocation61_spill] sm:$0xff] %v11175_v50  ;;  %19186 = vst [vmem:[#allocation62_spill] sm:$0xff] %v11177_v53 }
  0xfa   : > { %987 = vrot.lane.b32.xlu1 %v10862_v32, %s10639_s20  ;;  %985 = vrot.lane.b32.xlu0 %v10865_v33, %s10639_s20 }
  0xfc   : > { %v11183_v57 = vpop.permute.xlu1 %667  ;;  %v11185_v48 = vpop.permute.xlu0 %665 }
  0xfd   : > { %19187 = vst [vmem:[#allocation63_spill] sm:$0xff] %v11183_v57  ;;  %19188 = vst [vmem:[#allocation64_spill] sm:$0xff] %v11185_v48 }
  0xfe   : > { %991 = vrot.lane.b32.xlu1 %v10872_v34, %s10639_s20  ;;  %989 = vrot.lane.b32.xlu0 %v10875_v35, %s10639_s20 }
 0x100   : > { %v11191_v55 = vpop.permute.xlu1 %671  ;;  %v11193_v50 = vpop.permute.xlu0 %669 }
 0x101   : > { %19189 = vst [vmem:[#allocation65_spill] sm:$0xff] %v11191_v55  ;;  %19190 = vst [vmem:[#allocation66_spill] sm:$0xff] %v11193_v50 }
 0x102   : > { %995 = vrot.lane.b32.xlu1 %v10882_v36, %s10639_s20  ;;  %993 = vrot.lane.b32.xlu0 %v10885_v37, %s10639_s20 }
 0x104   : > { %v11199_v53 = vpop.permute.xlu1 %675  ;;  %v11201_v57 = vpop.permute.xlu0 %673 }
 0x105   : > { %19191 = vst [vmem:[#allocation67_spill] sm:$0xff] %v11199_v53  ;;  %19192 = vst [vmem:[#allocation68_spill] sm:$0xff] %v11201_v57 }
 0x106   : > { %999 = vrot.lane.b32.xlu1 %v10892_v38, %s10639_s20  ;;  %997 = vrot.lane.b32.xlu0 %v10895_v39, %s10639_s20 }
 0x108   : > { %v11207_v48 = vpop.permute.xlu1 %679  ;;  %v11209_v55 = vpop.permute.xlu0 %677 }
 0x109   : > { %19193 = vst [vmem:[#allocation69_spill] sm:$0xff] %v11207_v48  ;;  %19194 = vst [vmem:[#allocation70_spill] sm:$0xff] %v11209_v55 }
 0x10a   : > { %1003 = vrot.lane.b32.xlu1 %v10902_v40, %s10639_s20  ;;  %1001 = vrot.lane.b32.xlu0 %v10905_v41, %s10639_s20 }
 0x10c   : > { %v11215_v50 = vpop.permute.xlu1 %683  ;;  %v11217_v53 = vpop.permute.xlu0 %681 }
 0x10d   : > { %19195 = vst [vmem:[#allocation71_spill] sm:$0xff] %v11215_v50  ;;  %19196 = vst [vmem:[#allocation72_spill] sm:$0xff] %v11217_v53 }
 0x10e   : > { %1215 = vrot.lane.b32.xlu1 %v10715_v3, %s10640_s21  ;;  %1213 = vrot.lane.b32.xlu0 %v10705_v1, %s10640_s21 }
 0x110   : > { %v11223_v48 = vpop.permute.xlu1 %687  ;;  %v11225_v55 = vpop.permute.xlu0 %685 }
 0x111   : > { %19197 = vst [vmem:[#allocation73_spill] sm:$0xff] %v11223_v48  ;;  %19198 = vst [vmem:[#allocation74_spill] sm:$0xff] %v11225_v55 }
 0x112   : > { %1219 = vrot.lane.b32.xlu1 %v10712_v2, %s10640_s21  ;;  %1217 = vrot.lane.b32.xlu0 %v10702_v0, %s10640_s21 }
 0x114   : > { %v11231_v50 = vpop.permute.xlu1 %691  ;;  %v11233_v53 = vpop.permute.xlu0 %689 }
 0x115   : > { %19199 = vst [vmem:[#allocation75_spill] sm:$0xff] %v11231_v50  ;;  %19200 = vst [vmem:[#allocation76_spill] sm:$0xff] %v11233_v53 }
 0x116   : > { %1223 = vrot.lane.b32.xlu1 %v10722_v4, %s10640_s21  ;;  %1221 = vrot.lane.b32.xlu0 %v10725_v5, %s10640_s21 }
 0x118   : > { %v11239_v57 = vpop.permute.xlu1 %695  ;;  %v11241_v48 = vpop.permute.xlu0 %693 }
 0x119   : > { %19201 = vst [vmem:[#allocation77_spill] sm:$0xff] %v11239_v57  ;;  %19202 = vst [vmem:[#allocation78_spill] sm:$0xff] %v11241_v48 }
 0x11a   : > { %1227 = vrot.lane.b32.xlu1 %v10732_v6, %s10640_s21  ;;  %1225 = vrot.lane.b32.xlu0 %v10735_v7, %s10640_s21 }
 0x11c   : > { %v11247_v55 = vpop.permute.xlu1 %699  ;;  %v11249_v50 = vpop.permute.xlu0 %697 }
 0x11d   : > { %19203 = vst [vmem:[#allocation79_spill] sm:$0xff] %v11247_v55  ;;  %19204 = vst [vmem:[#allocation80_spill] sm:$0xff] %v11249_v50 }
 0x11e   : > { %1231 = vrot.lane.b32.xlu1 %v10742_v8, %s10640_s21  ;;  %1229 = vrot.lane.b32.xlu0 %v10745_v9, %s10640_s21 }
 0x120   : > { %v11255_v53 = vpop.permute.xlu1 %703  ;;  %v11257_v57 = vpop.permute.xlu0 %701 }
 0x121   : > { %19205 = vst [vmem:[#allocation81_spill] sm:$0xff] %v11255_v53  ;;  %19206 = vst [vmem:[#allocation82_spill] sm:$0xff] %v11257_v57 }
 0x122   : > { %1235 = vrot.lane.b32.xlu1 %v10752_v10, %s10640_s21  ;;  %1233 = vrot.lane.b32.xlu0 %v10755_v11, %s10640_s21 }
 0x124   : > { %v11263_v48 = vpop.permute.xlu1 %707  ;;  %v11265_v55 = vpop.permute.xlu0 %705 }
 0x125   : > { %19207 = vst [vmem:[#allocation83_spill] sm:$0xff] %v11263_v48  ;;  %19208 = vst [vmem:[#allocation84_spill] sm:$0xff] %v11265_v55 }
 0x126   : > { %1239 = vrot.lane.b32.xlu1 %v10762_v12, %s10640_s21  ;;  %1237 = vrot.lane.b32.xlu0 %v10765_v13, %s10640_s21 }
 0x128   : > { %v11271_v50 = vpop.permute.xlu1 %711  ;;  %v11273_v53 = vpop.permute.xlu0 %709 }
 0x129   : > { %19209 = vst [vmem:[#allocation85_spill] sm:$0xff] %v11271_v50  ;;  %19210 = vst [vmem:[#allocation86_spill] sm:$0xff] %v11273_v53 }
 0x12a   : > { %1243 = vrot.lane.b32.xlu1 %v10772_v14, %s10640_s21  ;;  %1241 = vrot.lane.b32.xlu0 %v10775_v15, %s10640_s21 }
 0x12c   : > { %v11279_v57 = vpop.permute.xlu1 %923  ;;  %v11281_v48 = vpop.permute.xlu0 %921 }
 0x12d   : > { %19211 = vst [vmem:[#allocation87_spill] sm:$0xff] %v11279_v57  ;;  %19212 = vst [vmem:[#allocation88_spill] sm:$0xff] %v11281_v48 }
 0x12e   : > { %1247 = vrot.lane.b32.xlu1 %v10782_v16, %s10640_s21  ;;  %1245 = vrot.lane.b32.xlu0 %v10785_v17, %s10640_s21 }
 0x130   : > { %v11287_v55 = vpop.permute.xlu1 %927  ;;  %v11289_v50 = vpop.permute.xlu0 %925 }
 0x131   : > { %19213 = vst [vmem:[#allocation89_spill] sm:$0xff] %v11287_v55  ;;  %19214 = vst [vmem:[#allocation90_spill] sm:$0xff] %v11289_v50 }
 0x132   : > { %1251 = vrot.lane.b32.xlu1 %v10792_v18, %s10640_s21  ;;  %1249 = vrot.lane.b32.xlu0 %v10795_v19, %s10640_s21 }
 0x134   : > { %v11295_v53 = vpop.permute.xlu1 %931  ;;  %v11297_v51 = vpop.permute.xlu0 %929 }
 0x135   : > { %19215 = vst [vmem:[#allocation91_spill] sm:$0xff] %v11295_v53  ;;  %19216 = vst [vmem:[#allocation92_spill] sm:$0xff] %v11297_v51 }
 0x136   : > { %1255 = vrot.lane.b32.xlu1 %v10802_v20, %s10640_s21  ;;  %1253 = vrot.lane.b32.xlu0 %v10805_v21, %s10640_s21 }
 0x138   : > { %v11303_v59 = vpop.permute.xlu1 %935  ;;  %v11305_v52 = vpop.permute.xlu0 %933 }
 0x139   : > { %19217 = vst [vmem:[#allocation93_spill] sm:$0xff] %v11303_v59  ;;  %19218 = vst [vmem:[#allocation94_spill] sm:$0xff] %v11305_v52 }
 0x13a   : > { %1259 = vrot.lane.b32.xlu1 %v10812_v22, %s10640_s21  ;;  %1257 = vrot.lane.b32.xlu0 %v10815_v23, %s10640_s21 }
 0x13c   : > { %v11311_v46 = vpop.permute.xlu1 %939  ;;  %v11313_v49 = vpop.permute.xlu0 %937 }
 0x13d   : > { %19219 = vst [vmem:[#allocation95_spill] sm:$0xff] %v11311_v46  ;;  %19220 = vst [vmem:[#allocation96_spill] sm:$0xff] %v11313_v49 }
 0x13e   : > { %1263 = vrot.lane.b32.xlu1 %v10822_v24, %s10640_s21  ;;  %1261 = vrot.lane.b32.xlu0 %v10825_v25, %s10640_s21 }
 0x140   : > { %v11319_v58 = vpop.permute.xlu1 %943  ;;  %v11321_v59 = vpop.permute.xlu0 %941 }
 0x141   : > { %19221 = vst [vmem:[#allocation97_spill] sm:$0xff] %v11319_v58  ;;  %19222 = vst [vmem:[#allocation98_spill] sm:$0xff] %v11321_v59 }
 0x142   : > { %1267 = vrot.lane.b32.xlu1 %v10832_v26, %s10640_s21  ;;  %1265 = vrot.lane.b32.xlu0 %v10835_v27, %s10640_s21 }
 0x144   : > { %v11327_v54 = vpop.permute.xlu1 %947  ;;  %v11329_v46 = vpop.permute.xlu0 %945 }
 0x145   : > { %19223 = vst [vmem:[#allocation99_spill] sm:$0xff] %v11327_v54  ;;  %19224 = vst [vmem:[#allocation100_spill] sm:$0xff] %v11329_v46 }
 0x146   : > { %1271 = vrot.lane.b32.xlu1 %v10842_v28, %s10640_s21  ;;  %1269 = vrot.lane.b32.xlu0 %v10845_v29, %s10640_s21 }
 0x148   : > { %v11335_v49 = vpop.permute.xlu1 %951  ;;  %v11337_v58 = vpop.permute.xlu0 %949 }
 0x149   : > { %19225 = vst [vmem:[#allocation101_spill] sm:$0xff] %v11335_v49  ;;  %19226 = vst [vmem:[#allocation102_spill] sm:$0xff] %v11337_v58 }
 0x14a   : > { %1275 = vrot.lane.b32.xlu1 %v10852_v30, %s10640_s21  ;;  %1273 = vrot.lane.b32.xlu0 %v10855_v31, %s10640_s21 }
 0x14c   : > { %v11343_v59 = vpop.permute.xlu1 %955  ;;  %v11345_v54 = vpop.permute.xlu0 %953 }
 0x14d   : > { %19227 = vst [vmem:[#allocation103_spill] sm:$0xff] %v11343_v59  ;;  %19228 = vst [vmem:[#allocation104_spill] sm:$0xff] %v11345_v54 }
 0x14e   : > { %1279 = vrot.lane.b32.xlu1 %v10862_v32, %s10640_s21  ;;  %1277 = vrot.lane.b32.xlu0 %v10865_v33, %s10640_s21 }
 0x150   : > { %v11351_v46 = vpop.permute.xlu1 %959  ;;  %v11353_v49 = vpop.permute.xlu0 %957 }
 0x151   : > { %19229 = vst [vmem:[#allocation105_spill] sm:$0xff] %v11351_v46  ;;  %19230 = vst [vmem:[#allocation106_spill] sm:$0xff] %v11353_v49 }
 0x152   : > { %1283 = vrot.lane.b32.xlu1 %v10872_v34, %s10640_s21  ;;  %1281 = vrot.lane.b32.xlu0 %v10875_v35, %s10640_s21 }
 0x154   : > { %v11359_v58 = vpop.permute.xlu1 %963  ;;  %v11361_v59 = vpop.permute.xlu0 %961 }
 0x155   : > { %19231 = vst [vmem:[#allocation107_spill] sm:$0xff] %v11359_v58  ;;  %19232 = vst [vmem:[#allocation108_spill] sm:$0xff] %v11361_v59 }
 0x156   : > { %1287 = vrot.lane.b32.xlu1 %v10882_v36, %s10640_s21  ;;  %1285 = vrot.lane.b32.xlu0 %v10885_v37, %s10640_s21 }
 0x158   : > { %v11367_v54 = vpop.permute.xlu1 %967  ;;  %v11369_v46 = vpop.permute.xlu0 %965 }
 0x159   : > { %19233 = vst [vmem:[#allocation109_spill] sm:$0xff] %v11367_v54  ;;  %19234 = vst [vmem:[#allocation110_spill] sm:$0xff] %v11369_v46 }
 0x15a   : > { %1291 = vrot.lane.b32.xlu1 %v10892_v38, %s10640_s21  ;;  %1289 = vrot.lane.b32.xlu0 %v10895_v39, %s10640_s21 }
 0x15c   : > { %v11375_v49 = vpop.permute.xlu1 %971  ;;  %v11377_v58 = vpop.permute.xlu0 %969 }
 0x15d   : > { %19235 = vst [vmem:[#allocation111_spill] sm:$0xff] %v11375_v49  ;;  %19236 = vst [vmem:[#allocation112_spill] sm:$0xff] %v11377_v58 }
 0x15e   : > { %1295 = vrot.lane.b32.xlu1 %v10902_v40, %s10640_s21  ;;  %1293 = vrot.lane.b32.xlu0 %v10905_v41, %s10640_s21  ;;  %s10662_s21 = smov 120  }
 0x160   : > { %v11383_v59 = vpop.permute.xlu1 %975  ;;  %v11385_v54 = vpop.permute.xlu0 %973 }
 0x161   : > { %19237 = vst [vmem:[#allocation113_spill] sm:$0xff] %v11383_v59  ;;  %19238 = vst [vmem:[#allocation114_spill] sm:$0xff] %v11385_v54 }
 0x162   : > { %1507 = vrot.lane.b32.xlu1 %v10715_v3, %s10641_s22  ;;  %1505 = vrot.lane.b32.xlu0 %v10705_v1, %s10641_s22 }
 0x164   : > { %v11391_v49 = vpop.permute.xlu1 %979  ;;  %v11393_v58 = vpop.permute.xlu0 %977 }
 0x165   : > { %19239 = vst [vmem:[#allocation115_spill] sm:$0xff] %v11391_v49  ;;  %19240 = vst [vmem:[#allocation116_spill] sm:$0xff] %v11393_v58 }
 0x166   : > { %1511 = vrot.lane.b32.xlu1 %v10712_v2, %s10641_s22  ;;  %1509 = vrot.lane.b32.xlu0 %v10702_v0, %s10641_s22 }
 0x168   : > { %v11399_v59 = vpop.permute.xlu1 %983  ;;  %v11401_v54 = vpop.permute.xlu0 %981 }
 0x169   : > { %19241 = vst [vmem:[#allocation117_spill] sm:$0xff] %v11399_v59  ;;  %19242 = vst [vmem:[#allocation118_spill] sm:$0xff] %v11401_v54 }
 0x16a   : > { %1515 = vrot.lane.b32.xlu1 %v10722_v4, %s10641_s22  ;;  %1513 = vrot.lane.b32.xlu0 %v10725_v5, %s10641_s22 }
 0x16c   : > { %v11407_v1 = vpop.permute.xlu1 %987  ;;  %v11409_v3 = vpop.permute.xlu0 %985 }
 0x16d   : > { %19243 = vst [vmem:[#allocation119_spill] sm:$0xff] %v11407_v1  ;;  %19244 = vst [vmem:[#allocation120_spill] sm:$0xff] %v11409_v3  ;;  %v11597_v1 = vld [vmem:[%s10699_s17 + $0x30] sm:$0xff]  ;;  %v11608_v3 = vld [vmem:[%s10699_s17 + $0x48] sm:$0xff] }
 0x16e   : > { %1519 = vrot.lane.b32.xlu1 %v10732_v6, %s10641_s22  ;;  %1517 = vrot.lane.b32.xlu0 %v10735_v7, %s10641_s22 }
 0x170   : > { %v11415_v0 = vpop.permute.xlu1 %991  ;;  %v11417_v2 = vpop.permute.xlu0 %989 }
 0x171   : > { %19245 = vst [vmem:[#allocation121_spill] sm:$0xff] %v11415_v0  ;;  %19246 = vst [vmem:[#allocation122_spill] sm:$0xff] %v11417_v2 }
 0x172   : > { %1523 = vrot.lane.b32.xlu1 %v10742_v8, %s10641_s22  ;;  %1521 = vrot.lane.b32.xlu0 %v10745_v9, %s10641_s22 }
 0x174   : > { %v11423_v4 = vpop.permute.xlu1 %995  ;;  %v11425_v5 = vpop.permute.xlu0 %993 }
 0x175   : > { %19247 = vst [vmem:[#allocation123_spill] sm:$0xff] %v11423_v4  ;;  %19248 = vst [vmem:[#allocation124_spill] sm:$0xff] %v11425_v5  ;;  %v11583_v4 = vld [vmem:[%s10699_s17 + $0x20] sm:$0xff]  ;;  %v11594_v5 = vld [vmem:[%s10699_s17 + $0x38] sm:$0xff] }
 0x176   : > { %1527 = vrot.lane.b32.xlu1 %v10752_v10, %s10641_s22  ;;  %1525 = vrot.lane.b32.xlu0 %v10755_v11, %s10641_s22 }
 0x178   : > { %v11431_v6 = vpop.permute.xlu1 %999  ;;  %v11433_v7 = vpop.permute.xlu0 %997 }
 0x179   : > { %19249 = vst [vmem:[#allocation125_spill] sm:$0xff] %v11431_v6  ;;  %19250 = vst [vmem:[#allocation126_spill] sm:$0xff] %v11433_v7 }
 0x17a   : > { %1531 = vrot.lane.b32.xlu1 %v10762_v12, %s10641_s22  ;;  %1529 = vrot.lane.b32.xlu0 %v10765_v13, %s10641_s22 }
 0x17c   : > { %v11439_v8 = vpop.permute.xlu1 %1003  ;;  %v11441_v9 = vpop.permute.xlu0 %1001 }
 0x17d   : > { %19251 = vst [vmem:[#allocation127_spill] sm:$0xff] %v11439_v8  ;;  %19252 = vst [vmem:[#allocation128_spill] sm:$0xff] %v11441_v9  ;;  %v11580_v9 = vld [vmem:[%s10699_s17 + $0x28] sm:$0xff] }
 0x17e   : > { %1535 = vrot.lane.b32.xlu1 %v10772_v14, %s10641_s22  ;;  %1533 = vrot.lane.b32.xlu0 %v10775_v15, %s10641_s22 }
 0x180   : > { %v11447_v10 = vpop.permute.xlu1 %1215  ;;  %v11449_v11 = vpop.permute.xlu0 %1213 }
 0x181   : > { %19253 = vst [vmem:[#allocation129_spill] sm:$0xff] %v11447_v10  ;;  %19254 = vst [vmem:[#allocation130_spill] sm:$0xff] %v11449_v11 }
 0x182   : > { %1539 = vrot.lane.b32.xlu1 %v10782_v16, %s10641_s22  ;;  %1537 = vrot.lane.b32.xlu0 %v10785_v17, %s10641_s22 }
 0x184   : > { %v11455_v12 = vpop.permute.xlu1 %1219  ;;  %v11457_v13 = vpop.permute.xlu0 %1217 }
 0x185   : > { %19255 = vst [vmem:[#allocation131_spill] sm:$0xff] %v11455_v12  ;;  %19256 = vst [vmem:[#allocation132_spill] sm:$0xff] %v11457_v13 }
 0x186   : > { %1543 = vrot.lane.b32.xlu1 %v10792_v18, %s10641_s22  ;;  %1541 = vrot.lane.b32.xlu0 %v10795_v19, %s10641_s22 }
 0x188   : > { %v11463_v14 = vpop.permute.xlu1 %1223  ;;  %v11465_v15 = vpop.permute.xlu0 %1221 }
 0x189   : > { %19257 = vst [vmem:[#allocation133_spill] sm:$0xff] %v11463_v14  ;;  %19258 = vst [vmem:[#allocation134_spill] sm:$0xff] %v11465_v15 }
 0x18a   : > { %1547 = vrot.lane.b32.xlu1 %v10802_v20, %s10641_s22  ;;  %1545 = vrot.lane.b32.xlu0 %v10805_v21, %s10641_s22 }
 0x18c   : > { %v11471_v16 = vpop.permute.xlu1 %1227  ;;  %v11473_v17 = vpop.permute.xlu0 %1225 }
 0x18d   : > { %19259 = vst [vmem:[#allocation135_spill] sm:$0xff] %v11471_v16  ;;  %19260 = vst [vmem:[#allocation136_spill] sm:$0xff] %v11473_v17 }
 0x18e   : > { %1551 = vrot.lane.b32.xlu1 %v10812_v22, %s10641_s22  ;;  %1549 = vrot.lane.b32.xlu0 %v10815_v23, %s10641_s22 }
 0x190   : > { %v11479_v18 = vpop.permute.xlu1 %1231  ;;  %v11481_v19 = vpop.permute.xlu0 %1229 }
 0x191   : > { %19261 = vst [vmem:[#allocation137_spill] sm:$0xff] %v11479_v18  ;;  %19262 = vst [vmem:[#allocation138_spill] sm:$0xff] %v11481_v19  ;;  %v11734_v18 = vld [vmem:[%s10699_s17 + $0xd8] sm:$0xff] }
 0x192   : > { %1555 = vrot.lane.b32.xlu1 %v10822_v24, %s10641_s22  ;;  %1553 = vrot.lane.b32.xlu0 %v10825_v25, %s10641_s22 }
 0x194   : > { %v11487_v20 = vpop.permute.xlu1 %1235  ;;  %v11489_v21 = vpop.permute.xlu0 %1233 }
 0x195   : > { %19263 = vst [vmem:[#allocation139_spill] sm:$0xff] %v11487_v20  ;;  %19264 = vst [vmem:[#allocation140_spill] sm:$0xff] %v11489_v21  ;;  %v11737_v21 = vld [vmem:[%s10699_s17 + $0xd0] sm:$0xff] }
 0x196   : > { %1559 = vrot.lane.b32.xlu1 %v10832_v26, %s10641_s22  ;;  %1557 = vrot.lane.b32.xlu0 %v10835_v27, %s10641_s22 }
 0x198   : > { %v11495_v22 = vpop.permute.xlu1 %1239  ;;  %v11497_v23 = vpop.permute.xlu0 %1237 }
 0x199   : > { %19265 = vst [vmem:[#allocation141_spill] sm:$0xff] %v11495_v22  ;;  %19266 = vst [vmem:[#allocation142_spill] sm:$0xff] %v11497_v23  ;;  %v11720_v22 = vld [vmem:[%s10699_s17 + $0xc8] sm:$0xff] }
 0x19a   : > { %1563 = vrot.lane.b32.xlu1 %v10842_v28, %s10641_s22  ;;  %1561 = vrot.lane.b32.xlu0 %v10845_v29, %s10641_s22 }
 0x19c   : > { %v11503_v24 = vpop.permute.xlu1 %1243  ;;  %v11505_v25 = vpop.permute.xlu0 %1241 }
 0x19d   : > { %19267 = vst [vmem:[#allocation143_spill] sm:$0xff] %v11503_v24  ;;  %19268 = vst [vmem:[#allocation144_spill] sm:$0xff] %v11505_v25  ;;  %v11723_v25 = vld [vmem:[%s10699_s17 + $0xc0] sm:$0xff] }
 0x19e   : > { %1567 = vrot.lane.b32.xlu1 %v10852_v30, %s10641_s22  ;;  %1565 = vrot.lane.b32.xlu0 %v10855_v31, %s10641_s22 }
 0x1a0   : > { %v11511_v26 = vpop.permute.xlu1 %1247  ;;  %v11513_v27 = vpop.permute.xlu0 %1245 }
 0x1a1   : > { %19269 = vst [vmem:[#allocation145_spill] sm:$0xff] %v11511_v26  ;;  %19270 = vst [vmem:[#allocation146_spill] sm:$0xff] %v11513_v27  ;;  %v11706_v26 = vld [vmem:[%s10699_s17 + $0xb8] sm:$0xff] }
 0x1a2   : > { %1571 = vrot.lane.b32.xlu1 %v10862_v32, %s10641_s22  ;;  %1569 = vrot.lane.b32.xlu0 %v10865_v33, %s10641_s22 }
 0x1a4   : > { %v11519_v28 = vpop.permute.xlu1 %1251  ;;  %v11521_v29 = vpop.permute.xlu0 %1249 }
 0x1a5   : > { %19271 = vst [vmem:[#allocation147_spill] sm:$0xff] %v11519_v28  ;;  %19272 = vst [vmem:[#allocation148_spill] sm:$0xff] %v11521_v29  ;;  %v11709_v29 = vld [vmem:[%s10699_s17 + $0xb0] sm:$0xff] }
 0x1a6   : > { %1575 = vrot.lane.b32.xlu1 %v10872_v34, %s10641_s22  ;;  %1573 = vrot.lane.b32.xlu0 %v10875_v35, %s10641_s22 }
 0x1a8   : > { %v11527_v30 = vpop.permute.xlu1 %1255  ;;  %v11529_v31 = vpop.permute.xlu0 %1253 }
 0x1a9   : > { %19273 = vst [vmem:[#allocation149_spill] sm:$0xff] %v11527_v30  ;;  %19274 = vst [vmem:[#allocation150_spill] sm:$0xff] %v11529_v31  ;;  %v11692_v30 = vld [vmem:[%s10699_s17 + $0xa8] sm:$0xff] }
 0x1aa   : > { %1579 = vrot.lane.b32.xlu1 %v10882_v36, %s10641_s22  ;;  %1577 = vrot.lane.b32.xlu0 %v10885_v37, %s10641_s22  ;;  %v11552_v36 = vld [vmem:[%s10699_s17 + $0x8] sm:$0xff]  ;;  %v11555_v37 = vld [vmem:[%s10699_s17] sm:$0xff] }
 0x1ac   : > { %v11535_v32 = vpop.permute.xlu1 %1259  ;;  %v11537_v33 = vpop.permute.xlu0 %1257 }
 0x1ad   : > { %19275 = vst [vmem:[#allocation151_spill] sm:$0xff] %v11535_v32  ;;  %19276 = vst [vmem:[#allocation152_spill] sm:$0xff] %v11537_v33  ;;  %v11695_v33 = vld [vmem:[%s10699_s17 + $0xa0] sm:$0xff] }
 0x1ae   : > { %1583 = vrot.lane.b32.xlu1 %v10892_v38, %s10641_s22  ;;  %1581 = vrot.lane.b32.xlu0 %v10895_v39, %s10641_s22  ;;  %v11566_v39 = vld [vmem:[%s10699_s17 + $0x18] sm:$0xff] }
 0x1b0   : > { %v11543_v34 = vpop.permute.xlu1 %1263  ;;  %v11545_v35 = vpop.permute.xlu0 %1261 }
 0x1b1   : > { %19277 = vst [vmem:[#allocation153_spill] sm:$0xff] %v11543_v34  ;;  %19278 = vst [vmem:[#allocation154_spill] sm:$0xff] %v11545_v35 }
 0x1b2   : > { %1587 = vrot.lane.b32.xlu1 %v10902_v40, %s10641_s22  ;;  %1585 = vrot.lane.b32.xlu0 %v10905_v41, %s10641_s22  ;;  %v11569_v40 = vld [vmem:[%s10699_s17 + $0x10] sm:$0xff] }
 0x1b4   : > { %v11557_v38 = vpop.permute.xlu1 %1267  ;;  %v11559_v8 = vpop.permute.xlu0 %1265 }
 0x1b5   : > { %19279 = vst [vmem:[#allocation155_spill] sm:$0xff] %v11557_v38  ;;  %19280 = vst [vmem:[#allocation156_spill] sm:$0xff] %v11559_v8 }
 0x1b6   : > { %1799 = vrot.lane.b32.xlu1 %v11552_v36, %s10642_s23  ;;  %1797 = vrot.lane.b32.xlu0 %v11555_v37, %s10642_s23 }
 0x1b8   : > { %v11571_v41 = vpop.permute.xlu1 %1271  ;;  %v11573_v6 = vpop.permute.xlu0 %1269 }
 0x1b9   : > { %19281 = vst [vmem:[#allocation157_spill] sm:$0xff] %v11571_v41  ;;  %19282 = vst [vmem:[#allocation158_spill] sm:$0xff] %v11573_v6 }
 0x1ba   : > { %1803 = vrot.lane.b32.xlu1 %v11566_v39, %s10642_s23  ;;  %1801 = vrot.lane.b32.xlu0 %v11569_v40, %s10642_s23 }
 0x1bc   : > { %v11585_v7 = vpop.permute.xlu1 %1275  ;;  %v11587_v0 = vpop.permute.xlu0 %1273 }
 0x1bd   : > { %19283 = vst [vmem:[#allocation159_spill] sm:$0xff] %v11585_v7  ;;  %19284 = vst [vmem:[#allocation160_spill] sm:$0xff] %v11587_v0  ;;  %v11611_v7 = vld [vmem:[%s10699_s17 + $0x40] sm:$0xff] }
 0x1be   : > { %1807 = vrot.lane.b32.xlu1 %v11580_v9, %s10642_s23  ;;  %1805 = vrot.lane.b32.xlu0 %v11583_v4, %s10642_s23 }
 0x1c0   : > { %v11599_v2 = vpop.permute.xlu1 %1279  ;;  %v11601_v59 = vpop.permute.xlu0 %1277 }
 0x1c1   : > { %19285 = vst [vmem:[#allocation161_spill] sm:$0xff] %v11599_v2  ;;  %19286 = vst [vmem:[#allocation162_spill] sm:$0xff] %v11601_v59  ;;  %v11622_v2 = vld [vmem:[%s10699_s17 + $0x58] sm:$0xff]  ;;  %v11625_v59 = vld [vmem:[%s10699_s17 + $0x50] sm:$0xff] }
 0x1c2   : > { %1811 = vrot.lane.b32.xlu1 %v11594_v5, %s10642_s23  ;;  %1809 = vrot.lane.b32.xlu0 %v11597_v1, %s10642_s23 }
 0x1c4   : > { %v11613_v49 = vpop.permute.xlu1 %1283  ;;  %v11615_v54 = vpop.permute.xlu0 %1281 }
 0x1c5   : > { %19287 = vst [vmem:[#allocation163_spill] sm:$0xff] %v11613_v49  ;;  %19288 = vst [vmem:[#allocation164_spill] sm:$0xff] %v11615_v54  ;;  %v11636_v49 = vld [vmem:[%s10699_s17 + $0x68] sm:$0xff]  ;;  %v11639_v54 = vld [vmem:[%s10699_s17 + $0x60] sm:$0xff] }
 0x1c6   : > { %1815 = vrot.lane.b32.xlu1 %v11608_v3, %s10642_s23  ;;  %1813 = vrot.lane.b32.xlu0 %v11611_v7, %s10642_s23 }
 0x1c8   : > { %v11627_v41 = vpop.permute.xlu1 %1287  ;;  %v11629_v0 = vpop.permute.xlu0 %1285 }
 0x1c9   : > { %19289 = vst [vmem:[#allocation165_spill] sm:$0xff] %v11627_v41  ;;  %19290 = vst [vmem:[#allocation166_spill] sm:$0xff] %v11629_v0  ;;  %v11650_v41 = vld [vmem:[%s10699_s17 + $0x78] sm:$0xff]  ;;  %v11653_v0 = vld [vmem:[%s10699_s17 + $0x70] sm:$0xff] }
 0x1ca   : > { %1819 = vrot.lane.b32.xlu1 %v11622_v2, %s10642_s23  ;;  %1817 = vrot.lane.b32.xlu0 %v11625_v59, %s10642_s23 }
 0x1cc   : > { %v11641_v58 = vpop.permute.xlu1 %1291  ;;  %v11643_v38 = vpop.permute.xlu0 %1289 }
 0x1cd   : > { %19291 = vst [vmem:[#allocation167_spill] sm:$0xff] %v11641_v58  ;;  %19292 = vst [vmem:[#allocation168_spill] sm:$0xff] %v11643_v38  ;;  %v11664_v58 = vld [vmem:[%s10699_s17 + $0x88] sm:$0xff]  ;;  %v11667_v38 = vld [vmem:[%s10699_s17 + $0x80] sm:$0xff] }
 0x1ce   : > { %1823 = vrot.lane.b32.xlu1 %v11636_v49, %s10642_s23  ;;  %1821 = vrot.lane.b32.xlu0 %v11639_v54, %s10642_s23 }
 0x1d0   : > { %v11655_v6 = vpop.permute.xlu1 %1295  ;;  %v11657_v34 = vpop.permute.xlu0 %1293 }
 0x1d1   : > { %19293 = vst [vmem:[#allocation169_spill] sm:$0xff] %v11655_v6  ;;  %19294 = vst [vmem:[#allocation170_spill] sm:$0xff] %v11657_v34  ;;  %v11678_v6 = vld [vmem:[%s10699_s17 + $0x98] sm:$0xff]  ;;  %v11681_v34 = vld [vmem:[%s10699_s17 + $0x90] sm:$0xff] }
 0x1d2   : > { %1827 = vrot.lane.b32.xlu1 %v11650_v41, %s10642_s23  ;;  %1825 = vrot.lane.b32.xlu0 %v11653_v0, %s10642_s23 }
 0x1d4   : > { %v11669_v8 = vpop.permute.xlu1 %1507  ;;  %v11671_v32 = vpop.permute.xlu0 %1505 }
 0x1d5   : > { %19295 = vst [vmem:[#allocation171_spill] sm:$0xff] %v11669_v8  ;;  %19296 = vst [vmem:[#allocation172_spill] sm:$0xff] %v11671_v32 }
 0x1d6   : > { %1831 = vrot.lane.b32.xlu1 %v11664_v58, %s10642_s23  ;;  %1829 = vrot.lane.b32.xlu0 %v11667_v38, %s10642_s23 }
 0x1d8   : > { %v11683_v35 = vpop.permute.xlu1 %1511  ;;  %v11685_v46 = vpop.permute.xlu0 %1509 }
 0x1d9   : > { %19297 = vst [vmem:[#allocation173_spill] sm:$0xff] %v11683_v35  ;;  %19298 = vst [vmem:[#allocation174_spill] sm:$0xff] %v11685_v46 }
 0x1da   : > { %1835 = vrot.lane.b32.xlu1 %v11678_v6, %s10642_s23  ;;  %1833 = vrot.lane.b32.xlu0 %v11681_v34, %s10642_s23 }
 0x1dc   : > { %v11697_v28 = vpop.permute.xlu1 %1515  ;;  %v11699_v31 = vpop.permute.xlu0 %1513 }
 0x1dd   : > { %19299 = vst [vmem:[#allocation175_spill] sm:$0xff] %v11697_v28  ;;  %19300 = vst [vmem:[#allocation176_spill] sm:$0xff] %v11699_v31 }
 0x1de   : > { %1839 = vrot.lane.b32.xlu1 %v11692_v30, %s10642_s23  ;;  %1837 = vrot.lane.b32.xlu0 %v11695_v33, %s10642_s23 }
 0x1e0   : > { %v11711_v24 = vpop.permute.xlu1 %1519  ;;  %v11713_v27 = vpop.permute.xlu0 %1517 }
 0x1e1   : > { %19301 = vst [vmem:[#allocation177_spill] sm:$0xff] %v11711_v24  ;;  %19302 = vst [vmem:[#allocation178_spill] sm:$0xff] %v11713_v27  ;;  %v11751_v24 = vld [vmem:[%s10699_s17 + $0xe0] sm:$0xff] }
 0x1e2   : > { %1843 = vrot.lane.b32.xlu1 %v11706_v26, %s10642_s23  ;;  %1841 = vrot.lane.b32.xlu0 %v11709_v29, %s10642_s23 }
 0x1e4   : > { %v11725_v20 = vpop.permute.xlu1 %1523  ;;  %v11727_v23 = vpop.permute.xlu0 %1521 }
 0x1e5   : > { %19303 = vst [vmem:[#allocation179_spill] sm:$0xff] %v11725_v20  ;;  %19304 = vst [vmem:[#allocation180_spill] sm:$0xff] %v11727_v23  ;;  %v11748_v20 = vld [vmem:[%s10699_s17 + $0xe8] sm:$0xff] }
 0x1e6   : > { %1847 = vrot.lane.b32.xlu1 %v11720_v22, %s10642_s23  ;;  %1845 = vrot.lane.b32.xlu0 %v11723_v25, %s10642_s23 }
 0x1e8   : > { %v11739_v16 = vpop.permute.xlu1 %1527  ;;  %v11741_v19 = vpop.permute.xlu0 %1525 }
 0x1e9   : > { %19305 = vst [vmem:[#allocation181_spill] sm:$0xff] %v11739_v16  ;;  %19306 = vst [vmem:[#allocation182_spill] sm:$0xff] %v11741_v19  ;;  %v11762_v16 = vld [vmem:[%s10699_s17 + $0xf8] sm:$0xff]  ;;  %v11765_v19 = vld [vmem:[%s10699_s17 + $0xf0] sm:$0xff] }
 0x1ea   : > { %1851 = vrot.lane.b32.xlu1 %v11734_v18, %s10642_s23  ;;  %1849 = vrot.lane.b32.xlu0 %v11737_v21, %s10642_s23 }
 0x1ec   : > { %v11753_v23 = vpop.permute.xlu1 %1531  ;;  %v11755_v53 = vpop.permute.xlu0 %1529 }
 0x1ed   : > { %19307 = vst [vmem:[#allocation183_spill] sm:$0xff] %v11753_v23  ;;  %19308 = vst [vmem:[#allocation184_spill] sm:$0xff] %v11755_v53  ;;  %v11776_v23 = vld [vmem:[%s10699_s17 + $0x108] sm:$0xff]  ;;  %v11779_v53 = vld [vmem:[%s10699_s17 + $0x100] sm:$0xff] }
 0x1ee   : > { %1855 = vrot.lane.b32.xlu1 %v11748_v20, %s10642_s23  ;;  %1853 = vrot.lane.b32.xlu0 %v11751_v24, %s10642_s23 }
 0x1f0   : > { %v11767_v52 = vpop.permute.xlu1 %1535  ;;  %v11769_v14 = vpop.permute.xlu0 %1533 }
 0x1f1   : > { %19309 = vst [vmem:[#allocation185_spill] sm:$0xff] %v11767_v52  ;;  %19310 = vst [vmem:[#allocation186_spill] sm:$0xff] %v11769_v14  ;;  %v11790_v52 = vld [vmem:[%s10699_s17 + $0x118] sm:$0xff]  ;;  %v11793_v14 = vld [vmem:[%s10699_s17 + $0x110] sm:$0xff] }
 0x1f2   : > { %1859 = vrot.lane.b32.xlu1 %v11762_v16, %s10642_s23  ;;  %1857 = vrot.lane.b32.xlu0 %v11765_v19, %s10642_s23 }
 0x1f4   : > { %v11781_v17 = vpop.permute.xlu1 %1539  ;;  %v11783_v28 = vpop.permute.xlu0 %1537 }
 0x1f5   : > { %19311 = vst [vmem:[#allocation187_spill] sm:$0xff] %v11781_v17  ;;  %19312 = vst [vmem:[#allocation188_spill] sm:$0xff] %v11783_v28  ;;  %v11804_v17 = vld [vmem:[%s10699_s17 + $0x128] sm:$0xff]  ;;  %v11807_v28 = vld [vmem:[%s10699_s17 + $0x120] sm:$0xff] }
 0x1f6   : > { %1863 = vrot.lane.b32.xlu1 %v11776_v23, %s10642_s23  ;;  %1861 = vrot.lane.b32.xlu0 %v11779_v53, %s10642_s23 }
 0x1f8   : > { %v11795_v27 = vpop.permute.xlu1 %1543  ;;  %v11797_v44 = vpop.permute.xlu0 %1541 }
 0x1f9   : > { %19313 = vst [vmem:[#allocation189_spill] sm:$0xff] %v11795_v27  ;;  %19314 = vst [vmem:[#allocation190_spill] sm:$0xff] %v11797_v44  ;;  %v11818_v27 = vld [vmem:[%s10699_s17 + $0x138] sm:$0xff]  ;;  %v11821_v44 = vld [vmem:[%s10699_s17 + $0x130] sm:$0xff] }
 0x1fa   : > { %1867 = vrot.lane.b32.xlu1 %v11790_v52, %s10642_s23  ;;  %1865 = vrot.lane.b32.xlu0 %v11793_v14, %s10642_s23 }
 0x1fc   : > { %v11809_v47 = vpop.permute.xlu1 %1547  ;;  %v11811_v62 = vpop.permute.xlu0 %1545 }
 0x1fd   : > { %19315 = vst [vmem:[#allocation191_spill] sm:$0xff] %v11809_v47  ;;  %19316 = vst [vmem:[#allocation192_spill] sm:$0xff] %v11811_v62  ;;  %v11832_v47 = vld [vmem:[%s10699_s17 + $0x148] sm:$0xff]  ;;  %v11835_v62 = vld [vmem:[%s10699_s17 + $0x140] sm:$0xff] }
 0x1fe   : > { %1871 = vrot.lane.b32.xlu1 %v11804_v17, %s10642_s23  ;;  %1869 = vrot.lane.b32.xlu0 %v11807_v28, %s10642_s23 }
 0x200   : > { %v11823_v56 = vpop.permute.xlu1 %1551  ;;  %v11825_v43 = vpop.permute.xlu0 %1549 }
 0x201   : > { %19317 = vst [vmem:[#allocation193_spill] sm:$0xff] %v11823_v56  ;;  %19318 = vst [vmem:[#allocation194_spill] sm:$0xff] %v11825_v43 }
 0x202   : > { %1875 = vrot.lane.b32.xlu1 %v11818_v27, %s10642_s23  ;;  %1873 = vrot.lane.b32.xlu0 %v11821_v44, %s10642_s23 }
 0x204   : > { %v11837_v55 = vpop.permute.xlu1 %1555  ;;  %v11839_v51 = vpop.permute.xlu0 %1553 }
 0x205   : > { %19319 = vst [vmem:[#allocation195_spill] sm:$0xff] %v11837_v55  ;;  %19320 = vst [vmem:[#allocation196_spill] sm:$0xff] %v11839_v51 }
 0x206   : > { %1879 = vrot.lane.b32.xlu1 %v11832_v47, %s10642_s23  ;;  %1877 = vrot.lane.b32.xlu0 %v11835_v62, %s10642_s23 }
 0x208   : > { %v11845_v56 = vpop.permute.xlu1 %1559  ;;  %v11847_v43 = vpop.permute.xlu0 %1557 }
 0x209   : > { %19321 = vst [vmem:[#allocation197_spill] sm:$0xff] %v11845_v56  ;;  %19322 = vst [vmem:[#allocation198_spill] sm:$0xff] %v11847_v43 }
 0x20a   : > { %2091 = vrot.lane.b32.xlu1 %v11552_v36, %s10643_s24  ;;  %2089 = vrot.lane.b32.xlu0 %v11555_v37, %s10643_s24 }
 0x20c   : > { %v11853_v55 = vpop.permute.xlu1 %1563  ;;  %v11855_v51 = vpop.permute.xlu0 %1561 }
 0x20d   : > { %19323 = vst [vmem:[#allocation199_spill] sm:$0xff] %v11853_v55  ;;  %19324 = vst [vmem:[#allocation200_spill] sm:$0xff] %v11855_v51 }
 0x20e   : > { %2095 = vrot.lane.b32.xlu1 %v11566_v39, %s10643_s24  ;;  %2093 = vrot.lane.b32.xlu0 %v11569_v40, %s10643_s24 }
 0x210   : > { %v11861_v56 = vpop.permute.xlu1 %1567  ;;  %v11863_v43 = vpop.permute.xlu0 %1565 }
 0x211   : > { %19325 = vst [vmem:[#allocation201_spill] sm:$0xff] %v11861_v56  ;;  %19326 = vst [vmem:[#allocation202_spill] sm:$0xff] %v11863_v43 }
 0x212   : > { %2099 = vrot.lane.b32.xlu1 %v11580_v9, %s10643_s24  ;;  %2097 = vrot.lane.b32.xlu0 %v11583_v4, %s10643_s24 }
 0x214   : > { %v11869_v45 = vpop.permute.xlu1 %1571  ;;  %v11871_v55 = vpop.permute.xlu0 %1569 }
 0x215   : > { %19327 = vst [vmem:[#allocation203_spill] sm:$0xff] %v11869_v45  ;;  %19328 = vst [vmem:[#allocation204_spill] sm:$0xff] %v11871_v55 }
 0x216   : > { %2103 = vrot.lane.b32.xlu1 %v11594_v5, %s10643_s24  ;;  %2101 = vrot.lane.b32.xlu0 %v11597_v1, %s10643_s24 }
 0x218   : > { %v11877_v51 = vpop.permute.xlu1 %1575  ;;  %v11879_v56 = vpop.permute.xlu0 %1573 }
 0x219   : > { %19329 = vst [vmem:[#allocation205_spill] sm:$0xff] %v11877_v51  ;;  %19330 = vst [vmem:[#allocation206_spill] sm:$0xff] %v11879_v56 }
 0x21a   : > { %2107 = vrot.lane.b32.xlu1 %v11608_v3, %s10643_s24  ;;  %2105 = vrot.lane.b32.xlu0 %v11611_v7, %s10643_s24 }
 0x21c   : > { %v11885_v43 = vpop.permute.xlu1 %1579  ;;  %v11887_v45 = vpop.permute.xlu0 %1577 }
 0x21d   : > { %19331 = vst [vmem:[#allocation207_spill] sm:$0xff] %v11885_v43  ;;  %19332 = vst [vmem:[#allocation208_spill] sm:$0xff] %v11887_v45 }
 0x21e   : > { %2111 = vrot.lane.b32.xlu1 %v11622_v2, %s10643_s24  ;;  %2109 = vrot.lane.b32.xlu0 %v11625_v59, %s10643_s24 }
 0x220   : > { %v11893_v55 = vpop.permute.xlu1 %1583  ;;  %v11895_v51 = vpop.permute.xlu0 %1581 }
 0x221   : > { %19333 = vst [vmem:[#allocation209_spill] sm:$0xff] %v11893_v55  ;;  %19334 = vst [vmem:[#allocation210_spill] sm:$0xff] %v11895_v51 }
 0x222   : > { %2115 = vrot.lane.b32.xlu1 %v11636_v49, %s10643_s24  ;;  %2113 = vrot.lane.b32.xlu0 %v11639_v54, %s10643_s24 }
 0x224   : > { %v11901_v56 = vpop.permute.xlu1 %1587  ;;  %v11903_v43 = vpop.permute.xlu0 %1585 }
 0x225   : > { %19335 = vst [vmem:[#allocation211_spill] sm:$0xff] %v11901_v56  ;;  %19336 = vst [vmem:[#allocation212_spill] sm:$0xff] %v11903_v43 }
 0x226   : > { %2119 = vrot.lane.b32.xlu1 %v11650_v41, %s10643_s24  ;;  %2117 = vrot.lane.b32.xlu0 %v11653_v0, %s10643_s24 }
 0x228   : > { %v11909_v45 = vpop.permute.xlu1 %1799  ;;  %v11911_v55 = vpop.permute.xlu0 %1797 }
 0x229   : > { %19337 = vst [vmem:[#allocation213_spill] sm:$0xff] %v11909_v45  ;;  %19338 = vst [vmem:[#allocation214_spill] sm:$0xff] %v11911_v55 }
 0x22a   : > { %2123 = vrot.lane.b32.xlu1 %v11664_v58, %s10643_s24  ;;  %2121 = vrot.lane.b32.xlu0 %v11667_v38, %s10643_s24 }
 0x22c   : > { %v11917_v51 = vpop.permute.xlu1 %1803  ;;  %v11919_v56 = vpop.permute.xlu0 %1801 }
 0x22d   : > { %19339 = vst [vmem:[#allocation215_spill] sm:$0xff] %v11917_v51  ;;  %19340 = vst [vmem:[#allocation216_spill] sm:$0xff] %v11919_v56 }
 0x22e   : > { %2127 = vrot.lane.b32.xlu1 %v11678_v6, %s10643_s24  ;;  %2125 = vrot.lane.b32.xlu0 %v11681_v34, %s10643_s24 }
 0x230   : > { %v11925_v43 = vpop.permute.xlu1 %1807  ;;  %v11927_v42 = vpop.permute.xlu0 %1805 }
 0x231   : > { %19341 = vst [vmem:[#allocation217_spill] sm:$0xff] %v11925_v43  ;;  %19342 = vst [vmem:[#allocation218_spill] sm:$0xff] %v11927_v42 }
 0x232   : > { %2131 = vrot.lane.b32.xlu1 %v11692_v30, %s10643_s24  ;;  %2129 = vrot.lane.b32.xlu0 %v11695_v33, %s10643_s24 }
 0x234   : > { %v11933_v61 = vpop.permute.xlu1 %1811  ;;  %v11935_v12 = vpop.permute.xlu0 %1809 }
 0x235   : > { %19343 = vst [vmem:[#allocation219_spill] sm:$0xff] %v11933_v61  ;;  %19344 = vst [vmem:[#allocation220_spill] sm:$0xff] %v11935_v12 }
 0x236   : > { %2135 = vrot.lane.b32.xlu1 %v11706_v26, %s10643_s24  ;;  %2133 = vrot.lane.b32.xlu0 %v11709_v29, %s10643_s24 }
 0x238   : > { %v11941_v15 = vpop.permute.xlu1 %1815  ;;  %v11943_v43 = vpop.permute.xlu0 %1813 }
 0x239   : > { %19345 = vst [vmem:[#allocation221_spill] sm:$0xff] %v11941_v15  ;;  %19346 = vst [vmem:[#allocation222_spill] sm:$0xff] %v11943_v43 }
 0x23a   : > { %2139 = vrot.lane.b32.xlu1 %v11720_v22, %s10643_s24  ;;  %2137 = vrot.lane.b32.xlu0 %v11723_v25, %s10643_s24 }
 0x23c   : > { %v11949_v60 = vpop.permute.xlu1 %1819  ;;  %v11951_v61 = vpop.permute.xlu0 %1817 }
 0x23d   : > { %19347 = vst [vmem:[#allocation223_spill] sm:$0xff] %v11949_v60  ;;  %19348 = vst [vmem:[#allocation224_spill] sm:$0xff] %v11951_v61 }
 0x23e   : > { %2143 = vrot.lane.b32.xlu1 %v11734_v18, %s10643_s24  ;;  %2141 = vrot.lane.b32.xlu0 %v11737_v21, %s10643_s24 }
 0x240   : > { %v11957_v12 = vpop.permute.xlu1 %1823  ;;  %v11959_v15 = vpop.permute.xlu0 %1821 }
 0x241   : > { %19349 = vst [vmem:[#allocation225_spill] sm:$0xff] %v11957_v12  ;;  %19350 = vst [vmem:[#allocation226_spill] sm:$0xff] %v11959_v15 }
 0x242   : > { %2147 = vrot.lane.b32.xlu1 %v11748_v20, %s10643_s24  ;;  %2145 = vrot.lane.b32.xlu0 %v11751_v24, %s10643_s24 }
 0x244   : > { %v11965_v43 = vpop.permute.xlu1 %1827  ;;  %v11967_v60 = vpop.permute.xlu0 %1825 }
 0x245   : > { %19351 = vst [vmem:[#allocation227_spill] sm:$0xff] %v11965_v43  ;;  %19352 = vst [vmem:[#allocation228_spill] sm:$0xff] %v11967_v60 }
 0x246   : > { %2151 = vrot.lane.b32.xlu1 %v11762_v16, %s10643_s24  ;;  %2149 = vrot.lane.b32.xlu0 %v11765_v19, %s10643_s24 }
 0x248   : > { %v11973_v61 = vpop.permute.xlu1 %1831  ;;  %v11975_v12 = vpop.permute.xlu0 %1829 }
 0x249   : > { %19353 = vst [vmem:[#allocation229_spill] sm:$0xff] %v11973_v61  ;;  %19354 = vst [vmem:[#allocation230_spill] sm:$0xff] %v11975_v12 }
 0x24a   : > { %2155 = vrot.lane.b32.xlu1 %v11776_v23, %s10643_s24  ;;  %2153 = vrot.lane.b32.xlu0 %v11779_v53, %s10643_s24 }
 0x24c   : > { %v11981_v15 = vpop.permute.xlu1 %1835  ;;  %v11983_v43 = vpop.permute.xlu0 %1833 }
 0x24d   : > { %19355 = vst [vmem:[#allocation231_spill] sm:$0xff] %v11981_v15  ;;  %19356 = vst [vmem:[#allocation232_spill] sm:$0xff] %v11983_v43 }
 0x24e   : > { %2159 = vrot.lane.b32.xlu1 %v11790_v52, %s10643_s24  ;;  %2157 = vrot.lane.b32.xlu0 %v11793_v14, %s10643_s24 }
 0x250   : > { %v11989_v60 = vpop.permute.xlu1 %1839  ;;  %v11991_v61 = vpop.permute.xlu0 %1837 }
 0x251   : > { %19357 = vst [vmem:[#allocation233_spill] sm:$0xff] %v11989_v60  ;;  %19358 = vst [vmem:[#allocation234_spill] sm:$0xff] %v11991_v61 }
 0x252   : > { %2163 = vrot.lane.b32.xlu1 %v11804_v17, %s10643_s24  ;;  %2161 = vrot.lane.b32.xlu0 %v11807_v28, %s10643_s24 }
 0x254   : > { %v11997_v12 = vpop.permute.xlu1 %1843  ;;  %v11999_v15 = vpop.permute.xlu0 %1841 }
 0x255   : > { %19359 = vst [vmem:[#allocation235_spill] sm:$0xff] %v11997_v12  ;;  %19360 = vst [vmem:[#allocation236_spill] sm:$0xff] %v11999_v15 }
 0x256   : > { %2167 = vrot.lane.b32.xlu1 %v11818_v27, %s10643_s24  ;;  %2165 = vrot.lane.b32.xlu0 %v11821_v44, %s10643_s24 }
 0x258   : > { %v12005_v43 = vpop.permute.xlu1 %1847  ;;  %v12007_v60 = vpop.permute.xlu0 %1845 }
 0x259   : > { %19361 = vst [vmem:[#allocation237_spill] sm:$0xff] %v12005_v43  ;;  %19362 = vst [vmem:[#allocation238_spill] sm:$0xff] %v12007_v60 }
 0x25a   : > { %2171 = vrot.lane.b32.xlu1 %v11832_v47, %s10643_s24  ;;  %2169 = vrot.lane.b32.xlu0 %v11835_v62, %s10643_s24 }
 0x25c   : > { %v12013_v61 = vpop.permute.xlu1 %1851  ;;  %v12015_v12 = vpop.permute.xlu0 %1849 }
 0x25d   : > { %19363 = vst [vmem:[#allocation239_spill] sm:$0xff] %v12013_v61  ;;  %19364 = vst [vmem:[#allocation240_spill] sm:$0xff] %v12015_v12 }
 0x25e   : > { %2383 = vrot.lane.b32.xlu1 %v11552_v36, %s10644_s25  ;;  %2381 = vrot.lane.b32.xlu0 %v11555_v37, %s10644_s25 }
 0x260   : > { %v12021_v43 = vpop.permute.xlu1 %1855  ;;  %v12023_v60 = vpop.permute.xlu0 %1853 }
 0x261   : > { %19365 = vst [vmem:[#allocation241_spill] sm:$0xff] %v12021_v43  ;;  %19366 = vst [vmem:[#allocation242_spill] sm:$0xff] %v12023_v60 }
 0x262   : > { %2387 = vrot.lane.b32.xlu1 %v11566_v39, %s10644_s25  ;;  %2385 = vrot.lane.b32.xlu0 %v11569_v40, %s10644_s25 }
 0x264   : > { %v12029_v61 = vpop.permute.xlu1 %1859  ;;  %v12031_v12 = vpop.permute.xlu0 %1857 }
 0x265   : > { %19367 = vst [vmem:[#allocation243_spill] sm:$0xff] %v12029_v61  ;;  %19368 = vst [vmem:[#allocation244_spill] sm:$0xff] %v12031_v12 }
 0x266   : > { %2391 = vrot.lane.b32.xlu1 %v11580_v9, %s10644_s25  ;;  %2389 = vrot.lane.b32.xlu0 %v11583_v4, %s10644_s25 }
 0x268   : > { %v12037_v36 = vpop.permute.xlu1 %1863  ;;  %v12039_v37 = vpop.permute.xlu0 %1861 }
 0x269   : > { %19369 = vst [vmem:[#allocation245_spill] sm:$0xff] %v12037_v36  ;;  %19370 = vst [vmem:[#allocation246_spill] sm:$0xff] %v12039_v37 }
 0x26a   : > { %2395 = vrot.lane.b32.xlu1 %v11594_v5, %s10644_s25  ;;  %2393 = vrot.lane.b32.xlu0 %v11597_v1, %s10644_s25 }
 0x26c   : > { %v12045_v43 = vpop.permute.xlu1 %1867  ;;  %v12047_v61 = vpop.permute.xlu0 %1865 }
 0x26d   : > { %19371 = vst [vmem:[#allocation247_spill] sm:$0xff] %v12045_v43  ;;  %19372 = vst [vmem:[#allocation248_spill] sm:$0xff] %v12047_v61 }
 0x26e   : > { %2399 = vrot.lane.b32.xlu1 %v11608_v3, %s10644_s25  ;;  %2397 = vrot.lane.b32.xlu0 %v11611_v7, %s10644_s25 }
 0x270   : > { %v12053_v12 = vpop.permute.xlu1 %1871  ;;  %v12055_v36 = vpop.permute.xlu0 %1869 }
 0x271   : > { %19373 = vst [vmem:[#allocation249_spill] sm:$0xff] %v12053_v12  ;;  %19374 = vst [vmem:[#allocation250_spill] sm:$0xff] %v12055_v36 }
 0x272   : > { %2403 = vrot.lane.b32.xlu1 %v11622_v2, %s10644_s25  ;;  %2401 = vrot.lane.b32.xlu0 %v11625_v59, %s10644_s25 }
 0x274   : > { %v12061_v37 = vpop.permute.xlu1 %1875  ;;  %v12063_v43 = vpop.permute.xlu0 %1873 }
 0x275   : > { %19375 = vst [vmem:[#allocation251_spill] sm:$0xff] %v12061_v37  ;;  %19376 = vst [vmem:[#allocation252_spill] sm:$0xff] %v12063_v43 }
 0x276   : > { %2407 = vrot.lane.b32.xlu1 %v11636_v49, %s10644_s25  ;;  %2405 = vrot.lane.b32.xlu0 %v11639_v54, %s10644_s25 }
 0x278   : > { %v12069_v61 = vpop.permute.xlu1 %1879  ;;  %v12071_v12 = vpop.permute.xlu0 %1877 }
 0x279   : > { %19377 = vst [vmem:[#allocation253_spill] sm:$0xff] %v12069_v61  ;;  %19378 = vst [vmem:[#allocation254_spill] sm:$0xff] %v12071_v12 }
 0x27a   : > { %2411 = vrot.lane.b32.xlu1 %v11650_v41, %s10644_s25  ;;  %2409 = vrot.lane.b32.xlu0 %v11653_v0, %s10644_s25 }
 0x27c   : > { %v12077_v36 = vpop.permute.xlu1 %2091  ;;  %v12079_v37 = vpop.permute.xlu0 %2089 }
 0x27d   : > { %19379 = vst [vmem:[#allocation255_spill] sm:$0xff] %v12077_v36  ;;  %19380 = vst [vmem:[#allocation256_spill] sm:$0xff] %v12079_v37 }
 0x27e   : > { %2415 = vrot.lane.b32.xlu1 %v11664_v58, %s10644_s25  ;;  %2413 = vrot.lane.b32.xlu0 %v11667_v38, %s10644_s25 }
 0x280   : > { %v12085_v43 = vpop.permute.xlu1 %2095  ;;  %v12087_v61 = vpop.permute.xlu0 %2093 }
 0x281   : > { %19381 = vst [vmem:[#allocation257_spill] sm:$0xff] %v12085_v43  ;;  %19382 = vst [vmem:[#allocation258_spill] sm:$0xff] %v12087_v61 }
 0x282   : > { %2419 = vrot.lane.b32.xlu1 %v11678_v6, %s10644_s25  ;;  %2417 = vrot.lane.b32.xlu0 %v11681_v34, %s10644_s25 }
 0x284   : > { %v12093_v12 = vpop.permute.xlu1 %2099  ;;  %v12095_v60 = vpop.permute.xlu0 %2097 }
 0x285   : > { %19383 = vst [vmem:[#allocation259_spill] sm:$0xff] %v12093_v12  ;;  %19384 = vst [vmem:[#allocation260_spill] sm:$0xff] %v12095_v60 }
 0x286   : > { %2423 = vrot.lane.b32.xlu1 %v11692_v30, %s10644_s25  ;;  %2421 = vrot.lane.b32.xlu0 %v11695_v33, %s10644_s25 }
 0x288   : > { %v12101_v15 = vpop.permute.xlu1 %2103  ;;  %v12103_v63 = vpop.permute.xlu0 %2101 }
 0x289   : > { %19385 = vst [vmem:[#allocation261_spill] sm:$0xff] %v12101_v15  ;;  %19386 = vst [vmem:[#allocation262_spill] sm:$0xff] %v12103_v63 }
 0x28a   : > { %2427 = vrot.lane.b32.xlu1 %v11706_v26, %s10644_s25  ;;  %2425 = vrot.lane.b32.xlu0 %v11709_v29, %s10644_s25 }
 0x28c   : > { %v12109_v48 = vpop.permute.xlu1 %2107  ;;  %v12111_v12 = vpop.permute.xlu0 %2105 }
 0x28d   : > { %19387 = vst [vmem:[#allocation263_spill] sm:$0xff] %v12109_v48  ;;  %19388 = vst [vmem:[#allocation264_spill] sm:$0xff] %v12111_v12 }
 0x28e   : > { %2431 = vrot.lane.b32.xlu1 %v11720_v22, %s10644_s25  ;;  %2429 = vrot.lane.b32.xlu0 %v11723_v25, %s10644_s25 }
 0x290   : > { %v12117_v35 = vpop.permute.xlu1 %2111  ;;  %v12119_v15 = vpop.permute.xlu0 %2109 }
 0x291   : > { %19389 = vst [vmem:[#allocation265_spill] sm:$0xff] %v12117_v35  ;;  %19390 = vst [vmem:[#allocation266_spill] sm:$0xff] %v12119_v15 }
 0x292   : > { %2435 = vrot.lane.b32.xlu1 %v11734_v18, %s10644_s25  ;;  %2433 = vrot.lane.b32.xlu0 %v11737_v21, %s10644_s25 }
 0x294   : > { %v12125_v63 = vpop.permute.xlu1 %2115  ;;  %v12127_v48 = vpop.permute.xlu0 %2113 }
 0x295   : > { %19391 = vst [vmem:[#allocation267_spill] sm:$0xff] %v12125_v63  ;;  %19392 = vst [vmem:[#allocation268_spill] sm:$0xff] %v12127_v48 }
 0x296   : > { %2439 = vrot.lane.b32.xlu1 %v11748_v20, %s10644_s25  ;;  %2437 = vrot.lane.b32.xlu0 %v11751_v24, %s10644_s25 }
 0x298   : > { %v12133_v12 = vpop.permute.xlu1 %2119  ;;  %v12135_v35 = vpop.permute.xlu0 %2117 }
 0x299   : > { %19393 = vst [vmem:[#allocation269_spill] sm:$0xff] %v12133_v12  ;;  %19394 = vst [vmem:[#allocation270_spill] sm:$0xff] %v12135_v35 }
 0x29a   : > { %2443 = vrot.lane.b32.xlu1 %v11762_v16, %s10644_s25  ;;  %2441 = vrot.lane.b32.xlu0 %v11765_v19, %s10644_s25 }
 0x29c   : > { %v12141_v15 = vpop.permute.xlu1 %2123  ;;  %v12143_v63 = vpop.permute.xlu0 %2121 }
 0x29d   : > { %19395 = vst [vmem:[#allocation271_spill] sm:$0xff] %v12141_v15  ;;  %19396 = vst [vmem:[#allocation272_spill] sm:$0xff] %v12143_v63 }
 0x29e   : > { %2447 = vrot.lane.b32.xlu1 %v11776_v23, %s10644_s25  ;;  %2445 = vrot.lane.b32.xlu0 %v11779_v53, %s10644_s25 }
 0x2a0   : > { %v12149_v48 = vpop.permute.xlu1 %2127  ;;  %v12151_v12 = vpop.permute.xlu0 %2125 }
 0x2a1   : > { %19397 = vst [vmem:[#allocation273_spill] sm:$0xff] %v12149_v48  ;;  %19398 = vst [vmem:[#allocation274_spill] sm:$0xff] %v12151_v12 }
 0x2a2   : > { %2451 = vrot.lane.b32.xlu1 %v11790_v52, %s10644_s25  ;;  %2449 = vrot.lane.b32.xlu0 %v11793_v14, %s10644_s25 }
 0x2a4   : > { %v12157_v35 = vpop.permute.xlu1 %2131  ;;  %v12159_v15 = vpop.permute.xlu0 %2129 }
 0x2a5   : > { %19399 = vst [vmem:[#allocation275_spill] sm:$0xff] %v12157_v35  ;;  %19400 = vst [vmem:[#allocation276_spill] sm:$0xff] %v12159_v15 }
 0x2a6   : > { %2455 = vrot.lane.b32.xlu1 %v11804_v17, %s10644_s25  ;;  %2453 = vrot.lane.b32.xlu0 %v11807_v28, %s10644_s25 }
 0x2a8   : > { %v12165_v63 = vpop.permute.xlu1 %2135  ;;  %v12167_v48 = vpop.permute.xlu0 %2133 }
 0x2a9   : > { %19401 = vst [vmem:[#allocation277_spill] sm:$0xff] %v12165_v63  ;;  %19402 = vst [vmem:[#allocation278_spill] sm:$0xff] %v12167_v48 }
 0x2aa   : > { %2459 = vrot.lane.b32.xlu1 %v11818_v27, %s10644_s25  ;;  %2457 = vrot.lane.b32.xlu0 %v11821_v44, %s10644_s25 }
 0x2ac   : > { %v12173_v12 = vpop.permute.xlu1 %2139  ;;  %v12175_v35 = vpop.permute.xlu0 %2137 }
 0x2ad   : > { %19403 = vst [vmem:[#allocation279_spill] sm:$0xff] %v12173_v12  ;;  %19404 = vst [vmem:[#allocation280_spill] sm:$0xff] %v12175_v35 }
 0x2ae   : > { %2463 = vrot.lane.b32.xlu1 %v11832_v47, %s10644_s25  ;;  %2461 = vrot.lane.b32.xlu0 %v11835_v62, %s10644_s25 }
 0x2b0   : > { %v12181_v15 = vpop.permute.xlu1 %2143  ;;  %v12183_v63 = vpop.permute.xlu0 %2141 }
 0x2b1   : > { %19405 = vst [vmem:[#allocation281_spill] sm:$0xff] %v12181_v15  ;;  %19406 = vst [vmem:[#allocation282_spill] sm:$0xff] %v12183_v63 }
 0x2b2   : > { %2675 = vrot.lane.b32.xlu1 %v11566_v39, %s10645_s26  ;;  %2673 = vrot.lane.b32.xlu0 %v11569_v40, %s10645_s26 }
 0x2b4   : > { %v12189_v12 = vpop.permute.xlu1 %2147  ;;  %v12191_v35 = vpop.permute.xlu0 %2145 }
 0x2b5   : > { %19407 = vst [vmem:[#allocation283_spill] sm:$0xff] %v12189_v12  ;;  %19408 = vst [vmem:[#allocation284_spill] sm:$0xff] %v12191_v35 }
 0x2b6   : > { %2679 = vrot.lane.b32.xlu1 %v11580_v9, %s10645_s26  ;;  %2677 = vrot.lane.b32.xlu0 %v11583_v4, %s10645_s26 }
 0x2b8   : > { %v12197_v15 = vpop.permute.xlu1 %2151  ;;  %v12199_v63 = vpop.permute.xlu0 %2149 }
 0x2b9   : > { %19409 = vst [vmem:[#allocation285_spill] sm:$0xff] %v12197_v15  ;;  %19410 = vst [vmem:[#allocation286_spill] sm:$0xff] %v12199_v63 }
 0x2ba   : > { %2683 = vrot.lane.b32.xlu1 %v11594_v5, %s10645_s26  ;;  %2681 = vrot.lane.b32.xlu0 %v11597_v1, %s10645_s26 }
 0x2bc   : > { %v12205_v48 = vpop.permute.xlu1 %2155  ;;  %v12207_v12 = vpop.permute.xlu0 %2153 }
 0x2bd   : > { %19411 = vst [vmem:[#allocation287_spill] sm:$0xff] %v12205_v48  ;;  %19412 = vst [vmem:[#allocation288_spill] sm:$0xff] %v12207_v12 }
 0x2be   : > { %2687 = vrot.lane.b32.xlu1 %v11608_v3, %s10645_s26  ;;  %2685 = vrot.lane.b32.xlu0 %v11611_v7, %s10645_s26 }
 0x2c0   : > { %v12213_v35 = vpop.permute.xlu1 %2159  ;;  %v12215_v15 = vpop.permute.xlu0 %2157 }
 0x2c1   : > { %19413 = vst [vmem:[#allocation289_spill] sm:$0xff] %v12213_v35  ;;  %19414 = vst [vmem:[#allocation290_spill] sm:$0xff] %v12215_v15 }
 0x2c2   : > { %2691 = vrot.lane.b32.xlu1 %v11622_v2, %s10645_s26  ;;  %2689 = vrot.lane.b32.xlu0 %v11625_v59, %s10645_s26 }
 0x2c4   : > { %v12221_v63 = vpop.permute.xlu1 %2163  ;;  %v12223_v48 = vpop.permute.xlu0 %2161 }
 0x2c5   : > { %19415 = vst [vmem:[#allocation291_spill] sm:$0xff] %v12221_v63  ;;  %19416 = vst [vmem:[#allocation292_spill] sm:$0xff] %v12223_v48 }
 0x2c6   : > { %2695 = vrot.lane.b32.xlu1 %v11636_v49, %s10645_s26  ;;  %2693 = vrot.lane.b32.xlu0 %v11639_v54, %s10645_s26 }
 0x2c8   : > { %v12229_v12 = vpop.permute.xlu1 %2167  ;;  %v12231_v35 = vpop.permute.xlu0 %2165 }
 0x2c9   : > { %19417 = vst [vmem:[#allocation293_spill] sm:$0xff] %v12229_v12  ;;  %19418 = vst [vmem:[#allocation294_spill] sm:$0xff] %v12231_v35 }
 0x2ca   : > { %2699 = vrot.lane.b32.xlu1 %v11650_v41, %s10645_s26  ;;  %2697 = vrot.lane.b32.xlu0 %v11653_v0, %s10645_s26 }
 0x2cc   : > { %v12237_v15 = vpop.permute.xlu1 %2171  ;;  %v12239_v63 = vpop.permute.xlu0 %2169 }
 0x2cd   : > { %19419 = vst [vmem:[#allocation295_spill] sm:$0xff] %v12237_v15  ;;  %19420 = vst [vmem:[#allocation296_spill] sm:$0xff] %v12239_v63 }
 0x2ce   : > { %2703 = vrot.lane.b32.xlu1 %v11664_v58, %s10645_s26  ;;  %2701 = vrot.lane.b32.xlu0 %v11667_v38, %s10645_s26 }
 0x2d0   : > { %v12245_v48 = vpop.permute.xlu1 %2383  ;;  %v12247_v12 = vpop.permute.xlu0 %2381 }
 0x2d1   : > { %19421 = vst [vmem:[#allocation297_spill] sm:$0xff] %v12245_v48  ;;  %19422 = vst [vmem:[#allocation298_spill] sm:$0xff] %v12247_v12 }
 0x2d2   : > { %2707 = vrot.lane.b32.xlu1 %v11678_v6, %s10645_s26  ;;  %2705 = vrot.lane.b32.xlu0 %v11681_v34, %s10645_s26 }
 0x2d4   : > { %v12253_v35 = vpop.permute.xlu1 %2387  ;;  %v12255_v15 = vpop.permute.xlu0 %2385 }
 0x2d5   : > { %19423 = vst [vmem:[#allocation299_spill] sm:$0xff] %v12253_v35  ;;  %19424 = vst [vmem:[#allocation300_spill] sm:$0xff] %v12255_v15 }
 0x2d6   : > { %2711 = vrot.lane.b32.xlu1 %v11692_v30, %s10645_s26  ;;  %2709 = vrot.lane.b32.xlu0 %v11695_v33, %s10645_s26 }
 0x2d8   : > { %v12261_v63 = vpop.permute.xlu1 %2391  ;;  %v12263_v31 = vpop.permute.xlu0 %2389 }
 0x2d9   : > { %19425 = vst [vmem:[#allocation301_spill] sm:$0xff] %v12261_v63  ;;  %19426 = vst [vmem:[#allocation302_spill] sm:$0xff] %v12263_v31 }
 0x2da   : > { %2715 = vrot.lane.b32.xlu1 %v11706_v26, %s10645_s26  ;;  %2713 = vrot.lane.b32.xlu0 %v11709_v29, %s10645_s26 }
 0x2dc   : > { %v12269_v57 = vpop.permute.xlu1 %2395  ;;  %v12271_v50 = vpop.permute.xlu0 %2393 }
 0x2dd   : > { %19427 = vst [vmem:[#allocation303_spill] sm:$0xff] %v12269_v57  ;;  %19428 = vst [vmem:[#allocation304_spill] sm:$0xff] %v12271_v50 }
 0x2de   : > { %2719 = vrot.lane.b32.xlu1 %v11720_v22, %s10645_s26  ;;  %2717 = vrot.lane.b32.xlu0 %v11723_v25, %s10645_s26 }
 0x2e0   : > { %v12277_v11 = vpop.permute.xlu1 %2399  ;;  %v12279_v63 = vpop.permute.xlu0 %2397 }
 0x2e1   : > { %19429 = vst [vmem:[#allocation305_spill] sm:$0xff] %v12277_v11  ;;  %19430 = vst [vmem:[#allocation306_spill] sm:$0xff] %v12279_v63 }
 0x2e2   : > { %2723 = vrot.lane.b32.xlu1 %v11734_v18, %s10645_s26  ;;  %2721 = vrot.lane.b32.xlu0 %v11737_v21, %s10645_s26 }
 0x2e4   : > { %v12285_v51 = vpop.permute.xlu1 %2403  ;;  %v12287_v57 = vpop.permute.xlu0 %2401 }
 0x2e5   : > { %19431 = vst [vmem:[#allocation307_spill] sm:$0xff] %v12285_v51  ;;  %19432 = vst [vmem:[#allocation308_spill] sm:$0xff] %v12287_v57 }
 0x2e6   : > { %2727 = vrot.lane.b32.xlu1 %v11748_v20, %s10645_s26  ;;  %2725 = vrot.lane.b32.xlu0 %v11751_v24, %s10645_s26 }
 0x2e8   : > { %v12293_v50 = vpop.permute.xlu1 %2407  ;;  %v12295_v11 = vpop.permute.xlu0 %2405 }
 0x2e9   : > { %19433 = vst [vmem:[#allocation309_spill] sm:$0xff] %v12293_v50  ;;  %19434 = vst [vmem:[#allocation310_spill] sm:$0xff] %v12295_v11 }
 0x2ea   : > { %2731 = vrot.lane.b32.xlu1 %v11762_v16, %s10645_s26  ;;  %2729 = vrot.lane.b32.xlu0 %v11765_v19, %s10645_s26 }
 0x2ec   : > { %v12301_v63 = vpop.permute.xlu1 %2411  ;;  %v12303_v51 = vpop.permute.xlu0 %2409 }
 0x2ed   : > { %19435 = vst [vmem:[#allocation311_spill] sm:$0xff] %v12301_v63  ;;  %19436 = vst [vmem:[#allocation312_spill] sm:$0xff] %v12303_v51 }
 0x2ee   : > { %2735 = vrot.lane.b32.xlu1 %v11776_v23, %s10645_s26  ;;  %2733 = vrot.lane.b32.xlu0 %v11779_v53, %s10645_s26 }
 0x2f0   : > { %v12309_v57 = vpop.permute.xlu1 %2415  ;;  %v12311_v50 = vpop.permute.xlu0 %2413 }
 0x2f1   : > { %19437 = vst [vmem:[#allocation313_spill] sm:$0xff] %v12309_v57  ;;  %19438 = vst [vmem:[#allocation314_spill] sm:$0xff] %v12311_v50 }
 0x2f2   : > { %2739 = vrot.lane.b32.xlu1 %v11790_v52, %s10645_s26  ;;  %2737 = vrot.lane.b32.xlu0 %v11793_v14, %s10645_s26 }
 0x2f4   : > { %v12317_v63 = vpop.permute.xlu1 %2419  ;;  %v12319_v51 = vpop.permute.xlu0 %2417 }
 0x2f5   : > { %19439 = vst [vmem:[#allocation315_spill] sm:$0xff] %v12317_v63  ;;  %19440 = vst [vmem:[#allocation316_spill] sm:$0xff] %v12319_v51  ;;  %v12342_v51 = vld [vmem:[%s10699_s17 + $0x158] sm:$0xff] }
 0x2f6   : > { %2743 = vrot.lane.b32.xlu1 %v11804_v17, %s10645_s26  ;;  %2741 = vrot.lane.b32.xlu0 %v11807_v28, %s10645_s26 }
 0x2f8   : > { %v12325_v57 = vpop.permute.xlu1 %2423  ;;  %v12327_v50 = vpop.permute.xlu0 %2421 }
 0x2f9   : > { %19441 = vst [vmem:[#allocation317_spill] sm:$0xff] %v12325_v57  ;;  %19442 = vst [vmem:[#allocation318_spill] sm:$0xff] %v12327_v50  ;;  %v12345_v57 = vld [vmem:[%s10699_s17 + $0x150] sm:$0xff] }
 0x2fa   : > { %2747 = vrot.lane.b32.xlu1 %v11818_v27, %s10645_s26  ;;  %2745 = vrot.lane.b32.xlu0 %v11821_v44, %s10645_s26 }
 0x2fc   : > { %v12333_v11 = vpop.permute.xlu1 %2427  ;;  %v12335_v63 = vpop.permute.xlu0 %2425 }
 0x2fd   : > { %19443 = vst [vmem:[#allocation319_spill] sm:$0xff] %v12333_v11  ;;  %19444 = vst [vmem:[#allocation320_spill] sm:$0xff] %v12335_v63 }
 0x2fe   : > { %2751 = vrot.lane.b32.xlu1 %v11832_v47, %s10645_s26  ;;  %2749 = vrot.lane.b32.xlu0 %v11835_v62, %s10645_s26 }
 0x300   : > { %v12347_v50 = vpop.permute.xlu1 %2431  ;;  %v12349_v42 = vpop.permute.xlu0 %2429 }
 0x301   : > { %19445 = vst [vmem:[#allocation321_spill] sm:$0xff] %v12347_v50  ;;  %19446 = vst [vmem:[#allocation322_spill] sm:$0xff] %v12349_v42 }
 0x302   : > { %2755 = vrot.lane.b32.xlu1 %v12342_v51, %s10645_s26  ;;  %2753 = vrot.lane.b32.xlu0 %v12345_v57, %s10645_s26 }
 0x304   : > { %v12355_v11 = vpop.permute.xlu1 %2435  ;;  %v12357_v63 = vpop.permute.xlu0 %2433 }
 0x305   : > { %19447 = vst [vmem:[#allocation323_spill] sm:$0xff] %v12355_v11  ;;  %19448 = vst [vmem:[#allocation324_spill] sm:$0xff] %v12357_v63 }
 0x306   : > { %2967 = vrot.lane.b32.xlu1 %v11566_v39, %s10646_s27  ;;  %2965 = vrot.lane.b32.xlu0 %v11569_v40, %s10646_s27 }
 0x308   : > { %v12363_v50 = vpop.permute.xlu1 %2439  ;;  %v12365_v42 = vpop.permute.xlu0 %2437 }
 0x309   : > { %19449 = vst [vmem:[#allocation325_spill] sm:$0xff] %v12363_v50  ;;  %19450 = vst [vmem:[#allocation326_spill] sm:$0xff] %v12365_v42 }
 0x30a   : > { %2971 = vrot.lane.b32.xlu1 %v11580_v9, %s10646_s27  ;;  %2969 = vrot.lane.b32.xlu0 %v11583_v4, %s10646_s27 }
 0x30c   : > { %v12371_v11 = vpop.permute.xlu1 %2443  ;;  %v12373_v63 = vpop.permute.xlu0 %2441 }
 0x30d   : > { %19451 = vst [vmem:[#allocation327_spill] sm:$0xff] %v12371_v11  ;;  %19452 = vst [vmem:[#allocation328_spill] sm:$0xff] %v12373_v63  ;;  %v12569_v11 = vld [vmem:[%s10699_s17 + $0x40] sm:$0xff]  ;;  %v12583_v63 = vld [vmem:[%s10699_s17 + $0x50] sm:$0xff] }
 0x30e   : > { %2975 = vrot.lane.b32.xlu1 %v11594_v5, %s10646_s27  ;;  %2973 = vrot.lane.b32.xlu0 %v11597_v1, %s10646_s27 }
 0x310   : > { %v12379_v39 = vpop.permute.xlu1 %2447  ;;  %v12381_v40 = vpop.permute.xlu0 %2445 }
 0x311   : > { %19453 = vst [vmem:[#allocation329_spill] sm:$0xff] %v12379_v39  ;;  %19454 = vst [vmem:[#allocation330_spill] sm:$0xff] %v12381_v40 }
 0x312   : > { %2979 = vrot.lane.b32.xlu1 %v11608_v3, %s10646_s27  ;;  %2977 = vrot.lane.b32.xlu0 %v11611_v7, %s10646_s27 }
 0x314   : > { %v12387_v4 = vpop.permute.xlu1 %2451  ;;  %v12389_v9 = vpop.permute.xlu0 %2449 }
 0x315   : > { %19455 = vst [vmem:[#allocation331_spill] sm:$0xff] %v12387_v4  ;;  %19456 = vst [vmem:[#allocation332_spill] sm:$0xff] %v12389_v9  ;;  %v12555_v4 = vld [vmem:[%s10699_s17 + $0x30] sm:$0xff]  ;;  %v12566_v9 = vld [vmem:[%s10699_s17 + $0x48] sm:$0xff] }
 0x316   : > { %2983 = vrot.lane.b32.xlu1 %v11622_v2, %s10646_s27  ;;  %2981 = vrot.lane.b32.xlu0 %v11625_v59, %s10646_s27 }
 0x318   : > { %v12395_v1 = vpop.permute.xlu1 %2455  ;;  %v12397_v5 = vpop.permute.xlu0 %2453 }
 0x319   : > { %19457 = vst [vmem:[#allocation333_spill] sm:$0xff] %v12395_v1  ;;  %19458 = vst [vmem:[#allocation334_spill] sm:$0xff] %v12397_v5 }
 0x31a   : > { %2987 = vrot.lane.b32.xlu1 %v11636_v49, %s10646_s27  ;;  %2985 = vrot.lane.b32.xlu0 %v11639_v54, %s10646_s27 }
 0x31c   : > { %v12403_v3 = vpop.permute.xlu1 %2459  ;;  %v12405_v7 = vpop.permute.xlu0 %2457 }
 0x31d   : > { %19459 = vst [vmem:[#allocation335_spill] sm:$0xff] %v12403_v3  ;;  %19460 = vst [vmem:[#allocation336_spill] sm:$0xff] %v12405_v7  ;;  %v12541_v3 = vld [vmem:[%s10699_s17 + $0x20] sm:$0xff]  ;;  %v12552_v7 = vld [vmem:[%s10699_s17 + $0x38] sm:$0xff] }
 0x31e   : > { %2991 = vrot.lane.b32.xlu1 %v11650_v41, %s10646_s27  ;;  %2989 = vrot.lane.b32.xlu0 %v11653_v0, %s10646_s27 }
 0x320   : > { %v12411_v59 = vpop.permute.xlu1 %2463  ;;  %v12413_v2 = vpop.permute.xlu0 %2461 }
 0x321   : > { %19461 = vst [vmem:[#allocation337_spill] sm:$0xff] %v12411_v59  ;;  %19462 = vst [vmem:[#allocation338_spill] sm:$0xff] %v12413_v2 }
 0x322   : > { %2995 = vrot.lane.b32.xlu1 %v11664_v58, %s10646_s27  ;;  %2993 = vrot.lane.b32.xlu0 %v11667_v38, %s10646_s27 }
 0x324   : > { %v12419_v49 = vpop.permute.xlu1 %2675  ;;  %v12421_v54 = vpop.permute.xlu0 %2673 }
 0x325   : > { %19463 = vst [vmem:[#allocation339_spill] sm:$0xff] %v12421_v54 }
 0x326   : > { %2999 = vrot.lane.b32.xlu1 %v11678_v6, %s10646_s27  ;;  %2997 = vrot.lane.b32.xlu0 %v11681_v34, %s10646_s27 }
 0x328   : > { %v12427_v0 = vpop.permute.xlu1 %2679  ;;  %v12429_v41 = vpop.permute.xlu0 %2677 }
 0x329   : > { %19464 = vst [vmem:[#allocation340_spill] sm:$0xff] %v12427_v0 }
 0x32a   : > { %3003 = vrot.lane.b32.xlu1 %v11692_v30, %s10646_s27  ;;  %3001 = vrot.lane.b32.xlu0 %v11695_v33, %s10646_s27 }
 0x32c   : > { %v12435_v58 = vpop.permute.xlu1 %2683  ;;  %v12437_v38 = vpop.permute.xlu0 %2681 }
 0x32d   : > { %19465 = vst [vmem:[#allocation341_spill] sm:$0xff] %v12435_v58  ;;  %19466 = vst [vmem:[#allocation342_spill] sm:$0xff] %v12437_v38 }
 0x32e   : > { %3007 = vrot.lane.b32.xlu1 %v11706_v26, %s10646_s27  ;;  %3005 = vrot.lane.b32.xlu0 %v11709_v29, %s10646_s27 }
 0x330   : > { %v12443_v6 = vpop.permute.xlu1 %2687  ;;  %v12445_v34 = vpop.permute.xlu0 %2685 }
 0x331   : > { %19467 = vst [vmem:[#allocation343_spill] sm:$0xff] %v12443_v6  ;;  %19468 = vst [vmem:[#allocation344_spill] sm:$0xff] %v12445_v34 }
 0x332   : > { %3011 = vrot.lane.b32.xlu1 %v11720_v22, %s10646_s27  ;;  %3009 = vrot.lane.b32.xlu0 %v11723_v25, %s10646_s27 }
 0x334   : > { %v12451_v30 = vpop.permute.xlu1 %2691  ;;  %v12453_v33 = vpop.permute.xlu0 %2689 }
 0x335   : > { %19469 = vst [vmem:[#allocation345_spill] sm:$0xff] %v12451_v30  ;;  %19470 = vst [vmem:[#allocation346_spill] sm:$0xff] %v12453_v33  ;;  %v12695_v30 = vld [vmem:[%s10699_s17 + $0xd0] sm:$0xff]  ;;  %v12706_v33 = vld [vmem:[%s10699_s17 + $0xe8] sm:$0xff] }
 0x336   : > { %3015 = vrot.lane.b32.xlu1 %v11734_v18, %s10646_s27  ;;  %3013 = vrot.lane.b32.xlu0 %v11737_v21, %s10646_s27 }
 0x338   : > { %v12459_v26 = vpop.permute.xlu1 %2695  ;;  %v12461_v29 = vpop.permute.xlu0 %2693 }
 0x339   : > { %19471 = vst [vmem:[#allocation347_spill] sm:$0xff] %v12459_v26  ;;  %19472 = vst [vmem:[#allocation348_spill] sm:$0xff] %v12461_v29 }
 0x33a   : > { %3019 = vrot.lane.b32.xlu1 %v11748_v20, %s10646_s27  ;;  %3017 = vrot.lane.b32.xlu0 %v11751_v24, %s10646_s27 }
 0x33c   : > { %v12467_v22 = vpop.permute.xlu1 %2699  ;;  %v12469_v25 = vpop.permute.xlu0 %2697 }
 0x33d   : > { %19473 = vst [vmem:[#allocation349_spill] sm:$0xff] %v12467_v22  ;;  %19474 = vst [vmem:[#allocation350_spill] sm:$0xff] %v12469_v25  ;;  %v12681_v22 = vld [vmem:[%s10699_s17 + $0xc0] sm:$0xff]  ;;  %v12692_v25 = vld [vmem:[%s10699_s17 + $0xd8] sm:$0xff] }
 0x33e   : > { %3023 = vrot.lane.b32.xlu1 %v11762_v16, %s10646_s27  ;;  %3021 = vrot.lane.b32.xlu0 %v11765_v19, %s10646_s27 }
 0x340   : > { %v12475_v18 = vpop.permute.xlu1 %2703  ;;  %v12477_v21 = vpop.permute.xlu0 %2701 }
 0x341   : > { %19475 = vst [vmem:[#allocation351_spill] sm:$0xff] %v12475_v18  ;;  %19476 = vst [vmem:[#allocation352_spill] sm:$0xff] %v12477_v21 }
 0x342   : > { %3027 = vrot.lane.b32.xlu1 %v11776_v23, %s10646_s27  ;;  %3025 = vrot.lane.b32.xlu0 %v11779_v53, %s10646_s27 }
 0x344   : > { %v12483_v20 = vpop.permute.xlu1 %2707  ;;  %v12485_v24 = vpop.permute.xlu0 %2705 }
 0x345   : > { %19477 = vst [vmem:[#allocation353_spill] sm:$0xff] %v12483_v20  ;;  %19478 = vst [vmem:[#allocation354_spill] sm:$0xff] %v12485_v24  ;;  %v12667_v20 = vld [vmem:[%s10699_s17 + $0xb0] sm:$0xff]  ;;  %v12678_v24 = vld [vmem:[%s10699_s17 + $0xc8] sm:$0xff] }
 0x346   : > { %3031 = vrot.lane.b32.xlu1 %v11790_v52, %s10646_s27  ;;  %3029 = vrot.lane.b32.xlu0 %v11793_v14, %s10646_s27 }
 0x348   : > { %v12491_v16 = vpop.permute.xlu1 %2711  ;;  %v12493_v19 = vpop.permute.xlu0 %2709 }
 0x349   : > { %19479 = vst [vmem:[#allocation355_spill] sm:$0xff] %v12491_v16  ;;  %19480 = vst [vmem:[#allocation356_spill] sm:$0xff] %v12493_v19 }
 0x34a   : > { %3035 = vrot.lane.b32.xlu1 %v11804_v17, %s10646_s27  ;;  %3033 = vrot.lane.b32.xlu0 %v11807_v28, %s10646_s27 }
 0x34c   : > { %v12499_v53 = vpop.permute.xlu1 %2715  ;;  %v12501_v23 = vpop.permute.xlu0 %2713 }
 0x34d   : > { %19481 = vst [vmem:[#allocation357_spill] sm:$0xff] %v12499_v53  ;;  %19482 = vst [vmem:[#allocation358_spill] sm:$0xff] %v12501_v23  ;;  %v12664_v23 = vld [vmem:[%s10699_s17 + $0xb8] sm:$0xff] }
 0x34e   : > { %3039 = vrot.lane.b32.xlu1 %v11818_v27, %s10646_s27  ;;  %3037 = vrot.lane.b32.xlu0 %v11821_v44, %s10646_s27  ;;  %v12524_v44 = vld [vmem:[%s10699_s17 + $0x18] sm:$0xff]  ;;  %v12527_v27 = vld [vmem:[%s10699_s17 + $0x10] sm:$0xff] }
 0x350   : > { %v12507_v52 = vpop.permute.xlu1 %2719  ;;  %v12509_v14 = vpop.permute.xlu0 %2717 }
 0x351   : > { %19483 = vst [vmem:[#allocation359_spill] sm:$0xff] %v12507_v52  ;;  %19484 = vst [vmem:[#allocation360_spill] sm:$0xff] %v12509_v14 }
 0x352   : > { %3043 = vrot.lane.b32.xlu1 %v11832_v47, %s10646_s27  ;;  %3041 = vrot.lane.b32.xlu0 %v11835_v62, %s10646_s27  ;;  %v12538_v62 = vld [vmem:[%s10699_s17 + $0x28] sm:$0xff] }
 0x354   : > { %v12515_v17 = vpop.permute.xlu1 %2723  ;;  %v12517_v28 = vpop.permute.xlu0 %2721 }
 0x355   : > { %19485 = vst [vmem:[#allocation361_spill] sm:$0xff] %v12515_v17  ;;  %19486 = vst [vmem:[#allocation362_spill] sm:$0xff] %v12517_v28 }
 0x356   : > { %3047 = vrot.lane.b32.xlu1 %v12342_v51, %s10646_s27  ;;  %3045 = vrot.lane.b32.xlu0 %v12345_v57, %s10646_s27 }
 0x358   : > { %v12529_v47 = vpop.permute.xlu1 %2727  ;;  %v12531_v59 = vpop.permute.xlu0 %2725 }
 0x359   : > { %19487 = vst [vmem:[#allocation363_spill] sm:$0xff] %v12529_v47  ;;  %19488 = vst [vmem:[#allocation364_spill] sm:$0xff] %v12531_v59 }
 0x35a   : > { %3259 = vrot.lane.b32.xlu1 %v12524_v44, %s10647_s28  ;;  %3257 = vrot.lane.b32.xlu0 %v12527_v27, %s10647_s28 }
 0x35c   : > { %v12543_v2 = vpop.permute.xlu1 %2731  ;;  %v12545_v1 = vpop.permute.xlu0 %2729 }
 0x35d   : > { %19489 = vst [vmem:[#allocation365_spill] sm:$0xff] %v12543_v2  ;;  %19490 = vst [vmem:[#allocation366_spill] sm:$0xff] %v12545_v1 }
 0x35e   : > { %3263 = vrot.lane.b32.xlu1 %v12538_v62, %s10647_s28  ;;  %3261 = vrot.lane.b32.xlu0 %v12541_v3, %s10647_s28 }
 0x360   : > { %v12557_v5 = vpop.permute.xlu1 %2735  ;;  %v12559_v39 = vpop.permute.xlu0 %2733 }
 0x361   : > { %19491 = vst [vmem:[#allocation367_spill] sm:$0xff] %v12557_v5  ;;  %19492 = vst [vmem:[#allocation368_spill] sm:$0xff] %v12559_v39  ;;  %v12580_v5 = vld [vmem:[%s10699_s17 + $0x58] sm:$0xff] }
 0x362   : > { %3267 = vrot.lane.b32.xlu1 %v12552_v7, %s10647_s28  ;;  %3265 = vrot.lane.b32.xlu0 %v12555_v4, %s10647_s28 }
 0x364   : > { %v12571_v40 = vpop.permute.xlu1 %2739  ;;  %v12573_v50 = vpop.permute.xlu0 %2737 }
 0x365   : > { %19493 = vst [vmem:[#allocation369_spill] sm:$0xff] %v12571_v40  ;;  %19494 = vst [vmem:[#allocation370_spill] sm:$0xff] %v12573_v50  ;;  %v12594_v40 = vld [vmem:[%s10699_s17 + $0x68] sm:$0xff]  ;;  %v12597_v50 = vld [vmem:[%s10699_s17 + $0x60] sm:$0xff] }
 0x366   : > { %3271 = vrot.lane.b32.xlu1 %v12566_v9, %s10647_s28  ;;  %3269 = vrot.lane.b32.xlu0 %v12569_v11, %s10647_s28 }
 0x368   : > { %v12585_v2 = vpop.permute.xlu1 %2743  ;;  %v12587_v39 = vpop.permute.xlu0 %2741 }
 0x369   : > { %19495 = vst [vmem:[#allocation371_spill] sm:$0xff] %v12585_v2  ;;  %19496 = vst [vmem:[#allocation372_spill] sm:$0xff] %v12587_v39  ;;  %v12608_v2 = vld [vmem:[%s10699_s17 + $0x78] sm:$0xff]  ;;  %v12611_v39 = vld [vmem:[%s10699_s17 + $0x70] sm:$0xff] }
 0x36a   : > { %3275 = vrot.lane.b32.xlu1 %v12580_v5, %s10647_s28  ;;  %3273 = vrot.lane.b32.xlu0 %v12583_v63, %s10647_s28 }
 0x36c   : > { %v12599_v42 = vpop.permute.xlu1 %2747  ;;  %v12601_v47 = vpop.permute.xlu0 %2745 }
 0x36d   : > { %19497 = vst [vmem:[#allocation373_spill] sm:$0xff] %v12599_v42  ;;  %19498 = vst [vmem:[#allocation374_spill] sm:$0xff] %v12601_v47  ;;  %v12622_v42 = vld [vmem:[%s10699_s17 + $0x88] sm:$0xff]  ;;  %v12625_v47 = vld [vmem:[%s10699_s17 + $0x80] sm:$0xff] }
 0x36e   : > { %3279 = vrot.lane.b32.xlu1 %v12594_v40, %s10647_s28  ;;  %3277 = vrot.lane.b32.xlu0 %v12597_v50, %s10647_s28 }
 0x370   : > { %v12613_v1 = vpop.permute.xlu1 %2751  ;;  %v12615_v17 = vpop.permute.xlu0 %2749 }
 0x371   : > { %19499 = vst [vmem:[#allocation375_spill] sm:$0xff] %v12613_v1  ;;  %19500 = vst [vmem:[#allocation376_spill] sm:$0xff] %v12615_v17  ;;  %v12636_v1 = vld [vmem:[%s10699_s17 + $0x98] sm:$0xff]  ;;  %v12639_v17 = vld [vmem:[%s10699_s17 + $0x90] sm:$0xff] }
 0x372   : > { %3283 = vrot.lane.b32.xlu1 %v12608_v2, %s10647_s28  ;;  %3281 = vrot.lane.b32.xlu0 %v12611_v39, %s10647_s28 }
 0x374   : > { %v12627_v59 = vpop.permute.xlu1 %2755  ;;  %v12629_v52 = vpop.permute.xlu0 %2753 }
 0x375   : > { %19501 = vst [vmem:[#allocation377_spill] sm:$0xff] %v12627_v59  ;;  %19502 = vst [vmem:[#allocation378_spill] sm:$0xff] %v12629_v52  ;;  %v12650_v59 = vld [vmem:[%s10699_s17 + $0xa8] sm:$0xff]  ;;  %v12653_v52 = vld [vmem:[%s10699_s17 + $0xa0] sm:$0xff] }
 0x376   : > { %3287 = vrot.lane.b32.xlu1 %v12622_v42, %s10647_s28  ;;  %3285 = vrot.lane.b32.xlu0 %v12625_v47, %s10647_s28 }
 0x378   : > { %v12641_v28 = vpop.permute.xlu1 %2967  ;;  %v12643_v53 = vpop.permute.xlu0 %2965 }
 0x37a   : > { %3291 = vrot.lane.b32.xlu1 %v12636_v1, %s10647_s28  ;;  %3289 = vrot.lane.b32.xlu0 %v12639_v17, %s10647_s28 }
 0x37c   : > { %v12655_v14 = vpop.permute.xlu1 %2971  ;;  %v12657_v16 = vpop.permute.xlu0 %2969 }
 0x37d   : > { %19503 = vst [vmem:[#allocation379_spill] sm:$0xff] %v12655_v14 }
 0x37e   : > { %3295 = vrot.lane.b32.xlu1 %v12650_v59, %s10647_s28  ;;  %3293 = vrot.lane.b32.xlu0 %v12653_v52, %s10647_s28 }
 0x380   : > { %v12669_v19 = vpop.permute.xlu1 %2975  ;;  %v12671_v18 = vpop.permute.xlu0 %2973 }
 0x381   : > { %19504 = vst [vmem:[#allocation380_spill] sm:$0xff] %v12669_v19  ;;  %19505 = vst [vmem:[#allocation381_spill] sm:$0xff] %v12671_v18 }
 0x382   : > { %3299 = vrot.lane.b32.xlu1 %v12664_v23, %s10647_s28  ;;  %3297 = vrot.lane.b32.xlu0 %v12667_v20, %s10647_s28 }
 0x384   : > { %v12683_v21 = vpop.permute.xlu1 %2979  ;;  %v12685_v26 = vpop.permute.xlu0 %2977 }
 0x385   : > { %19506 = vst [vmem:[#allocation382_spill] sm:$0xff] %v12683_v21  ;;  %19507 = vst [vmem:[#allocation383_spill] sm:$0xff] %v12685_v26  ;;  %v12709_v21 = vld [vmem:[%s10699_s17 + $0xe0] sm:$0xff] }
 0x386   : > { %3303 = vrot.lane.b32.xlu1 %v12678_v24, %s10647_s28  ;;  %3301 = vrot.lane.b32.xlu0 %v12681_v22, %s10647_s28 }
 0x388   : > { %v12697_v29 = vpop.permute.xlu1 %2983  ;;  %v12699_v6 = vpop.permute.xlu0 %2981 }
 0x389   : > { %19508 = vst [vmem:[#allocation384_spill] sm:$0xff] %v12697_v29  ;;  %19509 = vst [vmem:[#allocation385_spill] sm:$0xff] %v12699_v6  ;;  %v12720_v29 = vld [vmem:[%s10699_s17 + $0xf8] sm:$0xff]  ;;  %v12723_v6 = vld [vmem:[%s10699_s17 + $0xf0] sm:$0xff] }
 0x38a   : > { %3307 = vrot.lane.b32.xlu1 %v12692_v25, %s10647_s28  ;;  %3305 = vrot.lane.b32.xlu0 %v12695_v30, %s10647_s28 }
 0x38c   : > { %v12711_v58 = vpop.permute.xlu1 %2987  ;;  %v12713_v34 = vpop.permute.xlu0 %2985 }
 0x38d   : > { %19510 = vst [vmem:[#allocation386_spill] sm:$0xff] %v12711_v58  ;;  %19511 = vst [vmem:[#allocation387_spill] sm:$0xff] %v12713_v34  ;;  %v12734_v58 = vld [vmem:[%s10699_s17 + $0x108] sm:$0xff]  ;;  %v12737_v34 = vld [vmem:[%s10699_s17 + $0x100] sm:$0xff] }
 0x38e   : > { %3311 = vrot.lane.b32.xlu1 %v12706_v33, %s10647_s28  ;;  %3309 = vrot.lane.b32.xlu0 %v12709_v21, %s10647_s28 }
 0x390   : > { %v12725_v19 = vpop.permute.xlu1 %2991  ;;  %v12727_v26 = vpop.permute.xlu0 %2989 }
 0x391   : > { %19512 = vst [vmem:[#allocation388_spill] sm:$0xff] %v12725_v19  ;;  %19513 = vst [vmem:[#allocation389_spill] sm:$0xff] %v12727_v26  ;;  %v12748_v19 = vld [vmem:[%s10699_s17 + $0x118] sm:$0xff]  ;;  %v12751_v26 = vld [vmem:[%s10699_s17 + $0x110] sm:$0xff] }
 0x392   : > { %3315 = vrot.lane.b32.xlu1 %v12720_v29, %s10647_s28  ;;  %3313 = vrot.lane.b32.xlu0 %v12723_v6, %s10647_s28 }
 0x394   : > { %v12739_v10 = vpop.permute.xlu1 %2995  ;;  %v12741_v13 = vpop.permute.xlu0 %2993 }
 0x395   : > { %19514 = vst [vmem:[#allocation390_spill] sm:$0xff] %v12739_v10  ;;  %19515 = vst [vmem:[#allocation391_spill] sm:$0xff] %v12741_v13  ;;  %v12762_v10 = vld [vmem:[%s10699_s17 + $0x128] sm:$0xff]  ;;  %v12765_v13 = vld [vmem:[%s10699_s17 + $0x120] sm:$0xff] }
 0x396   : > { %3319 = vrot.lane.b32.xlu1 %v12734_v58, %s10647_s28  ;;  %3317 = vrot.lane.b32.xlu0 %v12737_v34, %s10647_s28 }
 0x398   : > { %v12753_v32 = vpop.permute.xlu1 %2999  ;;  %v12755_v43 = vpop.permute.xlu0 %2997 }
 0x399   : > { %19516 = vst [vmem:[#allocation392_spill] sm:$0xff] %v12753_v32  ;;  %19517 = vst [vmem:[#allocation393_spill] sm:$0xff] %v12755_v43  ;;  %v12776_v32 = vld [vmem:[%s10699_s17 + $0x138] sm:$0xff]  ;;  %v12779_v43 = vld [vmem:[%s10699_s17 + $0x130] sm:$0xff] }
 0x39a   : > { %3323 = vrot.lane.b32.xlu1 %v12748_v19, %s10647_s28  ;;  %3321 = vrot.lane.b32.xlu0 %v12751_v26, %s10647_s28 }
 0x39c   : > { %v12767_v60 = vpop.permute.xlu1 %3003  ;;  %v12769_v8 = vpop.permute.xlu0 %3001 }
 0x39d   : > { %19518 = vst [vmem:[#allocation394_spill] sm:$0xff] %v12767_v60  ;;  %19519 = vst [vmem:[#allocation395_spill] sm:$0xff] %v12769_v8  ;;  %v12790_v60 = vld [vmem:[%s10699_s17 + $0x148] sm:$0xff]  ;;  %v12793_v8 = vld [vmem:[%s10699_s17 + $0x140] sm:$0xff] }
 0x39e   : > { %3327 = vrot.lane.b32.xlu1 %v12762_v10, %s10647_s28  ;;  %3325 = vrot.lane.b32.xlu0 %v12765_v13, %s10647_s28 }
 0x3a0   : > { %v12781_v46 = vpop.permute.xlu1 %3007  ;;  %v12783_v55 = vpop.permute.xlu0 %3005 }
 0x3a1   : > { %19520 = vst [vmem:[#allocation396_spill] sm:$0xff] %v12781_v46  ;;  %19521 = vst [vmem:[#allocation397_spill] sm:$0xff] %v12783_v55 }
 0x3a2   : > { %3331 = vrot.lane.b32.xlu1 %v12776_v32, %s10647_s28  ;;  %3329 = vrot.lane.b32.xlu0 %v12779_v43, %s10647_s28 }
 0x3a4   : > { %v12795_v35 = vpop.permute.xlu1 %3011  ;;  %v12797_v31 = vpop.permute.xlu0 %3009 }
 0x3a5   : > { %19522 = vst [vmem:[#allocation398_spill] sm:$0xff] %v12795_v35  ;;  %19523 = vst [vmem:[#allocation399_spill] sm:$0xff] %v12797_v31 }
 0x3a6   : > { %3335 = vrot.lane.b32.xlu1 %v12790_v60, %s10647_s28  ;;  %3333 = vrot.lane.b32.xlu0 %v12793_v8, %s10647_s28 }
 0x3a8   : > { %v12803_v46 = vpop.permute.xlu1 %3015  ;;  %v12805_v55 = vpop.permute.xlu0 %3013 }
 0x3a9   : > { %19524 = vst [vmem:[#allocation400_spill] sm:$0xff] %v12803_v46  ;;  %19525 = vst [vmem:[#allocation401_spill] sm:$0xff] %v12805_v55 }
 0x3aa   : > { %3339 = vrot.lane.b32.xlu1 %v12342_v51, %s10647_s28  ;;  %3337 = vrot.lane.b32.xlu0 %v12345_v57, %s10647_s28 }
 0x3ac   : > { %v12811_v45 = vpop.permute.xlu1 %3019  ;;  %v12813_v35 = vpop.permute.xlu0 %3017 }
 0x3ad   : > { %19526 = vst [vmem:[#allocation402_spill] sm:$0xff] %v12811_v45  ;;  %19527 = vst [vmem:[#allocation403_spill] sm:$0xff] %v12813_v35 }
 0x3ae   : > { %3551 = vrot.lane.b32.xlu1 %v12524_v44, %s10648_s29  ;;  %3549 = vrot.lane.b32.xlu0 %v12527_v27, %s10648_s29 }
 0x3b0   : > { %v12819_v46 = vpop.permute.xlu1 %3023  ;;  %v12821_v55 = vpop.permute.xlu0 %3021 }
 0x3b1   : > { %19528 = vst [vmem:[#allocation404_spill] sm:$0xff] %v12819_v46  ;;  %19529 = vst [vmem:[#allocation405_spill] sm:$0xff] %v12821_v55 }
 0x3b2   : > { %3555 = vrot.lane.b32.xlu1 %v12538_v62, %s10648_s29  ;;  %3553 = vrot.lane.b32.xlu0 %v12541_v3, %s10648_s29 }
 0x3b4   : > { %v12827_v45 = vpop.permute.xlu1 %3027  ;;  %v12829_v35 = vpop.permute.xlu0 %3025 }
 0x3b5   : > { %19530 = vst [vmem:[#allocation406_spill] sm:$0xff] %v12827_v45  ;;  %19531 = vst [vmem:[#allocation407_spill] sm:$0xff] %v12829_v35 }
 0x3b6   : > { %3559 = vrot.lane.b32.xlu1 %v12552_v7, %s10648_s29  ;;  %3557 = vrot.lane.b32.xlu0 %v12555_v4, %s10648_s29 }
 0x3b8   : > { %v12835_v31 = vpop.permute.xlu1 %3031  ;;  %v12837_v46 = vpop.permute.xlu0 %3029 }
 0x3b9   : > { %19532 = vst [vmem:[#allocation408_spill] sm:$0xff] %v12835_v31  ;;  %19533 = vst [vmem:[#allocation409_spill] sm:$0xff] %v12837_v46 }
 0x3ba   : > { %3563 = vrot.lane.b32.xlu1 %v12566_v9, %s10648_s29  ;;  %3561 = vrot.lane.b32.xlu0 %v12569_v11, %s10648_s29 }
 0x3bc   : > { %v12843_v55 = vpop.permute.xlu1 %3035  ;;  %v12845_v45 = vpop.permute.xlu0 %3033 }
 0x3bd   : > { %19534 = vst [vmem:[#allocation410_spill] sm:$0xff] %v12843_v55  ;;  %19535 = vst [vmem:[#allocation411_spill] sm:$0xff] %v12845_v45 }
 0x3be   : > { %3567 = vrot.lane.b32.xlu1 %v12580_v5, %s10648_s29  ;;  %3565 = vrot.lane.b32.xlu0 %v12583_v63, %s10648_s29 }
 0x3c0   : > { %v12851_v35 = vpop.permute.xlu1 %3039  ;;  %v12853_v31 = vpop.permute.xlu0 %3037 }
 0x3c1   : > { %19536 = vst [vmem:[#allocation412_spill] sm:$0xff] %v12851_v35  ;;  %19537 = vst [vmem:[#allocation413_spill] sm:$0xff] %v12853_v31 }
 0x3c2   : > { %3571 = vrot.lane.b32.xlu1 %v12594_v40, %s10648_s29  ;;  %3569 = vrot.lane.b32.xlu0 %v12597_v50, %s10648_s29 }
 0x3c4   : > { %v12859_v46 = vpop.permute.xlu1 %3043  ;;  %v12861_v55 = vpop.permute.xlu0 %3041 }
 0x3c5   : > { %19538 = vst [vmem:[#allocation414_spill] sm:$0xff] %v12859_v46  ;;  %19539 = vst [vmem:[#allocation415_spill] sm:$0xff] %v12861_v55 }
 0x3c6   : > { %3575 = vrot.lane.b32.xlu1 %v12608_v2, %s10648_s29  ;;  %3573 = vrot.lane.b32.xlu0 %v12611_v39, %s10648_s29 }
 0x3c8   : > { %v12867_v45 = vpop.permute.xlu1 %3047  ;;  %v12869_v35 = vpop.permute.xlu0 %3045 }
 0x3c9   : > { %19540 = vst [vmem:[#allocation416_spill] sm:$0xff] %v12867_v45  ;;  %19541 = vst [vmem:[#allocation417_spill] sm:$0xff] %v12869_v35 }
 0x3ca   : > { %3579 = vrot.lane.b32.xlu1 %v12622_v42, %s10648_s29  ;;  %3577 = vrot.lane.b32.xlu0 %v12625_v47, %s10648_s29 }
 0x3cc   : > { %v12875_v31 = vpop.permute.xlu1 %3259  ;;  %v12877_v46 = vpop.permute.xlu0 %3257 }
 0x3ce   : > { %3583 = vrot.lane.b32.xlu1 %v12636_v1, %s10648_s29  ;;  %3581 = vrot.lane.b32.xlu0 %v12639_v17, %s10648_s29 }
 0x3d0   : > { %v12883_v55 = vpop.permute.xlu1 %3263  ;;  %v12885_v45 = vpop.permute.xlu0 %3261 }
 0x3d1   : > { %19542 = vst [vmem:[#allocation418_spill] sm:$0xff] %v12883_v55 }
 0x3d2   : > { %3587 = vrot.lane.b32.xlu1 %v12650_v59, %s10648_s29  ;;  %3585 = vrot.lane.b32.xlu0 %v12653_v52, %s10648_s29 }
 0x3d4   : > { %v12891_v35 = vpop.permute.xlu1 %3267  ;;  %v12893_v56 = vpop.permute.xlu0 %3265 }
 0x3d5   : > { %19543 = vst [vmem:[#allocation419_spill] sm:$0xff] %v12891_v35  ;;  %19544 = vst [vmem:[#allocation420_spill] sm:$0xff] %v12893_v56 }
 0x3d6   : > { %3591 = vrot.lane.b32.xlu1 %v12664_v23, %s10648_s29  ;;  %3589 = vrot.lane.b32.xlu0 %v12667_v20, %s10648_s29 }
 0x3d8   : > { %v12899_v37 = vpop.permute.xlu1 %3271  ;;  %v12901_v0 = vpop.permute.xlu0 %3269 }
 0x3d9   : > { %19545 = vst [vmem:[#allocation421_spill] sm:$0xff] %v12899_v37  ;;  %19546 = vst [vmem:[#allocation422_spill] sm:$0xff] %v12901_v0 }
 0x3da   : > { %3595 = vrot.lane.b32.xlu1 %v12678_v24, %s10648_s29  ;;  %3593 = vrot.lane.b32.xlu0 %v12681_v22, %s10648_s29 }
 0x3dc   : > { %v12907_v38 = vpop.permute.xlu1 %3275  ;;  %v12909_v35 = vpop.permute.xlu0 %3273 }
 0x3dd   : > { %19547 = vst [vmem:[#allocation423_spill] sm:$0xff] %v12907_v38  ;;  %19548 = vst [vmem:[#allocation424_spill] sm:$0xff] %v12909_v35 }
 0x3de   : > { %3599 = vrot.lane.b32.xlu1 %v12692_v25, %s10648_s29  ;;  %3597 = vrot.lane.b32.xlu0 %v12695_v30, %s10648_s29 }
 0x3e0   : > { %v12915_v36 = vpop.permute.xlu1 %3279  ;;  %v12917_v37 = vpop.permute.xlu0 %3277 }
 0x3e1   : > { %19549 = vst [vmem:[#allocation425_spill] sm:$0xff] %v12915_v36  ;;  %19550 = vst [vmem:[#allocation426_spill] sm:$0xff] %v12917_v37 }
 0x3e2   : > { %3603 = vrot.lane.b32.xlu1 %v12706_v33, %s10648_s29  ;;  %3601 = vrot.lane.b32.xlu0 %v12709_v21, %s10648_s29 }
 0x3e4   : > { %v12923_v0 = vpop.permute.xlu1 %3283  ;;  %v12925_v38 = vpop.permute.xlu0 %3281 }
 0x3e5   : > { %19551 = vst [vmem:[#allocation427_spill] sm:$0xff] %v12923_v0  ;;  %19552 = vst [vmem:[#allocation428_spill] sm:$0xff] %v12925_v38 }
 0x3e6   : > { %3607 = vrot.lane.b32.xlu1 %v12720_v29, %s10648_s29  ;;  %3605 = vrot.lane.b32.xlu0 %v12723_v6, %s10648_s29 }
 0x3e8   : > { %v12931_v35 = vpop.permute.xlu1 %3287  ;;  %v12933_v36 = vpop.permute.xlu0 %3285 }
 0x3e9   : > { %19553 = vst [vmem:[#allocation429_spill] sm:$0xff] %v12931_v35  ;;  %19554 = vst [vmem:[#allocation430_spill] sm:$0xff] %v12933_v36 }
 0x3ea   : > { %3611 = vrot.lane.b32.xlu1 %v12734_v58, %s10648_s29  ;;  %3609 = vrot.lane.b32.xlu0 %v12737_v34, %s10648_s29 }
 0x3ec   : > { %v12939_v37 = vpop.permute.xlu1 %3291  ;;  %v12941_v0 = vpop.permute.xlu0 %3289 }
 0x3ed   : > { %19555 = vst [vmem:[#allocation431_spill] sm:$0xff] %v12939_v37  ;;  %19556 = vst [vmem:[#allocation432_spill] sm:$0xff] %v12941_v0 }
 0x3ee   : > { %3615 = vrot.lane.b32.xlu1 %v12748_v19, %s10648_s29  ;;  %3613 = vrot.lane.b32.xlu0 %v12751_v26, %s10648_s29 }
 0x3f0   : > { %v12947_v38 = vpop.permute.xlu1 %3295  ;;  %v12949_v35 = vpop.permute.xlu0 %3293 }
 0x3f1   : > { %19557 = vst [vmem:[#allocation433_spill] sm:$0xff] %v12947_v38  ;;  %19558 = vst [vmem:[#allocation434_spill] sm:$0xff] %v12949_v35 }
 0x3f2   : > { %3619 = vrot.lane.b32.xlu1 %v12762_v10, %s10648_s29  ;;  %3617 = vrot.lane.b32.xlu0 %v12765_v13, %s10648_s29 }
 0x3f4   : > { %v12955_v36 = vpop.permute.xlu1 %3299  ;;  %v12957_v37 = vpop.permute.xlu0 %3297 }
 0x3f5   : > { %19559 = vst [vmem:[#allocation435_spill] sm:$0xff] %v12955_v36  ;;  %19560 = vst [vmem:[#allocation436_spill] sm:$0xff] %v12957_v37 }
 0x3f6   : > { %3623 = vrot.lane.b32.xlu1 %v12776_v32, %s10648_s29  ;;  %3621 = vrot.lane.b32.xlu0 %v12779_v43, %s10648_s29 }
 0x3f8   : > { %v12963_v0 = vpop.permute.xlu1 %3303  ;;  %v12965_v38 = vpop.permute.xlu0 %3301 }
 0x3f9   : > { %19561 = vst [vmem:[#allocation437_spill] sm:$0xff] %v12963_v0  ;;  %19562 = vst [vmem:[#allocation438_spill] sm:$0xff] %v12965_v38 }
 0x3fa   : > { %3627 = vrot.lane.b32.xlu1 %v12790_v60, %s10648_s29  ;;  %3625 = vrot.lane.b32.xlu0 %v12793_v8, %s10648_s29 }
 0x3fc   : > { %v12971_v35 = vpop.permute.xlu1 %3307  ;;  %v12973_v36 = vpop.permute.xlu0 %3305 }
 0x3fd   : > { %19563 = vst [vmem:[#allocation439_spill] sm:$0xff] %v12971_v35  ;;  %19564 = vst [vmem:[#allocation440_spill] sm:$0xff] %v12973_v36 }
 0x3fe   : > { %3631 = vrot.lane.b32.xlu1 %v12342_v51, %s10648_s29  ;;  %3629 = vrot.lane.b32.xlu0 %v12345_v57, %s10648_s29 }
 0x400   : > { %v12979_v37 = vpop.permute.xlu1 %3311  ;;  %v12981_v0 = vpop.permute.xlu0 %3309 }
 0x401   : > { %19565 = vst [vmem:[#allocation441_spill] sm:$0xff] %v12979_v37  ;;  %19566 = vst [vmem:[#allocation442_spill] sm:$0xff] %v12981_v0 }
 0x402   : > { %3843 = vrot.lane.b32.xlu1 %v12524_v44, %s10649_s30  ;;  %3841 = vrot.lane.b32.xlu0 %v12527_v27, %s10649_s30 }
 0x404   : > { %v12987_v35 = vpop.permute.xlu1 %3315  ;;  %v12989_v36 = vpop.permute.xlu0 %3313 }
 0x405   : > { %19567 = vst [vmem:[#allocation443_spill] sm:$0xff] %v12987_v35  ;;  %19568 = vst [vmem:[#allocation444_spill] sm:$0xff] %v12989_v36 }
 0x406   : > { %3847 = vrot.lane.b32.xlu1 %v12538_v62, %s10649_s30  ;;  %3845 = vrot.lane.b32.xlu0 %v12541_v3, %s10649_s30 }
 0x408   : > { %v12995_v37 = vpop.permute.xlu1 %3319  ;;  %v12997_v0 = vpop.permute.xlu0 %3317 }
 0x409   : > { %19569 = vst [vmem:[#allocation445_spill] sm:$0xff] %v12995_v37  ;;  %19570 = vst [vmem:[#allocation446_spill] sm:$0xff] %v12997_v0 }
 0x40a   : > { %3851 = vrot.lane.b32.xlu1 %v12552_v7, %s10649_s30  ;;  %3849 = vrot.lane.b32.xlu0 %v12555_v4, %s10649_s30 }
 0x40c   : > { %v13003_v38 = vpop.permute.xlu1 %3323  ;;  %v13005_v35 = vpop.permute.xlu0 %3321 }
 0x40d   : > { %19571 = vst [vmem:[#allocation447_spill] sm:$0xff] %v13003_v38  ;;  %19572 = vst [vmem:[#allocation448_spill] sm:$0xff] %v13005_v35 }
 0x40e   : > { %3855 = vrot.lane.b32.xlu1 %v12566_v9, %s10649_s30  ;;  %3853 = vrot.lane.b32.xlu0 %v12569_v11, %s10649_s30 }
 0x410   : > { %v13011_v36 = vpop.permute.xlu1 %3327  ;;  %v13013_v37 = vpop.permute.xlu0 %3325 }
 0x411   : > { %19573 = vst [vmem:[#allocation449_spill] sm:$0xff] %v13011_v36  ;;  %19574 = vst [vmem:[#allocation450_spill] sm:$0xff] %v13013_v37 }
 0x412   : > { %3859 = vrot.lane.b32.xlu1 %v12580_v5, %s10649_s30  ;;  %3857 = vrot.lane.b32.xlu0 %v12583_v63, %s10649_s30 }
 0x414   : > { %v13019_v0 = vpop.permute.xlu1 %3331  ;;  %v13021_v38 = vpop.permute.xlu0 %3329 }
 0x415   : > { %19575 = vst [vmem:[#allocation451_spill] sm:$0xff] %v13019_v0  ;;  %19576 = vst [vmem:[#allocation452_spill] sm:$0xff] %v13021_v38 }
 0x416   : > { %3863 = vrot.lane.b32.xlu1 %v12594_v40, %s10649_s30  ;;  %3861 = vrot.lane.b32.xlu0 %v12597_v50, %s10649_s30 }
 0x418   : > { %v13027_v35 = vpop.permute.xlu1 %3335  ;;  %v13029_v36 = vpop.permute.xlu0 %3333 }
 0x419   : > { %19577 = vst [vmem:[#allocation453_spill] sm:$0xff] %v13027_v35  ;;  %19578 = vst [vmem:[#allocation454_spill] sm:$0xff] %v13029_v36 }
 0x41a   : > { %3867 = vrot.lane.b32.xlu1 %v12608_v2, %s10649_s30  ;;  %3865 = vrot.lane.b32.xlu0 %v12611_v39, %s10649_s30 }
 0x41c   : > { %v13035_v37 = vpop.permute.xlu1 %3339  ;;  %v13037_v0 = vpop.permute.xlu0 %3337 }
 0x41d   : > { %19579 = vst [vmem:[#allocation455_spill] sm:$0xff] %v13035_v37  ;;  %19580 = vst [vmem:[#allocation456_spill] sm:$0xff] %v13037_v0 }
 0x41e   : > { %3871 = vrot.lane.b32.xlu1 %v12622_v42, %s10649_s30  ;;  %3869 = vrot.lane.b32.xlu0 %v12625_v47, %s10649_s30 }
 0x420   : > { %v13043_v38 = vpop.permute.xlu1 %3551  ;;  %v13045_v35 = vpop.permute.xlu0 %3549 }
 0x422   : > { %3875 = vrot.lane.b32.xlu1 %v12636_v1, %s10649_s30  ;;  %3873 = vrot.lane.b32.xlu0 %v12639_v17, %s10649_s30 }
 0x424   : > { %v13051_v36 = vpop.permute.xlu1 %3555  ;;  %v13053_v37 = vpop.permute.xlu0 %3553 }
 0x426   : > { %3879 = vrot.lane.b32.xlu1 %v12650_v59, %s10649_s30  ;;  %3877 = vrot.lane.b32.xlu0 %v12653_v52, %s10649_s30 }
 0x428   : > { %v13059_v0 = vpop.permute.xlu1 %3559  ;;  %v13061_v61 = vpop.permute.xlu0 %3557 }
 0x429   : > { %19581 = vst [vmem:[#allocation457_spill] sm:$0xff] %v13059_v0 }
 0x42a   : > { %3883 = vrot.lane.b32.xlu1 %v12664_v23, %s10649_s30  ;;  %3881 = vrot.lane.b32.xlu0 %v12667_v20, %s10649_s30 }
 0x42c   : > { %v13067_v12 = vpop.permute.xlu1 %3563  ;;  %v13069_v14 = vpop.permute.xlu0 %3561 }
 0x42d   : > { %19582 = vst [vmem:[#allocation458_spill] sm:$0xff] %v13067_v12  ;;  %19583 = vst [vmem:[#allocation459_spill] sm:$0xff] %v13069_v14 }
 0x42e   : > { %3887 = vrot.lane.b32.xlu1 %v12678_v24, %s10649_s30  ;;  %3885 = vrot.lane.b32.xlu0 %v12681_v22, %s10649_s30 }
 0x430   : > { %v13075_v18 = vpop.permute.xlu1 %3567  ;;  %v13077_v0 = vpop.permute.xlu0 %3565 }
 0x431   : > { %19584 = vst [vmem:[#allocation460_spill] sm:$0xff] %v13075_v18  ;;  %19585 = vst [vmem:[#allocation461_spill] sm:$0xff] %v13077_v0 }
 0x432   : > { %3891 = vrot.lane.b32.xlu1 %v12692_v25, %s10649_s30  ;;  %3889 = vrot.lane.b32.xlu0 %v12695_v30, %s10649_s30 }
 0x434   : > { %v13083_v48 = vpop.permute.xlu1 %3571  ;;  %v13085_v12 = vpop.permute.xlu0 %3569 }
 0x435   : > { %19586 = vst [vmem:[#allocation462_spill] sm:$0xff] %v13083_v48  ;;  %19587 = vst [vmem:[#allocation463_spill] sm:$0xff] %v13085_v12 }
 0x436   : > { %3895 = vrot.lane.b32.xlu1 %v12706_v33, %s10649_s30  ;;  %3893 = vrot.lane.b32.xlu0 %v12709_v21, %s10649_s30 }
 0x438   : > { %v13091_v14 = vpop.permute.xlu1 %3575  ;;  %v13093_v18 = vpop.permute.xlu0 %3573 }
 0x439   : > { %19588 = vst [vmem:[#allocation464_spill] sm:$0xff] %v13091_v14  ;;  %19589 = vst [vmem:[#allocation465_spill] sm:$0xff] %v13093_v18 }
 0x43a   : > { %3899 = vrot.lane.b32.xlu1 %v12720_v29, %s10649_s30  ;;  %3897 = vrot.lane.b32.xlu0 %v12723_v6, %s10649_s30 }
 0x43c   : > { %v13099_v0 = vpop.permute.xlu1 %3579  ;;  %v13101_v48 = vpop.permute.xlu0 %3577 }
 0x43d   : > { %19590 = vst [vmem:[#allocation466_spill] sm:$0xff] %v13099_v0  ;;  %19591 = vst [vmem:[#allocation467_spill] sm:$0xff] %v13101_v48 }
 0x43e   : > { %3903 = vrot.lane.b32.xlu1 %v12734_v58, %s10649_s30  ;;  %3901 = vrot.lane.b32.xlu0 %v12737_v34, %s10649_s30 }
 0x440   : > { %v13107_v12 = vpop.permute.xlu1 %3583  ;;  %v13109_v14 = vpop.permute.xlu0 %3581 }
 0x441   : > { %19592 = vst [vmem:[#allocation468_spill] sm:$0xff] %v13107_v12  ;;  %19593 = vst [vmem:[#allocation469_spill] sm:$0xff] %v13109_v14 }
 0x442   : > { %3907 = vrot.lane.b32.xlu1 %v12748_v19, %s10649_s30  ;;  %3905 = vrot.lane.b32.xlu0 %v12751_v26, %s10649_s30 }
 0x444   : > { %v13115_v18 = vpop.permute.xlu1 %3587  ;;  %v13117_v0 = vpop.permute.xlu0 %3585 }
 0x445   : > { %19594 = vst [vmem:[#allocation470_spill] sm:$0xff] %v13115_v18  ;;  %19595 = vst [vmem:[#allocation471_spill] sm:$0xff] %v13117_v0 }
 0x446   : > { %3911 = vrot.lane.b32.xlu1 %v12762_v10, %s10649_s30  ;;  %3909 = vrot.lane.b32.xlu0 %v12765_v13, %s10649_s30 }
 0x448   : > { %v13123_v48 = vpop.permute.xlu1 %3591  ;;  %v13125_v12 = vpop.permute.xlu0 %3589 }
 0x449   : > { %19596 = vst [vmem:[#allocation472_spill] sm:$0xff] %v13123_v48  ;;  %19597 = vst [vmem:[#allocation473_spill] sm:$0xff] %v13125_v12 }
 0x44a   : > { %3915 = vrot.lane.b32.xlu1 %v12776_v32, %s10649_s30  ;;  %3913 = vrot.lane.b32.xlu0 %v12779_v43, %s10649_s30 }
 0x44c   : > { %v13131_v14 = vpop.permute.xlu1 %3595  ;;  %v13133_v18 = vpop.permute.xlu0 %3593 }
 0x44d   : > { %19598 = vst [vmem:[#allocation474_spill] sm:$0xff] %v13131_v14  ;;  %19599 = vst [vmem:[#allocation475_spill] sm:$0xff] %v13133_v18 }
 0x44e   : > { %3919 = vrot.lane.b32.xlu1 %v12790_v60, %s10649_s30  ;;  %3917 = vrot.lane.b32.xlu0 %v12793_v8, %s10649_s30 }
 0x450   : > { %v13139_v0 = vpop.permute.xlu1 %3599  ;;  %v13141_v48 = vpop.permute.xlu0 %3597 }
 0x451   : > { %19600 = vst [vmem:[#allocation476_spill] sm:$0xff] %v13139_v0  ;;  %19601 = vst [vmem:[#allocation477_spill] sm:$0xff] %v13141_v48 }
 0x452   : > { %3923 = vrot.lane.b32.xlu1 %v12342_v51, %s10649_s30  ;;  %3921 = vrot.lane.b32.xlu0 %v12345_v57, %s10649_s30 }
 0x454   : > { %v13147_v12 = vpop.permute.xlu1 %3603  ;;  %v13149_v14 = vpop.permute.xlu0 %3601 }
 0x455   : > { %19602 = vst [vmem:[#allocation478_spill] sm:$0xff] %v13147_v12  ;;  %19603 = vst [vmem:[#allocation479_spill] sm:$0xff] %v13149_v14 }
 0x456   : > { %4135 = vrot.lane.b32.xlu1 %v12524_v44, %s10650_s4  ;;  %4133 = vrot.lane.b32.xlu0 %v12527_v27, %s10650_s4 }
 0x458   : > { %v13155_v0 = vpop.permute.xlu1 %3607  ;;  %v13157_v48 = vpop.permute.xlu0 %3605 }
 0x459   : > { %19604 = vst [vmem:[#allocation480_spill] sm:$0xff] %v13155_v0  ;;  %19605 = vst [vmem:[#allocation481_spill] sm:$0xff] %v13157_v48 }
 0x45a   : > { %4139 = vrot.lane.b32.xlu1 %v12538_v62, %s10650_s4  ;;  %4137 = vrot.lane.b32.xlu0 %v12541_v3, %s10650_s4 }
 0x45c   : > { %v13163_v51 = vpop.permute.xlu1 %3611  ;;  %v13165_v57 = vpop.permute.xlu0 %3609 }
 0x45d   : > { %19606 = vst [vmem:[#allocation482_spill] sm:$0xff] %v13163_v51  ;;  %19607 = vst [vmem:[#allocation483_spill] sm:$0xff] %v13165_v57 }
 0x45e   : > { %4143 = vrot.lane.b32.xlu1 %v12552_v7, %s10650_s4  ;;  %4141 = vrot.lane.b32.xlu0 %v12555_v4, %s10650_s4 }
 0x460   : > { %v13171_v12 = vpop.permute.xlu1 %3615  ;;  %v13173_v0 = vpop.permute.xlu0 %3613 }
 0x461   : > { %19608 = vst [vmem:[#allocation484_spill] sm:$0xff] %v13171_v12  ;;  %19609 = vst [vmem:[#allocation485_spill] sm:$0xff] %v13173_v0 }
 0x462   : > { %4147 = vrot.lane.b32.xlu1 %v12566_v9, %s10650_s4  ;;  %4145 = vrot.lane.b32.xlu0 %v12569_v11, %s10650_s4 }
 0x464   : > { %v13179_v48 = vpop.permute.xlu1 %3619  ;;  %v13181_v51 = vpop.permute.xlu0 %3617 }
 0x465   : > { %19610 = vst [vmem:[#allocation486_spill] sm:$0xff] %v13179_v48  ;;  %19611 = vst [vmem:[#allocation487_spill] sm:$0xff] %v13181_v51 }
 0x466   : > { %4151 = vrot.lane.b32.xlu1 %v12580_v5, %s10650_s4  ;;  %4149 = vrot.lane.b32.xlu0 %v12583_v63, %s10650_s4 }
 0x468   : > { %v13187_v57 = vpop.permute.xlu1 %3623  ;;  %v13189_v12 = vpop.permute.xlu0 %3621 }
 0x469   : > { %19612 = vst [vmem:[#allocation488_spill] sm:$0xff] %v13187_v57  ;;  %19613 = vst [vmem:[#allocation489_spill] sm:$0xff] %v13189_v12 }
 0x46a   : > { %4155 = vrot.lane.b32.xlu1 %v12594_v40, %s10650_s4  ;;  %4153 = vrot.lane.b32.xlu0 %v12597_v50, %s10650_s4 }
 0x46c   : > { %v13195_v0 = vpop.permute.xlu1 %3627  ;;  %v13197_v48 = vpop.permute.xlu0 %3625 }
 0x46d   : > { %19614 = vst [vmem:[#allocation490_spill] sm:$0xff] %v13195_v0  ;;  %19615 = vst [vmem:[#allocation491_spill] sm:$0xff] %v13197_v48 }
 0x46e   : > { %4159 = vrot.lane.b32.xlu1 %v12608_v2, %s10650_s4  ;;  %4157 = vrot.lane.b32.xlu0 %v12611_v39, %s10650_s4 }
 0x470   : > { %v13203_v51 = vpop.permute.xlu1 %3631  ;;  %v13205_v57 = vpop.permute.xlu0 %3629 }
 0x471   : > { %19616 = vst [vmem:[#allocation492_spill] sm:$0xff] %v13203_v51  ;;  %19617 = vst [vmem:[#allocation493_spill] sm:$0xff] %v13205_v57 }
 0x472   : > { %4163 = vrot.lane.b32.xlu1 %v12622_v42, %s10650_s4  ;;  %4161 = vrot.lane.b32.xlu0 %v12625_v47, %s10650_s4 }
 0x474   : > { %v13211_v12 = vpop.permute.xlu1 %3843  ;;  %v13213_v0 = vpop.permute.xlu0 %3841 }
 0x476   : > { %4167 = vrot.lane.b32.xlu1 %v12636_v1, %s10650_s4  ;;  %4165 = vrot.lane.b32.xlu0 %v12639_v17, %s10650_s4 }
 0x478   : > { %v13219_v48 = vpop.permute.xlu1 %3847  ;;  %v13221_v51 = vpop.permute.xlu0 %3845 }
 0x47a   : > { %4171 = vrot.lane.b32.xlu1 %v12650_v59, %s10650_s4  ;;  %4169 = vrot.lane.b32.xlu0 %v12653_v52, %s10650_s4 }
 0x47c   : > { %v13227_v57 = vpop.permute.xlu1 %3851  ;;  %v13229_v14 = vpop.permute.xlu0 %3849 }
 0x47d   : > { %19618 = vst [vmem:[#allocation494_spill] sm:$0xff] %v13227_v57 }
 0x47e   : > { %4175 = vrot.lane.b32.xlu1 %v12664_v23, %s10650_s4  ;;  %4173 = vrot.lane.b32.xlu0 %v12667_v20, %s10650_s4 }
 0x480   : > { %v13235_v18 = vpop.permute.xlu1 %3855  ;;  %v13237_v15 = vpop.permute.xlu0 %3853 }
 0x481   : > { %19619 = vst [vmem:[#allocation495_spill] sm:$0xff] %v13235_v18  ;;  %19620 = vst [vmem:[#allocation496_spill] sm:$0xff] %v13237_v15 }
 0x482   : > { %4179 = vrot.lane.b32.xlu1 %v12678_v24, %s10650_s4  ;;  %4177 = vrot.lane.b32.xlu0 %v12681_v22, %s10650_s4 }
 0x484   : > { %v13243_v54 = vpop.permute.xlu1 %3859  ;;  %v13245_v57 = vpop.permute.xlu0 %3857 }
 0x485   : > { %19621 = vst [vmem:[#allocation497_spill] sm:$0xff] %v13243_v54  ;;  %19622 = vst [vmem:[#allocation498_spill] sm:$0xff] %v13245_v57 }
 0x486   : > { %4183 = vrot.lane.b32.xlu1 %v12692_v25, %s10650_s4  ;;  %4181 = vrot.lane.b32.xlu0 %v12695_v30, %s10650_s4 }
 0x488   : > { %v13251_v55 = vpop.permute.xlu1 %3863  ;;  %v13253_v18 = vpop.permute.xlu0 %3861 }
 0x489   : > { %19623 = vst [vmem:[#allocation499_spill] sm:$0xff] %v13251_v55  ;;  %19624 = vst [vmem:[#allocation500_spill] sm:$0xff] %v13253_v18 }
 0x48a   : > { %4187 = vrot.lane.b32.xlu1 %v12706_v33, %s10650_s4  ;;  %4185 = vrot.lane.b32.xlu0 %v12709_v21, %s10650_s4 }
 0x48c   : > { %v13259_v15 = vpop.permute.xlu1 %3867  ;;  %v13261_v54 = vpop.permute.xlu0 %3865 }
 0x48d   : > { %19625 = vst [vmem:[#allocation501_spill] sm:$0xff] %v13259_v15  ;;  %19626 = vst [vmem:[#allocation502_spill] sm:$0xff] %v13261_v54 }
 0x48e   : > { %4191 = vrot.lane.b32.xlu1 %v12720_v29, %s10650_s4  ;;  %4189 = vrot.lane.b32.xlu0 %v12723_v6, %s10650_s4 }
 0x490   : > { %v13267_v57 = vpop.permute.xlu1 %3871  ;;  %v13269_v55 = vpop.permute.xlu0 %3869 }
 0x491   : > { %19627 = vst [vmem:[#allocation503_spill] sm:$0xff] %v13267_v57  ;;  %19628 = vst [vmem:[#allocation504_spill] sm:$0xff] %v13269_v55 }
 0x492   : > { %4195 = vrot.lane.b32.xlu1 %v12734_v58, %s10650_s4  ;;  %4193 = vrot.lane.b32.xlu0 %v12737_v34, %s10650_s4 }
 0x494   : > { %v13275_v18 = vpop.permute.xlu1 %3875  ;;  %v13277_v15 = vpop.permute.xlu0 %3873 }
 0x495   : > { %19629 = vst [vmem:[#allocation505_spill] sm:$0xff] %v13275_v18  ;;  %19630 = vst [vmem:[#allocation506_spill] sm:$0xff] %v13277_v15 }
 0x496   : > { %4199 = vrot.lane.b32.xlu1 %v12748_v19, %s10650_s4  ;;  %4197 = vrot.lane.b32.xlu0 %v12751_v26, %s10650_s4 }
 0x498   : > { %v13283_v57 = vpop.permute.xlu1 %3879  ;;  %v13285_v55 = vpop.permute.xlu0 %3877 }
 0x499   : > { %19631 = vst [vmem:[#allocation507_spill] sm:$0xff] %v13283_v57  ;;  %19632 = vst [vmem:[#allocation508_spill] sm:$0xff] %v13285_v55  ;;  %v13308_v55 = vld [vmem:[%s10699_s17 + $0x158] sm:$0xff] }
 0x49a   : > { %4203 = vrot.lane.b32.xlu1 %v12762_v10, %s10650_s4  ;;  %4201 = vrot.lane.b32.xlu0 %v12765_v13, %s10650_s4 }
 0x49c   : > { %v13291_v18 = vpop.permute.xlu1 %3883  ;;  %v13293_v15 = vpop.permute.xlu0 %3881 }
 0x49d   : > { %19633 = vst [vmem:[#allocation509_spill] sm:$0xff] %v13291_v18  ;;  %19634 = vst [vmem:[#allocation510_spill] sm:$0xff] %v13293_v15  ;;  %v13311_v18 = vld [vmem:[%s10699_s17 + $0x150] sm:$0xff] }
 0x49e   : > { %4207 = vrot.lane.b32.xlu1 %v12776_v32, %s10650_s4  ;;  %4205 = vrot.lane.b32.xlu0 %v12779_v43, %s10650_s4 }
 0x4a0   : > { %v13299_v54 = vpop.permute.xlu1 %3887  ;;  %v13301_v57 = vpop.permute.xlu0 %3885 }
 0x4a1   : > { %19635 = vst [vmem:[#allocation511_spill] sm:$0xff] %v13299_v54  ;;  %19636 = vst [vmem:[#allocation512_spill] sm:$0xff] %v13301_v57 }
 0x4a2   : > { %4211 = vrot.lane.b32.xlu1 %v12790_v60, %s10650_s4  ;;  %4209 = vrot.lane.b32.xlu0 %v12793_v8, %s10650_s4 }
 0x4a4   : > { %v13313_v15 = vpop.permute.xlu1 %3891  ;;  %v13315_v56 = vpop.permute.xlu0 %3889 }
 0x4a5   : > { %19637 = vst [vmem:[#allocation513_spill] sm:$0xff] %v13313_v15  ;;  %19638 = vst [vmem:[#allocation514_spill] sm:$0xff] %v13315_v56 }
 0x4a6   : > { %4215 = vrot.lane.b32.xlu1 %v13308_v55, %s10650_s4  ;;  %4213 = vrot.lane.b32.xlu0 %v13311_v18, %s10650_s4 }
 0x4a8   : > { %v13321_v54 = vpop.permute.xlu1 %3895  ;;  %v13323_v57 = vpop.permute.xlu0 %3893 }
 0x4a9   : > { %19639 = vst [vmem:[#allocation515_spill] sm:$0xff] %v13321_v54  ;;  %19640 = vst [vmem:[#allocation516_spill] sm:$0xff] %v13323_v57 }
 0x4aa   : > { %4427 = vrot.lane.b32.xlu1 %v12524_v44, %s10651_s5  ;;  %4425 = vrot.lane.b32.xlu0 %v12527_v27, %s10651_s5 }
 0x4ac   : > { %v13329_v15 = vpop.permute.xlu1 %3899  ;;  %v13331_v56 = vpop.permute.xlu0 %3897 }
 0x4ad   : > { %19641 = vst [vmem:[#allocation517_spill] sm:$0xff] %v13329_v15  ;;  %19642 = vst [vmem:[#allocation518_spill] sm:$0xff] %v13331_v56 }
 0x4ae   : > { %4431 = vrot.lane.b32.xlu1 %v12538_v62, %s10651_s5  ;;  %4429 = vrot.lane.b32.xlu0 %v12541_v3, %s10651_s5 }
 0x4b0   : > { %v13337_v54 = vpop.permute.xlu1 %3903  ;;  %v13339_v57 = vpop.permute.xlu0 %3901 }
 0x4b1   : > { %19643 = vst [vmem:[#allocation519_spill] sm:$0xff] %v13337_v54  ;;  %19644 = vst [vmem:[#allocation520_spill] sm:$0xff] %v13339_v57  ;;  %v13535_v54 = vld [vmem:[%s10699_s17 + $0x40] sm:$0xff]  ;;  %v13549_v57 = vld [vmem:[%s10699_s17 + $0x50] sm:$0xff] }
 0x4b2   : > { %4435 = vrot.lane.b32.xlu1 %v12552_v7, %s10651_s5  ;;  %4433 = vrot.lane.b32.xlu0 %v12555_v4, %s10651_s5 }
 0x4b4   : > { %v13345_v44 = vpop.permute.xlu1 %3907  ;;  %v13347_v27 = vpop.permute.xlu0 %3905 }
 0x4b5   : > { %19645 = vst [vmem:[#allocation521_spill] sm:$0xff] %v13345_v44  ;;  %19646 = vst [vmem:[#allocation522_spill] sm:$0xff] %v13347_v27 }
 0x4b6   : > { %4439 = vrot.lane.b32.xlu1 %v12566_v9, %s10651_s5  ;;  %4437 = vrot.lane.b32.xlu0 %v12569_v11, %s10651_s5 }
 0x4b8   : > { %v13353_v3 = vpop.permute.xlu1 %3911  ;;  %v13355_v62 = vpop.permute.xlu0 %3909 }
 0x4b9   : > { %19647 = vst [vmem:[#allocation523_spill] sm:$0xff] %v13353_v3  ;;  %19648 = vst [vmem:[#allocation524_spill] sm:$0xff] %v13355_v62  ;;  %v13521_v3 = vld [vmem:[%s10699_s17 + $0x30] sm:$0xff]  ;;  %v13532_v62 = vld [vmem:[%s10699_s17 + $0x48] sm:$0xff] }
 0x4ba   : > { %4443 = vrot.lane.b32.xlu1 %v12580_v5, %s10651_s5  ;;  %4441 = vrot.lane.b32.xlu0 %v12583_v63, %s10651_s5 }
 0x4bc   : > { %v13361_v4 = vpop.permute.xlu1 %3915  ;;  %v13363_v7 = vpop.permute.xlu0 %3913 }
 0x4bd   : > { %19649 = vst [vmem:[#allocation525_spill] sm:$0xff] %v13361_v4  ;;  %19650 = vst [vmem:[#allocation526_spill] sm:$0xff] %v13363_v7 }
 0x4be   : > { %4447 = vrot.lane.b32.xlu1 %v12594_v40, %s10651_s5  ;;  %4445 = vrot.lane.b32.xlu0 %v12597_v50, %s10651_s5 }
 0x4c0   : > { %v13369_v11 = vpop.permute.xlu1 %3919  ;;  %v13371_v9 = vpop.permute.xlu0 %3917 }
 0x4c1   : > { %19651 = vst [vmem:[#allocation527_spill] sm:$0xff] %v13369_v11  ;;  %19652 = vst [vmem:[#allocation528_spill] sm:$0xff] %v13371_v9  ;;  %v13507_v11 = vld [vmem:[%s10699_s17 + $0x20] sm:$0xff]  ;;  %v13518_v9 = vld [vmem:[%s10699_s17 + $0x38] sm:$0xff] }
 0x4c2   : > { %4451 = vrot.lane.b32.xlu1 %v12608_v2, %s10651_s5  ;;  %4449 = vrot.lane.b32.xlu0 %v12611_v39, %s10651_s5 }
 0x4c4   : > { %v13377_v63 = vpop.permute.xlu1 %3923  ;;  %v13379_v5 = vpop.permute.xlu0 %3921 }
 0x4c5   : > { %19653 = vst [vmem:[#allocation529_spill] sm:$0xff] %v13377_v63  ;;  %19654 = vst [vmem:[#allocation530_spill] sm:$0xff] %v13379_v5 }
 0x4c6   : > { %4455 = vrot.lane.b32.xlu1 %v12622_v42, %s10651_s5  ;;  %4453 = vrot.lane.b32.xlu0 %v12625_v47, %s10651_s5 }
 0x4c8   : > { %v13385_v50 = vpop.permute.xlu1 %4135  ;;  %v13387_v40 = vpop.permute.xlu0 %4133 }
 0x4ca   : > { %4459 = vrot.lane.b32.xlu1 %v12636_v1, %s10651_s5  ;;  %4457 = vrot.lane.b32.xlu0 %v12639_v17, %s10651_s5 }
 0x4cc   : > { %v13393_v39 = vpop.permute.xlu1 %4139  ;;  %v13395_v2 = vpop.permute.xlu0 %4137 }
 0x4ce   : > { %4463 = vrot.lane.b32.xlu1 %v12650_v59, %s10651_s5  ;;  %4461 = vrot.lane.b32.xlu0 %v12653_v52, %s10651_s5 }
 0x4d0   : > { %v13401_v42 = vpop.permute.xlu1 %4143  ;;  %v13403_v47 = vpop.permute.xlu0 %4141 }
 0x4d2   : > { %4467 = vrot.lane.b32.xlu1 %v12664_v23, %s10651_s5  ;;  %4465 = vrot.lane.b32.xlu0 %v12667_v20, %s10651_s5 }
 0x4d4   : > { %v13409_v1 = vpop.permute.xlu1 %4147  ;;  %v13411_v17 = vpop.permute.xlu0 %4145 }
 0x4d6   : > { %4471 = vrot.lane.b32.xlu1 %v12678_v24, %s10651_s5  ;;  %4469 = vrot.lane.b32.xlu0 %v12681_v22, %s10651_s5 }
 0x4d8   : > { %v13417_v59 = vpop.permute.xlu1 %4151  ;;  %v13419_v52 = vpop.permute.xlu0 %4149 }
 0x4da   : > { %4475 = vrot.lane.b32.xlu1 %v12692_v25, %s10651_s5  ;;  %4473 = vrot.lane.b32.xlu0 %v12695_v30, %s10651_s5 }
 0x4dc   : > { %v13425_v20 = vpop.permute.xlu1 %4155  ;;  %v13427_v23 = vpop.permute.xlu0 %4153 }
 0x4dd   : > { %19655 = vst [vmem:[#allocation531_spill] sm:$0xff] %v13425_v20 }
 0x4de   : > { %4479 = vrot.lane.b32.xlu1 %v12706_v33, %s10651_s5  ;;  %4477 = vrot.lane.b32.xlu0 %v12709_v21, %s10651_s5 }
 0x4e0   : > { %v13433_v22 = vpop.permute.xlu1 %4159  ;;  %v13435_v24 = vpop.permute.xlu0 %4157 }
 0x4e1   : > { %19656 = vst [vmem:[#allocation532_spill] sm:$0xff] %v13433_v22  ;;  %19657 = vst [vmem:[#allocation533_spill] sm:$0xff] %v13435_v24 }
 0x4e2   : > { %4483 = vrot.lane.b32.xlu1 %v12720_v29, %s10651_s5  ;;  %4481 = vrot.lane.b32.xlu0 %v12723_v6, %s10651_s5 }
 0x4e4   : > { %v13441_v30 = vpop.permute.xlu1 %4163  ;;  %v13443_v25 = vpop.permute.xlu0 %4161 }
 0x4e5   : > { %19658 = vst [vmem:[#allocation534_spill] sm:$0xff] %v13441_v30  ;;  %19659 = vst [vmem:[#allocation535_spill] sm:$0xff] %v13443_v25  ;;  %v19719_v30 = vld [vmem:[#allocation215_spill] sm:$0xff] }
 0x4e6   : > { %4487 = vrot.lane.b32.xlu1 %v12734_v58, %s10651_s5  ;;  %4485 = vrot.lane.b32.xlu0 %v12737_v34, %s10651_s5 }
 0x4e8   : > { %v13449_v33 = vpop.permute.xlu1 %4167  ;;  %v13451_v21 = vpop.permute.xlu0 %4165 }
 0x4e9   : > { %19660 = vst [vmem:[#allocation536_spill] sm:$0xff] %v13449_v33  ;;  %19661 = vst [vmem:[#allocation537_spill] sm:$0xff] %v13451_v21  ;;  %v4666_v21 = vld [vmem:[%s10699_s17 + $0x118] sm:$0xff] }
 0x4ea   : > { %4491 = vrot.lane.b32.xlu1 %v12748_v19, %s10651_s5  ;;  %4489 = vrot.lane.b32.xlu0 %v12751_v26, %s10651_s5 }
 0x4ec   : > { %v13457_v6 = vpop.permute.xlu1 %4171  ;;  %v13459_v29 = vpop.permute.xlu0 %4169 }
 0x4ed   : > { %19662 = vst [vmem:[#allocation538_spill] sm:$0xff] %v13457_v6  ;;  %19663 = vst [vmem:[#allocation539_spill] sm:$0xff] %v13459_v29  ;;  %v4651_v6 = vld [vmem:[%s10699_s17 + $0xa0] sm:$0xff]  ;;  %v4653_v29 = vld [vmem:[%s10699_s17 + $0xb0] sm:$0xff] }
 0x4ee   : > { %4495 = vrot.lane.b32.xlu1 %v12762_v10, %s10651_s5  ;;  %4493 = vrot.lane.b32.xlu0 %v12765_v13, %s10651_s5 }
 0x4f0   : > { %v13465_v58 = vpop.permute.xlu1 %4175  ;;  %v13467_v34 = vpop.permute.xlu0 %4173 }
 0x4f1   : > { %19664 = vst [vmem:[#allocation540_spill] sm:$0xff] %v13465_v58  ;;  %19665 = vst [vmem:[#allocation541_spill] sm:$0xff] %v13467_v34 }
 0x4f2   : > { %4499 = vrot.lane.b32.xlu1 %v12776_v32, %s10651_s5  ;;  %4497 = vrot.lane.b32.xlu0 %v12779_v43, %s10651_s5  ;;  %v13490_v43 = vld [vmem:[%s10699_s17 + $0x18] sm:$0xff]  ;;  %v13493_v32 = vld [vmem:[%s10699_s17 + $0x10] sm:$0xff] }
 0x4f4   : > { %v13473_v26 = vpop.permute.xlu1 %4179  ;;  %v13475_v19 = vpop.permute.xlu0 %4177 }
 0x4f5   : > { %19666 = vst [vmem:[#allocation542_spill] sm:$0xff] %v13473_v26  ;;  %19667 = vst [vmem:[#allocation543_spill] sm:$0xff] %v13475_v19  ;;  %v4652_v19 = vld [vmem:[%s10699_s17 + $0xa8] sm:$0xff] }
 0x4f6   : > { %4503 = vrot.lane.b32.xlu1 %v12790_v60, %s10651_s5  ;;  %4501 = vrot.lane.b32.xlu0 %v12793_v8, %s10651_s5  ;;  %v13504_v8 = vld [vmem:[%s10699_s17 + $0x28] sm:$0xff] }
 0x4f8   : > { %v13481_v10 = vpop.permute.xlu1 %4183  ;;  %v13483_v13 = vpop.permute.xlu0 %4181 }
 0x4f9   : > { %19668 = vst [vmem:[#allocation544_spill] sm:$0xff] %v13481_v10  ;;  %19669 = vst [vmem:[#allocation545_spill] sm:$0xff] %v13483_v13  ;;  %v4649_v13 = vld [vmem:[%s10699_s17 + $0x90] sm:$0xff] }
 0x4fa   : > { %4507 = vrot.lane.b32.xlu1 %v13308_v55, %s10651_s5  ;;  %4505 = vrot.lane.b32.xlu0 %v13311_v18, %s10651_s5 }
 0x4fc   : > { %v13495_v60 = vpop.permute.xlu1 %4187  ;;  %v13497_v63 = vpop.permute.xlu0 %4185 }
 0x4fd   : > { %19670 = vst [vmem:[#allocation546_spill] sm:$0xff] %v13495_v60  ;;  %19671 = vst [vmem:[#allocation547_spill] sm:$0xff] %v13497_v63 }
 0x4fe   : > { %4719 = vrot.lane.b32.xlu1 %v13490_v43, %s10652_s6  ;;  %4717 = vrot.lane.b32.xlu0 %v13493_v32, %s10652_s6 }
 0x500   : > { %v13509_v5 = vpop.permute.xlu1 %4191  ;;  %v13511_v4 = vpop.permute.xlu0 %4189 }
 0x501   : > { %19672 = vst [vmem:[#allocation548_spill] sm:$0xff] %v13509_v5  ;;  %19673 = vst [vmem:[#allocation549_spill] sm:$0xff] %v13511_v4 }
 0x502   : > { %4723 = vrot.lane.b32.xlu1 %v13504_v8, %s10652_s6  ;;  %4721 = vrot.lane.b32.xlu0 %v13507_v11, %s10652_s6 }
 0x504   : > { %v13523_v7 = vpop.permute.xlu1 %4195  ;;  %v13525_v44 = vpop.permute.xlu0 %4193 }
 0x505   : > { %19674 = vst [vmem:[#allocation550_spill] sm:$0xff] %v13523_v7  ;;  %19675 = vst [vmem:[#allocation551_spill] sm:$0xff] %v13525_v44  ;;  %v13546_v7 = vld [vmem:[%s10699_s17 + $0x58] sm:$0xff] }
 0x506   : > { %4727 = vrot.lane.b32.xlu1 %v13518_v9, %s10652_s6  ;;  %4725 = vrot.lane.b32.xlu0 %v13521_v3, %s10652_s6 }
 0x508   : > { %v13537_v27 = vpop.permute.xlu1 %4199  ;;  %v13539_v15 = vpop.permute.xlu0 %4197 }
 0x509   : > { %19676 = vst [vmem:[#allocation552_spill] sm:$0xff] %v13537_v27  ;;  %19677 = vst [vmem:[#allocation553_spill] sm:$0xff] %v13539_v15  ;;  %v13560_v27 = vld [vmem:[%s10699_s17 + $0x68] sm:$0xff]  ;;  %v13563_v15 = vld [vmem:[%s10699_s17 + $0x60] sm:$0xff] }
 0x50a   : > { %4731 = vrot.lane.b32.xlu1 %v13532_v62, %s10652_s6  ;;  %4729 = vrot.lane.b32.xlu0 %v13535_v54, %s10652_s6 }
 0x50c   : > { %v13551_v5 = vpop.permute.xlu1 %4203  ;;  %v13553_v44 = vpop.permute.xlu0 %4201 }
 0x50d   : > { %19678 = vst [vmem:[#allocation554_spill] sm:$0xff] %v13551_v5  ;;  %19679 = vst [vmem:[#allocation555_spill] sm:$0xff] %v13553_v44  ;;  %v13574_v5 = vld [vmem:[%s10699_s17 + $0x78] sm:$0xff]  ;;  %v13577_v44 = vld [vmem:[%s10699_s17 + $0x70] sm:$0xff] }
 0x50e   : > { %4735 = vrot.lane.b32.xlu1 %v13546_v7, %s10652_s6  ;;  %4733 = vrot.lane.b32.xlu0 %v13549_v57, %s10652_s6 }
 0x510   : > { %v13565_v56 = vpop.permute.xlu1 %4207  ;;  %v13567_v60 = vpop.permute.xlu0 %4205 }
 0x511   : > { %19680 = vst [vmem:[#allocation556_spill] sm:$0xff] %v13565_v56  ;;  %19681 = vst [vmem:[#allocation557_spill] sm:$0xff] %v13567_v60  ;;  %v4648_v56 = vld [vmem:[%s10699_s17 + $0x88] sm:$0xff]  ;;  %v4647_v60 = vld [vmem:[%s10699_s17 + $0x80] sm:$0xff] }
 0x512   : > { %4739 = vrot.lane.b32.xlu1 %v13560_v27, %s10652_s6  ;;  %4737 = vrot.lane.b32.xlu0 %v13563_v15, %s10652_s6 }
 0x514   : > { %v13579_v4 = vpop.permute.xlu1 %4211  ;;  %v13581_v10 = vpop.permute.xlu0 %4209 }
 0x515   : > { %19682 = vst [vmem:[#allocation558_spill] sm:$0xff] %v13579_v4  ;;  %19683 = vst [vmem:[#allocation559_spill] sm:$0xff] %v13581_v10  ;;  %v4650_v4 = vld [vmem:[%s10699_s17 + $0x98] sm:$0xff] }
 0x516   : > { %4743 = vrot.lane.b32.xlu1 %v13574_v5, %s10652_s6  ;;  %4741 = vrot.lane.b32.xlu0 %v13577_v44, %s10652_s6 }
 0x518   : > { %v13589_v63 = vpop.permute.xlu1 %4215  ;;  %v13591_v26 = vpop.permute.xlu0 %4213 }
 0x519   : > { %19684 = vst [vmem:[#allocation560_spill] sm:$0xff] %v13589_v63  ;;  %19685 = vst [vmem:[#allocation561_spill] sm:$0xff] %v13591_v26 }
 0x51a   : > { %4747 = vrot.lane.b32.xlu1 %v4648_v56, %s10652_s6  ;;  %4745 = vrot.lane.b32.xlu0 %v4647_v60, %s10652_s6  ;;  %v4654_v60 = vld [vmem:[%s10699_s17 + $0xb8] sm:$0xff] }
 0x51c   : > { %v4428_v10 = vpop.permute.xlu1 %4427  ;;  %v4426_v58 = vpop.permute.xlu0 %4425 }
 0x51d   : > { %v4510_v56 = vsel %vm4509_vm0, %v4426_v58, %v4428_v10 }
 0x51e   : > { %4751 = vrot.lane.b32.xlu1 %v4650_v4, %s10652_s6  ;;  %4749 = vrot.lane.b32.xlu0 %v4649_v13, %s10652_s6  ;;  %v4219_v13 = vsel %vm4217_vm1, %v13385_v50, %v13395_v2 }
 0x520   : > { %v4432_v34 = vpop.permute.xlu1 %4431  ;;  %v4430_v63 = vpop.permute.xlu0 %4429 }
 0x521   : > { %v4511_v26 = vsel %vm4509_vm0, %v4428_v10, %v4430_v63  ;;  %v3635_v10 = vsel %vm3633_vm3, %v13043_v38, %v13053_v37 }
 0x522   : > { %4755 = vrot.lane.b32.xlu1 %v4652_v19, %s10652_s6  ;;  %4753 = vrot.lane.b32.xlu0 %v4651_v6, %s10652_s6  ;;  %v4218_v6 = vsel %vm4217_vm1, %v13387_v40, %v13385_v50  ;;  %v3926_v19 = vsel %vm3925_vm2, %v13213_v0, %v13211_v12  ;;  %v4512_v50 = vsel %vm4509_vm0, %v4430_v63, %v4432_v34  ;;  %v4655_v0 = vld [vmem:[%s10699_s17 + $0xc0] sm:$0xff] }
 0x523   : > { %8964 = vmatprep.subr.mxu0 %v4511_v26  ;;  %v3927_v26 = vsel %vm3925_vm2, %v13211_v12, %v13221_v51  ;;  %v3634_v12 = vsel %vm3633_vm3, %v13045_v35, %v13043_v38  ;;  %v4220_v63 = vsel %vm4217_vm1, %v13395_v2, %v13393_v39  ;;  %v3929_v35 = vsel %vm3925_vm2, %v13219_v48, %v13229_v14 }
 0x524   : > { %8965 = vmatpush1.msra.mxu0 %v4510_v56  ;;  %v13606_v4 = vpop.permute.xlu1 %4435  ;;  %v13611_v33 = vpop.permute.xlu0 %4433  ;;  %v3342_v38 = vsel %vm3341_vm4, %v12877_v46, %v12875_v31  ;;  %v3637_v46 = vsel %vm3633_vm3, %v13051_v36, %v13061_v61 }
 0x525   : > { %8966 = vmatprep.subr.mxu0 %v4219_v13  ;;  %v4513_v58 = vsel %vm4509_vm0, %v4432_v34, %v13611_v33  ;;  %v3343_v34 = vsel %vm3341_vm4, %v12875_v31, %v12885_v45  ;;  %v3928_v13 = vsel %vm3925_vm2, %v13221_v51, %v13219_v48  ;;  %v3050_v31 = vsel %vm19125_vm5, %v12643_v53, %v12641_v28 }
 0x526   : > { %8967 = vmatpush1.msra.mxu0 %v4218_v6  ;;  %4759 = vrot.lane.b32.xlu1 %v4654_v60, %s10652_s6  ;;  %v4656_v60 = vld [vmem:[%s10699_s17 + $0xc8] sm:$0xff]  ;;  %v3051_v6 = vsel %vm19125_vm5, %v12641_v28, %v12657_v16  ;;  %v3636_v48 = vsel %vm3633_vm3, %v13053_v37, %v13051_v36  ;;  %v2759_v51 = vsel %vm19122_vm6, %v12419_v49, %v12429_v41  ;;  %v19689_v37 = vld [vmem:[#allocation339_spill] sm:$0xff] }
 0x527   : > { %4757 = vrot.lane.b32.xlu0 %v4653_v29, %s10652_s6  ;;  %8968 = vmatprep.subr.mxu0 %v3927_v26  ;;  %v4221_v29 = vsel %vm4217_vm1, %v13393_v39, %v13403_v47  ;;  %v4657_v26 = vld [vmem:[%s10699_s17 + $0xd0] sm:$0xff]  ;;  %v19687_v28 = vld [vmem:[#allocation420_spill] sm:$0xff] }
 0x528   : > { %9035 = vmatprep.subr.mxu1 %v4513_v58  ;;  %8969 = vmatpush1.msra.mxu0 %v3926_v19  ;;  %v13628_v40 = vpop.permute.xlu1 %4439  ;;  %v13633_v56 = vpop.permute.xlu0 %4437  ;;  %v4658_v58 = vld [vmem:[%s10699_s17 + $0xd8] sm:$0xff] }
 0x529   : > { %9036 = vmatpush1.msra.mxu1 %v4512_v50  ;;  %8970 = vmatprep.subr.mxu0 %v3635_v10  ;;  %v19688_v50 = vld [vmem:[#allocation418_spill] sm:$0xff]  ;;  %v2758_v10 = vsel %vm19122_vm6, %v19689_v37, %v12419_v49 }
 0x52a   : > { %9037 = vmatprep.subr.mxu1 %v4221_v29  ;;  %8971 = vmatpush1.msra.mxu0 %v3634_v12  ;;  %v3345_v36 = vsel %vm3341_vm4, %v19688_v50, %v19687_v28  ;;  %v19690_v29 = vld [vmem:[#allocation300_spill] sm:$0xff]  ;;  %v19691_v12 = vld [vmem:[#allocation297_spill] sm:$0xff] }
 0x52b   : > { %9038 = vmatpush1.msra.mxu1 %v4220_v63  ;;  %4763 = vrot.lane.b32.xlu1 %v4656_v60, %s10652_s6  ;;  %v3344_v60 = vsel %vm3341_vm4, %v12885_v45, %v19688_v50  ;;  %v4660_v63 = vld [vmem:[%s10699_s17 + $0xe8] sm:$0xff] }
 0x52c   : > { %4761 = vrot.lane.b32.xlu0 %v4655_v0, %s10652_s6  ;;  %8972 = vmatprep.subr.mxu0 %v3343_v34  ;;  %v13657_v39 = vpop.permute.xlu1 %4443  ;;  %v13659_v2 = vpop.permute.xlu0 %4441  ;;  %v2467_v0 = vsel %vm19121_vm7, %v19691_v12, %v19690_v29  ;;  %v19692_v34 = vld [vmem:[#allocation381_spill] sm:$0xff]  ;;  %v19700_v50 = vld [vmem:[#allocation340_spill] sm:$0xff] }
 0x52d   : > { %9039 = vmatprep.subr.mxu1 %v3929_v35  ;;  %8973 = vmatpush1.msra.mxu0 %v3342_v38  ;;  %v19693_v35 = vld [vmem:[#allocation379_spill] sm:$0xff] }
 0x52e   : > { %9040 = vmatpush1.msra.mxu1 %v3928_v13  ;;  %8974 = vmatprep.subr.mxu0 %v3051_v6  ;;  %v3053_v38 = vsel %vm19125_vm5, %v19693_v35, %v19692_v34  ;;  %v19694_v13 = vld [vmem:[#allocation298_spill] sm:$0xff]  ;;  %v4659_v6 = vld [vmem:[%s10699_s17 + $0xe0] sm:$0xff]  ;;  %v3052_v45 = vsel %vm19125_vm5, %v12657_v16, %v19693_v35 }
 0x52f   : > { %9041 = vmatprep.subr.mxu1 %v3637_v46  ;;  %8975 = vmatpush1.msra.mxu0 %v3050_v31  ;;  %v2466_v49 = vsel %vm19121_vm7, %v19694_v13, %v19691_v12  ;;  %v19697_v31 = vld [vmem:[#allocation258_spill] sm:$0xff]  ;;  %v19703_v12 = vld [vmem:[#allocation213_spill] sm:$0xff] }
 0x530   : > { %9042 = vmatpush1.msra.mxu1 %v3636_v48  ;;  %4767 = vrot.lane.b32.xlu1 %v4658_v58, %s10652_s6  ;;  %v13682_v19 = vpop.permute.xlu1 %4447  ;;  %v13684_v53 = vpop.permute.xlu0 %4445  ;;  %v19704_v35 = vld [vmem:[#allocation302_spill] sm:$0xff] }
 0x531   : > { %19686 = vst [vmem:[#allocation562_spill] sm:$0xff] %v13682_v19  ;;  %4765 = vrot.lane.b32.xlu0 %v4657_v26, %s10652_s6  ;;  %8976 = vmatprep.subr.mxu0 %v2759_v51  ;;  %v19698_v26 = vld [vmem:[#allocation255_spill] sm:$0xff]  ;;  %v19699_v51 = vld [vmem:[#allocation342_spill] sm:$0xff] }
 0x532   : > { %9043 = vmatprep.subr.mxu1 %v3345_v36  ;;  %8977 = vmatpush1.msra.mxu0 %v2758_v10  ;;  %v2175_v48 = vsel %vm19123_vm8, %v19698_v26, %v19697_v31  ;;  %v2761_v16 = vsel %vm19122_vm6, %v19700_v50, %v19699_v51  ;;  %v19701_v36 = vld [vmem:[#allocation256_spill] sm:$0xff]  ;;  %v2760_v10 = vsel %vm19122_vm6, %v12429_v41, %v19700_v50  ;;  %v19709_v50 = vld [vmem:[#allocation174_spill] sm:$0xff] }
 0x533   : > { %9044 = vmatpush1.msra.mxu1 %v3344_v60  ;;  %8978 = vmatprep.subr.mxu0 %v2467_v0  ;;  %v2174_v37 = vsel %vm19123_vm8, %v19701_v36, %v19698_v26  ;;  %v19702_v60 = vld [vmem:[#allocation216_spill] sm:$0xff] }
 0x534   : > { %9045 = vmatprep.subr.mxu1 %v3053_v38  ;;  %8979 = vmatpush1.msra.mxu0 %v2466_v49  ;;  %v13710_v58 = vpop.permute.xlu1 %4451  ;;  %v13712_v46 = vpop.permute.xlu0 %4449  ;;  %v1883_v0 = vsel %vm19117_vm9, %v19703_v12, %v19702_v60  ;;  %v19705_v38 = vld [vmem:[#allocation299_spill] sm:$0xff]  ;;  %v19706_v49 = vld [vmem:[#allocation214_spill] sm:$0xff] }
 0x535   : > { %19695 = vst [vmem:[#allocation420_spill] sm:$0xff] %v13710_v58  ;;  %19696 = vst [vmem:[#allocation418_spill] sm:$0xff] %v13712_v46  ;;  %9046 = vmatpush1.msra.mxu1 %v3052_v45  ;;  %4771 = vrot.lane.b32.xlu1 %v4660_v63, %s10652_s6  ;;  %v4662_v63 = vld [vmem:[%s10699_s17 + $0xf8] sm:$0xff]  ;;  %v2469_v13 = vsel %vm19121_vm7, %v19705_v38, %v19704_v35  ;;  %v4661_v45 = vld [vmem:[%s10699_s17 + $0xf0] sm:$0xff] }
 0x536   : > { %4769 = vrot.lane.b32.xlu0 %v4659_v6, %s10652_s6  ;;  %8980 = vmatprep.subr.mxu0 %v2175_v48  ;;  %v1882_v6 = vsel %vm19117_vm9, %v19706_v49, %v19703_v12  ;;  %v2468_v48 = vsel %vm19121_vm7, %v19690_v29, %v19705_v38  ;;  %v19714_v38 = vld [vmem:[#allocation132_spill] sm:$0xff] }
 0x537   : > { %9047 = vmatprep.subr.mxu1 %v2761_v16  ;;  %8981 = vmatpush1.msra.mxu0 %v2174_v37  ;;  %v19710_v16 = vld [vmem:[#allocation171_spill] sm:$0xff]  ;;  %v19711_v37 = vld [vmem:[#allocation260_spill] sm:$0xff] }
 0x538   : > { %9048 = vmatpush1.msra.mxu1 %v2760_v10  ;;  %8982 = vmatprep.subr.mxu0 %v1883_v0  ;;  %v13739_v26 = vpop.permute.xlu1 %4455  ;;  %v13741_v41 = vpop.permute.xlu0 %4453  ;;  %v1591_v36 = vsel %vm19108_vm10, %v19710_v16, %v19709_v50  ;;  %v19712_v10 = vld [vmem:[#allocation257_spill] sm:$0xff]  ;;  %v19713_v0 = vld [vmem:[#allocation172_spill] sm:$0xff] }
 0x539   : > { %19707 = vst [vmem:[#allocation339_spill] sm:$0xff] %v13739_v26  ;;  %19708 = vst [vmem:[#allocation300_spill] sm:$0xff] %v13741_v41  ;;  %9049 = vmatprep.subr.mxu1 %v2469_v13  ;;  %8983 = vmatpush1.msra.mxu0 %v1882_v6  ;;  %v2177_v12 = vsel %vm19123_vm8, %v19712_v10, %v19711_v37  ;;  %v1590_v29 = vsel %vm19108_vm10, %v19713_v0, %v19710_v16  ;;  %v19715_v13 = vld [vmem:[#allocation129_spill] sm:$0xff]  ;;  %v4664_v6 = vld [vmem:[%s10699_s17 + $0x108] sm:$0xff] }
 0x53a   : > { %9050 = vmatpush1.msra.mxu1 %v2468_v48  ;;  %4775 = vrot.lane.b32.xlu1 %v4662_v63, %s10652_s6  ;;  %v2176_v63 = vsel %vm19123_vm8, %v19697_v31, %v19712_v10  ;;  %v1299_v49 = vsel %vm19107_vm11, %v19715_v13, %v19714_v38  ;;  %v4663_v31 = vld [vmem:[%s10699_s17 + $0x100] sm:$0xff]  ;;  %v1884_v10 = vsel %vm19117_vm9, %v19702_v60, %v19719_v30  ;;  %v19730_v26 = vld [vmem:[#allocation134_spill] sm:$0xff] }
 0x53b   : > { %4773 = vrot.lane.b32.xlu0 %v4661_v45, %s10652_s6  ;;  %8984 = vmatprep.subr.mxu0 %v1591_v36  ;;  %v19718_v36 = vld [vmem:[#allocation218_spill] sm:$0xff] }
 0x53c   : > { %9051 = vmatprep.subr.mxu1 %v2177_v12  ;;  %8985 = vmatpush1.msra.mxu0 %v1590_v29  ;;  %v13764_v45 = vpop.permute.xlu1 %4459  ;;  %v13766_v48 = vpop.permute.xlu0 %4457  ;;  %v1885_v16 = vsel %vm19117_vm9, %v19719_v30, %v19718_v36  ;;  %v19720_v12 = vld [vmem:[#allocation130_spill] sm:$0xff]  ;;  %vm4801_vm9 = vcmask 187392  }
 0x53d   : > { %19716 = vst [vmem:[#allocation297_spill] sm:$0xff] %v13764_v45  ;;  %19717 = vst [vmem:[#allocation381_spill] sm:$0xff] %v13766_v48  ;;  %9052 = vmatpush1.msra.mxu1 %v2176_v63  ;;  %8986 = vmatprep.subr.mxu0 %v1299_v49  ;;  %v1298_v0 = vsel %vm19107_vm11, %v19720_v12, %v19715_v13  ;;  %v19721_v29 = vld [vmem:[#allocation90_spill] sm:$0xff]  ;;  %v19722_v63 = vld [vmem:[#allocation87_spill] sm:$0xff] }
 0x53e   : > { %9053 = vmatprep.subr.mxu1 %v1885_v16  ;;  %8987 = vmatpush1.msra.mxu0 %v1298_v0  ;;  %v1007_v49 = vsel %vm19106_vm12, %v19722_v63, %v19721_v29  ;;  %v19723_v13 = vld [vmem:[#allocation176_spill] sm:$0xff]  ;;  %v19724_v16 = vld [vmem:[#allocation173_spill] sm:$0xff] }
 0x53f   : > { %9054 = vmatpush1.msra.mxu1 %v1884_v10  ;;  %4779 = vrot.lane.b32.xlu1 %v4664_v6, %s10652_s6  ;;  %v1593_v12 = vsel %vm19108_vm10, %v19724_v16, %v19723_v13  ;;  %v19725_v0 = vld [vmem:[#allocation88_spill] sm:$0xff] }
 0x540   : > { %4777 = vrot.lane.b32.xlu0 %v4663_v31, %s10652_s6  ;;  %8988 = vmatprep.subr.mxu0 %v1007_v49  ;;  %v1006_v30 = vsel %vm19106_vm12, %v19725_v0, %v19722_v63  ;;  %v13789_v60 = vpop.permute.xlu1 %4463  ;;  %v13791_v6 = vpop.permute.xlu0 %4461  ;;  %v1592_v31 = vsel %vm19108_vm10, %v19709_v50, %v19724_v16  ;;  %v19728_v10 = vld [vmem:[#allocation48_spill] sm:$0xff]  ;;  %v19729_v49 = vld [vmem:[#allocation45_spill] sm:$0xff]  ;;  %v19731_v63 = vld [vmem:[#allocation131_spill] sm:$0xff]  ;;  %vm19111_vm10 = vcmask 826368  }
 0x541   : > { %19726 = vst [vmem:[#allocation379_spill] sm:$0xff] %v13789_v60  ;;  %19727 = vst [vmem:[#allocation298_spill] sm:$0xff] %v13791_v6  ;;  %9055 = vmatprep.subr.mxu1 %v1593_v12  ;;  %8989 = vmatpush1.msra.mxu0 %v1006_v30  ;;  %v715_v45 = vsel %vm19102_vm13, %v19729_v49, %v19728_v10  ;;  %v1301_v0 = vsel %vm19107_vm11, %v19731_v63, %v19730_v26  ;;  %v19732_v12 = vld [vmem:[#allocation46_spill] sm:$0xff]  ;;  %v4665_v60 = vld [vmem:[%s10699_s17 + $0x110] sm:$0xff] }
 0x542   : > { %9056 = vmatpush1.msra.mxu1 %v1592_v31  ;;  %8990 = vmatprep.subr.mxu0 %v715_v45  ;;  %v714_v30 = vsel %vm19102_vm13, %v19732_v12, %v19729_v49  ;;  %v1300_v50 = vsel %vm19107_vm11, %v19714_v38, %v19731_v63  ;;  %v19733_v45 = vld [vmem:[#allocation3_spill] sm:$0xff]  ;;  %v19734_v16 = vld [vmem:[#allocation6_spill] sm:$0xff]  ;;  %v19737_v49 = vld [vmem:[#allocation92_spill] sm:$0xff]  ;;  %vm19109_vm11 = vcmask 818176  }
 0x543   : > { %9057 = vmatprep.subr.mxu1 %v1301_v0  ;;  %8991 = vmatpush1.msra.mxu0 %v714_v30  ;;  %v423_v31 = vsel %vm19096_vm14, %v19734_v16, %v19733_v45  ;;  %v19738_v0 = vld [vmem:[#allocation89_spill] sm:$0xff]  ;;  %v19739_v38 = vld [vmem:[#allocation4_spill] sm:$0xff] }
 0x544   : > { %9058 = vmatpush1.msra.mxu1 %v1300_v50  ;;  %4783 = vrot.lane.b32.xlu1 %v4666_v21, %s10652_s6  ;;  %v13814_v6 = vpop.permute.xlu1 %4467  ;;  %v13816_v48 = vpop.permute.xlu0 %4465  ;;  %v1009_v12 = vsel %vm19106_vm12, %v19738_v0, %v19737_v49  ;;  %v422_v63 = vsel %vm19096_vm14, %v19739_v38, %v19734_v16  ;;  %v4668_v21 = vld [vmem:[%s10699_s17 + $0x128] sm:$0xff]  ;;  %v1008_v30 = vsel %vm19106_vm12, %v19721_v29, %v19738_v0  ;;  %v4667_v50 = vld [vmem:[%s10699_s17 + $0x120] sm:$0xff]  ;;  %v19745_v0 = vld [vmem:[#allocation5_spill] sm:$0xff]  ;;  %vm19126_vm12 = vcmask 687104  }
 0x545   : > { %19735 = vst [vmem:[#allocation258_spill] sm:$0xff] %v13814_v6  ;;  %19736 = vst [vmem:[#allocation255_spill] sm:$0xff] %v13816_v48  ;;  %4781 = vrot.lane.b32.xlu0 %v4665_v60, %s10652_s6  ;;  %8992 = vmatprep.subr.mxu0 %v423_v31  ;;  %v19740_v60 = vld [vmem:[#allocation50_spill] sm:$0xff]  ;;  %v19741_v31 = vld [vmem:[#allocation47_spill] sm:$0xff] }
 0x546   : > { %9059 = vmatprep.subr.mxu1 %v1009_v12  ;;  %8993 = vmatpush1.msra.mxu0 %v422_v63  ;;  %v717_v6 = vsel %vm19102_vm13, %v19741_v31, %v19740_v60  ;;  %v716_v16 = vsel %vm19102_vm13, %v19728_v10, %v19741_v31  ;;  %v19744_v29 = vld [vmem:[#allocation8_spill] sm:$0xff]  ;;  %v424_v10 = vsel %vm19096_vm14, %v19733_v45, %v19745_v0  ;;  %vm7429_vm13 = vcmask 678912  }
 0x547   : > { %9060 = vmatpush1.msra.mxu1 %v1008_v30  ;;  %v425_v63 = vsel %vm19096_vm14, %v19745_v0, %v19744_v29  ;;  %v4669_v30 = vld [vmem:[%s10699_s17 + $0x130] sm:$0xff]  ;;  %vm7721_vm14 = vcmask 670720  }
 0x548   : > { %9061 = vmatprep.subr.mxu1 %v717_v6  ;;  %4787 = vrot.lane.b32.xlu1 %v4668_v21, %s10652_s6  ;;  %v13837_v12 = vpop.permute.xlu1 %4471  ;;  %v13839_v38 = vpop.permute.xlu0 %4469  ;;  %v4670_v6 = vld [vmem:[%s10699_s17 + $0x138] sm:$0xff] }
 0x549   : > { %19742 = vst [vmem:[#allocation342_spill] sm:$0xff] %v13837_v12  ;;  %19743 = vst [vmem:[#allocation340_spill] sm:$0xff] %v13839_v38  ;;  %9062 = vmatpush1.msra.mxu1 %v716_v16  ;;  %4785 = vrot.lane.b32.xlu0 %v4667_v50, %s10652_s6  ;;  %v4672_v50 = vld [vmem:[%s10699_s17 + $0x148] sm:$0xff]  ;;  %v4671_v16 = vld [vmem:[%s10699_s17 + $0x140] sm:$0xff] }
 0x54a   : > { %9063 = vmatprep.subr.mxu1 %v425_v63 }
 0x54b   : > { %9064 = vmatpush1.msra.mxu1 %v424_v10 }
 0x54c   : > { %4791 = vrot.lane.b32.xlu1 %v4670_v6, %s10652_s6  ;;  %v13851_v21 = vpop.permute.xlu1 %4475  ;;  %v13853_v31 = vpop.permute.xlu0 %4473 }
 0x54d   : > { %19746 = vst [vmem:[#allocation256_spill] sm:$0xff] %v13851_v21  ;;  %19747 = vst [vmem:[#allocation216_spill] sm:$0xff] %v13853_v31  ;;  %4789 = vrot.lane.b32.xlu0 %v4669_v30, %s10652_s6 }
 0x550   : > { %4795 = vrot.lane.b32.xlu1 %v4672_v50, %s10652_s6  ;;  %v13859_v12 = vpop.permute.xlu1 %4479  ;;  %v13861_v63 = vpop.permute.xlu0 %4477 }
 0x551   : > { %19748 = vst [vmem:[#allocation213_spill] sm:$0xff] %v13859_v12  ;;  %19749 = vst [vmem:[#allocation302_spill] sm:$0xff] %v13861_v63  ;;  %4793 = vrot.lane.b32.xlu0 %v4671_v16, %s10652_s6  ;;  %v171_v16 = vld [vmem:[%s10699_s17] sm:$0xff] }
 0x554   : > { %4799 = vrot.lane.b32.xlu1 %v13308_v55, %s10652_s6  ;;  %v13866_v45 = vpop.permute.xlu1 %4483  ;;  %v13868_v0 = vpop.permute.xlu0 %4481 }
 0x555   : > { %19750 = vst [vmem:[#allocation299_spill] sm:$0xff] %v13866_v45  ;;  %19751 = vst [vmem:[#allocation214_spill] sm:$0xff] %v13868_v0  ;;  %4797 = vrot.lane.b32.xlu0 %v13311_v18, %s10652_s6 }
 0x558   : > { %5011 = vrot.lane.b32.xlu1 %v13490_v43, %s10653_s7  ;;  %v13874_v6 = vpop.permute.xlu1 %4487  ;;  %v13876_v10 = vpop.permute.xlu0 %4485 }
 0x559   : > { %19752 = vst [vmem:[#allocation174_spill] sm:$0xff] %v13874_v6  ;;  %19753 = vst [vmem:[#allocation171_spill] sm:$0xff] %v13876_v10  ;;  %5009 = vrot.lane.b32.xlu0 %v13493_v32, %s10653_s7 }
 0x55c   : > { %5015 = vrot.lane.b32.xlu1 %v13504_v8, %s10653_s7  ;;  %v13882_v55 = vpop.permute.xlu1 %4491  ;;  %v13884_v30 = vpop.permute.xlu0 %4489 }
 0x55d   : > { %19754 = vst [vmem:[#allocation260_spill] sm:$0xff] %v13882_v55  ;;  %19755 = vst [vmem:[#allocation257_spill] sm:$0xff] %v13884_v30  ;;  %5013 = vrot.lane.b32.xlu0 %v13507_v11, %s10653_s7  ;;  %v172_v11 = vld [vmem:[%s10699_s17 + $0x8] sm:$0xff] }
 0x55e   : > { %8994 = vmatprep.subr.mxu0 %v172_v11 }
 0x55f   : > { %8995 = vmatpush1.msra.mxu0 %v171_v16 }
 0x560   : > { %5019 = vrot.lane.b32.xlu1 %v13518_v9, %s10653_s7  ;;  %v13890_v18 = vpop.permute.xlu1 %4495  ;;  %v13892_v43 = vpop.permute.xlu0 %4493 }
 0x561   : > { %19756 = vst [vmem:[#allocation172_spill] sm:$0xff] %v13890_v18  ;;  %19757 = vst [vmem:[#allocation132_spill] sm:$0xff] %v13892_v43  ;;  %5017 = vrot.lane.b32.xlu0 %v13521_v3, %s10653_s7 }
 0x564   : > { %5023 = vrot.lane.b32.xlu1 %v13532_v62, %s10653_s7  ;;  %v13898_v32 = vpop.permute.xlu1 %4499  ;;  %v13900_v50 = vpop.permute.xlu0 %4497 }
 0x565   : > { %19758 = vst [vmem:[#allocation129_spill] sm:$0xff] %v13898_v32  ;;  %19759 = vst [vmem:[#allocation218_spill] sm:$0xff] %v13900_v50  ;;  %5021 = vrot.lane.b32.xlu0 %v13535_v54, %s10653_s7 }
 0x568   : > { %5027 = vrot.lane.b32.xlu1 %v13546_v7, %s10653_s7  ;;  %v13908_v18 = vpop.permute.xlu1 %4503  ;;  %v13910_v55 = vpop.permute.xlu0 %4501 }
 0x569   : > { %19760 = vst [vmem:[#allocation215_spill] sm:$0xff] %v13908_v18  ;;  %19761 = vst [vmem:[#allocation130_spill] sm:$0xff] %v13910_v55  ;;  %5025 = vrot.lane.b32.xlu0 %v13549_v57, %s10653_s7 }
 0x56c   : > { %5031 = vrot.lane.b32.xlu1 %v13560_v27, %s10653_s7  ;;  %v13916_v32 = vpop.permute.xlu1 %4507  ;;  %v13918_v50 = vpop.permute.xlu0 %4505 }
 0x56d   : > { %19762 = vst [vmem:[#allocation90_spill] sm:$0xff] %v13916_v32  ;;  %19763 = vst [vmem:[#allocation87_spill] sm:$0xff] %v13918_v50  ;;  %5029 = vrot.lane.b32.xlu0 %v13563_v15, %s10653_s7 }
 0x570   : > { %5035 = vrot.lane.b32.xlu1 %v13574_v5, %s10653_s7  ;;  %v13924_v18 = vpop.permute.xlu1 %4719  ;;  %v13926_v11 = vpop.permute.xlu0 %4717 }
 0x571   : > { %5033 = vrot.lane.b32.xlu0 %v13577_v44, %s10653_s7 }
 0x574   : > { %7641 = vrot.lane.b32.xlu1 %v13518_v9, %s10654_s8  ;;  %v13932_v16 = vpop.permute.xlu1 %4723  ;;  %v13934_v32 = vpop.permute.xlu0 %4721 }
 0x575   : > { %7639 = vrot.lane.b32.xlu0 %v13521_v3, %s10654_s8 }
 0x578   : > { %7347 = vrot.lane.b32.xlu1 %v13521_v3, %s10655_s9  ;;  %v13940_v50 = vpop.permute.xlu1 %4727  ;;  %v13942_v55 = vpop.permute.xlu0 %4725 }
 0x579   : > { %7637 = vrot.lane.b32.xlu0 %v13504_v8, %s10654_s8 }
 0x57c   : > { %7345 = vrot.lane.b32.xlu1 %v13504_v8, %s10655_s9  ;;  %v13948_v43 = vpop.permute.xlu1 %4731  ;;  %v13950_v6 = vpop.permute.xlu0 %4729 }
 0x57d   : > { %19764 = vst [vmem:[#allocation176_spill] sm:$0xff] %v13948_v43  ;;  %7349 = vrot.lane.b32.xlu0 %v13518_v9, %s10655_s9 }
 0x580   : > { %7057 = vrot.lane.b32.xlu1 %v13518_v9, %s10656_s10  ;;  %v13956_v30 = vpop.permute.xlu1 %4735  ;;  %v13958_v45 = vpop.permute.xlu0 %4733 }
 0x581   : > { %19765 = vst [vmem:[#allocation173_spill] sm:$0xff] %v13956_v30  ;;  %19766 = vst [vmem:[#allocation88_spill] sm:$0xff] %v13958_v45  ;;  %7055 = vrot.lane.b32.xlu0 %v13521_v3, %s10656_s10 }
 0x584   : > { %6763 = vrot.lane.b32.xlu1 %v13521_v3, %s10657_s11  ;;  %v13964_v10 = vpop.permute.xlu1 %4739  ;;  %v13966_v12 = vpop.permute.xlu0 %4737 }
 0x585   : > { %19767 = vst [vmem:[#allocation48_spill] sm:$0xff] %v13964_v10  ;;  %19768 = vst [vmem:[#allocation45_spill] sm:$0xff] %v13966_v12  ;;  %7053 = vrot.lane.b32.xlu0 %v13504_v8, %s10656_s10  ;;  %v14029_v10 = vld [vmem:[%s18500_s1 + $0x8] sm:$0xff] }
 0x586   : > { %10557 = vmatprep.mubr.msk.f32.mxu0 %vm19120_vm15, %v14029_v10  ;;  %10558 = vmatprep.mubr.msk.f32.mxu1 %vm19120_vm15, %v14029_v10 }
 0x588   : > { %6761 = vrot.lane.b32.xlu1 %v13504_v8, %s10657_s11  ;;  %v13972_v0 = vpop.permute.xlu1 %4743  ;;  %v13974_v21 = vpop.permute.xlu0 %4741 }
 0x589   : > { %19769 = vst [vmem:[#allocation134_spill] sm:$0xff] %v13972_v0  ;;  %19770 = vst [vmem:[#allocation131_spill] sm:$0xff] %v13974_v21  ;;  %6765 = vrot.lane.b32.xlu0 %v13518_v9, %s10657_s11 }
 0x58c   : > { %6473 = vrot.lane.b32.xlu1 %v13518_v9, %s10658_s14  ;;  %v13980_v63 = vpop.permute.xlu1 %4747  ;;  %v13982_v31 = vpop.permute.xlu0 %4745 }
 0x58d   : > { %19771 = vst [vmem:[#allocation46_spill] sm:$0xff] %v13980_v63  ;;  %19772 = vst [vmem:[#allocation3_spill] sm:$0xff] %v13982_v31  ;;  %6471 = vrot.lane.b32.xlu0 %v13521_v3, %s10658_s14  ;;  %v174_v31 = vld [vmem:[%s10699_s17 + $0x18] sm:$0xff] }
 0x58e   : > { %9065 = vmatprep.subr.mxu1 %v174_v31 }
 0x590   : > { %6179 = vrot.lane.b32.xlu1 %v13521_v3, %s10659_s15  ;;  %v13988_v38 = vpop.permute.xlu1 %4751  ;;  %v13990_v48 = vpop.permute.xlu0 %4749 }
 0x591   : > { %19773 = vst [vmem:[#allocation6_spill] sm:$0xff] %v13988_v38  ;;  %19774 = vst [vmem:[#allocation92_spill] sm:$0xff] %v13990_v48  ;;  %6469 = vrot.lane.b32.xlu0 %v13504_v8, %s10658_s14 }
 0x594   : > { %6177 = vrot.lane.b32.xlu1 %v13504_v8, %s10659_s15  ;;  %v13996_v63 = vpop.permute.xlu1 %4755  ;;  %v13998_v0 = vpop.permute.xlu0 %4753 }
 0x595   : > { %19775 = vst [vmem:[#allocation89_spill] sm:$0xff] %v13996_v63  ;;  %19776 = vst [vmem:[#allocation4_spill] sm:$0xff] %v13998_v0  ;;  %6181 = vrot.lane.b32.xlu0 %v13518_v9, %s10659_s15 }
 0x598   : > { %5889 = vrot.lane.b32.xlu1 %v13518_v9, %s10660_s16  ;;  %v14004_v38 = vpop.permute.xlu1 %4759 }
 0x599   : > { %19777 = vst [vmem:[#allocation50_spill] sm:$0xff] %v14004_v38  ;;  %5887 = vrot.lane.b32.xlu0 %v13521_v3, %s10660_s16  ;;  %v14008_v48 = vpop.permute.xlu0 %4757  ;;  %v173_v38 = vld [vmem:[%s10699_s17 + $0x10] sm:$0xff] }
 0x59a   : > { %19778 = vst [vmem:[#allocation47_spill] sm:$0xff] %v14008_v48  ;;  %9066 = vmatpush1.msra.mxu1 %v173_v38 }
 0x59c   : > { %5595 = vrot.lane.b32.xlu1 %v13521_v3, %s10661_s18 }
 0x59d   : > { %5885 = vrot.lane.b32.xlu0 %v13504_v8, %s10660_s16  ;;  %v14014_v63 = vpop.permute.xlu1 %4763 }
 0x59e   : > { %19779 = vst [vmem:[#allocation8_spill] sm:$0xff] %v14014_v63  ;;  %v14016_v0 = vpop.permute.xlu0 %4761 }
 0x59f   : > { %19780 = vst [vmem:[#allocation5_spill] sm:$0xff] %v14016_v0 }
 0x5a0   : > { %5593 = vrot.lane.b32.xlu1 %v13504_v8, %s10661_s18 }
 0x5a1   : > { %5597 = vrot.lane.b32.xlu0 %v13518_v9, %s10661_s18 }
 0x5a2   : > { %v14024_v48 = vpop.permute.xlu1 %4767 }
 0x5a3   : > { %19781 = vst [vmem:[#allocation563_spill] sm:$0xff] %v14024_v48  ;;  %v14031_v63 = vpop.permute.xlu0 %4765 }
 0x5a4   : > { %19782 = vst [vmem:[#allocation564_spill] sm:$0xff] %v14031_v63  ;;  %5305 = vrot.lane.b32.xlu1 %v13518_v9, %s10662_s21 }
 0x5a5   : > { %5303 = vrot.lane.b32.xlu0 %v13521_v3, %s10662_s21 }
 0x5a7   : > { %v14041_v38 = vpop.permute.xlu1 %4771 }
 0x5a8   : > { %19783 = vst [vmem:[#allocation565_spill] sm:$0xff] %v14041_v38  ;;  %7643 = vrot.lane.b32.xlu1 %v13535_v54, %s10654_s8  ;;  %v14045_v31 = vpop.permute.xlu0 %4769 }
 0x5a9   : > { %19784 = vst [vmem:[#allocation566_spill] sm:$0xff] %v14045_v31  ;;  %5301 = vrot.lane.b32.xlu0 %v13504_v8, %s10662_s21 }
 0x5ac   : > { %7351 = vrot.lane.b32.xlu1 %v13535_v54, %s10655_s9  ;;  %v14051_v48 = vpop.permute.xlu1 %4775 }
 0x5ad   : > { %19785 = vst [vmem:[#allocation567_spill] sm:$0xff] %v14051_v48  ;;  %7645 = vrot.lane.b32.xlu0 %v13532_v62, %s10654_s8  ;;  %v14055_v9 = vpop.permute.xlu0 %4773 }
 0x5ae   : > { %19786 = vst [vmem:[#allocation568_spill] sm:$0xff] %v14055_v9 }
 0x5b0   : > { %7647 = vrot.lane.b32.xlu1 %v13549_v57, %s10654_s8 }
 0x5b1   : > { %7353 = vrot.lane.b32.xlu0 %v13532_v62, %s10655_s9  ;;  %v14061_v3 = vpop.permute.xlu1 %4779 }
 0x5b2   : > { %19787 = vst [vmem:[#allocation569_spill] sm:$0xff] %v14061_v3  ;;  %v14063_v38 = vpop.permute.xlu0 %4777 }
 0x5b3   : > { %19788 = vst [vmem:[#allocation570_spill] sm:$0xff] %v14063_v38 }
 0x5b4   : > { %7059 = vrot.lane.b32.xlu1 %v13535_v54, %s10656_s10 }
 0x5b5   : > { %7649 = vrot.lane.b32.xlu0 %v13546_v7, %s10654_s8 }
 0x5b6   : > { %v14069_v8 = vpop.permute.xlu1 %4783 }
 0x5b7   : > { %19789 = vst [vmem:[#allocation571_spill] sm:$0xff] %v14069_v8  ;;  %v14071_v48 = vpop.permute.xlu0 %4781 }
 0x5b8   : > { %19790 = vst [vmem:[#allocation572_spill] sm:$0xff] %v14071_v48  ;;  %7355 = vrot.lane.b32.xlu1 %v13549_v57, %s10655_s9 }
 0x5b9   : > { %7061 = vrot.lane.b32.xlu0 %v13532_v62, %s10656_s10 }
 0x5ba   : > { %v14077_v9 = vpop.permute.xlu1 %4787 }
 0x5bb   : > { %19791 = vst [vmem:[#allocation573_spill] sm:$0xff] %v14077_v9  ;;  %v14079_v3 = vpop.permute.xlu0 %4785 }
 0x5bc   : > { %19792 = vst [vmem:[#allocation574_spill] sm:$0xff] %v14079_v3  ;;  %6767 = vrot.lane.b32.xlu1 %v13535_v54, %s10657_s11 }
 0x5bd   : > { %7357 = vrot.lane.b32.xlu0 %v13546_v7, %s10655_s9 }
 0x5be   : > { %v14085_v38 = vpop.permute.xlu1 %4791 }
 0x5bf   : > { %19793 = vst [vmem:[#allocation575_spill] sm:$0xff] %v14085_v38  ;;  %v14087_v8 = vpop.permute.xlu0 %4789 }
 0x5c0   : > { %19794 = vst [vmem:[#allocation576_spill] sm:$0xff] %v14087_v8  ;;  %7063 = vrot.lane.b32.xlu1 %v13549_v57, %s10656_s10 }
 0x5c1   : > { %6769 = vrot.lane.b32.xlu0 %v13532_v62, %s10657_s11 }
 0x5c2   : > { %v14093_v48 = vpop.permute.xlu1 %4795 }
 0x5c3   : > { %19795 = vst [vmem:[#allocation577_spill] sm:$0xff] %v14093_v48  ;;  %v14095_v9 = vpop.permute.xlu0 %4793 }
 0x5c4   : > { %19796 = vst [vmem:[#allocation578_spill] sm:$0xff] %v14095_v9  ;;  %6475 = vrot.lane.b32.xlu1 %v13535_v54, %s10658_s14 }
 0x5c5   : > { %7065 = vrot.lane.b32.xlu0 %v13546_v7, %s10656_s10 }
 0x5c6   : > { %v14101_v3 = vpop.permute.xlu1 %4799 }
 0x5c7   : > { %19797 = vst [vmem:[#allocation579_spill] sm:$0xff] %v14101_v3  ;;  %v14103_v38 = vpop.permute.xlu0 %4797 }
 0x5c8   : > { %19798 = vst [vmem:[#allocation580_spill] sm:$0xff] %v14103_v38  ;;  %6771 = vrot.lane.b32.xlu1 %v13549_v57, %s10657_s11 }
 0x5c9   : > { %6477 = vrot.lane.b32.xlu0 %v13532_v62, %s10658_s14 }
 0x5ca   : > { %v14109_v8 = vpop.permute.xlu1 %5011 }
 0x5cb   : > { %v14111_v48 = vpop.permute.xlu0 %5009 }
 0x5cc   : > { %6183 = vrot.lane.b32.xlu1 %v13535_v54, %s10659_s15 }
 0x5cd   : > { %6773 = vrot.lane.b32.xlu0 %v13546_v7, %s10657_s11 }
 0x5ce   : > { %v14117_v9 = vpop.permute.xlu1 %5015 }
 0x5cf   : > { %v14119_v3 = vpop.permute.xlu0 %5013 }
 0x5d0   : > { %6479 = vrot.lane.b32.xlu1 %v13549_v57, %s10658_s14 }
 0x5d1   : > { %6185 = vrot.lane.b32.xlu0 %v13532_v62, %s10659_s15 }
 0x5d2   : > { %v14125_v38 = vpop.permute.xlu1 %5019 }
 0x5d3   : > { %v14127_v31 = vpop.permute.xlu0 %5017 }
 0x5d4   : > { %5891 = vrot.lane.b32.xlu1 %v13535_v54, %s10660_s16 }
 0x5d5   : > { %6481 = vrot.lane.b32.xlu0 %v13546_v7, %s10658_s14 }
 0x5d6   : > { %v14133_v63 = vpop.permute.xlu1 %5023 }
 0x5d7   : > { %19799 = vst [vmem:[#allocation581_spill] sm:$0xff] %v14133_v63  ;;  %v14135_v0 = vpop.permute.xlu0 %5021 }
 0x5d8   : > { %6187 = vrot.lane.b32.xlu1 %v13549_v57, %s10659_s15 }
 0x5d9   : > { %5893 = vrot.lane.b32.xlu0 %v13532_v62, %s10660_s16 }
 0x5da   : > { %v14141_v21 = vpop.permute.xlu1 %5027 }
 0x5db   : > { %19800 = vst [vmem:[#allocation582_spill] sm:$0xff] %v14141_v21  ;;  %v14143_v22 = vpop.permute.xlu0 %5025 }
 0x5dc   : > { %19801 = vst [vmem:[#allocation583_spill] sm:$0xff] %v14143_v22  ;;  %5599 = vrot.lane.b32.xlu1 %v13535_v54, %s10661_s18 }
 0x5dd   : > { %6189 = vrot.lane.b32.xlu0 %v13546_v7, %s10659_s15 }
 0x5de   : > { %v14149_v25 = vpop.permute.xlu1 %5031 }
 0x5df   : > { %19802 = vst [vmem:[#allocation584_spill] sm:$0xff] %v14149_v25  ;;  %v14151_v58 = vpop.permute.xlu0 %5029 }
 0x5e0   : > { %19803 = vst [vmem:[#allocation585_spill] sm:$0xff] %v14151_v58  ;;  %5895 = vrot.lane.b32.xlu1 %v13549_v57, %s10660_s16 }
 0x5e1   : > { %5601 = vrot.lane.b32.xlu0 %v13532_v62, %s10661_s18 }
 0x5e2   : > { %v14157_v41 = vpop.permute.xlu1 %5035 }
 0x5e3   : > { %19804 = vst [vmem:[#allocation586_spill] sm:$0xff] %v14157_v41  ;;  %v14159_v30 = vpop.permute.xlu0 %5033 }
 0x5e4   : > { %19805 = vst [vmem:[#allocation587_spill] sm:$0xff] %v14159_v30  ;;  %5307 = vrot.lane.b32.xlu1 %v13535_v54, %s10662_s21 }
 0x5e5   : > { %5897 = vrot.lane.b32.xlu0 %v13546_v7, %s10660_s16 }
 0x5e6   : > { %v14165_v25 = vpop.permute.xlu1 %7641 }
 0x5e7   : > { %v7640_v12 = vpop.permute.xlu0 %7639 }
 0x5e8   : > { %5603 = vrot.lane.b32.xlu1 %v13549_v57, %s10661_s18  ;;  %v7723_v21 = vsel %vm7721_vm14, %v7640_v12, %v14165_v25 }
 0x5e9   : > { %5309 = vrot.lane.b32.xlu0 %v13532_v62, %s10662_s21  ;;  %9006 = vmatprep.subr.mxu0 %v7723_v21 }
 0x5ea   : > { %v7348_v41 = vpop.permute.xlu1 %7347 }
 0x5eb   : > { %v7638_v30 = vpop.permute.xlu0 %7637 }
 0x5ec   : > { %5311 = vrot.lane.b32.xlu1 %v13549_v57, %s10662_s21  ;;  %v7722_v54 = vsel %vm7721_vm14, %v7638_v30, %v7640_v12 }
 0x5ed   : > { %5605 = vrot.lane.b32.xlu0 %v13546_v7, %s10661_s18  ;;  %9007 = vmatpush2.msra.mxu0 %v7722_v54 }
 0x5ee   : > { %v7346_v58 = vpop.permute.xlu1 %7345 }
 0x5ef   : > { %v14178_v20 = vpop.permute.xlu0 %7349  ;;  %v7430_v24 = vsel %vm7429_vm13, %v7346_v58, %v7348_v41 }
 0x5f0   : > { %7651 = vrot.lane.b32.xlu1 %v13563_v15, %s10654_s8  ;;  %v7431_v62 = vsel %vm7429_vm13, %v7348_v41, %v14178_v20 }
 0x5f1   : > { %5313 = vrot.lane.b32.xlu0 %v13546_v7, %s10662_s21  ;;  %9008 = vmatprep.subr.mxu0 %v7431_v62 }
 0x5f2   : > { %9009 = vmatpush2.msra.mxu0 %v7430_v24  ;;  %v14187_v57 = vpop.permute.xlu1 %7057 }
 0x5f3   : > { %v7056_v12 = vpop.permute.xlu0 %7055 }
 0x5f4   : > { %7359 = vrot.lane.b32.xlu1 %v13563_v15, %s10655_s9  ;;  %v7139_v58 = vsel %vm19126_vm12, %v7056_v12, %v14187_v57 }
 0x5f5   : > { %7653 = vrot.lane.b32.xlu0 %v13560_v27, %s10654_s8  ;;  %9010 = vmatprep.subr.mxu0 %v7139_v58 }
 0x5f6   : > { %v6764_v41 = vpop.permute.xlu1 %6763 }
 0x5f7   : > { %v7054_v21 = vpop.permute.xlu0 %7053 }
 0x5f8   : > { %7655 = vrot.lane.b32.xlu1 %v13577_v44, %s10654_s8  ;;  %v7138_v7 = vsel %vm19126_vm12, %v7054_v21, %v7056_v12  ;;  %v14212_v12 = vld [vmem:[%s10699_s17 + $0x68] sm:$0xff]  ;;  %v14224_v21 = vld [vmem:[%s10699_s17 + $0x78] sm:$0xff] }
 0x5f9   : > { %7361 = vrot.lane.b32.xlu0 %v13560_v27, %s10655_s9  ;;  %9011 = vmatpush2.msra.mxu0 %v7138_v7 }
 0x5fa   : > { %v6762_v24 = vpop.permute.xlu1 %6761 }
 0x5fb   : > { %v14200_v30 = vpop.permute.xlu0 %6765  ;;  %v6846_v54 = vsel %vm19109_vm11, %v6762_v24, %v6764_v41 }
 0x5fc   : > { %7067 = vrot.lane.b32.xlu1 %v13563_v15, %s10656_s10  ;;  %v6847_v62 = vsel %vm19109_vm11, %v6764_v41, %v14200_v30  ;;  %vm19112_vm11 = vcmask 834560  }
 0x5fd   : > { %7657 = vrot.lane.b32.xlu0 %v13574_v5, %s10654_s8  ;;  %9012 = vmatprep.subr.mxu0 %v6847_v62  ;;  %v14221_v5 = vld [vmem:[%s10699_s17 + $0x60] sm:$0xff] }
 0x5fe   : > { %9013 = vmatpush2.msra.mxu0 %v6846_v54  ;;  %v14209_v27 = vpop.permute.xlu1 %6473 }
 0x5ff   : > { %v6472_v58 = vpop.permute.xlu0 %6471 }
 0x600   : > { %7363 = vrot.lane.b32.xlu1 %v13577_v44, %s10655_s9  ;;  %v6555_v15 = vsel %vm19111_vm10, %v6472_v58, %v14209_v27  ;;  %v14232_v44 = vld [vmem:[%s10699_s17 + $0x70] sm:$0xff] }
 0x601   : > { %7069 = vrot.lane.b32.xlu0 %v14212_v12, %s10656_s10  ;;  %9014 = vmatprep.subr.mxu0 %v6555_v15 }
 0x602   : > { %v6180_v41 = vpop.permute.xlu1 %6179 }
 0x603   : > { %v6470_v7 = vpop.permute.xlu0 %6469 }
 0x604   : > { %6775 = vrot.lane.b32.xlu1 %v14221_v5, %s10657_s11  ;;  %v6554_v24 = vsel %vm19111_vm10, %v6470_v7, %v6472_v58  ;;  %vm19115_vm10 = vcmask 965632  }
 0x605   : > { %7365 = vrot.lane.b32.xlu0 %v14224_v21, %s10655_s9  ;;  %9015 = vmatpush2.msra.mxu0 %v6554_v24 }
 0x606   : > { %v6178_v54 = vpop.permute.xlu1 %6177 }
 0x607   : > { %v14234_v62 = vpop.permute.xlu0 %6181  ;;  %v6262_v15 = vsel %vm19112_vm11, %v6178_v54, %v6180_v41 }
 0x608   : > { %7071 = vrot.lane.b32.xlu1 %v14232_v44, %s10656_s10  ;;  %v6263_v19 = vsel %vm19112_vm11, %v6180_v41, %v14234_v62  ;;  %vm19116_vm11 = vcmask 973824  }
 0x609   : > { %6777 = vrot.lane.b32.xlu0 %v14212_v12, %s10657_s11  ;;  %9016 = vmatprep.subr.mxu0 %v6263_v19 }
 0x60a   : > { %9017 = vmatpush2.msra.mxu0 %v6262_v15  ;;  %v14243_v58 = vpop.permute.xlu1 %5889 }
 0x60b   : > { %v5888_v7 = vpop.permute.xlu0 %5887 }
 0x60c   : > { %6483 = vrot.lane.b32.xlu1 %v14221_v5, %s10658_s14  ;;  %v5971_v24 = vsel %vm19115_vm10, %v5888_v7, %v14243_v58 }
 0x60d   : > { %7073 = vrot.lane.b32.xlu0 %v14224_v21, %s10656_s10  ;;  %9018 = vmatprep.subr.mxu0 %v5971_v24 }
 0x60e   : > { %v5596_v41 = vpop.permute.xlu1 %5595 }
 0x60f   : > { %v5886_v54 = vpop.permute.xlu0 %5885 }
 0x610   : > { %6779 = vrot.lane.b32.xlu1 %v14232_v44, %s10657_s11  ;;  %v5970_v19 = vsel %vm19115_vm10, %v5886_v54, %v5888_v7  ;;  %vm5385_vm10 = vcmask 982016  }
 0x611   : > { %6485 = vrot.lane.b32.xlu0 %v14212_v12, %s10658_s14  ;;  %9019 = vmatpush2.msra.mxu0 %v5970_v19 }
 0x612   : > { %v5594_v15 = vpop.permute.xlu1 %5593 }
 0x613   : > { %v14256_v46 = vpop.permute.xlu0 %5597  ;;  %v5678_v43 = vsel %vm19116_vm11, %v5594_v15, %v5596_v41 }
 0x614   : > { %6191 = vrot.lane.b32.xlu1 %v14221_v5, %s10659_s15  ;;  %v5679_v24 = vsel %vm19116_vm11, %v5596_v41, %v14256_v46  ;;  %vm5093_vm11 = vcmask 179200  }
 0x615   : > { %6781 = vrot.lane.b32.xlu0 %v14224_v21, %s10657_s11  ;;  %9020 = vmatprep.subr.mxu0 %v5679_v24  ;;  %v5095_v24 = vsel %vm5093_vm11, %v14109_v8, %v14119_v3 }
 0x616   : > { %9021 = vmatpush2.msra.mxu0 %v5678_v43  ;;  %v14265_v7 = vpop.permute.xlu1 %5305 }
 0x617   : > { %v5304_v54 = vpop.permute.xlu0 %5303 }
 0x618   : > { %6487 = vrot.lane.b32.xlu1 %v14232_v44, %s10658_s14  ;;  %v5387_v19 = vsel %vm5385_vm10, %v5304_v54, %v14265_v7 }
 0x619   : > { %6193 = vrot.lane.b32.xlu0 %v14212_v12, %s10659_s15  ;;  %9022 = vmatprep.subr.mxu0 %v5387_v19  ;;  %v5094_v19 = vsel %vm5093_vm11, %v14111_v48, %v14109_v8  ;;  %v14299_v48 = vld [vmem:[%s18500_s1] sm:$0xff]  ;;  %v4515_v8 = vsel %vm4509_vm0, %v13606_v4, %v13633_v56 }
 0x61a   : > { %v7644_v41 = vpop.permute.xlu1 %7643 }
 0x61b   : > { %v5302_v15 = vpop.permute.xlu0 %5301 }
 0x61c   : > { %5899 = vrot.lane.b32.xlu1 %v14221_v5, %s10660_s16  ;;  %v5386_v43 = vsel %vm5385_vm10, %v5302_v15, %v5304_v54  ;;  %v4803_v54 = vsel %vm4801_vm9, %v13924_v18, %v13934_v32  ;;  %v4802_v15 = vsel %vm4801_vm9, %v13926_v11, %v13924_v18  ;;  %v7724_v18 = vsel %vm7721_vm14, %v14165_v25, %v7644_v41 }
 0x61d   : > { %6489 = vrot.lane.b32.xlu0 %v14224_v21, %s10658_s14  ;;  %9023 = vmatpush2.msra.mxu0 %v5386_v43 }
 0x61e   : > { %9024 = vmatprep.subr.mxu0 %v5095_v24  ;;  %v7352_v45 = vpop.permute.xlu1 %7351 }
 0x61f   : > { %v14284_v63 = vpop.permute.xlu0 %7645  ;;  %9025 = vmatpush2.msra.mxu0 %v5094_v19  ;;  %v4514_v19 = vsel %vm4509_vm0, %v13611_v33, %v13606_v4  ;;  %v7432_v33 = vsel %vm7429_vm13, %v14178_v20, %v7352_v45  ;;  %v19806_v4 = vld [vmem:[#allocation496_spill] sm:$0xff] }
 0x620   : > { %9026 = vmatprep.subr.mxu0 %v4803_v54  ;;  %6195 = vrot.lane.b32.xlu1 %v14232_v44, %s10659_s15  ;;  %v7725_v43 = vsel %vm7721_vm14, %v7644_v41, %v14284_v63  ;;  %v4223_v54 = vsel %vm4217_vm1, %v13401_v42, %v13411_v17  ;;  %v4222_v41 = vsel %vm4217_vm1, %v13403_v47, %v13401_v42  ;;  %v19808_v42 = vld [vmem:[#allocation459_spill] sm:$0xff]  ;;  %v19809_v47 = vld [vmem:[#allocation457_spill] sm:$0xff] }
 0x621   : > { %5901 = vrot.lane.b32.xlu0 %v14212_v12, %s10660_s16  ;;  %9027 = vmatpush2.msra.mxu0 %v4802_v15  ;;  %v19807_v15 = vld [vmem:[#allocation494_spill] sm:$0xff]  ;;  %v3638_v20 = vsel %vm3633_vm3, %v13061_v61, %v19809_v47  ;;  %v19813_v61 = vld [vmem:[#allocation380_spill] sm:$0xff] }
 0x622   : > { %9077 = vmatprep.subr.mxu1 %v7725_v43  ;;  %9106 = vmatprep.subr.mxu0 %v4515_v8  ;;  %v14308_v11 = vpop.permute.xlu1 %7647  ;;  %v3931_v43 = vsel %vm3925_vm2, %v19807_v15, %v19806_v4 }
 0x623   : > { %9078 = vmatpush2.msra.mxu1 %v7724_v18  ;;  %v14310_v24 = vpop.permute.xlu0 %7353  ;;  %9029 = vmatmul.mubr.f32.vlgmr.msra.gmra.mxu0 %v14299_v48 }
 0x624   : > { %9107 = vmatpush1.msra.mxu0 %v4514_v19  ;;  %5607 = vrot.lane.b32.xlu1 %v14221_v5, %s10661_s18  ;;  %v7433_v25 = vsel %vm7429_vm13, %v7352_v45, %v14310_v24  ;;  %v3930_v19 = vsel %vm3925_vm2, %v13229_v14, %v19807_v15  ;;  %v19810_v45 = vld [vmem:[#allocation422_spill] sm:$0xff] }
 0x625   : > { %9108 = vmatprep.subr.mxu0 %v4223_v54  ;;  %6197 = vrot.lane.b32.xlu0 %v14224_v21, %s10659_s15  ;;  %v3639_v54 = vsel %vm3633_vm3, %v19809_v47, %v19808_v42 }
 0x626   : > { %9079 = vmatprep.subr.mxu1 %v7433_v25  ;;  %9109 = vmatpush1.msra.mxu0 %v4222_v41  ;;  %v7060_v8 = vpop.permute.xlu1 %7059  ;;  %v19811_v25 = vld [vmem:[#allocation419_spill] sm:$0xff] }
 0x627   : > { %9080 = vmatpush2.msra.mxu1 %v7432_v33  ;;  %9110 = vmatprep.subr.mxu0 %v3931_v43  ;;  %v14333_v18 = vpop.permute.xlu0 %7649  ;;  %v3347_v14 = vsel %vm3341_vm4, %v19811_v25, %v19810_v45  ;;  %v3346_v15 = vsel %vm3341_vm4, %v19687_v28, %v19811_v25  ;;  %v19812_v43 = vld [vmem:[#allocation383_spill] sm:$0xff]  ;;  %v7140_v28 = vsel %vm19126_vm12, %v14187_v57, %v7060_v8 }
 0x628   : > { %9111 = vmatpush1.msra.mxu0 %v3930_v19  ;;  %5903 = vrot.lane.b32.xlu1 %v14232_v44, %s10660_s16  ;;  %v3055_v19 = vsel %vm19125_vm5, %v19813_v61, %v19812_v43 }
 0x629   : > { %9112 = vmatprep.subr.mxu0 %v3639_v54  ;;  %5609 = vrot.lane.b32.xlu0 %v14212_v12, %s10661_s18  ;;  %v19814_v54 = vld [vmem:[#allocation344_spill] sm:$0xff] }
 0x62a   : > { %9113 = vmatpush1.msra.mxu0 %v3638_v20  ;;  %v14351_v41 = vpop.permute.xlu1 %7355  ;;  %10559 = vmatprep.mubr.msk.f32.mxu0 %vm19120_vm15, %v14029_v10  ;;  %v3054_v10 = vsel %vm19125_vm5, %v19692_v34, %v19813_v61  ;;  %v19815_v20 = vld [vmem:[#allocation341_spill] sm:$0xff]  ;;  %v19816_v34 = vld [vmem:[#allocation304_spill] sm:$0xff]  ;;  %vm19822_vm15 = vcmask 752640  }
 0x62b   : > { %9114 = vmatprep.subr.mxu0 %v3347_v14  ;;  %v14355_v33 = vpop.permute.xlu0 %7061  ;;  %v19817_v61 = vld [vmem:[#allocation301_spill] sm:$0xff] }
 0x62c   : > { %9115 = vmatpush1.msra.mxu0 %v3346_v15  ;;  %5315 = vrot.lane.b32.xlu1 %v14221_v5, %s10662_s21  ;;  %v7141_v47 = vsel %vm19126_vm12, %v7060_v8, %v14355_v33  ;;  %v2763_v5 = vsel %vm19122_vm6, %v19815_v20, %v19814_v54  ;;  %v2762_v15 = vsel %vm19122_vm6, %v19699_v51, %v19815_v20  ;;  %v19818_v8 = vld [vmem:[#allocation262_spill] sm:$0xff]  ;;  %v19819_v51 = vld [vmem:[#allocation259_spill] sm:$0xff]  ;;  %vm19824_vm6 = vmmov %vm19822_vm15 }
 0x62d   : > { %9116 = vmatprep.subr.mxu0 %v3055_v19  ;;  %5905 = vrot.lane.b32.xlu0 %v14224_v21, %s10660_s16  ;;  %v2471_v19 = vsel %vm19121_vm7, %v19817_v61, %v19816_v34  ;;  %v2470_v57 = vsel %vm19121_vm7, %v19704_v35, %v19817_v61  ;;  %v2178_v20 = vsel %vm19123_vm8, %v19711_v37, %v19819_v51  ;;  %vm19823_vm7 = vcmask 818176   ;;  %v14415_v37 = vld [vmem:[%s10699_s17 + $0x80] sm:$0xff] }
 0x62e   : > { %9081 = vmatprep.subr.mxu1 %v7141_v47  ;;  %9117 = vmatpush1.msra.mxu0 %v3054_v10  ;;  %v6768_v25 = vpop.permute.xlu1 %6767  ;;  %v2179_v47 = vsel %vm19123_vm8, %v19819_v51, %v19818_v8  ;;  %vm19828_vm8 = vcmask 883712  }
 0x62f   : > { %9082 = vmatpush2.msra.mxu1 %v7140_v28  ;;  %9118 = vmatprep.subr.mxu0 %v2763_v5  ;;  %v14377_v14 = vpop.permute.xlu0 %7357  ;;  %v19821_v5 = vld [vmem:[#allocation217_spill] sm:$0xff] }
 0x630   : > { %9119 = vmatpush1.msra.mxu0 %v2762_v15  ;;  %5611 = vrot.lane.b32.xlu1 %v14232_v44, %s10661_s18  ;;  %v1886_v61 = vsel %vm19824_vm6, %v19718_v36, %v19821_v5  ;;  %vm19829_vm6 = vmmov %vm19828_vm8 }
 0x631   : > { %9120 = vmatprep.subr.mxu0 %v2471_v19  ;;  %5317 = vrot.lane.b32.xlu0 %v14212_v12, %s10662_s21  ;;  %v19820_v12 = vld [vmem:[#allocation220_spill] sm:$0xff] }
 0x632   : > { %9121 = vmatpush1.msra.mxu0 %v2470_v57  ;;  %v14395_v10 = vpop.permute.xlu1 %7063  ;;  %v1887_v15 = vsel %vm19822_vm15, %v19821_v5, %v19820_v12  ;;  %vm19825_vm15 = vmmov %vm19823_vm7  ;;  %v19826_v57 = vld [vmem:[#allocation178_spill] sm:$0xff]  ;;  %v19830_v5 = vld [vmem:[#allocation136_spill] sm:$0xff] }
 0x633   : > { %9122 = vmatprep.subr.mxu0 %v2179_v47  ;;  %v14397_v28 = vpop.permute.xlu0 %6769  ;;  %v6848_v19 = vsel %vm19825_vm15, %v14200_v30, %v6768_v25  ;;  %vm19836_vm15 = vcmask 900096  }
 0x634   : > { %9123 = vmatpush1.msra.mxu0 %v2178_v20  ;;  %5319 = vrot.lane.b32.xlu1 %v14232_v44, %s10662_s21  ;;  %v6849_v35 = vsel %vm19823_vm7, %v6768_v25, %v14397_v28  ;;  %v19827_v44 = vld [vmem:[#allocation175_spill] sm:$0xff]  ;;  %vm19832_vm7 = vcmask 891904   ;;  %v19834_v25 = vld [vmem:[#allocation94_spill] sm:$0xff] }
 0x635   : > { %9124 = vmatprep.subr.mxu0 %v1887_v15  ;;  %5613 = vrot.lane.b32.xlu0 %v14224_v21, %s10661_s18  ;;  %v1595_v51 = vsel %vm19828_vm8, %v19827_v44, %v19826_v57  ;;  %v1594_v36 = vsel %vm19829_vm6, %v19723_v13, %v19827_v44  ;;  %v19831_v15 = vld [vmem:[#allocation133_spill] sm:$0xff]  ;;  %vm19833_vm8 = vmmov %vm19832_vm7  ;;  %v19835_v13 = vld [vmem:[#allocation91_spill] sm:$0xff] }
 0x636   : > { %9083 = vmatprep.subr.mxu1 %v6849_v35  ;;  %9125 = vmatpush1.msra.mxu0 %v1886_v61  ;;  %v6476_v47 = vpop.permute.xlu1 %6475  ;;  %v1303_v35 = vsel %vm19832_vm7, %v19831_v15, %v19830_v5  ;;  %v1302_v30 = vsel %vm19833_vm8, %v19730_v26, %v19831_v15  ;;  %v1011_v61 = vsel %vm19836_vm15, %v19835_v13, %v19834_v25  ;;  %v14441_v44 = vld [vmem:[%s10699_s17 + $0x88] sm:$0xff]  ;;  %vm19837_vm6 = vmmov %vm19836_vm15  ;;  %vm19840_vm7 = vcmask 1031168  }
 0x637   : > { %9084 = vmatpush2.msra.mxu1 %v6848_v19  ;;  %9126 = vmatprep.subr.mxu0 %v1595_v51  ;;  %v14422_v20 = vpop.permute.xlu0 %7065  ;;  %vm19841_vm8 = vcmask 826368   ;;  %vm19842_vm15 = vmmov %vm19840_vm7 }
 0x638   : > { %9127 = vmatpush1.msra.mxu0 %v1594_v36  ;;  %7659 = vrot.lane.b32.xlu1 %v14415_v37, %s10654_s8  ;;  %v19838_v36 = vld [vmem:[#allocation52_spill] sm:$0xff] }
 0x639   : > { %9128 = vmatprep.subr.mxu0 %v1303_v35  ;;  %5321 = vrot.lane.b32.xlu0 %v14224_v21, %s10662_s21  ;;  %v1010_v21 = vsel %vm19837_vm6, %v19737_v49, %v19835_v13  ;;  %v19839_v35 = vld [vmem:[#allocation49_spill] sm:$0xff]  ;;  %vm19843_vm6 = vmmov %vm19841_vm8 }
 0x63a   : > { %9129 = vmatpush1.msra.mxu0 %v1302_v30  ;;  %v6772_v19 = vpop.permute.xlu1 %6771  ;;  %v719_v26 = vsel %vm19840_vm7, %v19839_v35, %v19838_v36  ;;  %v718_v30 = vsel %vm19842_vm15, %v19740_v60, %v19839_v35  ;;  %v14458_v49 = vld [vmem:[%s10699_s17 + $0x90] sm:$0xff]  ;;  %v6556_v13 = vsel %vm19843_vm6, %v14209_v27, %v6476_v47  ;;  %vm19846_vm7 = vcmask 1039360   ;;  %v176_v36 = vld [vmem:[%s10699_s17 + $0x28] sm:$0xff]  ;;  %v175_v35 = vld [vmem:[%s10699_s17 + $0x20] sm:$0xff] }
 0x63b   : > { %9130 = vmatprep.subr.mxu0 %v1011_v61  ;;  %v6478_v51 = vpop.permute.xlu0 %6477  ;;  %v19844_v61 = vld [vmem:[#allocation10_spill] sm:$0xff]  ;;  %vm19848_vm15 = vcmask 834560  }
 0x63c   : > { %9131 = vmatpush1.msra.mxu0 %v1010_v21  ;;  %7367 = vrot.lane.b32.xlu1 %v14415_v37, %s10655_s9  ;;  %v6557_v15 = vsel %vm19841_vm8, %v6476_v47, %v6478_v51  ;;  %v19845_v21 = vld [vmem:[#allocation7_spill] sm:$0xff]  ;;  %vm19847_vm8 = vmmov %vm19846_vm7  ;;  %v14480_v47 = vld [vmem:[%s10699_s17 + $0x98] sm:$0xff] }
 0x63d   : > { %9132 = vmatprep.subr.mxu0 %v719_v26  ;;  %7661 = vrot.lane.b32.xlu0 %v14441_v44, %s10654_s8  ;;  %v427_v22 = vsel %vm19846_vm7, %v19845_v21, %v19844_v61  ;;  %v426_v60 = vsel %vm19847_vm8, %v19744_v29, %v19845_v21  ;;  %v7726_v29 = vsel %vm7721_vm14, %v14284_v63, %v14308_v11  ;;  %vm19849_vm6 = vmmov %vm19848_vm15  ;;  %vm19850_vm7 = vcmask 818176  }
 0x63e   : > { %9085 = vmatprep.subr.mxu1 %v6557_v15  ;;  %9133 = vmatpush1.msra.mxu0 %v718_v30  ;;  %v6184_v26 = vpop.permute.xlu1 %6183  ;;  %vm19851_vm8 = vcmask 826368  }
 0x63f   : > { %9086 = vmatpush2.msra.mxu1 %v6556_v13  ;;  %9134 = vmatprep.subr.mxu0 %v427_v22  ;;  %v14466_v25 = vpop.permute.xlu0 %6773  ;;  %v7727_v22 = vsel %vm7721_vm14, %v14308_v11, %v14333_v18  ;;  %v7434_v13 = vsel %vm7429_vm13, %v14310_v24, %v14351_v41  ;;  %v6264_v63 = vsel %vm19849_vm6, %v14234_v62, %v6184_v26  ;;  %vm19853_vm6 = vmmov %vm19851_vm8 }
 0x640   : > { %9135 = vmatpush1.msra.mxu0 %v426_v60  ;;  %7663 = vrot.lane.b32.xlu1 %v14458_v49, %s10654_s8  ;;  %v7143_v11 = vsel %vm19126_vm12, %v14395_v10, %v14422_v20  ;;  %v6851_v24 = vsel %vm19850_vm7, %v6772_v19, %v14466_v25 }
 0x641   : > { %9136 = vmatprep.subr.mxu0 %v176_v36  ;;  %7369 = vrot.lane.b32.xlu0 %v14441_v44, %s10655_s9  ;;  %v7435_v36 = vsel %vm7429_vm13, %v14351_v41, %v14377_v14 }
 0x642   : > { %9137 = vmatpush1.msra.mxu0 %v175_v35  ;;  %v6480_v27 = vpop.permute.xlu1 %6479  ;;  %v7142_v35 = vsel %vm19126_vm12, %v14355_v33, %v14395_v10 }
 0x643   : > { %9148 = vmatprep.subr.mxu0 %v7727_v22  ;;  %v6186_v15 = vpop.permute.xlu0 %6185  ;;  %v6558_v10 = vsel %vm19853_vm6, %v6478_v51, %v6480_v27 }
 0x644   : > { %9149 = vmatpush2.msra.mxu0 %v7726_v29  ;;  %7075 = vrot.lane.b32.xlu1 %v14415_v37, %s10656_s10  ;;  %v6265_v30 = vsel %vm19848_vm15, %v6184_v26, %v6186_v15  ;;  %vm19852_vm15 = vmmov %vm19850_vm7  ;;  %vm19854_vm7 = vcmask 965632  }
 0x645   : > { %9150 = vmatprep.subr.mxu0 %v7435_v36  ;;  %7665 = vrot.lane.b32.xlu0 %v14480_v47, %s10654_s8  ;;  %v6850_v41 = vsel %vm19852_vm15, %v14397_v28, %v6772_v19  ;;  %vm19856_vm15 = vcmask 834560  }
 0x646   : > { %9087 = vmatprep.subr.mxu1 %v6265_v30  ;;  %9151 = vmatpush2.msra.mxu0 %v7434_v13  ;;  %v5892_v21 = vpop.permute.xlu1 %5891  ;;  %vm19857_vm6 = vmmov %vm19856_vm15 }
 0x647   : > { %9088 = vmatpush2.msra.mxu1 %v6264_v63  ;;  %9152 = vmatprep.subr.mxu0 %v7143_v11  ;;  %v14501_v60 = vpop.permute.xlu0 %6481 }
 0x648   : > { %9153 = vmatpush2.msra.mxu0 %v7142_v35  ;;  %7371 = vrot.lane.b32.xlu1 %v14458_v49, %s10655_s9  ;;  %v6559_v62 = vsel %vm19851_vm8, %v6480_v27, %v14501_v60  ;;  %vm19855_vm8 = vmmov %vm19854_vm7 }
 0x649   : > { %9154 = vmatprep.subr.mxu0 %v6851_v24  ;;  %7077 = vrot.lane.b32.xlu0 %v14441_v44, %s10656_s10  ;;  %v5972_v29 = vsel %vm19855_vm8, %v14243_v58, %v5892_v21 }
 0x64a   : > { %9155 = vmatpush2.msra.mxu0 %v6850_v41  ;;  %v6188_v26 = vpop.permute.xlu1 %6187 }
 0x64b   : > { %9156 = vmatprep.subr.mxu0 %v6559_v62  ;;  %v5894_v33 = vpop.permute.xlu0 %5893  ;;  %v6266_v27 = vsel %vm19857_vm6, %v6186_v15, %v6188_v26 }
 0x64c   : > { %9157 = vmatpush2.msra.mxu0 %v6558_v10  ;;  %6783 = vrot.lane.b32.xlu1 %v14415_v37, %s10657_s11  ;;  %v5973_v22 = vsel %vm19854_vm7, %v5892_v21, %v5894_v33  ;;  %vm19858_vm7 = vcmask 973824   ;;  %v5096_v10 = vsel %vm5093_vm11, %v14119_v3, %v14117_v9 }
 0x64d   : > { %7373 = vrot.lane.b32.xlu0 %v14480_v47, %s10655_s9  ;;  %9089 = vmatprep.subr.mxu1 %v5973_v22  ;;  %vm19859_vm8 = vmmov %vm19858_vm7 }
 0x64e   : > { %9090 = vmatpush2.msra.mxu1 %v5972_v29  ;;  %v5600_v28 = vpop.permute.xlu1 %5599  ;;  %v4804_v29 = vsel %vm4801_vm9, %v13934_v32, %v13932_v16  ;;  %v4516_v32 = vsel %vm4509_vm0, %v13633_v56, %v13628_v40 }
 0x64f   : > { %v14524_v19 = vpop.permute.xlu0 %6189  ;;  %v5680_v13 = vsel %vm19859_vm8, %v14256_v46, %v5600_v28  ;;  %vm19862_vm8 = vmmov %vm19858_vm7 }
 0x650   : > { %7079 = vrot.lane.b32.xlu1 %v14458_v49, %s10656_s10  ;;  %v6267_v51 = vsel %vm19856_vm15, %v6188_v26, %v14524_v19  ;;  %vm19860_vm15 = vcmask 965632   ;;  %v5097_v26 = vsel %vm5093_vm11, %v14117_v9, %v14127_v31 }
 0x651   : > { %6785 = vrot.lane.b32.xlu0 %v14441_v44, %s10657_s11  ;;  %9158 = vmatprep.subr.mxu0 %v6267_v51  ;;  %vm19861_vm6 = vmmov %vm19860_vm15 }
 0x652   : > { %9159 = vmatpush2.msra.mxu0 %v6266_v27  ;;  %v5896_v36 = vpop.permute.xlu1 %5895  ;;  %v4225_v27 = vsel %vm4217_vm1, %v13409_v1, %v13419_v52 }
 0x653   : > { %v5602_v30 = vpop.permute.xlu0 %5601  ;;  %v5974_v21 = vsel %vm19861_vm6, %v5894_v33, %v5896_v36 }
 0x654   : > { %6491 = vrot.lane.b32.xlu1 %v14415_v37, %s10658_s14  ;;  %v5681_v58 = vsel %vm19858_vm7, %v5600_v28, %v5602_v30  ;;  %v4517_v28 = vsel %vm4509_vm0, %v13628_v40, %v13659_v2  ;;  %v4224_v40 = vsel %vm4217_vm1, %v13411_v17, %v13409_v1  ;;  %v5098_v1 = vsel %vm5093_vm11, %v14127_v31, %v14125_v38 }
 0x655   : > { %7081 = vrot.lane.b32.xlu0 %v14480_v47, %s10656_s10  ;;  %9091 = vmatprep.subr.mxu1 %v5681_v58  ;;  %v5099_v58 = vsel %vm5093_vm11, %v14125_v38, %v14135_v0 }
 0x656   : > { %9092 = vmatpush2.msra.mxu1 %v5680_v13  ;;  %v5308_v63 = vpop.permute.xlu1 %5307  ;;  %v19863_v13 = vld [vmem:[#allocation498_spill] sm:$0xff] }
 0x657   : > { %v14540_v11 = vpop.permute.xlu0 %5897  ;;  %v5388_v62 = vsel %vm5385_vm10, %v14265_v7, %v5308_v63  ;;  %v4805_v7 = vsel %vm4801_vm9, %v13932_v16, %v13942_v55 }
 0x658   : > { %6787 = vrot.lane.b32.xlu1 %v14458_v49, %s10657_s11  ;;  %v5975_v15 = vsel %vm19860_vm15, %v5896_v36, %v14540_v11  ;;  %vm19873_vm15 = vcmask 490496  }
 0x659   : > { %6493 = vrot.lane.b32.xlu0 %v14441_v44, %s10658_s14  ;;  %9160 = vmatprep.subr.mxu0 %v5975_v15  ;;  %vm19876_vm6 = vmmov %vm19873_vm15 }
 0x65a   : > { %9161 = vmatpush2.msra.mxu0 %v5974_v21  ;;  %v5604_v35 = vpop.permute.xlu1 %5603  ;;  %v4807_v21 = vsel %vm4801_vm9, %v13940_v50, %v13950_v6 }
 0x65b   : > { %v5310_v24 = vpop.permute.xlu0 %5309  ;;  %v5682_v9 = vsel %vm19862_vm8, %v5602_v30, %v5604_v35 }
 0x65c   : > { %6199 = vrot.lane.b32.xlu1 %v14415_v37, %s10659_s15  ;;  %v5389_v46 = vsel %vm5385_vm10, %v5308_v63, %v5310_v24  ;;  %v19864_v63 = vld [vmem:[#allocation495_spill] sm:$0xff] }
 0x65d   : > { %6789 = vrot.lane.b32.xlu0 %v14480_v47, %s10657_s11  ;;  %9093 = vmatprep.subr.mxu1 %v5389_v46  ;;  %v3933_v15 = vsel %vm3925_vm2, %v19864_v63, %v19863_v13  ;;  %v3932_v17 = vsel %vm3925_vm2, %v19806_v4, %v19864_v63  ;;  %v4806_v4 = vsel %vm4801_vm9, %v13942_v55, %v13940_v50 }
 0x65e   : > { %9094 = vmatpush2.msra.mxu1 %v5388_v62  ;;  %v5312_v41 = vpop.permute.xlu1 %5311  ;;  %v4518_v50 = vsel %vm4509_vm0, %v13659_v2, %v13657_v39 }
 0x65f   : > { %v14559_v33 = vpop.permute.xlu0 %5605  ;;  %9095 = vmatprep.subr.mxu1 %v5097_v26  ;;  %v5390_v36 = vsel %vm5385_vm10, %v5310_v24, %v5312_v41  ;;  %v19866_v24 = vld [vmem:[#allocation458_spill] sm:$0xff]  ;;  %v19868_v26 = vld [vmem:[#allocation421_spill] sm:$0xff] }
 0x660   : > { %9096 = vmatpush2.msra.mxu1 %v5096_v10  ;;  %6495 = vrot.lane.b32.xlu1 %v14458_v49, %s10658_s14  ;;  %v5683_v22 = vsel %vm19858_vm7, %v5604_v35, %v14559_v33  ;;  %v19865_v35 = vld [vmem:[#allocation461_spill] sm:$0xff]  ;;  %v3640_v46 = vsel %vm3633_vm3, %v19808_v42, %v19866_v24  ;;  %v3348_v55 = vsel %vm3341_vm4, %v19810_v45, %v19868_v26  ;;  %vm19879_vm7 = vcmask 736256  }
 0x661   : > { %6201 = vrot.lane.b32.xlu0 %v14441_v44, %s10659_s15  ;;  %9097 = vmatprep.subr.mxu1 %v4805_v7  ;;  %v3641_v38 = vsel %vm3633_vm3, %v19866_v24, %v19865_v35  ;;  %v4519_v7 = vsel %vm4509_vm0, %v13657_v39, %v13684_v53  ;;  %v4227_v39 = vsel %vm4217_vm1, %v13417_v59, %v13427_v23  ;;  %vm19882_vm8 = vmmov %vm19879_vm7 }
 0x662   : > { %9162 = vmatprep.subr.mxu0 %v5683_v22  ;;  %9098 = vmatpush2.msra.mxu1 %v4804_v29  ;;  %v14577_v3 = vpop.permute.xlu1 %7651  ;;  %v19869_v22 = vld [vmem:[#allocation385_spill] sm:$0xff]  ;;  %v19870_v29 = vld [vmem:[#allocation382_spill] sm:$0xff]  ;;  %v4226_v45 = vsel %vm4217_vm1, %v13419_v52, %v13417_v59 }
 0x663   : > { %9163 = vmatpush2.msra.mxu0 %v5682_v9  ;;  %v14582_v51 = vpop.permute.xlu0 %5313  ;;  %9177 = vmatprep.subr.mxu1 %v4517_v28  ;;  %v3057_v9 = vsel %vm19125_vm5, %v19870_v29, %v19869_v22  ;;  %v3056_v2 = vsel %vm19125_vm5, %v19812_v43, %v19870_v29 }
 0x664   : > { %9100 = vmatmul.mubr.f32.vlgmr.msra.gmra.mxu1 %v14299_v48  ;;  %5907 = vrot.lane.b32.xlu1 %v14415_v37, %s10660_s16  ;;  %v5391_v16 = vsel %vm5385_vm10, %v5312_v41, %v14582_v51  ;;  %v19867_v41 = vld [vmem:[#allocation424_spill] sm:$0xff] }
 0x665   : > { %9178 = vmatpush1.msra.mxu1 %v4516_v32  ;;  %6497 = vrot.lane.b32.xlu0 %v14480_v47, %s10658_s14  ;;  %v3349_v10 = vsel %vm3341_vm4, %v19868_v26, %v19867_v41  ;;  %v19871_v32 = vld [vmem:[#allocation346_spill] sm:$0xff] }
 0x666   : > { %9164 = vmatprep.subr.mxu0 %v5391_v16  ;;  %9179 = vmatprep.subr.mxu1 %v4225_v27  ;;  %v14601_v56 = vpop.permute.xlu1 %7359  ;;  %v19872_v16 = vld [vmem:[#allocation343_spill] sm:$0xff] }
 0x667   : > { %9165 = vmatpush2.msra.mxu0 %v5390_v36  ;;  %9180 = vmatpush1.msra.mxu1 %v4224_v40  ;;  %v14603_v30 = vpop.permute.xlu0 %7653  ;;  %v2765_v27 = vsel %vm19873_vm15, %v19872_v16, %v19871_v32  ;;  %v19874_v36 = vld [vmem:[#allocation500_spill] sm:$0xff]  ;;  %v19875_v40 = vld [vmem:[#allocation497_spill] sm:$0xff]  ;;  %v2764_v43 = vsel %vm19876_vm6, %v19814_v54, %v19872_v16  ;;  %v19880_v54 = vld [vmem:[#allocation463_spill] sm:$0xff]  ;;  %vm19885_vm15 = vcmask 744448  }
 0x668   : > { %9166 = vmatprep.subr.mxu0 %v5099_v58  ;;  %9181 = vmatprep.subr.mxu1 %v3933_v15  ;;  %v3935_v58 = vsel %vm3925_vm2, %v19875_v40, %v19874_v36  ;;  %v3934_v59 = vsel %vm3925_vm2, %v19863_v13, %v19875_v40  ;;  %v19877_v15 = vld [vmem:[#allocation306_spill] sm:$0xff]  ;;  %vm19888_vm6 = vmmov %vm19885_vm15 }
 0x669   : > { %9167 = vmatpush2.msra.mxu0 %v5098_v1  ;;  %9182 = vmatpush1.msra.mxu1 %v3932_v17  ;;  %v19878_v1 = vld [vmem:[#allocation303_spill] sm:$0xff] }
 0x66a   : > { %6203 = vrot.lane.b32.xlu1 %v14458_v49, %s10659_s15  ;;  %5909 = vrot.lane.b32.xlu0 %v14441_v44, %s10660_s16  ;;  %v14627_v31 = vpop.permute.xlu1 %7655  ;;  %v2473_v17 = vsel %vm19879_vm7, %v19878_v1, %v19877_v15  ;;  %v2472_v13 = vsel %vm19882_vm8, %v19816_v34, %v19878_v1  ;;  %vm19891_vm7 = vcmask 752640  }
 0x66b   : > { %9168 = vmatprep.subr.mxu0 %v4807_v21  ;;  %9183 = vmatprep.subr.mxu1 %v3641_v38  ;;  %v14635_v62 = vpop.permute.xlu0 %7361  ;;  %v19881_v21 = vld [vmem:[#allocation460_spill] sm:$0xff]  ;;  %vm19894_vm8 = vmmov %vm19891_vm7 }
 0x66c   : > { %9169 = vmatpush2.msra.mxu0 %v4806_v4  ;;  %9184 = vmatpush1.msra.mxu1 %v3640_v46  ;;  %v3643_v24 = vsel %vm3633_vm3, %v19881_v21, %v19880_v54  ;;  %v3642_v38 = vsel %vm3633_vm3, %v19865_v35, %v19881_v21  ;;  %v19883_v4 = vld [vmem:[#allocation264_spill] sm:$0xff]  ;;  %v19884_v46 = vld [vmem:[#allocation261_spill] sm:$0xff] }
 0x66d   : > { %9185 = vmatprep.subr.mxu1 %v3349_v10  ;;  %9248 = vmatprep.subr.mxu0 %v4519_v7  ;;  %v2181_v26 = vsel %vm19885_vm15, %v19884_v46, %v19883_v4  ;;  %v19886_v7 = vld [vmem:[#allocation426_spill] sm:$0xff]  ;;  %v2180_v34 = vsel %vm19888_vm6, %v19818_v8, %v19884_v46  ;;  %v19892_v8 = vld [vmem:[#allocation387_spill] sm:$0xff]  ;;  %vm19897_vm15 = vcmask 883712   ;;  %v19899_v21 = vld [vmem:[#allocation345_spill] sm:$0xff]  ;;  %vm19900_vm6 = vcmask 490496  }
 0x66e   : > { %9171 = vmatmul.mubr.f32.vlgmr.msra.gmra.mxu0 %v14299_v48  ;;  %9186 = vmatpush1.msra.mxu1 %v3348_v55  ;;  %v14650_v42 = vpop.permute.xlu1 %7067  ;;  %v19887_v55 = vld [vmem:[#allocation423_spill] sm:$0xff] }
 0x66f   : > { %9249 = vmatpush1.msra.mxu0 %v4518_v50  ;;  %5615 = vrot.lane.b32.xlu1 %v14415_v37, %s10661_s18  ;;  %v14657_v28 = vpop.permute.xlu0 %7657  ;;  %v3351_v50 = vsel %vm3341_vm4, %v19887_v55, %v19886_v7  ;;  %v3350_v35 = vsel %vm3341_vm4, %v19867_v41, %v19887_v55  ;;  %v19907_v55 = vld [vmem:[#allocation305_spill] sm:$0xff] }
 0x670   : > { %6205 = vrot.lane.b32.xlu0 %v14480_v47, %s10659_s15  ;;  %9187 = vmatprep.subr.mxu1 %v3057_v9  ;;  %v19889_v9 = vld [vmem:[#allocation222_spill] sm:$0xff] }
 0x671   : > { %9250 = vmatprep.subr.mxu0 %v4227_v39  ;;  %9188 = vmatpush1.msra.mxu1 %v3056_v2  ;;  %v19890_v39 = vld [vmem:[#allocation219_spill] sm:$0xff] }
 0x672   : > { %9251 = vmatpush1.msra.mxu0 %v4226_v45  ;;  %9189 = vmatprep.subr.mxu1 %v2765_v27  ;;  %v14679_v63 = vpop.permute.xlu1 %7363  ;;  %v1889_v2 = vsel %vm19891_vm7, %v19890_v39, %v19889_v9  ;;  %v19893_v45 = vld [vmem:[#allocation384_spill] sm:$0xff]  ;;  %v1888_v41 = vsel %vm19894_vm8, %v19820_v12, %v19890_v39  ;;  %vm19901_vm7 = vmmov %vm19897_vm15 }
 0x673   : > { %9252 = vmatprep.subr.mxu0 %v3935_v58  ;;  %9190 = vmatpush1.msra.mxu1 %v2764_v43  ;;  %v14684_v52 = vpop.permute.xlu0 %7069  ;;  %v3059_v16 = vsel %vm19125_vm5, %v19893_v45, %v19892_v8  ;;  %v3058_v40 = vsel %vm19125_vm5, %v19869_v22, %v19893_v45  ;;  %v19895_v58 = vld [vmem:[#allocation180_spill] sm:$0xff]  ;;  %v19896_v43 = vld [vmem:[#allocation177_spill] sm:$0xff]  ;;  %vm19902_vm8 = vmmov %vm19900_vm6 }
 0x674   : > { %9253 = vmatpush1.msra.mxu0 %v3934_v59  ;;  %5911 = vrot.lane.b32.xlu1 %v14458_v49, %s10660_s16  ;;  %v1597_v59 = vsel %vm19897_vm15, %v19896_v43, %v19895_v58  ;;  %v2766_v22 = vsel %vm19902_vm8, %v19871_v32, %v19899_v21  ;;  %vm19905_vm15 = vcmask 891904   ;;  %v19911_v39 = vld [vmem:[#allocation96_spill] sm:$0xff]  ;;  %v19914_v45 = vld [vmem:[#allocation266_spill] sm:$0xff] }
 0x675   : > { %5617 = vrot.lane.b32.xlu0 %v14441_v44, %s10661_s18  ;;  %9191 = vmatprep.subr.mxu1 %v2473_v17  ;;  %v19898_v17 = vld [vmem:[#allocation348_spill] sm:$0xff] }
 0x676   : > { %9254 = vmatprep.subr.mxu0 %v3643_v24  ;;  %9192 = vmatpush1.msra.mxu1 %v2472_v13  ;;  %v14705_v10 = vpop.permute.xlu1 %6775  ;;  %v2767_v12 = vsel %vm19900_vm6, %v19899_v21, %v19898_v17  ;;  %v1596_v24 = vsel %vm19901_vm7, %v19826_v57, %v19896_v43  ;;  %v19903_v13 = vld [vmem:[#allocation138_spill] sm:$0xff]  ;;  %v19906_v57 = vld [vmem:[#allocation308_spill] sm:$0xff]  ;;  %vm19908_vm6 = vcmask 736256   ;;  %vm19909_vm7 = vmmov %vm19905_vm15 }
 0x677   : > { %9255 = vmatpush1.msra.mxu0 %v3642_v38  ;;  %9193 = vmatprep.subr.mxu1 %v2181_v26  ;;  %v14713_v29 = vpop.permute.xlu0 %7365  ;;  %v19904_v38 = vld [vmem:[#allocation135_spill] sm:$0xff]  ;;  %vm19910_vm8 = vmmov %vm19908_vm6 }
 0x678   : > { %9256 = vmatprep.subr.mxu0 %v3351_v50  ;;  %9194 = vmatpush1.msra.mxu1 %v2180_v34  ;;  %v1305_v46 = vsel %vm19905_vm15, %v19904_v38, %v19903_v13  ;;  %v2475_v50 = vsel %vm19908_vm6, %v19907_v55, %v19906_v57  ;;  %v1304_v32 = vsel %vm19909_vm7, %v19830_v5, %v19904_v38  ;;  %vm19913_vm15 = vcmask 900096   ;;  %v19917_v5 = vld [vmem:[#allocation94_spill] sm:$0xff]  ;;  %v19921_v21 = vld [vmem:[#allocation51_spill] sm:$0xff]  ;;  %v19924_v38 = vld [vmem:[#allocation221_spill] sm:$0xff] }
 0x679   : > { %9257 = vmatpush1.msra.mxu0 %v3350_v35  ;;  %5323 = vrot.lane.b32.xlu1 %v14415_v37, %s10662_s21  ;;  %v2474_v35 = vsel %vm19910_vm8, %v19877_v15, %v19907_v55  ;;  %vm19916_vm6 = vcmask 744448   ;;  %vm19918_vm7 = vmmov %vm19913_vm15  ;;  %vm19922_vm8 = vcmask 1031168  }
 0x67a   : > { %5913 = vrot.lane.b32.xlu0 %v14480_v47, %s10660_s16  ;;  %9195 = vmatprep.subr.mxu1 %v1889_v2  ;;  %v14731_v27 = vpop.permute.xlu1 %7071  ;;  %v19912_v2 = vld [vmem:[#allocation93_spill] sm:$0xff]  ;;  %vm19919_vm5 = vmmov %vm19916_vm6 }
 0x67b   : > { %9258 = vmatprep.subr.mxu0 %v3059_v16  ;;  %9196 = vmatpush1.msra.mxu1 %v1888_v41  ;;  %v14739_v1 = vpop.permute.xlu0 %6777  ;;  %v19915_v16 = vld [vmem:[#allocation263_spill] sm:$0xff] }
 0x67c   : > { %9259 = vmatpush1.msra.mxu0 %v3058_v40  ;;  %9197 = vmatprep.subr.mxu1 %v1597_v59  ;;  %v2183_v41 = vsel %vm19916_vm6, %v19915_v16, %v19914_v45  ;;  %v1012_v40 = vsel %vm19918_vm7, %v19917_v5, %v19912_v2  ;;  %v2182_v15 = vsel %vm19919_vm5, %v19883_v4, %v19915_v16  ;;  %v19920_v59 = vld [vmem:[#allocation54_spill] sm:$0xff]  ;;  %vm19925_vm5 = vcmask 752640  }
 0x67d   : > { %9260 = vmatprep.subr.mxu0 %v2767_v12  ;;  %9198 = vmatpush1.msra.mxu1 %v1596_v24  ;;  %v721_v12 = vsel %vm19922_vm8, %v19921_v21, %v19920_v59  ;;  %vm19928_vm6 = vmmov %vm19925_vm5  ;;  %vm19931_vm7 = vcmask 1039360   ;;  %v178_v5 = vld [vmem:[%s10699_s17 + $0x38] sm:$0xff] }
 0x67e   : > { %9261 = vmatpush1.msra.mxu0 %v2766_v22  ;;  %5619 = vrot.lane.b32.xlu1 %v14458_v49, %s10661_s18  ;;  %v14755_v26 = vpop.permute.xlu1 %6483  ;;  %v19923_v22 = vld [vmem:[#allocation224_spill] sm:$0xff] }
 0x67f   : > { %5325 = vrot.lane.b32.xlu0 %v14441_v44, %s10662_s21  ;;  %9199 = vmatprep.subr.mxu1 %v1305_v46  ;;  %v14765_v34 = vpop.permute.xlu0 %7073  ;;  %v1013_v44 = vsel %vm19913_vm15, %v19912_v2, %v19911_v39  ;;  %v1891_v4 = vsel %vm19925_vm5, %v19924_v38, %v19923_v22  ;;  %v19926_v46 = vld [vmem:[#allocation52_spill] sm:$0xff]  ;;  %vm19927_vm15 = vmmov %vm19922_vm8  ;;  %v19932_v2 = vld [vmem:[#allocation182_spill] sm:$0xff]  ;;  %vm19934_vm8 = vcmask 883712  }
 0x680   : > { %9262 = vmatprep.subr.mxu0 %v2475_v50  ;;  %9200 = vmatpush1.msra.mxu1 %v1304_v32  ;;  %v720_v55 = vsel %vm19927_vm15, %v19926_v46, %v19921_v21  ;;  %v19929_v50 = vld [vmem:[#allocation12_spill] sm:$0xff]  ;;  %v19930_v32 = vld [vmem:[#allocation9_spill] sm:$0xff]  ;;  %vm19935_vm5 = vmmov %vm19931_vm7 }
 0x681   : > { %9263 = vmatpush1.msra.mxu0 %v2474_v35  ;;  %9201 = vmatprep.subr.mxu1 %v1013_v44  ;;  %v429_v35 = vsel %vm19931_vm7, %v19930_v32, %v19929_v50  ;;  %v19933_v44 = vld [vmem:[#allocation179_spill] sm:$0xff]  ;;  %vm19936_vm15 = vmmov %vm19934_vm8  ;;  %v14834_v46 = vld [vmem:[%s10699_s17 + $0xa8] sm:$0xff] }
 0x682   : > { %9264 = vmatprep.subr.mxu0 %v2183_v41  ;;  %9202 = vmatpush1.msra.mxu1 %v1012_v40  ;;  %v14782_v43 = vpop.permute.xlu1 %6779  ;;  %v1599_v16 = vsel %vm19934_vm8, %v19933_v44, %v19932_v2  ;;  %v428_v41 = vsel %vm19935_vm5, %v19844_v61, %v19930_v32  ;;  %v19937_v61 = vld [vmem:[#allocation140_spill] sm:$0xff]  ;;  %vm19943_vm8 = vcmask 900096   ;;  %v7728_v32 = vsel %vm7721_vm14, %v14333_v18, %v14577_v3 }
 0x683   : > { %9265 = vmatpush1.msra.mxu0 %v2182_v15  ;;  %5327 = vrot.lane.b32.xlu1 %v14458_v49, %s10662_s21  ;;  %v14789_v24 = vpop.permute.xlu0 %6485  ;;  %v1890_v49 = vsel %vm19928_vm6, %v19889_v9, %v19924_v38  ;;  %v1598_v9 = vsel %vm19936_vm15, %v19895_v58, %v19933_v44  ;;  %v177_v15 = vld [vmem:[%s10699_s17 + $0x30] sm:$0xff]  ;;  %vm19939_vm6 = vcmask 891904   ;;  %vm19944_vm5 = vmmov %vm19943_vm8  ;;  %v19945_v18 = vld [vmem:[#allocation56_spill] sm:$0xff]  ;;  %vm19947_vm15 = vcmask 1031168  }
 0x684   : > { %5621 = vrot.lane.b32.xlu0 %v14480_v47, %s10661_s18  ;;  %9203 = vmatprep.subr.mxu1 %v721_v12  ;;  %v19938_v12 = vld [vmem:[#allocation137_spill] sm:$0xff]  ;;  %vm19940_vm7 = vmmov %vm19939_vm6 }
 0x685   : > { %9266 = vmatprep.subr.mxu0 %v1891_v4  ;;  %9204 = vmatpush1.msra.mxu1 %v720_v55  ;;  %v1307_v38 = vsel %vm19939_vm6, %v19938_v12, %v19937_v61  ;;  %v1306_v58 = vsel %vm19940_vm7, %v19903_v13, %v19938_v12  ;;  %v7729_v4 = vsel %vm7721_vm14, %v14577_v3, %v14603_v30  ;;  %v19942_v55 = vld [vmem:[#allocation95_spill] sm:$0xff]  ;;  %v19946_v3 = vld [vmem:[#allocation53_spill] sm:$0xff]  ;;  %vm19948_vm6 = vmmov %vm19947_vm15  ;;  %vm19951_vm7 = vcmask 1039360  }
 0x686   : > { %9267 = vmatpush1.msra.mxu0 %v1890_v49  ;;  %9205 = vmatprep.subr.mxu1 %v429_v35  ;;  %v14812_v40 = vpop.permute.xlu1 %6191  ;;  %v14845_v35 = vld [vmem:[%s10699_s17 + $0xa0] sm:$0xff]  ;;  %v1014_v44 = vsel %vm19944_vm5, %v19911_v39, %v19942_v55  ;;  %v7436_v39 = vsel %vm7429_vm13, %v14377_v14, %v14601_v56  ;;  %vm19953_vm5 = vcmask 818176  }
 0x687   : > { %9268 = vmatprep.subr.mxu0 %v1599_v16  ;;  %9206 = vmatpush1.msra.mxu1 %v428_v41  ;;  %v14818_v21 = vpop.permute.xlu0 %6781  ;;  %v7437_v16 = vsel %vm7429_vm13, %v14601_v56, %v14635_v62  ;;  %v723_v41 = vsel %vm19947_vm15, %v19946_v3, %v19945_v18  ;;  %v7144_v56 = vsel %vm19126_vm12, %v14422_v20, %v14650_v42  ;;  %vm19954_vm15 = vmmov %vm19953_vm5 }
 0x688   : > { %9269 = vmatpush1.msra.mxu0 %v1598_v9  ;;  %5037 = vrot.lane.b32.xlu1 %v14415_v37, %s10653_s7  ;;  %v722_v9 = vsel %vm19948_vm6, %v19920_v59, %v19946_v3  ;;  %v6852_v20 = vsel %vm19954_vm15, %v14466_v25, %v14705_v10  ;;  %vm19955_vm6 = vcmask 826368  }
 0x689   : > { %5329 = vrot.lane.b32.xlu0 %v14480_v47, %s10662_s21  ;;  %9207 = vmatprep.subr.mxu1 %v178_v5  ;;  %v19941_v47 = vld [vmem:[#allocation98_spill] sm:$0xff] }
 0x68a   : > { %9270 = vmatprep.subr.mxu0 %v1307_v38  ;;  %9208 = vmatpush1.msra.mxu1 %v177_v15  ;;  %v14836_v37 = vpop.permute.xlu1 %6487  ;;  %v1015_v49 = vsel %vm19943_vm8, %v19942_v55, %v19941_v47  ;;  %v7145_v15 = vsel %vm19126_vm12, %v14650_v42, %v14684_v52  ;;  %v19949_v38 = vld [vmem:[#allocation14_spill] sm:$0xff]  ;;  %vm19952_vm8 = vmmov %vm19951_vm7  ;;  %v6853_v55 = vsel %vm19953_vm5, %v14705_v10, %v14739_v1  ;;  %v14909_v10 = vld [vmem:[%s10699_s17 + $0xb0] sm:$0xff]  ;;  %vm19958_vm5 = vcmask 965632  }
 0x68b   : > { %9271 = vmatpush1.msra.mxu0 %v1306_v58  ;;  %9219 = vmatprep.subr.mxu1 %v7729_v4  ;;  %v14847_v13 = vpop.permute.xlu0 %6193  ;;  %v19950_v58 = vld [vmem:[#allocation11_spill] sm:$0xff]  ;;  %v180_v4 = vld [vmem:[%s10699_s17 + $0x48] sm:$0xff] }
 0x68c   : > { %9272 = vmatprep.subr.mxu0 %v1015_v49  ;;  %9220 = vmatpush2.msra.mxu1 %v7728_v32  ;;  %v431_v14 = vsel %vm19951_vm7, %v19950_v58, %v19949_v38  ;;  %v430_v59 = vsel %vm19952_vm8, %v19929_v50, %v19950_v58  ;;  %v179_v49 = vld [vmem:[%s10699_s17 + $0x40] sm:$0xff]  ;;  %v6561_v50 = vsel %vm19955_vm6, %v14755_v26, %v14789_v24  ;;  %vm19956_vm7 = vmmov %vm19955_vm6  ;;  %vm19957_vm8 = vcmask 834560  }
 0x68d   : > { %9273 = vmatpush1.msra.mxu0 %v1014_v44  ;;  %7669 = vrot.lane.b32.xlu1 %v14834_v46, %s10654_s8  ;;  %v14900_v44 = vld [vmem:[%s10699_s17 + $0xb8] sm:$0xff]  ;;  %v6560_v25 = vsel %vm19956_vm7, %v14501_v60, %v14755_v26  ;;  %v6269_v3 = vsel %vm19957_vm8, %v14812_v40, %v14847_v13  ;;  %vm19959_vm15 = vmmov %vm19957_vm8  ;;  %vm19960_vm6 = vcmask 818176   ;;  %vm19962_vm8 = vcmask 973824  }
 0x68e   : > { %7667 = vrot.lane.b32.xlu0 %v14845_v35, %s10654_s8  ;;  %9221 = vmatprep.subr.mxu1 %v7437_v16  ;;  %v5900_v5 = vpop.permute.xlu1 %5899  ;;  %v7731_v16 = vsel %vm7721_vm14, %v14627_v31, %v14657_v28  ;;  %vm19961_vm7 = vmmov %vm19958_vm5 }
 0x68f   : > { %9274 = vmatprep.subr.mxu0 %v723_v41  ;;  %9222 = vmatpush2.msra.mxu1 %v7436_v39  ;;  %v14871_v12 = vpop.permute.xlu0 %6489  ;;  %v7730_v41 = vsel %vm7721_vm14, %v14603_v30, %v14627_v31  ;;  %v6268_v30 = vsel %vm19959_vm15, %v14524_v19, %v14812_v40  ;;  %v7438_v31 = vsel %vm7429_vm13, %v14635_v62, %v14679_v63  ;;  %vm19964_vm15 = vcmask 826368  }
 0x690   : > { %9275 = vmatpush1.msra.mxu0 %v722_v9  ;;  %9223 = vmatprep.subr.mxu1 %v7145_v15  ;;  %v7439_v9 = vsel %vm7429_vm13, %v14679_v63, %v14713_v29  ;;  %v7147_v15 = vsel %vm19126_vm12, %v14731_v27, %v14765_v34  ;;  %v6855_v62 = vsel %vm19960_vm6, %v14782_v43, %v14818_v21 }
 0x691   : > { %9276 = vmatprep.subr.mxu0 %v431_v14  ;;  %9224 = vmatpush2.msra.mxu1 %v7144_v56  ;;  %v7146_v14 = vsel %vm19126_vm12, %v14684_v52, %v14731_v27  ;;  %v5976_v63 = vsel %vm19961_vm7, %v14540_v11, %v5900_v5  ;;  %v6563_v27 = vsel %vm19964_vm15, %v14836_v37, %v14871_v12  ;;  %vm19965_vm12 = vcmask 834560   ;;  %vm19967_vm7 = vmmov %vm19962_vm8 }
 0x692   : > { %9277 = vmatpush1.msra.mxu0 %v430_v59  ;;  %7377 = vrot.lane.b32.xlu1 %v14834_v46, %s10655_s9  ;;  %v6196_v32 = vpop.permute.xlu1 %6195 }
 0x693   : > { %7375 = vrot.lane.b32.xlu0 %v14845_v35, %s10655_s9  ;;  %9225 = vmatprep.subr.mxu1 %v6853_v55  ;;  %v14894_v42 = vpop.permute.xlu0 %5901 }
 0x694   : > { %9278 = vmatprep.subr.mxu0 %v180_v4  ;;  %9226 = vmatpush2.msra.mxu1 %v6852_v20  ;;  %v5977_v60 = vsel %vm19958_vm5, %v5900_v5, %v14894_v42  ;;  %vm19963_vm5 = vmmov %vm19960_vm6  ;;  %v19973_v20 = vld [vmem:[#allocation583_spill] sm:$0xff] }
 0x695   : > { %9279 = vmatpush1.msra.mxu0 %v179_v49  ;;  %9227 = vmatprep.subr.mxu1 %v6561_v50  ;;  %v6854_v52 = vsel %vm19963_vm5, %v14739_v1, %v14782_v43  ;;  %vm19966_vm6 = vmmov %vm19964_vm15  ;;  %vm19970_vm5 = vcmask 719872   ;;  %v19974_v50 = vld [vmem:[#allocation581_spill] sm:$0xff] }
 0x696   : > { %9290 = vmatprep.subr.mxu0 %v7731_v16  ;;  %9228 = vmatpush2.msra.mxu1 %v6560_v25  ;;  %v5608_v39 = vpop.permute.xlu1 %5607  ;;  %v6562_v11 = vsel %vm19966_vm6, %v14789_v24, %v14836_v37  ;;  %v14976_v37 = vld [vmem:[%s18500_s1 + $0x8] sm:$0xff]  ;;  %vm19972_vm6 = vmmov %vm19970_vm5  ;;  %v5100_v25 = vsel %vm5093_vm11, %v14135_v0, %v19974_v50 }
 0x697   : > { %9291 = vmatpush2.msra.mxu0 %v7730_v41  ;;  %7673 = vrot.lane.b32.xlu1 %v14900_v44, %s10654_s8  ;;  %v14921_v26 = vpop.permute.xlu0 %6197  ;;  %v5684_v43 = vsel %vm19967_vm7, %v14559_v33, %v5608_v39 }
 0x698   : > { %7671 = vrot.lane.b32.xlu0 %v14909_v10, %s10654_s8  ;;  %9229 = vmatprep.subr.mxu1 %v6269_v3  ;;  %v6271_v56 = vsel %vm19965_vm12, %v6196_v32, %v14921_v26  ;;  %vm19968_vm12 = vcmask 965632   ;;  %v19976_v3 = vld [vmem:[#allocation176_spill] sm:$0xff] }
 0x699   : > { %9292 = vmatprep.subr.mxu0 %v7439_v9  ;;  %9230 = vmatpush2.msra.mxu1 %v6268_v30  ;;  %vm19971_vm15 = vmmov %vm19968_vm12  ;;  %v19978_v30 = vld [vmem:[#allocation418_spill] sm:$0xff] }
 0x69a   : > { %9293 = vmatpush2.msra.mxu0 %v7438_v31  ;;  %9231 = vmatprep.subr.mxu1 %v5977_v60  ;;  %v5904_v58 = vpop.permute.xlu1 %5903  ;;  %v4808_v60 = vsel %vm4801_vm9, %v13950_v6, %v19976_v3  ;;  %v19979_v31 = vld [vmem:[#allocation562_spill] sm:$0xff] }
 0x69b   : > { %9294 = vmatprep.subr.mxu0 %v7147_v15  ;;  %7085 = vrot.lane.b32.xlu1 %v14834_v46, %s10656_s10  ;;  %v5610_v19 = vpop.permute.xlu0 %5609  ;;  %v5978_v33 = vsel %vm19971_vm15, %v14894_v42, %v5904_v58  ;;  %v5101_v42 = vsel %vm5093_vm11, %v19974_v50, %v19973_v20  ;;  %v4521_v15 = vsel %vm4509_vm0, %v19979_v31, %v19978_v30  ;;  %vm20002_vm15 = vcmask 490496  }
 0x69c   : > { %9295 = vmatpush2.msra.mxu0 %v7146_v14  ;;  %7083 = vrot.lane.b32.xlu0 %v14845_v35, %s10656_s10  ;;  %v5685_v40 = vsel %vm19962_vm8, %v5608_v39, %v5610_v19  ;;  %vm19969_vm8 = vcmask 834560   ;;  %v4520_v6 = vsel %vm4509_vm0, %v13684_v53, %v19979_v31 }
 0x69d   : > { %9296 = vmatprep.subr.mxu0 %v6855_v62  ;;  %9232 = vmatpush2.msra.mxu1 %v5976_v63  ;;  %v6270_v4 = vsel %vm19969_vm8, %v14847_v13, %v6196_v32  ;;  %v19981_v62 = vld [vmem:[#allocation531_spill] sm:$0xff]  ;;  %vm19996_vm8 = vcmask 482304  }
 0x69e   : > { %9297 = vmatpush2.msra.mxu0 %v6854_v52  ;;  %9233 = vmatprep.subr.mxu1 %v5685_v40  ;;  %v5316_v59 = vpop.permute.xlu1 %5315 }
 0x69f   : > { %9298 = vmatprep.subr.mxu0 %v6563_v27  ;;  %7381 = vrot.lane.b32.xlu1 %v14900_v44, %s10655_s9  ;;  %v14963_v1 = vpop.permute.xlu0 %5905  ;;  %v5392_v49 = vsel %vm5385_vm10, %v14582_v51, %v5316_v59  ;;  %v19975_v51 = vld [vmem:[#allocation88_spill] sm:$0xff]  ;;  %v19982_v27 = vld [vmem:[#allocation585_spill] sm:$0xff] }
 0x6a0   : > { %9299 = vmatpush2.msra.mxu0 %v6562_v11  ;;  %7379 = vrot.lane.b32.xlu0 %v14909_v10, %s10655_s9  ;;  %v5979_v5 = vsel %vm19968_vm12, %v5904_v58, %v14963_v1  ;;  %v4809_v41 = vsel %vm4801_vm9, %v19976_v3, %v19975_v51  ;;  %vm19977_vm12 = vmmov %vm19967_vm7  ;;  %v19984_v11 = vld [vmem:[#allocation502_spill] sm:$0xff]  ;;  %v19991_v3 = vld [vmem:[#allocation420_spill] sm:$0xff] }
 0x6a1   : > { %9300 = vmatprep.subr.mxu0 %v6271_v56  ;;  %9234 = vmatpush2.msra.mxu1 %v5684_v43  ;;  %v19983_v56 = vld [vmem:[#allocation582_spill] sm:$0xff]  ;;  %v19985_v43 = vld [vmem:[#allocation499_spill] sm:$0xff] }
 0x6a2   : > { %9301 = vmatpush2.msra.mxu0 %v6270_v4  ;;  %v5612_v24 = vpop.permute.xlu1 %5611  ;;  %10560 = vmatprep.mubr.msk.f32.mxu1 %vm19970_vm5, %v14976_v37  ;;  %v3936_v4 = vsel %vm3925_vm2, %v19874_v36, %v19985_v43  ;;  %vm19999_vm5 = vmmov %vm19996_vm8 }
 0x6a3   : > { %6793 = vrot.lane.b32.xlu1 %v14834_v46, %s10657_s11  ;;  %9302 = vmatprep.subr.mxu0 %v5979_v5  ;;  %v5318_v55 = vpop.permute.xlu0 %5317  ;;  %v5686_v9 = vsel %vm19977_vm12, %v5610_v19, %v5612_v24  ;;  %v19980_v19 = vld [vmem:[#allocation533_spill] sm:$0xff]  ;;  %v5102_v5 = vsel %vm5093_vm11, %v19973_v20, %v19983_v56 }
 0x6a4   : > { %6791 = vrot.lane.b32.xlu0 %v14845_v35, %s10657_s11  ;;  %9303 = vmatpush2.msra.mxu0 %v5978_v33  ;;  %v5393_v13 = vsel %vm5385_vm10, %v5316_v59, %v5318_v55  ;;  %v4229_v63 = vsel %vm4217_vm1, %v19981_v62, %v19980_v19  ;;  %v5103_v59 = vsel %vm5093_vm11, %v19983_v56, %v19982_v27  ;;  %v19987_v33 = vld [vmem:[#allocation173_spill] sm:$0xff] }
 0x6a5   : > { %9235 = vmatprep.subr.mxu1 %v5393_v13  ;;  %10561 = vmatprep.mubr.msk.f32.mxu0 %vm19972_vm6, %v14976_v37  ;;  %v19988_v13 = vld [vmem:[#allocation465_spill] sm:$0xff]  ;;  %v4810_v36 = vsel %vm4801_vm9, %v19975_v51, %v19987_v33  ;;  %v15085_v51 = vld [vmem:[%s18500_s1] sm:$0xff]  ;;  %vm20005_vm6 = vmmov %vm20002_vm15 }
 0x6a6   : > { %9236 = vmatpush2.msra.mxu1 %v5392_v49  ;;  %v5320_v32 = vpop.permute.xlu1 %5319  ;;  %v19989_v49 = vld [vmem:[#allocation462_spill] sm:$0xff] }
 0x6a7   : > { %7089 = vrot.lane.b32.xlu1 %v14900_v44, %s10656_s10  ;;  %v14996_v16 = vpop.permute.xlu0 %5613  ;;  %9237 = vmatprep.subr.mxu1 %v5101_v42  ;;  %v5394_v40 = vsel %vm5385_vm10, %v5318_v55, %v5320_v32  ;;  %v3644_v42 = vsel %vm3633_vm3, %v19880_v54, %v19989_v49 }
 0x6a8   : > { %7087 = vrot.lane.b32.xlu0 %v14909_v10, %s10656_s10  ;;  %9238 = vmatpush2.msra.mxu1 %v5100_v25  ;;  %v5687_v39 = vsel %vm19967_vm7, %v5612_v24, %v14996_v16  ;;  %v19986_v24 = vld [vmem:[#allocation45_spill] sm:$0xff]  ;;  %v19990_v25 = vld [vmem:[#allocation300_spill] sm:$0xff]  ;;  %vm20008_vm7 = vcmask 736256  }
 0x6a9   : > { %9239 = vmatprep.subr.mxu1 %v4809_v41  ;;  %9304 = vmatprep.subr.mxu0 %v5687_v39  ;;  %v4811_v55 = vsel %vm4801_vm9, %v19987_v33, %v19986_v24  ;;  %v4523_v41 = vsel %vm4509_vm0, %v19991_v3, %v19990_v25  ;;  %v19992_v39 = vld [vmem:[#allocation428_spill] sm:$0xff]  ;;  %v20004_v33 = vld [vmem:[#allocation501_spill] sm:$0xff]  ;;  %vm20011_vm12 = vmmov %vm20008_vm7 }
 0x6aa   : > { %9240 = vmatpush2.msra.mxu1 %v4808_v60  ;;  %9305 = vmatpush2.msra.mxu0 %v5686_v9  ;;  %v15012_v0 = vpop.permute.xlu1 %7659  ;;  %v19993_v60 = vld [vmem:[#allocation425_spill] sm:$0xff] }
 0x6ab   : > { %6501 = vrot.lane.b32.xlu1 %v14834_v46, %s10658_s14  ;;  %v15019_v58 = vpop.permute.xlu0 %5321  ;;  %9319 = vmatprep.subr.mxu1 %v4521_v15  ;;  %v3353_v9 = vsel %vm3341_vm4, %v19993_v60, %v19992_v39  ;;  %v3352_v54 = vsel %vm3341_vm4, %v19886_v7, %v19993_v60  ;;  %v4522_v15 = vsel %vm4509_vm0, %v19978_v30, %v19991_v3  ;;  %v20009_v3 = vld [vmem:[#allocation467_spill] sm:$0xff] }
 0x6ac   : > { %6499 = vrot.lane.b32.xlu0 %v14845_v35, %s10658_s14  ;;  %9242 = vmatmul.mubr.f32.vlgmr.msra.gmra.mxu1 %v14299_v48  ;;  %v5395_v14 = vsel %vm5385_vm10, %v5320_v32, %v15019_v58  ;;  %v4228_v48 = vsel %vm4217_vm1, %v13427_v23, %v19981_v62  ;;  %v3937_v23 = vsel %vm3925_vm2, %v19985_v43, %v19984_v11  ;;  %v19995_v62 = vld [vmem:[#allocation386_spill] sm:$0xff]  ;;  %v20001_v43 = vld [vmem:[#allocation347_spill] sm:$0xff] }
 0x6ad   : > { %9320 = vmatpush1.msra.mxu1 %v4520_v6  ;;  %9306 = vmatprep.subr.mxu0 %v5395_v14  ;;  %v3645_v32 = vsel %vm3633_vm3, %v19989_v49, %v19988_v13  ;;  %v19994_v14 = vld [vmem:[#allocation389_spill] sm:$0xff]  ;;  %v3060_v30 = vsel %vm19999_vm5, %v19892_v8, %v19995_v62  ;;  %v3938_v49 = vsel %vm3925_vm2, %v19984_v11, %v20004_v33 }
 0x6ae   : > { %9321 = vmatprep.subr.mxu1 %v4229_v63  ;;  %9307 = vmatpush2.msra.mxu0 %v5394_v40  ;;  %v15036_v52 = vpop.permute.xlu1 %7367  ;;  %v3061_v7 = vsel %vm19996_vm8, %v19995_v62, %v19994_v14  ;;  %v19997_v63 = vld [vmem:[#allocation535_spill] sm:$0xff]  ;;  %v19998_v40 = vld [vmem:[#allocation532_spill] sm:$0xff]  ;;  %v20013_v62 = vld [vmem:[#allocation265_spill] sm:$0xff]  ;;  %vm20014_vm8 = vcmask 744448  }
 0x6af   : > { %6797 = vrot.lane.b32.xlu1 %v14900_v44, %s10657_s11  ;;  %9322 = vmatpush1.msra.mxu1 %v4228_v48  ;;  %v15040_v53 = vpop.permute.xlu0 %7661  ;;  %v4231_v48 = vsel %vm4217_vm1, %v19998_v40, %v19997_v63  ;;  %v4230_v56 = vsel %vm4217_vm1, %v19980_v19, %v19998_v40  ;;  %v2768_v19 = vsel %vm20005_vm6, %v19898_v17, %v20001_v43  ;;  %v20016_v40 = vld [vmem:[#allocation427_spill] sm:$0xff]  ;;  %vm20017_vm5 = vmmov %vm20014_vm8  ;;  %vm20023_vm6 = vcmask 482304  }
 0x6b0   : > { %6795 = vrot.lane.b32.xlu0 %v14909_v10, %s10657_s11  ;;  %9308 = vmatprep.subr.mxu0 %v5103_v59  ;;  %v20000_v59 = vld [vmem:[#allocation350_spill] sm:$0xff] }
 0x6b1   : > { %9323 = vmatprep.subr.mxu1 %v3937_v23  ;;  %9309 = vmatpush2.msra.mxu0 %v5102_v5  ;;  %v2769_v23 = vsel %vm20002_vm15, %v20001_v43, %v20000_v59  ;;  %v20019_v43 = vld [vmem:[#allocation223_spill] sm:$0xff]  ;;  %vm20020_vm15 = vcmask 752640  }
 0x6b2   : > { %9324 = vmatpush1.msra.mxu1 %v3936_v4  ;;  %9310 = vmatprep.subr.mxu0 %v4811_v55  ;;  %v15062_v50 = vpop.permute.xlu1 %7663  ;;  %v20003_v4 = vld [vmem:[#allocation504_spill] sm:$0xff] }
 0x6b3   : > { %6209 = vrot.lane.b32.xlu1 %v14834_v46, %s10659_s15  ;;  %9325 = vmatprep.subr.mxu1 %v3645_v32  ;;  %v15069_v20 = vpop.permute.xlu0 %7369  ;;  %v3939_v8 = vsel %vm3925_vm2, %v20004_v33, %v20003_v4  ;;  %v20006_v32 = vld [vmem:[#allocation310_spill] sm:$0xff] }
 0x6b4   : > { %6207 = vrot.lane.b32.xlu0 %v14845_v35, %s10659_s15  ;;  %9311 = vmatpush2.msra.mxu0 %v4810_v36  ;;  %v20007_v36 = vld [vmem:[#allocation307_spill] sm:$0xff] }
 0x6b5   : > { %9326 = vmatpush1.msra.mxu1 %v3644_v42  ;;  %9390 = vmatprep.subr.mxu0 %v4523_v41  ;;  %v2477_v42 = vsel %vm20008_vm7, %v20007_v36, %v20006_v32  ;;  %v20010_v41 = vld [vmem:[#allocation464_spill] sm:$0xff]  ;;  %v2476_v17 = vsel %vm20011_vm12, %v19906_v57, %v20007_v36  ;;  %vm20024_vm7 = vmmov %vm20020_vm15 }
 0x6b6   : > { %9327 = vmatprep.subr.mxu1 %v3353_v9  ;;  %9313 = vmatmul.mubr.f32.vlgmr.msra.gmra.mxu0 %v15085_v51  ;;  %v15091_v31 = vpop.permute.xlu1 %7075  ;;  %v3647_v60 = vsel %vm3633_vm3, %v20010_v41, %v20009_v3  ;;  %v3646_v11 = vsel %vm3633_vm3, %v19988_v13, %v20010_v41  ;;  %v2184_v13 = vsel %vm20017_vm5, %v19914_v45, %v20013_v62  ;;  %vm20025_vm12 = vmmov %vm20023_vm6  ;;  %v20027_v41 = vld [vmem:[#allocation181_spill] sm:$0xff]  ;;  %vm20031_vm5 = vcmask 490496  }
 0x6b7   : > { %6505 = vrot.lane.b32.xlu1 %v14900_v44, %s10658_s14  ;;  %9328 = vmatpush1.msra.mxu1 %v3352_v54  ;;  %v15098_v6 = vpop.permute.xlu0 %7665 }
 0x6b8   : > { %6503 = vrot.lane.b32.xlu0 %v14909_v10, %s10658_s14  ;;  %9391 = vmatpush1.msra.mxu0 %v4522_v15  ;;  %v20012_v15 = vld [vmem:[#allocation268_spill] sm:$0xff] }
 0x6b9   : > { %9329 = vmatprep.subr.mxu1 %v3061_v7  ;;  %9392 = vmatprep.subr.mxu0 %v4231_v48  ;;  %v2185_v57 = vsel %vm20014_vm8, %v20013_v62, %v20012_v15  ;;  %v20015_v7 = vld [vmem:[#allocation430_spill] sm:$0xff]  ;;  %vm20028_vm8 = vcmask 883712  }
 0x6ba   : > { %9330 = vmatpush1.msra.mxu1 %v3060_v30  ;;  %9393 = vmatpush1.msra.mxu0 %v4230_v56  ;;  %v15117_v5 = vpop.permute.xlu1 %7371  ;;  %v3355_v48 = vsel %vm3341_vm4, %v20016_v40, %v20015_v7  ;;  %v3354_v30 = vsel %vm3341_vm4, %v19992_v39, %v20016_v40  ;;  %v20018_v56 = vld [vmem:[#allocation226_spill] sm:$0xff]  ;;  %v1892_v39 = vsel %vm20024_vm7, %v19923_v22, %v20019_v43  ;;  %vm20036_vm7 = vcmask 891904  }
 0x6bb   : > { %5917 = vrot.lane.b32.xlu1 %v14834_v46, %s10660_s16  ;;  %9331 = vmatprep.subr.mxu1 %v2769_v23  ;;  %v15124_v55 = vpop.permute.xlu0 %7077  ;;  %v1893_v23 = vsel %vm20020_vm15, %v20019_v43, %v20018_v56  ;;  %vm20032_vm15 = vmmov %vm20028_vm8  ;;  %v20038_v43 = vld [vmem:[#allocation309_spill] sm:$0xff] }
 0x6bc   : > { %5915 = vrot.lane.b32.xlu0 %v14845_v35, %s10660_s16  ;;  %9394 = vmatprep.subr.mxu0 %v3939_v8  ;;  %v20021_v8 = vld [vmem:[#allocation391_spill] sm:$0xff]  ;;  %v1600_v22 = vsel %vm20032_vm15, %v19932_v2, %v20027_v41  ;;  %vm20044_vm15 = vcmask 900096  }
 0x6bd   : > { %9332 = vmatpush1.msra.mxu1 %v2768_v19  ;;  %9395 = vmatpush1.msra.mxu0 %v3938_v49  ;;  %v20022_v19 = vld [vmem:[#allocation388_spill] sm:$0xff] }
 0x6be   : > { %9333 = vmatprep.subr.mxu1 %v2477_v42  ;;  %9396 = vmatprep.subr.mxu0 %v3647_v60  ;;  %v15143_v9 = vpop.permute.xlu1 %6783  ;;  %v3063_v45 = vsel %vm20023_vm6, %v20022_v19, %v20021_v8  ;;  %v3062_v36 = vsel %vm20025_vm12, %v19994_v14, %v20022_v19  ;;  %v20026_v42 = vld [vmem:[#allocation184_spill] sm:$0xff]  ;;  %vm20033_vm6 = vmmov %vm20031_vm5  ;;  %vm20039_vm12 = vcmask 736256  }
 0x6bf   : > { %6213 = vrot.lane.b32.xlu1 %v14900_v44, %s10659_s15  ;;  %9334 = vmatpush1.msra.mxu1 %v2476_v17  ;;  %v15150_v54 = vpop.permute.xlu0 %7373  ;;  %v1601_v60 = vsel %vm20028_vm8, %v20027_v41, %v20026_v42  ;;  %v20029_v17 = vld [vmem:[#allocation352_spill] sm:$0xff]  ;;  %vm20040_vm8 = vmmov %vm20036_vm7 }
 0x6c0   : > { %6211 = vrot.lane.b32.xlu0 %v14909_v10, %s10659_s15  ;;  %9397 = vmatpush1.msra.mxu0 %v3646_v11  ;;  %v20030_v11 = vld [vmem:[#allocation349_spill] sm:$0xff] }
 0x6c1   : > { %9335 = vmatprep.subr.mxu1 %v2185_v57  ;;  %9398 = vmatprep.subr.mxu0 %v3355_v48  ;;  %v2771_v62 = vsel %vm20031_vm5, %v20030_v11, %v20029_v17  ;;  %v2770_v14 = vsel %vm20033_vm6, %v20000_v59, %v20030_v11  ;;  %v20034_v48 = vld [vmem:[#allocation142_spill] sm:$0xff]  ;;  %vm20041_vm5 = vmmov %vm20039_vm12  ;;  %v20046_v11 = vld [vmem:[#allocation267_spill] sm:$0xff]  ;;  %vm20047_vm6 = vcmask 744448  }
 0x6c2   : > { %9336 = vmatpush1.msra.mxu1 %v2184_v13  ;;  %9399 = vmatpush1.msra.mxu0 %v3354_v30  ;;  %v15169_v33 = vpop.permute.xlu1 %7079  ;;  %v20035_v13 = vld [vmem:[#allocation139_spill] sm:$0xff]  ;;  %v20037_v30 = vld [vmem:[#allocation312_spill] sm:$0xff]  ;;  %v2478_v19 = vsel %vm20041_vm5, %v20006_v32, %v20038_v43  ;;  %vm20055_vm5 = vcmask 752640  }
 0x6c3   : > { %5625 = vrot.lane.b32.xlu1 %v14834_v46, %s10661_s18  ;;  %9337 = vmatprep.subr.mxu1 %v1893_v23  ;;  %v15176_v49 = vpop.permute.xlu0 %6785  ;;  %v1309_v2 = vsel %vm20036_vm7, %v20035_v13, %v20034_v48  ;;  %v2479_v23 = vsel %vm20039_vm12, %v20038_v43, %v20037_v30  ;;  %v1308_v59 = vsel %vm20040_vm8, %v19937_v61, %v20035_v13  ;;  %vm20048_vm7 = vmmov %vm20044_vm15  ;;  %vm20052_vm8 = vcmask 1031168   ;;  %v20054_v43 = vld [vmem:[#allocation225_spill] sm:$0xff] }
 0x6c4   : > { %5623 = vrot.lane.b32.xlu0 %v14845_v35, %s10661_s18  ;;  %9400 = vmatprep.subr.mxu0 %v3063_v45  ;;  %v20042_v45 = vld [vmem:[#allocation100_spill] sm:$0xff]  ;;  %vm20049_vm12 = vmmov %vm20047_vm6 }
 0x6c5   : > { %9338 = vmatpush1.msra.mxu1 %v1892_v39  ;;  %9401 = vmatpush1.msra.mxu0 %v3062_v36  ;;  %v20043_v39 = vld [vmem:[#allocation97_spill] sm:$0xff] }
 0x6c6   : > { %9339 = vmatprep.subr.mxu1 %v1601_v60  ;;  %9402 = vmatprep.subr.mxu0 %v2771_v62  ;;  %v15195_v57 = vpop.permute.xlu1 %6491  ;;  %v1017_v36 = vsel %vm20044_vm15, %v20043_v39, %v20042_v45  ;;  %v20045_v60 = vld [vmem:[#allocation270_spill] sm:$0xff]  ;;  %v1016_v32 = vsel %vm20048_vm7, %v19941_v47, %v20043_v39  ;;  %vm20056_vm15 = vmmov %vm20052_vm8  ;;  %v20058_v39 = vld [vmem:[#allocation16_spill] sm:$0xff]  ;;  %vm20060_vm7 = vcmask 1039360  }
 0x6c7   : > { %5921 = vrot.lane.b32.xlu1 %v14900_v44, %s10660_s16  ;;  %9340 = vmatpush1.msra.mxu1 %v1600_v22  ;;  %v15202_v40 = vpop.permute.xlu0 %7081  ;;  %v2187_v61 = vsel %vm20047_vm6, %v20046_v11, %v20045_v60  ;;  %v2186_v22 = vsel %vm20049_vm12, %v20012_v15, %v20046_v11  ;;  %vm20057_vm6 = vmmov %vm20055_vm5  ;;  %v20061_v11 = vld [vmem:[#allocation186_spill] sm:$0xff]  ;;  %vm20063_vm12 = vcmask 883712  }
 0x6c8   : > { %5919 = vrot.lane.b32.xlu0 %v14909_v10, %s10660_s16  ;;  %9403 = vmatpush1.msra.mxu0 %v2770_v14  ;;  %v20051_v14 = vld [vmem:[#allocation55_spill] sm:$0xff] }
 0x6c9   : > { %9341 = vmatprep.subr.mxu1 %v1309_v2  ;;  %9404 = vmatprep.subr.mxu0 %v2479_v23  ;;  %v20053_v2 = vld [vmem:[#allocation228_spill] sm:$0xff]  ;;  %v724_v47 = vsel %vm20056_vm15, %v19945_v18, %v20051_v14  ;;  %v20059_v18 = vld [vmem:[#allocation13_spill] sm:$0xff]  ;;  %vm20068_vm15 = vcmask 891904  }
 0x6ca   : > { %9342 = vmatpush1.msra.mxu1 %v1308_v59  ;;  %9405 = vmatpush1.msra.mxu0 %v2478_v19  ;;  %v15221_v41 = vpop.permute.xlu1 %6787  ;;  %v1895_v23 = vsel %vm20055_vm5, %v20054_v43, %v20053_v2  ;;  %v1894_v59 = vsel %vm20057_vm6, %v20018_v56, %v20054_v43  ;;  %vm20065_vm5 = vmmov %vm20063_vm12  ;;  %v15273_v43 = vld [vmem:[%s10699_s17 + $0x88] sm:$0xff] }
 0x6cb   : > { %5333 = vrot.lane.b32.xlu1 %v14834_v46, %s10662_s21  ;;  %9343 = vmatprep.subr.mxu1 %v1017_v36  ;;  %v15228_v62 = vpop.permute.xlu0 %6493  ;;  %v20050_v46 = vld [vmem:[#allocation58_spill] sm:$0xff]  ;;  %v433_v36 = vsel %vm20060_vm7, %v20059_v18, %v20058_v39  ;;  %vm20069_vm6 = vmmov %vm20068_vm15 }
 0x6cc   : > { %5331 = vrot.lane.b32.xlu0 %v14845_v35, %s10662_s21  ;;  %9406 = vmatprep.subr.mxu0 %v2187_v61  ;;  %v725_v13 = vsel %vm20052_vm8, %v20051_v14, %v20050_v46  ;;  %v20062_v61 = vld [vmem:[#allocation183_spill] sm:$0xff]  ;;  %v182_v14 = vld [vmem:[%s10699_s17 + $0x58] sm:$0xff]  ;;  %vm20064_vm8 = vmmov %vm20060_vm7  ;;  %vm20072_vm7 = vcmask 900096  }
 0x6cd   : > { %9344 = vmatpush1.msra.mxu1 %v1016_v32  ;;  %9407 = vmatpush1.msra.mxu0 %v2186_v22  ;;  %v1603_v32 = vsel %vm20063_vm12, %v20062_v61, %v20061_v11  ;;  %v4941_v22 = vld [vmem:[%s10699_s17 + $0x90] sm:$0xff]  ;;  %v432_v56 = vsel %vm20064_vm8, %v19949_v38, %v20059_v18  ;;  %v20070_v18 = vld [vmem:[#allocation102_spill] sm:$0xff]  ;;  %vm20073_vm12 = vmmov %vm20072_vm7  ;;  %vm20076_vm8 = vcmask 1031168  }
 0x6ce   : > { %9345 = vmatprep.subr.mxu1 %v725_v13  ;;  %9408 = vmatprep.subr.mxu0 %v1895_v23  ;;  %v15247_v15 = vpop.permute.xlu1 %6199  ;;  %v1602_v13 = vsel %vm20065_vm5, %v20026_v42, %v20062_v61  ;;  %v181_v23 = vld [vmem:[%s10699_s17 + $0x50] sm:$0xff]  ;;  %v7733_v42 = vsel %vm7721_vm14, %v15012_v0, %v15040_v53  ;;  %v20071_v61 = vld [vmem:[#allocation99_spill] sm:$0xff]  ;;  %vm20077_vm5 = vmmov %vm20076_vm8 }
 0x6cf   : > { %5629 = vrot.lane.b32.xlu1 %v14900_v44, %s10661_s18  ;;  %9346 = vmatpush1.msra.mxu1 %v724_v47  ;;  %v15254_v19 = vpop.permute.xlu0 %6789 }
 0x6d0   : > { %5627 = vrot.lane.b32.xlu0 %v14909_v10, %s10661_s18  ;;  %9409 = vmatpush1.msra.mxu0 %v1894_v59  ;;  %v20066_v59 = vld [vmem:[#allocation144_spill] sm:$0xff] }
 0x6d1   : > { %9347 = vmatprep.subr.mxu1 %v433_v36  ;;  %9410 = vmatprep.subr.mxu0 %v1603_v32  ;;  %v20067_v36 = vld [vmem:[#allocation141_spill] sm:$0xff] }
 0x6d2   : > { %9348 = vmatpush1.msra.mxu1 %v432_v56  ;;  %9411 = vmatpush1.msra.mxu0 %v1602_v13  ;;  %v15276_v47 = vpop.permute.xlu1 %6495  ;;  %v1311_v32 = vsel %vm20068_vm15, %v20067_v36, %v20066_v59  ;;  %v1310_v38 = vsel %vm20069_vm6, %v20034_v48, %v20067_v36  ;;  %v1018_v48 = vsel %vm20073_vm12, %v20042_v45, %v20071_v61  ;;  %v20075_v45 = vld [vmem:[#allocation57_spill] sm:$0xff]  ;;  %vm20078_vm15 = vcmask 687104  }
 0x6d3   : > { %5041 = vrot.lane.b32.xlu1 %v4941_v22, %s10653_s7  ;;  %9349 = vmatprep.subr.mxu1 %v182_v14  ;;  %v15282_v11 = vpop.permute.xlu0 %6201  ;;  %v1019_v22 = vsel %vm20072_vm7, %v20071_v61, %v20070_v18  ;;  %v7732_v14 = vsel %vm7721_vm14, %v14657_v28, %v15012_v0  ;;  %v7441_v28 = vsel %vm7429_vm13, %v15036_v52, %v15069_v20  ;;  %v20074_v0 = vld [vmem:[#allocation60_spill] sm:$0xff]  ;;  %vm20081_vm6 = vcmask 1039360   ;;  %v4942_v61 = vld [vmem:[%s10699_s17 + $0x98] sm:$0xff]  ;;  %vm20082_vm7 = vmmov %vm20078_vm15 }
 0x6d4   : > { %5039 = vrot.lane.b32.xlu0 %v15273_v43, %s10653_s7  ;;  %9412 = vmatprep.subr.mxu0 %v1311_v32  ;;  %v7440_v36 = vsel %vm7429_vm13, %v14713_v29, %v15036_v52  ;;  %v20079_v32 = vld [vmem:[#allocation18_spill] sm:$0xff]  ;;  %v7148_v29 = vsel %vm20082_vm7, %v14765_v34, %v15091_v31  ;;  %vm20083_vm12 = vmmov %vm20081_vm6  ;;  %vm20088_vm7 = vcmask 834560  }
 0x6d5   : > { %9350 = vmatpush1.msra.mxu1 %v181_v23  ;;  %9413 = vmatpush1.msra.mxu0 %v1310_v38  ;;  %v727_v23 = vsel %vm20076_vm8, %v20075_v45, %v20074_v0  ;;  %v20080_v38 = vld [vmem:[#allocation15_spill] sm:$0xff]  ;;  %vm20084_vm8 = vcmask 818176  }
 0x6d6   : > { %9361 = vmatprep.subr.mxu1 %v7733_v42  ;;  %9414 = vmatprep.subr.mxu0 %v1019_v22  ;;  %v15301_v56 = vpop.permute.xlu1 %5907  ;;  %v435_v42 = vsel %vm20081_vm6, %v20080_v38, %v20079_v32  ;;  %v434_v52 = vsel %vm20083_vm12, %v20058_v39, %v20080_v38  ;;  %v183_v22 = vld [vmem:[%s10699_s17 + $0x60] sm:$0xff]  ;;  %v6857_v34 = vsel %vm20084_vm8, %v15143_v9, %v15176_v49  ;;  %vm20089_vm12 = vcmask 965632  }
 0x6d7   : > { %9362 = vmatpush2.msra.mxu1 %v7732_v14  ;;  %9415 = vmatpush1.msra.mxu0 %v1018_v48  ;;  %v15303_v13 = vpop.permute.xlu0 %6497 }
 0x6d8   : > { %5337 = vrot.lane.b32.xlu1 %v14900_v44, %s10662_s21  ;;  %5335 = vrot.lane.b32.xlu0 %v14909_v10, %s10662_s21  ;;  %v726_v44 = vsel %vm20077_vm5, %v20050_v46, %v20075_v45  ;;  %v7149_v10 = vsel %vm20078_vm15, %v15091_v31, %v15124_v55  ;;  %v184_v46 = vld [vmem:[%s10699_s17 + $0x68] sm:$0xff]  ;;  %vm20085_vm5 = vmmov %vm20084_vm8  ;;  %vm20086_vm15 = vcmask 826368   ;;  %v15357_v45 = vld [vmem:[%s10699_s17 + $0xc0] sm:$0xff] }
 0x6d9   : > { %9363 = vmatprep.subr.mxu1 %v7441_v28  ;;  %9416 = vmatprep.subr.mxu0 %v727_v23  ;;  %v6856_v31 = vsel %vm20085_vm5, %v14818_v21, %v15143_v9  ;;  %v6565_v39 = vsel %vm20086_vm15, %v15195_v57, %v15228_v62  ;;  %v15354_v28 = vld [vmem:[%s10699_s17 + $0xc8] sm:$0xff]  ;;  %vm20087_vm6 = vmmov %vm20086_vm15  ;;  %v7734_v9 = vsel %vm7721_vm14, %v15040_v53, %v15062_v50  ;;  %vm20091_vm5 = vcmask 687104  }
 0x6da   : > { %9364 = vmatpush2.msra.mxu1 %v7440_v36  ;;  %9417 = vmatpush1.msra.mxu0 %v726_v44  ;;  %v6564_v21 = vsel %vm20087_vm6, %v14871_v12, %v15195_v57  ;;  %v6273_v23 = vsel %vm20088_vm7, %v15247_v15, %v15282_v11  ;;  %v7443_v12 = vsel %vm7429_vm13, %v15117_v5, %v15150_v54  ;;  %vm20090_vm8 = vmmov %vm20088_vm7  ;;  %vm20093_vm6 = vcmask 818176  }
 0x6db   : > { %9365 = vmatprep.subr.mxu1 %v7149_v10  ;;  %9418 = vmatprep.subr.mxu0 %v435_v42  ;;  %v6272_v57 = vsel %vm20090_vm8, %v14921_v26, %v15247_v15  ;;  %v7442_v44 = vsel %vm7429_vm13, %v15069_v20, %v15117_v5  ;;  %v7151_v10 = vsel %vm20091_vm5, %v15169_v33, %v15202_v40  ;;  %vm20092_vm15 = vmmov %vm20091_vm5  ;;  %v15403_v15 = vld [vmem:[%s10699_s17 + $0xd8] sm:$0xff]  ;;  %vm20095_vm8 = vcmask 826368  }
 0x6dc   : > { %9366 = vmatpush2.msra.mxu1 %v7148_v29  ;;  %9419 = vmatpush1.msra.mxu0 %v434_v52  ;;  %v6204_v14 = vpop.permute.xlu1 %6203  ;;  %v15336_v48 = vpop.permute.xlu0 %5909  ;;  %v7150_v38 = vsel %vm20092_vm15, %v15124_v55, %v15169_v33  ;;  %v6859_v26 = vsel %vm20093_vm6, %v15221_v41, %v15254_v19  ;;  %vm20094_vm7 = vmmov %vm20093_vm6  ;;  %v5980_v55 = vsel %vm20089_vm12, %v14963_v1, %v15301_v56  ;;  %vm20096_vm5 = vcmask 834560  }
 0x6dd   : > { %5045 = vrot.lane.b32.xlu1 %v14845_v35, %s10653_s7  ;;  %5043 = vrot.lane.b32.xlu0 %v4942_v61, %s10653_s7  ;;  %v7735_v35 = vsel %vm7721_vm14, %v15062_v50, %v15098_v6  ;;  %v5981_v53 = vsel %vm20089_vm12, %v15301_v56, %v15336_v48  ;;  %v6858_v5 = vsel %vm20094_vm7, %v15176_v49, %v15221_v41  ;;  %v15412_v61 = vld [vmem:[%s10699_s17 + $0xd0] sm:$0xff]  ;;  %vm20097_vm15 = vcmask 973824   ;;  %vm20098_vm6 = vmmov %vm20095_vm8 }
 0x6de   : > { %9367 = vmatprep.subr.mxu1 %v6857_v34  ;;  %9420 = vmatprep.subr.mxu0 %v184_v46  ;;  %v6567_v42 = vsel %vm20095_vm8, %v15276_v47, %v15303_v13  ;;  %v6566_v41 = vsel %vm20098_vm6, %v15228_v62, %v15276_v47  ;;  %vm20099_vm7 = vmmov %vm20096_vm5  ;;  %vm20101_vm8 = vcmask 965632   ;;  %v20106_v34 = vld [vmem:[#allocation584_spill] sm:$0xff] }
 0x6df   : > { %9368 = vmatpush2.msra.mxu1 %v6856_v31  ;;  %9421 = vmatpush1.msra.mxu0 %v183_v22  ;;  %v6274_v1 = vsel %vm20099_vm7, %v15282_v11, %v6204_v14  ;;  %vm20100_vm12 = vmmov %vm20097_vm15 }
 0x6e0   : > { %9369 = vmatprep.subr.mxu1 %v6565_v39  ;;  %9432 = vmatprep.subr.mxu0 %v7735_v35  ;;  %vm20104_vm6 = vmmov %vm20101_vm8  ;;  %v5104_v35 = vsel %vm5093_vm11, %v19982_v27, %v20106_v34 }
 0x6e1   : > { %9370 = vmatpush2.msra.mxu1 %v6564_v21  ;;  %9433 = vmatpush2.msra.mxu0 %v7734_v9  ;;  %v5616_v36 = vpop.permute.xlu1 %5615  ;;  %v20107_v9 = vld [vmem:[#allocation131_spill] sm:$0xff]  ;;  %vm20109_vm7 = vmmov %vm20100_vm12 }
 0x6e2   : > { %7677 = vrot.lane.b32.xlu1 %v15354_v28, %s10654_s8  ;;  %7675 = vrot.lane.b32.xlu0 %v15357_v45, %s10654_s8  ;;  %v15378_v50 = vpop.permute.xlu0 %6205  ;;  %v5688_v56 = vsel %vm20100_vm12, %v14996_v16, %v5616_v36  ;;  %vm20110_vm12 = vmmov %vm20109_vm7 }
 0x6e3   : > { %9371 = vmatprep.subr.mxu1 %v6273_v23  ;;  %9434 = vmatprep.subr.mxu0 %v7443_v12  ;;  %v6275_v29 = vsel %vm20096_vm5, %v6204_v14, %v15378_v50  ;;  %vm20102_vm5 = vcmask 719872   ;;  %v20108_v23 = vld [vmem:[#allocation48_spill] sm:$0xff] }
 0x6e4   : > { %9372 = vmatpush2.msra.mxu1 %v6272_v57  ;;  %9435 = vmatpush2.msra.mxu0 %v7442_v44  ;;  %v4812_v27 = vsel %vm4801_vm9, %v19986_v24, %v20108_v23  ;;  %v20112_v57 = vld [vmem:[#allocation339_spill] sm:$0xff] }
 0x6e5   : > { %9436 = vmatprep.subr.mxu0 %v7151_v10  ;;  %9373 = vmatprep.subr.mxu1 %v5981_v53  ;;  %v20111_v53 = vld [vmem:[#allocation381_spill] sm:$0xff]  ;;  %v4524_v24 = vsel %vm4509_vm0, %v19990_v25, %v20112_v57 }
 0x6e6   : > { %9437 = vmatpush2.msra.mxu0 %v7150_v38  ;;  %7385 = vrot.lane.b32.xlu1 %v15354_v28, %s10655_s9  ;;  %v5912_v20 = vpop.permute.xlu1 %5911  ;;  %v4525_v44 = vsel %vm4509_vm0, %v20112_v57, %v20111_v53  ;;  %v20128_v57 = vld [vmem:[#allocation390_spill] sm:$0xff] }
 0x6e7   : > { %7383 = vrot.lane.b32.xlu0 %v15357_v45, %s10655_s9  ;;  %9438 = vmatprep.subr.mxu0 %v6859_v26  ;;  %v5618_v33 = vpop.permute.xlu0 %5617  ;;  %v5982_v16 = vsel %vm20104_vm6, %v15336_v48, %v5912_v20  ;;  %v20105_v48 = vld [vmem:[#allocation587_spill] sm:$0xff]  ;;  %v20113_v26 = vld [vmem:[#allocation537_spill] sm:$0xff]  ;;  %vm20135_vm6 = vcmask 490496  }
 0x6e8   : > { %9439 = vmatpush2.msra.mxu0 %v6858_v5  ;;  %9374 = vmatpush2.msra.mxu1 %v5980_v55  ;;  %v5689_v49 = vsel %vm20097_vm15, %v5616_v36, %v5618_v33  ;;  %vm20103_vm15 = vmmov %vm20102_vm5  ;;  %v5105_v31 = vsel %vm5093_vm11, %v20106_v34, %v20105_v48  ;;  %v20123_v34 = vld [vmem:[#allocation298_spill] sm:$0xff] }
 0x6e9   : > { %9440 = vmatprep.subr.mxu0 %v6567_v42  ;;  %9375 = vmatprep.subr.mxu1 %v5689_v49  ;;  %v20116_v42 = vld [vmem:[#allocation586_spill] sm:$0xff] }
 0x6ea   : > { %9441 = vmatpush2.msra.mxu0 %v6566_v41  ;;  %7681 = vrot.lane.b32.xlu1 %v15403_v15, %s10654_s8 }
 0x6eb   : > { %7679 = vrot.lane.b32.xlu0 %v15412_v61, %s10654_s8  ;;  %9442 = vmatprep.subr.mxu0 %v6275_v29  ;;  %v5324_v52 = vpop.permute.xlu1 %5323 }
 0x6ec   : > { %9443 = vmatpush2.msra.mxu0 %v6274_v1  ;;  %9376 = vmatpush2.msra.mxu1 %v5688_v56  ;;  %v15428_v46 = vpop.permute.xlu0 %5913  ;;  %v5396_v14 = vsel %vm5385_vm10, %v15019_v58, %v5324_v52  ;;  %v4813_v58 = vsel %vm4801_vm9, %v20108_v23, %v20107_v9  ;;  %v5106_v1 = vsel %vm5093_vm11, %v20105_v48, %v20116_v42  ;;  %v20125_v23 = vld [vmem:[#allocation432_spill] sm:$0xff] }
 0x6ed   : > { %v5983_v62 = vsel %vm20101_vm8, %v5912_v20, %v15428_v46  ;;  %10562 = vmatprep.mubr.msk.f32.mxu1 %vm20102_vm5, %v14976_v37  ;;  %10563 = vmatprep.mubr.msk.f32.mxu0 %vm20103_vm15, %v14976_v37  ;;  %v20114_v20 = vld [vmem:[#allocation534_spill] sm:$0xff]  ;;  %vm20115_vm8 = vmmov %vm20102_vm5  ;;  %vm20129_vm5 = vcmask 482304  }
 0x6ee   : > { %7093 = vrot.lane.b32.xlu1 %v15354_v28, %s10656_s10  ;;  %9444 = vmatprep.subr.mxu0 %v5983_v62  ;;  %v4233_v5 = vsel %vm4217_vm1, %v20114_v20, %v20113_v26  ;;  %v20119_v62 = vld [vmem:[#allocation3_spill] sm:$0xff]  ;;  %vm20132_vm15 = vmmov %vm20129_vm5 }
 0x6ef   : > { %7091 = vrot.lane.b32.xlu0 %v15357_v45, %s10656_s10  ;;  %9445 = vmatpush2.msra.mxu0 %v5982_v16  ;;  %v20120_v16 = vld [vmem:[#allocation134_spill] sm:$0xff] }
 0x6f0   : > { %v5620_v11 = vpop.permute.xlu1 %5619  ;;  %v4814_v48 = vsel %vm4801_vm9, %v20107_v9, %v20120_v16 }
 0x6f1   : > { %v5326_v47 = vpop.permute.xlu0 %5325  ;;  %v5690_v12 = vsel %vm20110_vm12, %v5618_v33, %v5620_v11  ;;  %v4232_v33 = vsel %vm4217_vm1, %v19997_v63, %v20114_v20  ;;  %v20117_v63 = vld [vmem:[#allocation506_spill] sm:$0xff]  ;;  %v3064_v20 = vsel %vm20132_vm15, %v20021_v8, %v20128_v57  ;;  %v20137_v8 = vld [vmem:[#allocation505_spill] sm:$0xff]  ;;  %vm20141_vm12 = vcmask 736256  }
 0x6f2   : > { %7389 = vrot.lane.b32.xlu1 %v15403_v15, %s10655_s9  ;;  %v5397_v22 = vsel %vm5385_vm10, %v5324_v52, %v5326_v47 }
 0x6f3   : > { %7387 = vrot.lane.b32.xlu0 %v15412_v61, %s10655_s9  ;;  %9377 = vmatprep.subr.mxu1 %v5397_v22  ;;  %v20122_v22 = vld [vmem:[#allocation466_spill] sm:$0xff] }
 0x6f4   : > { %9378 = vmatpush2.msra.mxu1 %v5396_v14 }
 0x6f5   : > { %v5328_v39 = vpop.permute.xlu1 %5327  ;;  %9379 = vmatprep.subr.mxu1 %v5105_v31  ;;  %v20124_v31 = vld [vmem:[#allocation297_spill] sm:$0xff] }
 0x6f6   : > { %6801 = vrot.lane.b32.xlu1 %v15354_v28, %s10657_s11  ;;  %v15457_v21 = vpop.permute.xlu0 %5621  ;;  %9380 = vmatpush2.msra.mxu1 %v5104_v35  ;;  %v5398_v25 = vsel %vm5385_vm10, %v5326_v47, %v5328_v39  ;;  %v20121_v47 = vld [vmem:[#allocation469_spill] sm:$0xff] }
 0x6f7   : > { %6799 = vrot.lane.b32.xlu0 %v15357_v45, %s10657_s11  ;;  %9381 = vmatprep.subr.mxu1 %v4813_v58  ;;  %v5691_v36 = vsel %vm20109_vm7, %v5620_v11, %v15457_v21  ;;  %v4815_v11 = vsel %vm4801_vm9, %v20120_v16, %v20119_v62  ;;  %v3649_v14 = vsel %vm3633_vm3, %v20122_v22, %v20121_v47  ;;  %v20126_v58 = vld [vmem:[#allocation429_spill] sm:$0xff]  ;;  %vm20138_vm7 = vmmov %vm20135_vm6 }
 0x6f8   : > { %9446 = vmatprep.subr.mxu0 %v5691_v36  ;;  %9382 = vmatpush2.msra.mxu1 %v4812_v27  ;;  %v3357_v36 = vsel %vm3341_vm4, %v20126_v58, %v20125_v23  ;;  %v4526_v27 = vsel %vm4509_vm0, %v20111_v53, %v20124_v31 }
 0x6f9   : > { %9447 = vmatpush2.msra.mxu0 %v5690_v12  ;;  %9461 = vmatprep.subr.mxu1 %v4525_v44  ;;  %v20127_v12 = vld [vmem:[#allocation393_spill] sm:$0xff]  ;;  %v20130_v44 = vld [vmem:[#allocation539_spill] sm:$0xff] }
 0x6fa   : > { %7097 = vrot.lane.b32.xlu1 %v15403_v15, %s10656_s10  ;;  %v15475_v10 = vpop.permute.xlu1 %5037  ;;  %9384 = vmatmul.mubr.f32.vlgmr.msra.gmra.mxu1 %v15085_v51 }
 0x6fb   : > { %7095 = vrot.lane.b32.xlu0 %v15412_v61, %s10656_s10  ;;  %v15483_v38 = vpop.permute.xlu0 %5329  ;;  %9462 = vmatpush1.msra.mxu1 %v4524_v24  ;;  %v5107_v29 = vsel %vm5093_vm11, %v20116_v42, %v15475_v10  ;;  %v20131_v24 = vld [vmem:[#allocation536_spill] sm:$0xff] }
 0x6fc   : > { %v5399_v55 = vsel %vm5385_vm10, %v5328_v39, %v15483_v38  ;;  %9463 = vmatprep.subr.mxu1 %v4233_v5  ;;  %10564 = vmatprep.mubr.msk.f32.mxu1 %vm20115_vm8, %v14976_v37  ;;  %v20118_v37 = vld [vmem:[#allocation503_spill] sm:$0xff]  ;;  %v4527_v39 = vsel %vm4509_vm0, %v20124_v31, %v20123_v34  ;;  %v4234_v53 = vsel %vm4217_vm1, %v20113_v26, %v20131_v24  ;;  %vm20144_vm8 = vmmov %vm20141_vm12  ;;  %v20145_v31 = vld [vmem:[#allocation272_spill] sm:$0xff] }
 0x6fd   : > { %9448 = vmatprep.subr.mxu0 %v5399_v55  ;;  %9464 = vmatpush1.msra.mxu1 %v4232_v33  ;;  %v3941_v41 = vsel %vm3925_vm2, %v20118_v37, %v20117_v63  ;;  %v3940_v52 = vsel %vm3925_vm2, %v20003_v4, %v20118_v37  ;;  %v3648_v4 = vsel %vm3633_vm3, %v20009_v3, %v20122_v22  ;;  %v20133_v55 = vld [vmem:[#allocation354_spill] sm:$0xff]  ;;  %v20134_v33 = vld [vmem:[#allocation351_spill] sm:$0xff]  ;;  %v20143_v22 = vld [vmem:[#allocation468_spill] sm:$0xff] }
 0x6fe   : > { %6509 = vrot.lane.b32.xlu1 %v15354_v28, %s10658_s14  ;;  %9449 = vmatpush2.msra.mxu0 %v5398_v25  ;;  %v3356_v3 = vsel %vm3341_vm4, %v20015_v7, %v20126_v58  ;;  %v4235_v7 = vsel %vm4217_vm1, %v20131_v24, %v20130_v44  ;;  %v2773_v25 = vsel %vm20135_vm6, %v20134_v33, %v20133_v55  ;;  %v20148_v58 = vld [vmem:[#allocation434_spill] sm:$0xff]  ;;  %vm20153_vm6 = vcmask 752640  }
 0x6ff   : > { %6507 = vrot.lane.b32.xlu0 %v15357_v45, %s10658_s14  ;;  %v15503_v49 = vpop.permute.xlu1 %7669  ;;  %9450 = vmatprep.subr.mxu0 %v5107_v29  ;;  %v20136_v29 = vld [vmem:[#allocation508_spill] sm:$0xff]  ;;  %v2772_v26 = vsel %vm20138_vm7, %v20029_v17, %v20134_v33  ;;  %vm20156_vm7 = vcmask 482304  }
 0x700   : > { %v15511_v56 = vpop.permute.xlu0 %7667  ;;  %9465 = vmatprep.subr.mxu1 %v3941_v41  ;;  %9451 = vmatpush2.msra.mxu0 %v5106_v1  ;;  %v3943_v37 = vsel %vm3925_vm2, %v20137_v8, %v20136_v29  ;;  %v3942_v41 = vsel %vm3925_vm2, %v20117_v63, %v20137_v8  ;;  %v20139_v1 = vld [vmem:[#allocation314_spill] sm:$0xff]  ;;  %v3650_v63 = vsel %vm3633_vm3, %v20121_v47, %v20143_v22  ;;  %v20159_v8 = vld [vmem:[#allocation188_spill] sm:$0xff] }
 0x701   : > { %9466 = vmatpush1.msra.mxu1 %v3940_v52  ;;  %9452 = vmatprep.subr.mxu0 %v4815_v11  ;;  %v20140_v52 = vld [vmem:[#allocation311_spill] sm:$0xff] }
 0x702   : > { %6805 = vrot.lane.b32.xlu1 %v15403_v15, %s10657_s11  ;;  %9467 = vmatprep.subr.mxu1 %v3649_v14  ;;  %v2481_v16 = vsel %vm20141_vm12, %v20140_v52, %v20139_v1  ;;  %v20142_v11 = vld [vmem:[#allocation471_spill] sm:$0xff]  ;;  %v2480_v17 = vsel %vm20144_vm8, %v20037_v30, %v20140_v52  ;;  %vm20157_vm12 = vmmov %vm20153_vm6  ;;  %v20163_v52 = vld [vmem:[#allocation353_spill] sm:$0xff] }
 0x703   : > { %6803 = vrot.lane.b32.xlu0 %v15412_v61, %s10657_s11  ;;  %9453 = vmatpush2.msra.mxu0 %v4814_v48  ;;  %v3651_v14 = vsel %vm3633_vm3, %v20143_v22, %v20142_v11  ;;  %vm20158_vm8 = vmmov %vm20156_vm7  ;;  %v20165_v22 = vld [vmem:[#allocation186_spill] sm:$0xff] }
 0x704   : > { %9468 = vmatpush1.msra.mxu1 %v3648_v4  ;;  %v15535_v35 = vpop.permute.xlu1 %7377  ;;  %9532 = vmatprep.subr.mxu0 %v4527_v39  ;;  %v20146_v39 = vld [vmem:[#allocation269_spill] sm:$0xff] }
 0x705   : > { %v15540_v9 = vpop.permute.xlu0 %7375  ;;  %9469 = vmatprep.subr.mxu1 %v3357_v36  ;;  %9455 = vmatmul.mubr.f32.vlgmr.msra.gmra.mxu0 %v15085_v51  ;;  %v3065_v51 = vsel %vm20129_vm5, %v20128_v57, %v20127_v12  ;;  %vm20147_vm5 = vcmask 744448   ;;  %v20149_v36 = vld [vmem:[#allocation431_spill] sm:$0xff]  ;;  %v20151_v57 = vld [vmem:[#allocation230_spill] sm:$0xff] }
 0x706   : > { %6217 = vrot.lane.b32.xlu1 %v15354_v28, %s10659_s15  ;;  %9470 = vmatpush1.msra.mxu1 %v3356_v3  ;;  %v2189_v30 = vsel %vm20147_vm5, %v20146_v39, %v20145_v31  ;;  %v3359_v3 = vsel %vm3341_vm4, %v20149_v36, %v20148_v58  ;;  %vm20150_vm15 = vmmov %vm20147_vm5  ;;  %vm20161_vm5 = vcmask 883712  }
 0x707   : > { %6215 = vrot.lane.b32.xlu0 %v15357_v45, %s10659_s15  ;;  %9533 = vmatpush1.msra.mxu0 %v4526_v27  ;;  %v2188_v47 = vsel %vm20150_vm15, %v20045_v60, %v20146_v39  ;;  %v3358_v27 = vsel %vm3341_vm4, %v20125_v23, %v20149_v36  ;;  %vm20164_vm15 = vcmask 490496   ;;  %v20169_v39 = vld [vmem:[#allocation143_spill] sm:$0xff]  ;;  %v20171_v36 = vld [vmem:[#allocation316_spill] sm:$0xff] }
 0x708   : > { %9471 = vmatprep.subr.mxu1 %v3065_v51  ;;  %9534 = vmatprep.subr.mxu0 %v4235_v7  ;;  %v20152_v51 = vld [vmem:[#allocation227_spill] sm:$0xff] }
 0x709   : > { %9472 = vmatpush1.msra.mxu1 %v3064_v20  ;;  %9535 = vmatpush1.msra.mxu0 %v4234_v53  ;;  %v15565_v5 = vpop.permute.xlu1 %7673  ;;  %v1897_v24 = vsel %vm20153_vm6, %v20152_v51, %v20151_v57  ;;  %v20154_v20 = vld [vmem:[#allocation395_spill] sm:$0xff]  ;;  %v20155_v53 = vld [vmem:[#allocation392_spill] sm:$0xff]  ;;  %v1896_v23 = vsel %vm20157_vm12, %v20053_v2, %v20152_v51  ;;  %vm20166_vm6 = vmmov %vm20161_vm5  ;;  %vm20170_vm12 = vcmask 891904  }
 0x70a   : > { %6513 = vrot.lane.b32.xlu1 %v15403_v15, %s10658_s14  ;;  %v15572_v42 = vpop.permute.xlu0 %7671  ;;  %9473 = vmatprep.subr.mxu1 %v2773_v25  ;;  %v3067_v60 = vsel %vm20156_vm7, %v20155_v53, %v20154_v20  ;;  %v3066_v25 = vsel %vm20158_vm8, %v20127_v12, %v20155_v53  ;;  %vm20167_vm7 = vmmov %vm20164_vm15  ;;  %vm20173_vm8 = vcmask 736256   ;;  %v20176_v51 = vld [vmem:[#allocation104_spill] sm:$0xff] }
 0x70b   : > { %6511 = vrot.lane.b32.xlu0 %v15412_v61, %s10658_s14  ;;  %9536 = vmatprep.subr.mxu0 %v3943_v37  ;;  %v20160_v37 = vld [vmem:[#allocation185_spill] sm:$0xff]  ;;  %v2774_v12 = vsel %vm20167_vm7, %v20133_v55, %v20163_v52  ;;  %vm20181_vm7 = vcmask 744448  }
 0x70c   : > { %9474 = vmatpush1.msra.mxu1 %v2772_v26  ;;  %9537 = vmatpush1.msra.mxu0 %v3942_v41  ;;  %v1605_v26 = vsel %vm20161_vm5, %v20160_v37, %v20159_v8  ;;  %v20162_v41 = vld [vmem:[#allocation356_spill] sm:$0xff]  ;;  %v1604_v2 = vsel %vm20166_vm6, %v20165_v22, %v20160_v37  ;;  %vm20174_vm5 = vmmov %vm20170_vm12  ;;  %vm20178_vm6 = vcmask 900096  }
 0x70d   : > { %9475 = vmatprep.subr.mxu1 %v2481_v16  ;;  %9538 = vmatprep.subr.mxu0 %v3651_v14  ;;  %v15594_v48 = vpop.permute.xlu1 %7085  ;;  %v2775_v16 = vsel %vm20164_vm15, %v20163_v52, %v20162_v41  ;;  %vm20175_vm15 = vmmov %vm20173_vm8  ;;  %v20184_v52 = vld [vmem:[#allocation62_spill] sm:$0xff] }
 0x70e   : > { %5925 = vrot.lane.b32.xlu1 %v15354_v28, %s10660_s16  ;;  %9476 = vmatpush1.msra.mxu1 %v2480_v17  ;;  %v15601_v4 = vpop.permute.xlu0 %7083 }
 0x70f   : > { %5923 = vrot.lane.b32.xlu0 %v15357_v45, %s10660_s16  ;;  %9539 = vmatpush1.msra.mxu0 %v3650_v63  ;;  %v20168_v63 = vld [vmem:[#allocation146_spill] sm:$0xff] }
 0x710   : > { %9477 = vmatprep.subr.mxu1 %v2189_v30  ;;  %9540 = vmatprep.subr.mxu0 %v3359_v3  ;;  %v1313_v30 = vsel %vm20170_vm12, %v20169_v39, %v20168_v63  ;;  %v20172_v3 = vld [vmem:[#allocation313_spill] sm:$0xff]  ;;  %vm20182_vm12 = vmmov %vm20178_vm6 }
 0x711   : > { %9478 = vmatpush1.msra.mxu1 %v2188_v47  ;;  %9541 = vmatpush1.msra.mxu0 %v3358_v27  ;;  %v15620_v7 = vpop.permute.xlu1 %7381  ;;  %v2483_v55 = vsel %vm20173_vm8, %v20172_v3, %v20171_v36  ;;  %v1312_v47 = vsel %vm20174_vm5, %v20066_v59, %v20169_v39  ;;  %v2482_v27 = vsel %vm20175_vm15, %v20139_v1, %v20172_v3  ;;  %vm20183_vm8 = vmmov %vm20181_vm7  ;;  %vm20186_vm5 = vcmask 1031168   ;;  %v20192_v3 = vld [vmem:[#allocation20_spill] sm:$0xff] }
 0x712   : > { %6221 = vrot.lane.b32.xlu1 %v15403_v15, %s10659_s15  ;;  %9479 = vmatprep.subr.mxu1 %v1897_v24  ;;  %v15627_v33 = vpop.permute.xlu0 %7379  ;;  %v20177_v24 = vld [vmem:[#allocation101_spill] sm:$0xff]  ;;  %vm20189_vm15 = vcmask 752640  }
 0x713   : > { %6219 = vrot.lane.b32.xlu0 %v15412_v61, %s10659_s15  ;;  %9542 = vmatprep.subr.mxu0 %v3067_v60  ;;  %v1021_v53 = vsel %vm20178_vm6, %v20177_v24, %v20176_v51  ;;  %v20179_v60 = vld [vmem:[#allocation274_spill] sm:$0xff]  ;;  %v1020_v59 = vsel %vm20182_vm12, %v20070_v18, %v20177_v24  ;;  %v20188_v18 = vld [vmem:[#allocation229_spill] sm:$0xff]  ;;  %vm20190_vm6 = vmmov %vm20186_vm5  ;;  %vm20194_vm12 = vcmask 1039360  }
 0x714   : > { %9480 = vmatpush1.msra.mxu1 %v1896_v23  ;;  %9543 = vmatpush1.msra.mxu0 %v3066_v25  ;;  %v20180_v23 = vld [vmem:[#allocation271_spill] sm:$0xff] }
 0x715   : > { %9481 = vmatprep.subr.mxu1 %v1605_v26  ;;  %9544 = vmatprep.subr.mxu0 %v2775_v16  ;;  %v15649_v14 = vpop.permute.xlu1 %6793  ;;  %v2191_v25 = vsel %vm20181_vm7, %v20180_v23, %v20179_v60  ;;  %v2190_v1 = vsel %vm20183_vm8, %v20145_v31, %v20180_v23  ;;  %v20185_v16 = vld [vmem:[#allocation59_spill] sm:$0xff]  ;;  %vm20191_vm7 = vmmov %vm20189_vm15  ;;  %vm20197_vm8 = vcmask 883712  }
 0x716   : > { %9482 = vmatpush1.msra.mxu1 %v1604_v2  ;;  %9545 = vmatpush1.msra.mxu0 %v2774_v12  ;;  %v15651_v17 = vpop.permute.xlu0 %6791  ;;  %v729_v22 = vsel %vm20186_vm5, %v20185_v16, %v20184_v52  ;;  %v20187_v2 = vld [vmem:[#allocation232_spill] sm:$0xff]  ;;  %v728_v31 = vsel %vm20190_vm6, %v20074_v0, %v20185_v16  ;;  %v1898_v39 = vsel %vm20191_vm7, %v20151_v57, %v20188_v18  ;;  %v20196_v24 = vld [vmem:[#allocation187_spill] sm:$0xff]  ;;  %vm20198_vm5 = vmmov %vm20194_vm12  ;;  %vm20202_vm6 = vcmask 891904  }
 0x717   : > { %5633 = vrot.lane.b32.xlu1 %v15354_v28, %s10661_s18  ;;  %5631 = vrot.lane.b32.xlu0 %v15357_v45, %s10661_s18  ;;  %v1899_v12 = vsel %vm20189_vm15, %v20188_v18, %v20187_v2  ;;  %vm20199_vm15 = vmmov %vm20197_vm8  ;;  %v20201_v16 = vld [vmem:[#allocation145_spill] sm:$0xff] }
 0x718   : > { %9483 = vmatprep.subr.mxu1 %v1313_v30  ;;  %9546 = vmatprep.subr.mxu0 %v2483_v55  ;;  %v20193_v55 = vld [vmem:[#allocation17_spill] sm:$0xff]  ;;  %v1606_v57 = vsel %vm20199_vm15, %v20159_v8, %v20196_v24  ;;  %vm20203_vm7 = vmmov %vm20202_vm6 }
 0x719   : > { %9484 = vmatpush1.msra.mxu1 %v1312_v47  ;;  %9547 = vmatpush1.msra.mxu0 %v2482_v27  ;;  %v15675_v37 = vpop.permute.xlu1 %7089  ;;  %v437_v47 = vsel %vm20194_vm12, %v20193_v55, %v20192_v3  ;;  %v20195_v27 = vld [vmem:[#allocation190_spill] sm:$0xff]  ;;  %v436_v0 = vsel %vm20198_vm5, %v20079_v32, %v20193_v55  ;;  %v1314_v32 = vsel %vm20203_vm7, %v20168_v63, %v20201_v16  ;;  %vm20206_vm12 = vcmask 900096  }
 0x71a   : > { %9485 = vmatprep.subr.mxu1 %v1021_v53  ;;  %9548 = vmatprep.subr.mxu0 %v2191_v25  ;;  %v15683_v26 = vpop.permute.xlu0 %7087  ;;  %v1607_v53 = vsel %vm20197_vm8, %v20196_v24, %v20195_v27  ;;  %v186_v25 = vld [vmem:[%s10699_s17 + $0x78] sm:$0xff]  ;;  %v7736_v55 = vsel %vm7721_vm14, %v15098_v6, %v15511_v56  ;;  %vm20207_vm8 = vmmov %vm20206_vm12  ;;  %v7445_v6 = vsel %vm7429_vm13, %v15540_v9, %v15535_v35  ;;  %v20209_v24 = vld [vmem:[#allocation61_spill] sm:$0xff]  ;;  %vm20210_vm5 = vcmask 1031168  }
 0x71b   : > { %9486 = vmatpush1.msra.mxu1 %v1020_v59  ;;  %9549 = vmatpush1.msra.mxu0 %v2190_v1  ;;  %v185_v59 = vld [vmem:[%s10699_s17 + $0x70] sm:$0xff]  ;;  %v20200_v1 = vld [vmem:[#allocation148_spill] sm:$0xff]  ;;  %vm20211_vm15 = vmmov %vm20210_vm5  ;;  %vm20215_vm7 = vcmask 1039360  }
 0x71c   : > { %5929 = vrot.lane.b32.xlu1 %v15403_v15, %s10660_s16  ;;  %5927 = vrot.lane.b32.xlu0 %v15412_v61, %s10660_s16 }
 0x71d   : > { %9487 = vmatprep.subr.mxu1 %v729_v22  ;;  %9550 = vmatprep.subr.mxu0 %v1899_v12  ;;  %v15701_v30 = vpop.permute.xlu1 %6501  ;;  %v1315_v22 = vsel %vm20202_vm6, %v20201_v16, %v20200_v1  ;;  %v20204_v12 = vld [vmem:[#allocation106_spill] sm:$0xff]  ;;  %vm20212_vm6 = vcmask 687104   ;;  %v20214_v16 = vld [vmem:[#allocation19_spill] sm:$0xff] }
 0x71e   : > { %9488 = vmatpush1.msra.mxu1 %v728_v31  ;;  %9551 = vmatpush1.msra.mxu0 %v1898_v39  ;;  %v15709_v23 = vpop.permute.xlu0 %6499  ;;  %v20205_v31 = vld [vmem:[#allocation103_spill] sm:$0xff] }
 0x71f   : > { %9489 = vmatprep.subr.mxu1 %v437_v47  ;;  %9552 = vmatprep.subr.mxu0 %v1607_v53  ;;  %v1023_v39 = vsel %vm20206_vm12, %v20205_v31, %v20204_v12  ;;  %v1022_v63 = vsel %vm20207_vm8, %v20176_v51, %v20205_v31  ;;  %vm20216_vm12 = vmmov %vm20212_vm6  ;;  %v187_v31 = vld [vmem:[%s10699_s17 + $0x80] sm:$0xff] }
 0x720   : > { %9490 = vmatpush1.msra.mxu1 %v436_v0  ;;  %9553 = vmatpush1.msra.mxu0 %v1606_v57  ;;  %v7444_v0 = vsel %vm7429_vm13, %v15150_v54, %v15540_v9  ;;  %v730_v57 = vsel %vm20211_vm15, %v20184_v52, %v20209_v24  ;;  %v7152_v54 = vsel %vm20216_vm12, %v15202_v40, %v15601_v4  ;;  %vm20217_vm8 = vmmov %vm20215_vm7  ;;  %vm20222_vm12 = vcmask 834560  }
 0x721   : > { %5341 = vrot.lane.b32.xlu1 %v15354_v28, %s10662_s21  ;;  %5339 = vrot.lane.b32.xlu0 %v15357_v45, %s10662_s21  ;;  %v15726_v18 = vpop.permute.xlu1 %6797  ;;  %v7737_v28 = vsel %vm7721_vm14, %v15511_v56, %v15503_v49  ;;  %v20208_v56 = vld [vmem:[#allocation64_spill] sm:$0xff]  ;;  %v438_v9 = vsel %vm20217_vm8, %v20192_v3, %v20214_v16  ;;  %v7739_v3 = vsel %vm7721_vm14, %v15572_v42, %v15565_v5  ;;  %vm20223_vm8 = vmmov %vm20222_vm12 }
 0x722   : > { %9491 = vmatprep.subr.mxu1 %v186_v25  ;;  %9554 = vmatprep.subr.mxu0 %v1315_v22  ;;  %v15731_v8 = vpop.permute.xlu0 %6795  ;;  %v731_v51 = vsel %vm20210_vm5, %v20209_v24, %v20208_v56  ;;  %v7153_v25 = vsel %vm20212_vm6, %v15601_v4, %v15594_v48  ;;  %vm20218_vm5 = vcmask 818176   ;;  %vm20220_vm6 = vcmask 826368  }
 0x723   : > { %9492 = vmatpush1.msra.mxu1 %v185_v59  ;;  %9555 = vmatpush1.msra.mxu0 %v1314_v32  ;;  %v20213_v59 = vld [vmem:[#allocation22_spill] sm:$0xff]  ;;  %v4945_v32 = vld [vmem:[%s10699_s17 + $0xb0] sm:$0xff]  ;;  %vm20219_vm15 = vmmov %vm20218_vm5  ;;  %v6569_v4 = vsel %vm20220_vm6, %v15709_v23, %v15701_v30 }
 0x724   : > { %9503 = vmatprep.subr.mxu1 %v7737_v28  ;;  %9556 = vmatprep.subr.mxu0 %v1023_v39  ;;  %v439_v22 = vsel %vm20215_vm7, %v20214_v16, %v20213_v59  ;;  %v15771_v28 = vld [vmem:[%s10699_s17 + $0xa8] sm:$0xff]  ;;  %v6860_v40 = vsel %vm20219_vm15, %v15254_v19, %v15651_v17  ;;  %vm20221_vm7 = vmmov %vm20220_vm6  ;;  %v7738_v19 = vsel %vm7721_vm14, %v15503_v49, %v15572_v42  ;;  %vm20225_vm15 = vcmask 687104  }
 0x725   : > { %9504 = vmatpush2.msra.mxu1 %v7736_v55  ;;  %9557 = vmatpush1.msra.mxu0 %v1022_v63  ;;  %v15745_v47 = vpop.permute.xlu1 %6209  ;;  %v6861_v55 = vsel %vm20218_vm5, %v15651_v17, %v15649_v14  ;;  %vm20224_vm5 = vcmask 965632   ;;  %v7446_v42 = vsel %vm7429_vm13, %v15535_v35, %v15627_v33  ;;  %vm20226_vm6 = vmmov %vm20225_vm15  ;;  %v15857_v16 = vld [vmem:[%s18500_s1 + $0x8] sm:$0xff] }
 0x726   : > { %5637 = vrot.lane.b32.xlu1 %v15403_v15, %s10661_s18  ;;  %5635 = vrot.lane.b32.xlu0 %v15412_v61, %s10661_s18  ;;  %v6208_v53 = vpop.permute.xlu0 %6207 }
 0x727   : > { %9505 = vmatprep.subr.mxu1 %v7445_v6  ;;  %9558 = vmatprep.subr.mxu0 %v731_v51  ;;  %v6277_v17 = vsel %vm20222_vm12, %v6208_v53, %v15745_v47  ;;  %v6276_v24 = vsel %vm20223_vm8, %v15378_v50, %v6208_v53  ;;  %v7155_v50 = vsel %vm20225_vm15, %v15683_v26, %v15675_v37  ;;  %vm20228_vm12 = vcmask 818176  }
 0x728   : > { %9506 = vmatpush2.msra.mxu1 %v7444_v0  ;;  %9559 = vmatpush1.msra.mxu0 %v730_v57  ;;  %v7154_v51 = vsel %vm20226_vm6, %v15594_v48, %v15683_v26  ;;  %vm20229_vm8 = vmmov %vm20228_vm12  ;;  %v15840_v48 = vld [vmem:[%s10699_s17 + $0xe8] sm:$0xff]  ;;  %v15845_v0 = vld [vmem:[%s10699_s17 + $0xe0] sm:$0xff]  ;;  %vm20231_vm15 = vcmask 834560  }
 0x729   : > { %9507 = vmatprep.subr.mxu1 %v7153_v25  ;;  %9560 = vmatprep.subr.mxu0 %v439_v22  ;;  %v15779_v52 = vpop.permute.xlu1 %6505  ;;  %v6862_v53 = vsel %vm20229_vm8, %v15649_v14, %v15731_v8  ;;  %vm20235_vm8 = vcmask 719872  }
 0x72a   : > { %9508 = vmatpush2.msra.mxu1 %v7152_v54  ;;  %9561 = vmatpush1.msra.mxu0 %v438_v9  ;;  %v6504_v39 = vpop.permute.xlu0 %6503 }
 0x72b   : > { %5049 = vrot.lane.b32.xlu1 %v4945_v32, %s10653_s7  ;;  %5047 = vrot.lane.b32.xlu0 %v15771_v28, %s10653_s7 }
 0x72c   : > { %9509 = vmatprep.subr.mxu1 %v6861_v55  ;;  %9562 = vmatprep.subr.mxu0 %v15273_v43  ;;  %v6568_v43 = vsel %vm20221_vm7, %v15303_v13, %v15709_v23  ;;  %v7447_v13 = vsel %vm7429_vm13, %v15627_v33, %v15620_v7  ;;  %vm20227_vm7 = vmmov %vm20224_vm5  ;;  %v6863_v33 = vsel %vm20228_vm12, %v15731_v8, %v15726_v18  ;;  %vm20234_vm12 = vcmask 973824  }
 0x72d   : > { %9510 = vmatpush2.msra.mxu1 %v6860_v40  ;;  %9563 = vmatpush1.msra.mxu0 %v187_v31  ;;  %v5918_v63 = vpop.permute.xlu1 %5917  ;;  %v15880_v31 = vld [vmem:[%s10699_s17 + $0xf0] sm:$0xff] }
 0x72e   : > { %9511 = vmatprep.subr.mxu1 %v6569_v4  ;;  %9574 = vmatprep.subr.mxu0 %v7739_v3  ;;  %v5916_v6 = vpop.permute.xlu0 %5915 }
 0x72f   : > { %9512 = vmatpush2.msra.mxu1 %v6568_v43  ;;  %9575 = vmatpush2.msra.mxu0 %v7738_v19  ;;  %v5985_v49 = vsel %vm20224_vm5, %v5916_v6, %v5918_v63  ;;  %v5984_v35 = vsel %vm20227_vm7, %v15428_v46, %v5916_v6  ;;  %vm20230_vm5 = vcmask 826368   ;;  %vm20233_vm7 = vmmov %vm20231_vm15 }
 0x730   : > { %5345 = vrot.lane.b32.xlu1 %v15403_v15, %s10662_s21  ;;  %5343 = vrot.lane.b32.xlu0 %v15412_v61, %s10662_s21  ;;  %v4946_v15 = vld [vmem:[%s10699_s17 + $0xb8] sm:$0xff]  ;;  %v6571_v46 = vsel %vm20230_vm5, %v6504_v39, %v15779_v52  ;;  %vm20232_vm6 = vmmov %vm20230_vm5 }
 0x731   : > { %9513 = vmatprep.subr.mxu1 %v6277_v17  ;;  %9576 = vmatprep.subr.mxu0 %v7447_v13  ;;  %v15819_v23 = vpop.permute.xlu1 %6213  ;;  %v6570_v25 = vsel %vm20232_vm6, %v15701_v30, %v6504_v39  ;;  %vm20236_vm5 = vmmov %vm20234_vm12  ;;  %v20242_v13 = vld [vmem:[#allocation46_spill] sm:$0xff] }
 0x732   : > { %9514 = vmatpush2.msra.mxu1 %v6276_v24  ;;  %9577 = vmatpush2.msra.mxu0 %v7446_v42  ;;  %v6212_v61 = vpop.permute.xlu0 %6211  ;;  %v20241_v24 = vld [vmem:[#allocation92_spill] sm:$0xff] }
 0x733   : > { %9578 = vmatprep.subr.mxu0 %v7155_v50  ;;  %9515 = vmatprep.subr.mxu1 %v5985_v49  ;;  %v6278_v14 = vsel %vm20233_vm7, %v15745_v47, %v6212_v61  ;;  %vm20239_vm7 = vmmov %vm20236_vm5  ;;  %v4817_v49 = vsel %vm4801_vm9, %v20242_v13, %v20241_v24 }
 0x734   : > { %9579 = vmatpush2.msra.mxu0 %v7154_v51  ;;  %5053 = vrot.lane.b32.xlu1 %v15357_v45, %s10653_s7  ;;  %v6279_v45 = vsel %vm20231_vm15, %v6212_v61, %v15819_v23  ;;  %vm20237_vm15 = vcmask 965632   ;;  %v20243_v51 = vld [vmem:[#allocation255_spill] sm:$0xff] }
 0x735   : > { %5051 = vrot.lane.b32.xlu0 %v4946_v15, %s10653_s7  ;;  %9580 = vmatprep.subr.mxu0 %v6863_v33  ;;  %v5626_v26 = vpop.permute.xlu1 %5625  ;;  %vm20238_vm6 = vmmov %vm20237_vm15 }
 0x736   : > { %9581 = vmatpush2.msra.mxu0 %v6862_v53  ;;  %9516 = vmatpush2.msra.mxu1 %v5984_v35  ;;  %v5624_v57 = vpop.permute.xlu0 %5623  ;;  %v20244_v35 = vld [vmem:[#allocation379_spill] sm:$0xff] }
 0x737   : > { %9582 = vmatprep.subr.mxu0 %v6571_v46  ;;  %v5693_v8 = vsel %vm20234_vm12, %v5624_v57, %v5626_v26  ;;  %10565 = vmatprep.mubr.msk.f32.mxu0 %vm20235_vm8, %v15857_v16  ;;  %v5692_v30 = vsel %vm20236_vm5, %v15457_v21, %v5624_v57  ;;  %v15877_v21 = vld [vmem:[%s10699_s17 + $0xf8] sm:$0xff]  ;;  %vm20240_vm12 = vmmov %vm20236_vm5  ;;  %v4529_v33 = vsel %vm4509_vm0, %v20244_v35, %v20243_v51  ;;  %vm20259_vm5 = vcmask 482304  }
 0x738   : > { %9583 = vmatpush2.msra.mxu0 %v6570_v25  ;;  %7685 = vrot.lane.b32.xlu1 %v15840_v48, %s10654_s8  ;;  %v4528_v53 = vsel %vm4509_vm0, %v20123_v34, %v20244_v35  ;;  %v20246_v57 = vld [vmem:[#allocation538_spill] sm:$0xff] }
 0x739   : > { %7683 = vrot.lane.b32.xlu0 %v15845_v0, %s10654_s8  ;;  %9584 = vmatprep.subr.mxu0 %v6279_v45  ;;  %v15867_v47 = vpop.permute.xlu1 %5921  ;;  %v20245_v45 = vld [vmem:[#allocation541_spill] sm:$0xff]  ;;  %v20258_v35 = vld [vmem:[#allocation394_spill] sm:$0xff] }
 0x73a   : > { %9585 = vmatpush2.msra.mxu0 %v6278_v14  ;;  %9517 = vmatprep.subr.mxu1 %v5693_v8  ;;  %v5920_v22 = vpop.permute.xlu0 %5919  ;;  %v4237_v25 = vsel %vm4217_vm1, %v20246_v57, %v20245_v45  ;;  %v4236_v14 = vsel %vm4217_vm1, %v20130_v44, %v20246_v57  ;;  %v20249_v44 = vld [vmem:[#allocation4_spill] sm:$0xff] }
 0x73b   : > { %9518 = vmatpush2.msra.mxu1 %v5692_v30  ;;  %v5987_v32 = vsel %vm20237_vm15, %v5920_v22, %v15867_v47  ;;  %v5986_v54 = vsel %vm20238_vm6, %v5918_v63, %v5920_v22  ;;  %v20247_v30 = vld [vmem:[#allocation510_spill] sm:$0xff]  ;;  %v20248_v22 = vld [vmem:[#allocation507_spill] sm:$0xff]  ;;  %vm20262_vm15 = vmmov %vm20259_vm5  ;;  %vm20265_vm6 = vcmask 490496  }
 0x73c   : > { %7393 = vrot.lane.b32.xlu1 %v15840_v48, %s10655_s9  ;;  %9586 = vmatprep.subr.mxu0 %v5987_v32  ;;  %v3945_v32 = vsel %vm3925_vm2, %v20248_v22, %v20247_v30  ;;  %v3068_v57 = vsel %vm20262_vm15, %v20154_v20, %v20258_v35  ;;  %v20266_v20 = vld [vmem:[#allocation512_spill] sm:$0xff] }
 0x73d   : > { %7391 = vrot.lane.b32.xlu0 %v15845_v0, %s10655_s9  ;;  %9587 = vmatpush2.msra.mxu0 %v5986_v54  ;;  %v5334_v9 = vpop.permute.xlu1 %5333  ;;  %v3944_v54 = vsel %vm3925_vm2, %v20136_v29, %v20248_v22  ;;  %v20267_v22 = vld [vmem:[#allocation509_spill] sm:$0xff] }
 0x73e   : > { %v5332_v39 = vpop.permute.xlu0 %5331 }
 0x73f   : > { %v5401_v55 = vsel %vm5385_vm10, %v5332_v39, %v5334_v9  ;;  %v5400_v40 = vsel %vm5385_vm10, %v15483_v38, %v5332_v39 }
 0x740   : > { %7689 = vrot.lane.b32.xlu1 %v15877_v21, %s10654_s8  ;;  %9519 = vmatprep.subr.mxu1 %v5401_v55 }
 0x741   : > { %7687 = vrot.lane.b32.xlu0 %v15880_v31, %s10654_s8  ;;  %9520 = vmatpush2.msra.mxu1 %v5400_v40  ;;  %v15889_v4 = vpop.permute.xlu1 %5629 }
 0x742   : > { %v5628_v3 = vpop.permute.xlu0 %5627 }
 0x743   : > { %v5695_v63 = vsel %vm20239_vm7, %v5628_v3, %v15889_v4  ;;  %v5694_v43 = vsel %vm20240_vm12, %v5626_v26, %v5628_v3  ;;  %v20251_v3 = vld [vmem:[#allocation473_spill] sm:$0xff]  ;;  %vm20268_vm7 = vmmov %vm20265_vm6  ;;  %vm20271_vm12 = vcmask 736256  }
 0x744   : > { %7101 = vrot.lane.b32.xlu1 %v15840_v48, %s10656_s10  ;;  %9588 = vmatprep.subr.mxu0 %v5695_v63  ;;  %v20252_v63 = vld [vmem:[#allocation470_spill] sm:$0xff] }
 0x745   : > { %7099 = vrot.lane.b32.xlu0 %v15845_v0, %s10656_s10  ;;  %9589 = vmatpush2.msra.mxu0 %v5694_v43  ;;  %v5042_v38 = vpop.permute.xlu1 %5041  ;;  %v3653_v43 = vsel %vm3633_vm3, %v20252_v63, %v20251_v3 }
 0x746   : > { %v5040_v19 = vpop.permute.xlu0 %5039 }
 0x747   : > { %v5109_v17 = vsel %vm5093_vm11, %v5040_v19, %v5042_v38  ;;  %v5108_v6 = vsel %vm5093_vm11, %v15475_v10, %v5040_v19  ;;  %v4816_v10 = vsel %vm4801_vm9, %v20119_v62, %v20242_v13  ;;  %v15926_v62 = vld [vmem:[%s18500_s1] sm:$0xff]  ;;  %v20253_v19 = vld [vmem:[#allocation436_spill] sm:$0xff] }
 0x748   : > { %7397 = vrot.lane.b32.xlu1 %v15877_v21, %s10655_s9  ;;  %9521 = vmatprep.subr.mxu1 %v5109_v17  ;;  %v20254_v17 = vld [vmem:[#allocation433_spill] sm:$0xff]  ;;  %v20255_v13 = vld [vmem:[#allocation340_spill] sm:$0xff] }
 0x749   : > { %7395 = vrot.lane.b32.xlu0 %v15880_v31, %s10655_s9  ;;  %9522 = vmatpush2.msra.mxu1 %v5108_v6  ;;  %v3361_v6 = vsel %vm3341_vm4, %v20254_v17, %v20253_v19 }
 0x74a   : > { %v15908_v42 = vpop.permute.xlu1 %5337  ;;  %v5336_v50 = vpop.permute.xlu0 %5335  ;;  %9523 = vmatprep.subr.mxu1 %v4817_v49  ;;  %v20256_v49 = vld [vmem:[#allocation258_spill] sm:$0xff] }
 0x74b   : > { %9524 = vmatpush2.msra.mxu1 %v4816_v10  ;;  %v5403_v15 = vsel %vm5385_vm10, %v5336_v50, %v15908_v42  ;;  %v5402_v61 = vsel %vm5385_vm10, %v5334_v9, %v5336_v50  ;;  %v20250_v9 = vld [vmem:[#allocation6_spill] sm:$0xff]  ;;  %v4531_v50 = vsel %vm4509_vm0, %v20256_v49, %v20255_v13  ;;  %v4530_v10 = vsel %vm4509_vm0, %v20243_v51, %v20256_v49  ;;  %v20275_v49 = vld [vmem:[#allocation276_spill] sm:$0xff] }
 0x74c   : > { %6809 = vrot.lane.b32.xlu1 %v15840_v48, %s10657_s11  ;;  %9590 = vmatprep.subr.mxu0 %v5403_v15  ;;  %v4819_v39 = vsel %vm4801_vm9, %v20250_v9, %v20249_v44  ;;  %v4818_v29 = vsel %vm4801_vm9, %v20241_v24, %v20250_v9  ;;  %v3946_v9 = vsel %vm3925_vm2, %v20247_v30, %v20267_v22 }
 0x74d   : > { %6807 = vrot.lane.b32.xlu0 %v15845_v0, %s10657_s11  ;;  %9603 = vmatprep.subr.mxu1 %v4529_v33 }
 0x74e   : > { %9526 = vmatmul.mubr.f32.vlgmr.msra.gmra.mxu1 %v15926_v62  ;;  %9591 = vmatpush2.msra.mxu0 %v5402_v61  ;;  %v20257_v61 = vld [vmem:[#allocation397_spill] sm:$0xff] }
 0x74f   : > { %9604 = vmatpush1.msra.mxu1 %v4528_v53  ;;  %v15932_v26 = vpop.permute.xlu1 %5045  ;;  %v5044_v46 = vpop.permute.xlu0 %5043  ;;  %10566 = vmatprep.mubr.msk.f32.mxu1 %vm20235_vm8, %v15857_v16  ;;  %v3069_v33 = vsel %vm20259_vm5, %v20258_v35, %v20257_v61  ;;  %v20260_v53 = vld [vmem:[#allocation543_spill] sm:$0xff]  ;;  %vm20274_vm8 = vmmov %vm20271_vm12  ;;  %vm20277_vm5 = vcmask 744448   ;;  %v20278_v35 = vld [vmem:[#allocation438_spill] sm:$0xff] }
 0x750   : > { %7105 = vrot.lane.b32.xlu1 %v15877_v21, %s10656_s10  ;;  %9605 = vmatprep.subr.mxu1 %v4237_v25  ;;  %v5111_v34 = vsel %vm5093_vm11, %v5044_v46, %v15932_v26  ;;  %v5110_v8 = vsel %vm5093_vm11, %v5042_v38, %v5044_v46  ;;  %v3652_v38 = vsel %vm3633_vm3, %v20142_v11, %v20252_v63  ;;  %v20263_v25 = vld [vmem:[#allocation358_spill] sm:$0xff]  ;;  %v20270_v63 = vld [vmem:[#allocation315_spill] sm:$0xff]  ;;  %vm20280_vm15 = vmmov %vm20277_vm5 }
 0x751   : > { %7103 = vrot.lane.b32.xlu0 %v15880_v31, %s10656_s10  ;;  %9606 = vmatpush1.msra.mxu1 %v4236_v14  ;;  %v3360_v11 = vsel %vm3341_vm4, %v20148_v58, %v20254_v17  ;;  %v20261_v58 = vld [vmem:[#allocation540_spill] sm:$0xff]  ;;  %v20264_v14 = vld [vmem:[#allocation355_spill] sm:$0xff] }
 0x752   : > { %9592 = vmatprep.subr.mxu0 %v5111_v34  ;;  %9607 = vmatprep.subr.mxu1 %v3945_v32  ;;  %v4239_v46 = vsel %vm4217_vm1, %v20261_v58, %v20260_v53  ;;  %v4238_v51 = vsel %vm4217_vm1, %v20245_v45, %v20261_v58  ;;  %v2777_v34 = vsel %vm20265_vm6, %v20264_v14, %v20263_v25  ;;  %vm20283_vm6 = vcmask 752640  }
 0x753   : > { %9593 = vmatpush2.msra.mxu0 %v5110_v8  ;;  %9608 = vmatpush1.msra.mxu1 %v3944_v54  ;;  %v3947_v32 = vsel %vm3925_vm2, %v20267_v22, %v20266_v20  ;;  %v2776_v45 = vsel %vm20268_vm7, %v20162_v41, %v20264_v14  ;;  %v2484_v41 = vsel %vm20274_vm8, %v20171_v36, %v20270_v63  ;;  %v20279_v36 = vld [vmem:[#allocation435_spill] sm:$0xff]  ;;  %vm20286_vm7 = vcmask 482304  }
 0x754   : > { %6517 = vrot.lane.b32.xlu1 %v15840_v48, %s10658_s14  ;;  %v15960_v55 = vpop.permute.xlu1 %7677  ;;  %v15962_v40 = vpop.permute.xlu0 %7675  ;;  %9594 = vmatprep.subr.mxu0 %v4819_v39  ;;  %v20269_v39 = vld [vmem:[#allocation318_spill] sm:$0xff]  ;;  %vm20288_vm8 = vmmov %vm20286_vm7 }
 0x755   : > { %6515 = vrot.lane.b32.xlu0 %v15845_v0, %s10658_s14  ;;  %9609 = vmatprep.subr.mxu1 %v3653_v43  ;;  %v2485_v43 = vsel %vm20271_vm12, %v20270_v63, %v20269_v39  ;;  %vm20287_vm12 = vmmov %vm20283_vm6  ;;  %v20290_v63 = vld [vmem:[#allocation189_spill] sm:$0xff] }
 0x756   : > { %9595 = vmatpush2.msra.mxu0 %v4818_v29  ;;  %9610 = vmatpush1.msra.mxu1 %v3652_v38  ;;  %v20272_v29 = vld [vmem:[#allocation475_spill] sm:$0xff]  ;;  %v20273_v38 = vld [vmem:[#allocation472_spill] sm:$0xff] }
 0x757   : > { %9611 = vmatprep.subr.mxu1 %v3361_v6  ;;  %9674 = vmatprep.subr.mxu0 %v4531_v50  ;;  %v3655_v17 = vsel %vm3633_vm3, %v20273_v38, %v20272_v29  ;;  %v3654_v30 = vsel %vm3633_vm3, %v20251_v3, %v20273_v38  ;;  %v20276_v50 = vld [vmem:[#allocation273_spill] sm:$0xff]  ;;  %v3362_v3 = vsel %vm3341_vm4, %v20253_v19, %v20279_v36  ;;  %v20292_v38 = vld [vmem:[#allocation360_spill] sm:$0xff] }
 0x758   : > { %6813 = vrot.lane.b32.xlu1 %v15877_v21, %s10657_s11  ;;  %9597 = vmatmul.mubr.f32.vlgmr.msra.gmra.mxu0 %v15926_v62  ;;  %v15987_v24 = vpop.permute.xlu1 %7385  ;;  %v2192_v58 = vsel %vm20280_vm15, %v20179_v60, %v20276_v50  ;;  %v20284_v60 = vld [vmem:[#allocation399_spill] sm:$0xff]  ;;  %vm20294_vm15 = vcmask 490496  }
 0x759   : > { %6811 = vrot.lane.b32.xlu0 %v15880_v31, %s10657_s11  ;;  %9612 = vmatpush1.msra.mxu1 %v3360_v11  ;;  %v15994_v15 = vpop.permute.xlu0 %7383  ;;  %v2193_v11 = vsel %vm20277_vm5, %v20276_v50, %v20275_v49  ;;  %vm20291_vm5 = vcmask 883712   ;;  %v20297_v50 = vld [vmem:[#allocation150_spill] sm:$0xff] }
 0x75a   : > { %9675 = vmatpush1.msra.mxu0 %v4530_v10  ;;  %9613 = vmatprep.subr.mxu1 %v3069_v33  ;;  %v3363_v33 = vsel %vm3341_vm4, %v20279_v36, %v20278_v35 }
 0x75b   : > { %9676 = vmatprep.subr.mxu0 %v4239_v46  ;;  %9614 = vmatpush1.msra.mxu1 %v3068_v57  ;;  %v20281_v46 = vld [vmem:[#allocation234_spill] sm:$0xff]  ;;  %v20282_v57 = vld [vmem:[#allocation231_spill] sm:$0xff] }
 0x75c   : > { %6225 = vrot.lane.b32.xlu1 %v15840_v48, %s10659_s15  ;;  %9677 = vmatpush1.msra.mxu0 %v4238_v51  ;;  %v16013_v8 = vpop.permute.xlu1 %7681  ;;  %v1901_v51 = vsel %vm20283_vm6, %v20282_v57, %v20281_v46  ;;  %v1900_v19 = vsel %vm20287_vm12, %v20187_v2, %v20282_v57  ;;  %vm20295_vm6 = vmmov %vm20291_vm5  ;;  %vm20299_vm12 = vcmask 891904  }
 0x75d   : > { %6223 = vrot.lane.b32.xlu0 %v15845_v0, %s10659_s15  ;;  %9615 = vmatprep.subr.mxu1 %v2777_v34  ;;  %v16023_v54 = vpop.permute.xlu0 %7679  ;;  %v20285_v34 = vld [vmem:[#allocation396_spill] sm:$0xff]  ;;  %v1608_v2 = vsel %vm20295_vm6, %v20195_v27, %v20290_v63  ;;  %v20301_v27 = vld [vmem:[#allocation317_spill] sm:$0xff]  ;;  %vm20307_vm6 = vcmask 900096  }
 0x75e   : > { %9678 = vmatprep.subr.mxu0 %v3947_v32  ;;  %9616 = vmatpush1.msra.mxu1 %v2776_v45  ;;  %v3071_v22 = vsel %vm20286_vm7, %v20285_v34, %v20284_v60  ;;  %v3070_v45 = vsel %vm20288_vm8, %v20257_v61, %v20285_v34  ;;  %vm20296_vm7 = vmmov %vm20294_vm15  ;;  %vm20302_vm8 = vcmask 736256   ;;  %v20306_v34 = vld [vmem:[#allocation105_spill] sm:$0xff] }
 0x75f   : > { %9679 = vmatpush1.msra.mxu0 %v3946_v9  ;;  %9617 = vmatprep.subr.mxu1 %v2485_v43  ;;  %v20289_v9 = vld [vmem:[#allocation192_spill] sm:$0xff] }
 0x760   : > { %6521 = vrot.lane.b32.xlu1 %v15877_v21, %s10658_s14  ;;  %9680 = vmatprep.subr.mxu0 %v3655_v17  ;;  %v16039_v6 = vpop.permute.xlu1 %7093  ;;  %v1609_v43 = vsel %vm20291_vm5, %v20290_v63, %v20289_v9  ;;  %v20293_v17 = vld [vmem:[#allocation357_spill] sm:$0xff]  ;;  %vm20303_vm5 = vmmov %vm20299_vm12 }
 0x761   : > { %6519 = vrot.lane.b32.xlu0 %v15880_v31, %s10658_s14  ;;  %9618 = vmatpush1.msra.mxu1 %v2484_v41  ;;  %v16049_v10 = vpop.permute.xlu0 %7091  ;;  %v2779_v41 = vsel %vm20294_vm15, %v20293_v17, %v20292_v38  ;;  %v2778_v61 = vsel %vm20296_vm7, %v20263_v25, %v20293_v17  ;;  %vm20304_vm15 = vmmov %vm20302_vm8  ;;  %vm20310_vm7 = vcmask 744448  }
 0x762   : > { %9681 = vmatpush1.msra.mxu0 %v3654_v30  ;;  %9619 = vmatprep.subr.mxu1 %v2193_v11  ;;  %v20298_v11 = vld [vmem:[#allocation147_spill] sm:$0xff]  ;;  %v2486_v25 = vsel %vm20304_vm15, %v20269_v39, %v20301_v27  ;;  %vm20318_vm15 = vcmask 752640  }
 0x763   : > { %9682 = vmatprep.subr.mxu0 %v3363_v33  ;;  %9620 = vmatpush1.msra.mxu1 %v2192_v58  ;;  %v1317_v36 = vsel %vm20299_vm12, %v20298_v11, %v20297_v50  ;;  %v20300_v58 = vld [vmem:[#allocation320_spill] sm:$0xff]  ;;  %v1316_v57 = vsel %vm20303_vm5, %v20200_v1, %v20298_v11  ;;  %v20308_v1 = vld [vmem:[#allocation278_spill] sm:$0xff]  ;;  %vm20311_vm12 = vmmov %vm20307_vm6  ;;  %vm20315_vm5 = vcmask 1031168  }
 0x764   : > { %5933 = vrot.lane.b32.xlu1 %v15840_v48, %s10660_s16  ;;  %9683 = vmatpush1.msra.mxu0 %v3362_v3  ;;  %v16065_v14 = vpop.permute.xlu1 %7389  ;;  %v2487_v3 = vsel %vm20302_vm8, %v20301_v27, %v20300_v58  ;;  %v1024_v39 = vsel %vm20311_vm12, %v20204_v12, %v20306_v34  ;;  %vm20312_vm8 = vmmov %vm20310_vm7  ;;  %v20316_v11 = vld [vmem:[#allocation236_spill] sm:$0xff]  ;;  %vm20323_vm12 = vcmask 1039360  }
 0x765   : > { %5931 = vrot.lane.b32.xlu0 %v15845_v0, %s10660_s16  ;;  %9621 = vmatprep.subr.mxu1 %v1901_v51  ;;  %v16075_v32 = vpop.permute.xlu0 %7387  ;;  %v20305_v51 = vld [vmem:[#allocation108_spill] sm:$0xff] }
 0x766   : > { %9684 = vmatprep.subr.mxu0 %v3071_v22  ;;  %9622 = vmatpush1.msra.mxu1 %v1900_v19  ;;  %v1025_v22 = vsel %vm20307_vm6, %v20306_v34, %v20305_v51  ;;  %vm20319_vm6 = vmmov %vm20315_vm5 }
 0x767   : > { %9685 = vmatpush1.msra.mxu0 %v3070_v45  ;;  %9623 = vmatprep.subr.mxu1 %v1609_v43  ;;  %v20309_v45 = vld [vmem:[#allocation275_spill] sm:$0xff] }
 0x768   : > { %6229 = vrot.lane.b32.xlu1 %v15877_v21, %s10659_s15  ;;  %9686 = vmatprep.subr.mxu0 %v2779_v41  ;;  %v16091_v30 = vpop.permute.xlu1 %6801  ;;  %v2195_v63 = vsel %vm20310_vm7, %v20309_v45, %v20308_v1  ;;  %v2194_v17 = vsel %vm20312_vm8, %v20275_v49, %v20309_v45  ;;  %v20313_v41 = vld [vmem:[#allocation66_spill] sm:$0xff]  ;;  %vm20320_vm7 = vmmov %vm20318_vm15  ;;  %vm20326_vm8 = vcmask 883712  }
 0x769   : > { %6227 = vrot.lane.b32.xlu0 %v15880_v31, %s10659_s15  ;;  %9624 = vmatpush1.msra.mxu1 %v1608_v2  ;;  %v16101_v33 = vpop.permute.xlu0 %6799  ;;  %v20314_v2 = vld [vmem:[#allocation63_spill] sm:$0xff] }
 0x76a   : > { %9687 = vmatpush1.msra.mxu0 %v2778_v61  ;;  %9625 = vmatprep.subr.mxu1 %v1317_v36  ;;  %v733_v61 = vsel %vm20315_vm5, %v20314_v2, %v20313_v41  ;;  %v20317_v36 = vld [vmem:[#allocation233_spill] sm:$0xff]  ;;  %v732_v27 = vsel %vm20319_vm6, %v20208_v56, %v20314_v2  ;;  %v20324_v56 = vld [vmem:[#allocation194_spill] sm:$0xff]  ;;  %vm20327_vm5 = vmmov %vm20323_vm12  ;;  %vm20331_vm6 = vcmask 891904  }
 0x76b   : > { %9688 = vmatprep.subr.mxu0 %v2487_v3  ;;  %9626 = vmatpush1.msra.mxu1 %v1316_v57  ;;  %v1903_v12 = vsel %vm20318_vm15, %v20317_v36, %v20316_v11  ;;  %v1902_v49 = vsel %vm20320_vm7, %v20281_v46, %v20317_v36  ;;  %v20321_v57 = vld [vmem:[#allocation24_spill] sm:$0xff]  ;;  %vm20328_vm15 = vmmov %vm20326_vm8  ;;  %v20330_v36 = vld [vmem:[#allocation149_spill] sm:$0xff] }
 0x76c   : > { %9689 = vmatpush1.msra.mxu0 %v2486_v25  ;;  %5641 = vrot.lane.b32.xlu1 %v15840_v48, %s10661_s18  ;;  %v16117_v19 = vpop.permute.xlu1 %7097  ;;  %v20322_v25 = vld [vmem:[#allocation21_spill] sm:$0xff]  ;;  %vm20332_vm7 = vmmov %vm20331_vm6 }
 0x76d   : > { %5639 = vrot.lane.b32.xlu0 %v15845_v0, %s10661_s18  ;;  %9627 = vmatprep.subr.mxu1 %v1025_v22  ;;  %v16127_v43 = vpop.permute.xlu0 %7095  ;;  %v441_v34 = vsel %vm20323_vm12, %v20322_v25, %v20321_v57  ;;  %v190_v22 = vld [vmem:[%s10699_s17 + $0x98] sm:$0xff]  ;;  %vm20335_vm12 = vcmask 900096  }
 0x76e   : > { %9690 = vmatprep.subr.mxu0 %v2195_v63  ;;  %9628 = vmatpush1.msra.mxu1 %v1024_v39  ;;  %v20325_v63 = vld [vmem:[#allocation191_spill] sm:$0xff]  ;;  %v440_v39 = vsel %vm20327_vm5, %v20213_v59, %v20322_v25  ;;  %v1318_v59 = vsel %vm20332_vm7, %v20297_v50, %v20330_v36  ;;  %v20333_v25 = vld [vmem:[#allocation110_spill] sm:$0xff]  ;;  %v7740_v50 = vsel %vm7721_vm14, %v15565_v5, %v15962_v40  ;;  %vm20339_vm5 = vcmask 1031168  }
 0x76f   : > { %9691 = vmatpush1.msra.mxu0 %v2194_v17  ;;  %9629 = vmatprep.subr.mxu1 %v733_v61  ;;  %v1611_v46 = vsel %vm20326_vm8, %v20325_v63, %v20324_v56  ;;  %v189_v17 = vld [vmem:[%s10699_s17 + $0x90] sm:$0xff]  ;;  %v1610_v2 = vsel %vm20328_vm15, %v20289_v9, %v20325_v63  ;;  %v20329_v61 = vld [vmem:[#allocation152_spill] sm:$0xff]  ;;  %v7741_v9 = vsel %vm7721_vm14, %v15962_v40, %v15960_v55  ;;  %vm20336_vm8 = vmmov %vm20335_vm12  ;;  %vm20344_vm7 = vcmask 1039360  }
 0x770   : > { %9692 = vmatprep.subr.mxu0 %v1903_v12  ;;  %9630 = vmatpush1.msra.mxu1 %v732_v27  ;;  %v16144_v3 = vpop.permute.xlu1 %6509  ;;  %v1319_v12 = vsel %vm20331_vm6, %v20330_v36, %v20329_v61  ;;  %v7449_v63 = vsel %vm7429_vm13, %v15994_v15, %v15987_v24  ;;  %v7448_v5 = vsel %vm7429_vm13, %v15620_v7, %v15994_v15  ;;  %vm20340_vm15 = vmmov %vm20339_vm5  ;;  %vm20341_vm6 = vcmask 687104   ;;  %v20342_v7 = vld [vmem:[#allocation26_spill] sm:$0xff]  ;;  %v20343_v15 = vld [vmem:[#allocation23_spill] sm:$0xff] }
 0x771   : > { %9693 = vmatpush1.msra.mxu0 %v1902_v49  ;;  %5937 = vrot.lane.b32.xlu1 %v15877_v21, %s10660_s16  ;;  %v16152_v45 = vpop.permute.xlu0 %6507  ;;  %v7157_v36 = vsel %vm20341_vm6, %v16049_v10, %v16039_v6 }
 0x772   : > { %5935 = vrot.lane.b32.xlu0 %v15880_v31, %s10660_s16  ;;  %9631 = vmatprep.subr.mxu1 %v441_v34  ;;  %v20334_v34 = vld [vmem:[#allocation107_spill] sm:$0xff] }
 0x773   : > { %9694 = vmatprep.subr.mxu0 %v1611_v46  ;;  %9632 = vmatpush1.msra.mxu1 %v440_v39  ;;  %v20337_v39 = vld [vmem:[#allocation68_spill] sm:$0xff] }
 0x774   : > { %9695 = vmatpush1.msra.mxu0 %v1610_v2  ;;  %9633 = vmatprep.subr.mxu1 %v190_v22  ;;  %v16169_v27 = vpop.permute.xlu1 %6805  ;;  %v1027_v22 = vsel %vm20335_vm12, %v20334_v34, %v20333_v25  ;;  %vm20345_vm12 = vmmov %vm20341_vm6  ;;  %vm20349_vm6 = vcmask 826368  }
 0x775   : > { %9696 = vmatprep.subr.mxu0 %v1319_v12  ;;  %9634 = vmatpush1.msra.mxu1 %v189_v17  ;;  %v16174_v49 = vpop.permute.xlu0 %6803  ;;  %v20338_v17 = vld [vmem:[#allocation65_spill] sm:$0xff]  ;;  %v443_v12 = vsel %vm20344_vm7, %v20343_v15, %v20342_v7 }
 0x776   : > { %9697 = vmatpush1.msra.mxu0 %v1318_v59  ;;  %5349 = vrot.lane.b32.xlu1 %v15840_v48, %s10662_s21  ;;  %v1026_v48 = vsel %vm20336_vm8, %v20305_v51, %v20334_v34  ;;  %v735_v2 = vsel %vm20339_vm5, %v20338_v17, %v20337_v39  ;;  %v734_v51 = vsel %vm20340_vm15, %v20313_v41, %v20338_v17  ;;  %vm20346_vm8 = vmmov %vm20344_vm7  ;;  %vm20347_vm5 = vcmask 818176  }
 0x777   : > { %5347 = vrot.lane.b32.xlu0 %v15845_v0, %s10662_s21  ;;  %9645 = vmatprep.subr.mxu1 %v7741_v9  ;;  %v7156_v41 = vsel %vm20345_vm12, %v15675_v37, %v16049_v10  ;;  %v442_v9 = vsel %vm20346_vm8, %v20321_v57, %v20343_v15  ;;  %v6865_v34 = vsel %vm20347_vm5, %v16101_v33, %v16091_v30  ;;  %vm20348_vm15 = vmmov %vm20347_vm5  ;;  %v16233_v10 = vld [vmem:[%s10699_s17 + $0xc8] sm:$0xff]  ;;  %vm20350_vm7 = vcmask 834560  }
 0x778   : > { %9698 = vmatprep.subr.mxu0 %v1027_v22  ;;  %9646 = vmatpush2.msra.mxu1 %v7740_v50  ;;  %v16195_v46 = vpop.permute.xlu1 %6217  ;;  %v191_v22 = vld [vmem:[%s10699_s17 + $0xa0] sm:$0xff]  ;;  %v4949_v50 = vld [vmem:[%s10699_s17 + $0xd0] sm:$0xff]  ;;  %v6864_v37 = vsel %vm20348_vm15, %v15726_v18, %v16101_v33  ;;  %v6573_v57 = vsel %vm20349_vm6, %v16152_v45, %v16144_v3  ;;  %v7743_v18 = vsel %vm7721_vm14, %v16023_v54, %v16013_v8  ;;  %vm20351_vm12 = vmmov %vm20349_vm6  ;;  %vm20353_vm5 = vcmask 965632  }
 0x779   : > { %9699 = vmatpush1.msra.mxu0 %v1026_v48  ;;  %9647 = vmatprep.subr.mxu1 %v7449_v63  ;;  %v6216_v40 = vpop.permute.xlu0 %6215  ;;  %vm20352_vm8 = vmmov %vm20350_vm7  ;;  %vm20354_vm15 = vcmask 687104  }
 0x77a   : > { %9700 = vmatprep.subr.mxu0 %v735_v2  ;;  %9648 = vmatpush2.msra.mxu1 %v7448_v5  ;;  %v6281_v63 = vsel %vm20350_vm7, %v6216_v40, %v16195_v46  ;;  %v7742_v2 = vsel %vm7721_vm14, %v15960_v55, %v16023_v54  ;;  %v7451_v5 = vsel %vm7429_vm13, %v16075_v32, %v16065_v14  ;;  %vm20355_vm6 = vmmov %vm20354_vm15  ;;  %vm20356_vm7 = vcmask 818176  }
 0x77b   : > { %9701 = vmatpush1.msra.mxu0 %v734_v51  ;;  %5645 = vrot.lane.b32.xlu1 %v15877_v21, %s10661_s18  ;;  %v6280_v51 = vsel %vm20352_vm8, %v15819_v23, %v6216_v40  ;;  %v7159_v23 = vsel %vm20354_vm15, %v16127_v43, %v16117_v19  ;;  %vm20357_vm8 = vmmov %vm20353_vm5 }
 0x77c   : > { %5643 = vrot.lane.b32.xlu0 %v15880_v31, %s10661_s18  ;;  %9649 = vmatprep.subr.mxu1 %v7157_v36  ;;  %v16219_v59 = vpop.permute.xlu1 %6513  ;;  %vm20359_vm15 = vmmov %vm20351_vm12 }
 0x77d   : > { %9702 = vmatprep.subr.mxu0 %v443_v12  ;;  %9650 = vmatpush2.msra.mxu1 %v7156_v41  ;;  %v6512_v48 = vpop.permute.xlu0 %6511  ;;  %v16296_v41 = vld [vmem:[%s10699_s17 + $0x100] sm:$0xff] }
 0x77e   : > { %9703 = vmatpush1.msra.mxu0 %v442_v9  ;;  %9651 = vmatprep.subr.mxu1 %v6865_v34  ;;  %v16319_v34 = vld [vmem:[%s10699_s17 + $0x118] sm:$0xff] }
 0x77f   : > { %9704 = vmatprep.subr.mxu0 %v15771_v28  ;;  %9652 = vmatpush2.msra.mxu1 %v6864_v37  ;;  %v6572_v28 = vsel %vm20351_vm12, %v15779_v52, %v16152_v45  ;;  %v7450_v52 = vsel %vm7429_vm13, %v15987_v24, %v16075_v32  ;;  %v4950_v24 = vld [vmem:[%s10699_s17 + $0xd8] sm:$0xff]  ;;  %v6867_v32 = vsel %vm20356_vm7, %v16174_v49, %v16169_v27 }
 0x780   : > { %9705 = vmatpush1.msra.mxu0 %v191_v22  ;;  %5057 = vrot.lane.b32.xlu1 %v4949_v50, %s10653_s7  ;;  %v5926_v17 = vpop.permute.xlu1 %5925  ;;  %v16322_v22 = vld [vmem:[%s10699_s17 + $0x110] sm:$0xff] }
 0x781   : > { %5055 = vrot.lane.b32.xlu0 %v16233_v10, %s10653_s7  ;;  %9653 = vmatprep.subr.mxu1 %v6573_v57  ;;  %v5924_v33 = vpop.permute.xlu0 %5923 }
 0x782   : > { %9716 = vmatprep.subr.mxu0 %v7743_v18  ;;  %9654 = vmatpush2.msra.mxu1 %v6572_v28  ;;  %v5989_v55 = vsel %vm20353_vm5, %v5924_v33, %v5926_v17  ;;  %v5988_v40 = vsel %vm20357_vm8, %v15867_v47, %v5924_v33  ;;  %vm20358_vm5 = vmmov %vm20356_vm7 }
 0x783   : > { %9717 = vmatpush2.msra.mxu0 %v7742_v2  ;;  %9655 = vmatprep.subr.mxu1 %v6281_v63  ;;  %v6866_v36 = vsel %vm20358_vm5, %v16091_v30, %v16174_v49  ;;  %vm20364_vm5 = vcmask 719872  }
 0x784   : > { %9718 = vmatprep.subr.mxu0 %v7451_v5  ;;  %5353 = vrot.lane.b32.xlu1 %v15877_v21, %s10662_s21  ;;  %v16264_v54 = vpop.permute.xlu1 %6221  ;;  %v7158_v21 = vsel %vm20355_vm6, %v16039_v6, %v16127_v43  ;;  %v6574_v6 = vsel %vm20359_vm15, %v16144_v3, %v6512_v48  ;;  %v16291_v43 = vld [vmem:[%s10699_s17 + $0x108] sm:$0xff]  ;;  %vm20360_vm6 = vcmask 834560   ;;  %vm20365_vm15 = vcmask 965632  }
 0x785   : > { %9719 = vmatpush2.msra.mxu0 %v7450_v52  ;;  %5351 = vrot.lane.b32.xlu0 %v15880_v31, %s10662_s21  ;;  %v6220_v45 = vpop.permute.xlu0 %6219  ;;  %v6575_v31 = vsel %vm20351_vm12, %v6512_v48, %v16219_v59  ;;  %vm20361_vm7 = vmmov %vm20360_vm6  ;;  %vm20362_vm12 = vcmask 973824   ;;  %v20370_v52 = vld [vmem:[#allocation89_spill] sm:$0xff] }
 0x786   : > { %9720 = vmatprep.subr.mxu0 %v7159_v23  ;;  %9656 = vmatpush2.msra.mxu1 %v6280_v51  ;;  %v6283_v15 = vsel %vm20360_vm6, %v6220_v45, %v16264_v54  ;;  %vm20363_vm8 = vmmov %vm20362_vm12  ;;  %v20369_v51 = vld [vmem:[#allocation47_spill] sm:$0xff]  ;;  %v4820_v23 = vsel %vm4801_vm9, %v20249_v44, %v20370_v52 }
 0x787   : > { %9721 = vmatpush2.msra.mxu0 %v7158_v21  ;;  %9657 = vmatprep.subr.mxu1 %v5989_v55  ;;  %vm20366_vm6 = vmmov %vm20365_vm15  ;;  %v4821_v55 = vsel %vm4801_vm9, %v20370_v52, %v20369_v51  ;;  %v20371_v21 = vld [vmem:[#allocation216_spill] sm:$0xff]  ;;  %v20385_v52 = vld [vmem:[#allocation437_spill] sm:$0xff] }
 0x788   : > { %9722 = vmatprep.subr.mxu0 %v6867_v32  ;;  %5061 = vrot.lane.b32.xlu1 %v15845_v0, %s10653_s7  ;;  %v6282_v0 = vsel %vm20361_vm7, %v16195_v46, %v6220_v45  ;;  %vm20367_vm7 = vmmov %vm20363_vm8 }
 0x789   : > { %9723 = vmatpush2.msra.mxu0 %v6866_v36  ;;  %5059 = vrot.lane.b32.xlu0 %v4950_v24, %s10653_s7  ;;  %v5634_v47 = vpop.permute.xlu1 %5633  ;;  %v5632_v12 = vpop.permute.xlu0 %5631  ;;  %v20372_v24 = vld [vmem:[#allocation342_spill] sm:$0xff] }
 0x78a   : > { %9724 = vmatprep.subr.mxu0 %v6575_v31  ;;  %9658 = vmatpush2.msra.mxu1 %v5988_v40  ;;  %v5697_v30 = vsel %vm20362_vm12, %v5632_v12, %v5634_v47  ;;  %v5696_v3 = vsel %vm20363_vm8, %v15889_v4, %v5632_v12  ;;  %vm20368_vm12 = vmmov %vm20367_vm7  ;;  %v4533_v32 = vsel %vm4509_vm0, %v20372_v24, %v20371_v21 }
 0x78b   : > { %9725 = vmatpush2.msra.mxu0 %v6574_v6  ;;  %9659 = vmatprep.subr.mxu1 %v5697_v30  ;;  %v4532_v44 = vsel %vm4509_vm0, %v20255_v13, %v20372_v24  ;;  %v20373_v6 = vld [vmem:[#allocation545_spill] sm:$0xff]  ;;  %vm20375_vm8 = vmmov %vm20364_vm5 }
 0x78c   : > { %7693 = vrot.lane.b32.xlu1 %v16291_v43, %s10654_s8  ;;  %9726 = vmatprep.subr.mxu0 %v6283_v15  ;;  %v20374_v15 = vld [vmem:[#allocation542_spill] sm:$0xff]  ;;  %v20386_v24 = vld [vmem:[#allocation401_spill] sm:$0xff] }
 0x78d   : > { %7691 = vrot.lane.b32.xlu0 %v16296_v41, %s10654_s8  ;;  %9727 = vmatpush2.msra.mxu0 %v6282_v0  ;;  %v4240_v0 = vsel %vm4217_vm1, %v20260_v53, %v20374_v15 }
 0x78e   : > { %9660 = vmatpush2.msra.mxu1 %v5696_v3  ;;  %v16307_v49 = vpop.permute.xlu1 %5929  ;;  %v5928_v46 = vpop.permute.xlu0 %5927  ;;  %10567 = vmatprep.mubr.msk.f32.mxu0 %vm20364_vm5, %v15857_v16  ;;  %v20377_v3 = vld [vmem:[#allocation511_spill] sm:$0xff]  ;;  %vm20388_vm5 = vcmask 482304  }
 0x78f   : > { %v5991_v9 = vsel %vm20365_vm15, %v5928_v46, %v16307_v49  ;;  %v5990_v4 = vsel %vm20366_vm6, %v5926_v17, %v5928_v46  ;;  %v3948_v53 = vsel %vm3925_vm2, %v20266_v20, %v20377_v3  ;;  %vm20391_vm15 = vmmov %vm20388_vm5  ;;  %vm20394_vm6 = vcmask 490496  }
 0x790   : > { %7401 = vrot.lane.b32.xlu1 %v16291_v43, %s10655_s9  ;;  %9728 = vmatprep.subr.mxu0 %v5991_v9 }
 0x791   : > { %7399 = vrot.lane.b32.xlu0 %v16296_v41, %s10655_s9  ;;  %9729 = vmatpush2.msra.mxu0 %v5990_v4  ;;  %v20378_v4 = vld [vmem:[#allocation5_spill] sm:$0xff] }
 0x793   : > { %v5342_v50 = vpop.permute.xlu1 %5341  ;;  %v5340_v48 = vpop.permute.xlu0 %5339 }
 0x794   : > { %7697 = vrot.lane.b32.xlu1 %v16319_v34, %s10654_s8  ;;  %v5405_v37 = vsel %vm5385_vm10, %v5340_v48, %v5342_v50  ;;  %v5404_v57 = vsel %vm5385_vm10, %v15908_v42, %v5340_v48 }
 0x795   : > { %7695 = vrot.lane.b32.xlu0 %v16322_v22, %s10654_s8  ;;  %9661 = vmatprep.subr.mxu1 %v5405_v37 }
 0x796   : > { %9662 = vmatpush2.msra.mxu1 %v5404_v57  ;;  %v20380_v57 = vld [vmem:[#allocation477_spill] sm:$0xff] }
 0x798   : > { %7109 = vrot.lane.b32.xlu1 %v16291_v43, %s10656_s10  ;;  %v16333_v63 = vpop.permute.xlu1 %5637  ;;  %v5636_v17 = vpop.permute.xlu0 %5635 }
 0x799   : > { %7107 = vrot.lane.b32.xlu0 %v16296_v41, %s10656_s10  ;;  %v5699_v18 = vsel %vm20367_vm7, %v5636_v17, %v16333_v63  ;;  %v5698_v28 = vsel %vm20368_vm12, %v5634_v47, %v5636_v17  ;;  %v4241_v47 = vsel %vm4217_vm1, %v20374_v15, %v20373_v6  ;;  %v20381_v17 = vld [vmem:[#allocation474_spill] sm:$0xff]  ;;  %vm20397_vm7 = vmmov %vm20394_vm6  ;;  %vm20400_vm12 = vcmask 736256  }
 0x79a   : > { %9730 = vmatprep.subr.mxu0 %v5699_v18  ;;  %v3657_v18 = vsel %vm3633_vm3, %v20381_v17, %v20380_v57 }
 0x79b   : > { %9731 = vmatpush2.msra.mxu0 %v5698_v28  ;;  %v3656_v28 = vsel %vm3633_vm3, %v20272_v29, %v20381_v17  ;;  %v20401_v17 = vld [vmem:[#allocation479_spill] sm:$0xff] }
 0x79c   : > { %7405 = vrot.lane.b32.xlu1 %v16319_v34, %s10655_s9 }
 0x79d   : > { %7403 = vrot.lane.b32.xlu0 %v16322_v22, %s10655_s9  ;;  %v5050_v42 = vpop.permute.xlu1 %5049  ;;  %v5048_v33 = vpop.permute.xlu0 %5047 }
 0x79e   : > { %v5113_v2 = vsel %vm5093_vm11, %v5048_v33, %v5050_v42  ;;  %v5112_v5 = vsel %vm5093_vm11, %v15932_v26, %v5048_v33  ;;  %v20383_v33 = vld [vmem:[#allocation256_spill] sm:$0xff] }
 0x79f   : > { %9663 = vmatprep.subr.mxu1 %v5113_v2 }
 0x7a0   : > { %6817 = vrot.lane.b32.xlu1 %v16291_v43, %s10657_s11  ;;  %9664 = vmatpush2.msra.mxu1 %v5112_v5  ;;  %v20384_v5 = vld [vmem:[#allocation440_spill] sm:$0xff] }
 0x7a1   : > { %6815 = vrot.lane.b32.xlu0 %v16296_v41, %s10657_s11  ;;  %9665 = vmatprep.subr.mxu1 %v4821_v55  ;;  %v3365_v55 = vsel %vm3341_vm4, %v20385_v52, %v20384_v5 }
 0x7a2   : > { %v16357_v45 = vpop.permute.xlu1 %5345  ;;  %v5344_v26 = vpop.permute.xlu0 %5343  ;;  %9666 = vmatpush2.msra.mxu1 %v4820_v23 }
 0x7a3   : > { %v5407_v31 = vsel %vm5385_vm10, %v5344_v26, %v16357_v45  ;;  %9745 = vmatprep.subr.mxu1 %v4533_v32  ;;  %9668 = vmatmul.mubr.f32.vlgmr.msra.gmra.mxu1 %v15926_v62  ;;  %v5406_v40 = vsel %vm5385_vm10, %v5342_v50, %v5344_v26  ;;  %v20379_v50 = vld [vmem:[#allocation50_spill] sm:$0xff]  ;;  %v4534_v26 = vsel %vm4509_vm0, %v20371_v21, %v20383_v33 }
 0x7a4   : > { %7113 = vrot.lane.b32.xlu1 %v16319_v34, %s10656_s10  ;;  %9732 = vmatprep.subr.mxu0 %v5407_v31  ;;  %v4823_v48 = vsel %vm4801_vm9, %v20379_v50, %v20378_v4  ;;  %v4822_v20 = vsel %vm4801_vm9, %v20369_v51, %v20379_v50  ;;  %v3364_v51 = vsel %vm3341_vm4, %v20278_v35, %v20385_v52  ;;  %v20389_v31 = vld [vmem:[#allocation547_spill] sm:$0xff]  ;;  %v20390_v35 = vld [vmem:[#allocation544_spill] sm:$0xff]  ;;  %v20405_v52 = vld [vmem:[#allocation277_spill] sm:$0xff] }
 0x7a5   : > { %7111 = vrot.lane.b32.xlu0 %v16322_v22, %s10656_s10  ;;  %9733 = vmatpush2.msra.mxu0 %v5406_v40  ;;  %v4243_v40 = vsel %vm4217_vm1, %v20390_v35, %v20389_v31  ;;  %v4242_v21 = vsel %vm4217_vm1, %v20373_v6, %v20390_v35  ;;  %v20399_v50 = vld [vmem:[#allocation319_spill] sm:$0xff]  ;;  %v20410_v35 = vld [vmem:[#allocation238_spill] sm:$0xff] }
 0x7a6   : > { %9746 = vmatpush1.msra.mxu1 %v4532_v44  ;;  %v16373_v36 = vpop.permute.xlu1 %5053  ;;  %10568 = vmatprep.mubr.msk.f32.mxu1 %vm20375_vm8, %v15857_v16  ;;  %v20376_v16 = vld [vmem:[#allocation514_spill] sm:$0xff]  ;;  %vm20403_vm8 = vmmov %vm20400_vm12 }
 0x7a7   : > { %v5052_v12 = vpop.permute.xlu0 %5051  ;;  %9747 = vmatprep.subr.mxu1 %v4241_v47  ;;  %v3949_v46 = vsel %vm3925_vm2, %v20377_v3, %v20376_v16  ;;  %v20392_v47 = vld [vmem:[#allocation362_spill] sm:$0xff] }
 0x7a8   : > { %6525 = vrot.lane.b32.xlu1 %v16291_v43, %s10658_s14  ;;  %9748 = vmatpush1.msra.mxu1 %v4240_v0  ;;  %v5115_v13 = vsel %vm5093_vm11, %v5052_v12, %v16373_v36  ;;  %v5114_v30 = vsel %vm5093_vm11, %v5050_v42, %v5052_v12  ;;  %v20382_v42 = vld [vmem:[#allocation302_spill] sm:$0xff]  ;;  %v20393_v12 = vld [vmem:[#allocation359_spill] sm:$0xff] }
 0x7a9   : > { %6523 = vrot.lane.b32.xlu0 %v16296_v41, %s10658_s14  ;;  %9734 = vmatprep.subr.mxu0 %v5115_v13  ;;  %v4535_v2 = vsel %vm4509_vm0, %v20383_v33, %v20382_v42  ;;  %v2781_v0 = vsel %vm20394_vm6, %v20393_v12, %v20392_v47  ;;  %v2780_v6 = vsel %vm20397_vm7, %v20292_v38, %v20393_v12  ;;  %vm20412_vm6 = vcmask 752640   ;;  %v20414_v12 = vld [vmem:[#allocation400_spill] sm:$0xff] }
 0x7aa   : > { %9749 = vmatprep.subr.mxu1 %v3949_v46  ;;  %9735 = vmatpush2.msra.mxu0 %v5114_v30  ;;  %v16396_v9 = vpop.permute.xlu1 %7685  ;;  %v20395_v30 = vld [vmem:[#allocation516_spill] sm:$0xff]  ;;  %v2488_v38 = vsel %vm20403_vm8, %v20300_v58, %v20399_v50  ;;  %v20408_v58 = vld [vmem:[#allocation439_spill] sm:$0xff]  ;;  %vm20415_vm7 = vcmask 482304  }
 0x7ab   : > { %9750 = vmatpush1.msra.mxu1 %v3948_v53  ;;  %v16401_v37 = vpop.permute.xlu0 %7683  ;;  %9736 = vmatprep.subr.mxu0 %v4823_v48  ;;  %v20398_v53 = vld [vmem:[#allocation322_spill] sm:$0xff]  ;;  %vm20417_vm8 = vmmov %vm20415_vm7 }
 0x7ac   : > { %6821 = vrot.lane.b32.xlu1 %v16319_v34, %s10657_s11  ;;  %9751 = vmatprep.subr.mxu1 %v3657_v18  ;;  %v2489_v48 = vsel %vm20400_vm12, %v20399_v50, %v20398_v53  ;;  %v20402_v18 = vld [vmem:[#allocation476_spill] sm:$0xff]  ;;  %vm20416_vm12 = vmmov %vm20412_vm6 }
 0x7ad   : > { %6819 = vrot.lane.b32.xlu0 %v16322_v22, %s10657_s11  ;;  %9737 = vmatpush2.msra.mxu0 %v4822_v20  ;;  %v3659_v20 = vsel %vm3633_vm3, %v20402_v18, %v20401_v17  ;;  %v20421_v50 = vld [vmem:[#allocation364_spill] sm:$0xff] }
 0x7ae   : > { %9752 = vmatpush1.msra.mxu1 %v3656_v28  ;;  %9816 = vmatprep.subr.mxu0 %v4535_v2  ;;  %v16422_v23 = vpop.permute.xlu1 %7393  ;;  %v20404_v2 = vld [vmem:[#allocation280_spill] sm:$0xff] }
 0x7af   : > { %9753 = vmatprep.subr.mxu1 %v3365_v55  ;;  %9739 = vmatmul.mubr.f32.vlgmr.msra.gmra.mxu0 %v15926_v62  ;;  %v16428_v29 = vpop.permute.xlu0 %7391  ;;  %v20387_v62 = vld [vmem:[#allocation398_spill] sm:$0xff] }
 0x7b0   : > { %6233 = vrot.lane.b32.xlu1 %v16291_v43, %s10659_s15  ;;  %9754 = vmatpush1.msra.mxu1 %v3364_v51  ;;  %v3073_v32 = vsel %vm20388_vm5, %v20387_v62, %v20386_v24  ;;  %v3072_v44 = vsel %vm20391_vm15, %v20284_v60, %v20387_v62  ;;  %v20396_v60 = vld [vmem:[#allocation513_spill] sm:$0xff]  ;;  %vm20406_vm5 = vcmask 744448   ;;  %v20407_v51 = vld [vmem:[#allocation442_spill] sm:$0xff]  ;;  %v3366_v62 = vsel %vm3341_vm4, %v20384_v5, %v20408_v58 }
 0x7b1   : > { %6231 = vrot.lane.b32.xlu0 %v16296_v41, %s10659_s15  ;;  %9817 = vmatpush1.msra.mxu0 %v4534_v26  ;;  %v3951_v3 = vsel %vm3925_vm2, %v20396_v60, %v20395_v30  ;;  %v3950_v46 = vsel %vm3925_vm2, %v20376_v16, %v20396_v60  ;;  %v3658_v16 = vsel %vm3633_vm3, %v20380_v57, %v20402_v18  ;;  %vm20409_vm15 = vmmov %vm20406_vm5 }
 0x7b2   : > { %9755 = vmatprep.subr.mxu1 %v3073_v32  ;;  %9818 = vmatprep.subr.mxu0 %v4243_v40  ;;  %v16449_v15 = vpop.permute.xlu1 %7689  ;;  %v2197_v55 = vsel %vm20406_vm5, %v20405_v52, %v20404_v2  ;;  %v3367_v26 = vsel %vm3341_vm4, %v20408_v58, %v20407_v51  ;;  %v2196_v57 = vsel %vm20409_vm15, %v20308_v1, %v20405_v52  ;;  %v20411_v40 = vld [vmem:[#allocation235_spill] sm:$0xff]  ;;  %vm20420_vm5 = vcmask 883712   ;;  %v20429_v58 = vld [vmem:[#allocation324_spill] sm:$0xff] }
 0x7b3   : > { %9756 = vmatpush1.msra.mxu1 %v3072_v44  ;;  %9819 = vmatpush1.msra.mxu0 %v4242_v21  ;;  %v16454_v13 = vpop.permute.xlu0 %7687  ;;  %v1905_v44 = vsel %vm20412_vm6, %v20411_v40, %v20410_v35  ;;  %v20413_v21 = vld [vmem:[#allocation403_spill] sm:$0xff]  ;;  %v1904_v1 = vsel %vm20416_vm12, %v20316_v11, %v20411_v40  ;;  %v3074_v5 = vsel %vm20417_vm8, %v20386_v24, %v20414_v12  ;;  %vm20423_vm15 = vcmask 490496   ;;  %vm20424_vm6 = vmmov %vm20420_vm5  ;;  %v20434_v40 = vld [vmem:[#allocation112_spill] sm:$0xff] }
 0x7b4   : > { %6529 = vrot.lane.b32.xlu1 %v16319_v34, %s10658_s14  ;;  %9757 = vmatprep.subr.mxu1 %v2781_v0  ;;  %v3075_v0 = vsel %vm20415_vm7, %v20414_v12, %v20413_v21  ;;  %vm20425_vm7 = vmmov %vm20423_vm15  ;;  %v20427_v52 = vld [vmem:[#allocation151_spill] sm:$0xff]  ;;  %vm20428_vm12 = vcmask 891904   ;;  %vm20431_vm8 = vcmask 736256  }
 0x7b5   : > { %6527 = vrot.lane.b32.xlu0 %v16322_v22, %s10658_s14  ;;  %9820 = vmatprep.subr.mxu0 %v3951_v3  ;;  %v20418_v3 = vld [vmem:[#allocation196_spill] sm:$0xff] }
 0x7b6   : > { %9758 = vmatpush1.msra.mxu1 %v2780_v6  ;;  %9821 = vmatpush1.msra.mxu0 %v3950_v46  ;;  %v16475_v28 = vpop.permute.xlu1 %7101  ;;  %v20419_v6 = vld [vmem:[#allocation193_spill] sm:$0xff] }
 0x7b7   : > { %9759 = vmatprep.subr.mxu1 %v2489_v48  ;;  %9822 = vmatprep.subr.mxu0 %v3659_v20  ;;  %v16483_v33 = vpop.permute.xlu0 %7099  ;;  %v1613_v46 = vsel %vm20420_vm5, %v20419_v6, %v20418_v3  ;;  %v20422_v48 = vld [vmem:[#allocation361_spill] sm:$0xff]  ;;  %v1612_v24 = vsel %vm20424_vm6, %v20324_v56, %v20419_v6  ;;  %vm20432_vm5 = vmmov %vm20428_vm12  ;;  %vm20436_vm6 = vcmask 900096  }
 0x7b8   : > { %9760 = vmatpush1.msra.mxu1 %v2488_v38  ;;  %9823 = vmatpush1.msra.mxu0 %v3658_v16  ;;  %v2783_v11 = vsel %vm20423_vm15, %v20422_v48, %v20421_v50  ;;  %v2782_v20 = vsel %vm20425_vm7, %v20392_v47, %v20422_v48  ;;  %v20426_v16 = vld [vmem:[#allocation154_spill] sm:$0xff]  ;;  %v1320_v56 = vsel %vm20432_vm5, %v20329_v61, %v20427_v52  ;;  %vm20433_vm15 = vmmov %vm20431_vm8  ;;  %v20438_v61 = vld [vmem:[#allocation279_spill] sm:$0xff]  ;;  %vm20439_vm7 = vcmask 744448  }
 0x7b9   : > { %5941 = vrot.lane.b32.xlu1 %v16291_v43, %s10660_s16  ;;  %5939 = vrot.lane.b32.xlu0 %v16296_v41, %s10660_s16  ;;  %v20443_v48 = vld [vmem:[#allocation67_spill] sm:$0xff]  ;;  %vm20444_vm5 = vcmask 1031168  }
 0x7ba   : > { %9761 = vmatprep.subr.mxu1 %v2197_v55  ;;  %9824 = vmatprep.subr.mxu0 %v3367_v26  ;;  %v16501_v32 = vpop.permute.xlu1 %7397  ;;  %v1321_v55 = vsel %vm20428_vm12, %v20427_v52, %v20426_v16  ;;  %v20430_v26 = vld [vmem:[#allocation321_spill] sm:$0xff]  ;;  %vm20440_vm12 = vmmov %vm20436_vm6 }
 0x7bb   : > { %9762 = vmatpush1.msra.mxu1 %v2196_v57  ;;  %9825 = vmatpush1.msra.mxu0 %v3366_v62  ;;  %v16509_v60 = vpop.permute.xlu0 %7395  ;;  %v2491_v57 = vsel %vm20431_vm8, %v20430_v26, %v20429_v58  ;;  %v2490_v47 = vsel %vm20433_vm15, %v20398_v53, %v20430_v26  ;;  %vm20441_vm8 = vmmov %vm20439_vm7  ;;  %vm20447_vm15 = vcmask 752640  }
 0x7bc   : > { %9763 = vmatprep.subr.mxu1 %v1905_v44  ;;  %9826 = vmatprep.subr.mxu0 %v3075_v0  ;;  %v20435_v44 = vld [vmem:[#allocation109_spill] sm:$0xff]  ;;  %v20437_v0 = vld [vmem:[#allocation282_spill] sm:$0xff]  ;;  %v2198_v6 = vsel %vm20441_vm8, %v20404_v2, %v20438_v61  ;;  %vm20455_vm8 = vcmask 883712  }
 0x7bd   : > { %9764 = vmatpush1.msra.mxu1 %v1904_v1  ;;  %9827 = vmatpush1.msra.mxu0 %v3074_v5  ;;  %v1029_v12 = vsel %vm20436_vm6, %v20435_v44, %v20434_v40  ;;  %v2199_v1 = vsel %vm20439_vm7, %v20438_v61, %v20437_v0  ;;  %v1028_v53 = vsel %vm20440_vm12, %v20333_v25, %v20435_v44  ;;  %vm20448_vm6 = vmmov %vm20444_vm5  ;;  %vm20452_vm12 = vcmask 1039360   ;;  %v20454_v44 = vld [vmem:[#allocation195_spill] sm:$0xff] }
 0x7be   : > { %6237 = vrot.lane.b32.xlu1 %v16319_v34, %s10659_s15  ;;  %6235 = vrot.lane.b32.xlu0 %v16322_v22, %s10659_s15  ;;  %v16527_v18 = vpop.permute.xlu1 %6809  ;;  %v736_v25 = vsel %vm20448_vm6, %v20337_v39, %v20443_v48  ;;  %vm20449_vm7 = vmmov %vm20447_vm15  ;;  %vm20460_vm6 = vcmask 891904  }
 0x7bf   : > { %9765 = vmatprep.subr.mxu1 %v1613_v46  ;;  %9828 = vmatprep.subr.mxu0 %v2783_v11  ;;  %v16535_v38 = vpop.permute.xlu0 %6807  ;;  %v20442_v46 = vld [vmem:[#allocation70_spill] sm:$0xff] }
 0x7c0   : > { %9766 = vmatpush1.msra.mxu1 %v1612_v24  ;;  %9829 = vmatpush1.msra.mxu0 %v2782_v20  ;;  %v737_v11 = vsel %vm20444_vm5, %v20443_v48, %v20442_v46  ;;  %v20445_v24 = vld [vmem:[#allocation240_spill] sm:$0xff]  ;;  %v20446_v20 = vld [vmem:[#allocation237_spill] sm:$0xff]  ;;  %vm20456_vm5 = vmmov %vm20452_vm12 }
 0x7c1   : > { %9767 = vmatprep.subr.mxu1 %v1321_v55  ;;  %9830 = vmatprep.subr.mxu0 %v2491_v57  ;;  %v1907_v52 = vsel %vm20447_vm15, %v20446_v20, %v20445_v24  ;;  %v1906_v2 = vsel %vm20449_vm7, %v20410_v35, %v20446_v20  ;;  %v20450_v57 = vld [vmem:[#allocation28_spill] sm:$0xff]  ;;  %vm20457_vm15 = vmmov %vm20455_vm8  ;;  %v20459_v48 = vld [vmem:[#allocation153_spill] sm:$0xff] }
 0x7c2   : > { %9768 = vmatpush1.msra.mxu1 %v1320_v56  ;;  %9831 = vmatpush1.msra.mxu0 %v2490_v47  ;;  %v16549_v62 = vpop.permute.xlu1 %7105  ;;  %v20451_v56 = vld [vmem:[#allocation25_spill] sm:$0xff]  ;;  %v20453_v47 = vld [vmem:[#allocation198_spill] sm:$0xff]  ;;  %vm20461_vm7 = vmmov %vm20460_vm6 }
 0x7c3   : > { %5649 = vrot.lane.b32.xlu1 %v16291_v43, %s10661_s18  ;;  %5647 = vrot.lane.b32.xlu0 %v16296_v41, %s10661_s18  ;;  %v16561_v5 = vpop.permute.xlu0 %7103  ;;  %v445_v39 = vsel %vm20452_vm12, %v20451_v56, %v20450_v57  ;;  %v1615_v35 = vsel %vm20455_vm8, %v20454_v44, %v20453_v47  ;;  %v444_v61 = vsel %vm20456_vm5, %v20342_v7, %v20451_v56  ;;  %vm20464_vm12 = vcmask 900096  }
 0x7c4   : > { %9769 = vmatprep.subr.mxu1 %v1029_v12  ;;  %9832 = vmatprep.subr.mxu0 %v2199_v1  ;;  %v194_v12 = vld [vmem:[%s10699_s17 + $0xb8] sm:$0xff]  ;;  %v1614_v1 = vsel %vm20457_vm15, %v20418_v3, %v20454_v44  ;;  %v7745_v3 = vsel %vm7721_vm14, %v16401_v37, %v16396_v9  ;;  %vm20465_vm8 = vmmov %vm20464_vm12  ;;  %v7453_v44 = vsel %vm7429_vm13, %v16428_v29, %v16422_v23  ;;  %vm20468_vm5 = vcmask 1031168  }
 0x7c5   : > { %9770 = vmatpush1.msra.mxu1 %v1028_v53  ;;  %9833 = vmatpush1.msra.mxu0 %v2198_v6  ;;  %v193_v53 = vld [vmem:[%s10699_s17 + $0xb0] sm:$0xff]  ;;  %v20458_v6 = vld [vmem:[#allocation156_spill] sm:$0xff]  ;;  %vm20469_vm15 = vmmov %vm20468_vm5 }
 0x7c6   : > { %9771 = vmatprep.subr.mxu1 %v737_v11  ;;  %9834 = vmatprep.subr.mxu0 %v1907_v52  ;;  %v16581_v55 = vpop.permute.xlu1 %6517  ;;  %v1323_v11 = vsel %vm20460_vm6, %v20459_v48, %v20458_v6  ;;  %v1322_v52 = vsel %vm20461_vm7, %v20426_v16, %v20459_v48  ;;  %v7744_v16 = vsel %vm7721_vm14, %v16013_v8, %v16401_v37  ;;  %vm20470_vm6 = vcmask 687104  }
 0x7c7   : > { %9772 = vmatpush1.msra.mxu1 %v736_v25  ;;  %9835 = vmatpush1.msra.mxu0 %v1906_v2  ;;  %v16583_v26 = vpop.permute.xlu0 %6515  ;;  %v20462_v25 = vld [vmem:[#allocation114_spill] sm:$0xff]  ;;  %v20463_v2 = vld [vmem:[#allocation111_spill] sm:$0xff]  ;;  %v7452_v8 = vsel %vm7429_vm13, %v16065_v14, %v16428_v29  ;;  %vm20473_vm7 = vcmask 1039360  }
 0x7c8   : > { %5945 = vrot.lane.b32.xlu1 %v16319_v34, %s10660_s16  ;;  %5943 = vrot.lane.b32.xlu0 %v16322_v22, %s10660_s16  ;;  %v1031_v56 = vsel %vm20464_vm12, %v20463_v2, %v20462_v25  ;;  %v20472_v14 = vld [vmem:[#allocation27_spill] sm:$0xff]  ;;  %vm20474_vm12 = vmmov %vm20470_vm6 }
 0x7c9   : > { %9773 = vmatprep.subr.mxu1 %v445_v39  ;;  %9836 = vmatprep.subr.mxu0 %v1615_v35  ;;  %v20466_v35 = vld [vmem:[#allocation72_spill] sm:$0xff] }
 0x7ca   : > { %9774 = vmatpush1.msra.mxu1 %v444_v61  ;;  %9837 = vmatpush1.msra.mxu0 %v1614_v1  ;;  %v16606_v20 = vpop.permute.xlu1 %6813 }
 0x7cb   : > { %9775 = vmatprep.subr.mxu1 %v194_v12  ;;  %9838 = vmatprep.subr.mxu0 %v1323_v11  ;;  %v16611_v7 = vpop.permute.xlu0 %6811  ;;  %v20467_v12 = vld [vmem:[#allocation69_spill] sm:$0xff] }
 0x7cc   : > { %9776 = vmatpush1.msra.mxu1 %v193_v53  ;;  %9839 = vmatpush1.msra.mxu0 %v1322_v52  ;;  %v739_v61 = vsel %vm20468_vm5, %v20467_v12, %v20466_v35  ;;  %v738_v37 = vsel %vm20469_vm15, %v20442_v46, %v20467_v12  ;;  %v20471_v53 = vld [vmem:[#allocation30_spill] sm:$0xff]  ;;  %v7160_v46 = vsel %vm20474_vm12, %v16117_v19, %v16483_v33  ;;  %v195_v52 = vld [vmem:[%s10699_s17 + $0xc0] sm:$0xff]  ;;  %vm20476_vm5 = vcmask 818176  }
 0x7cd   : > { %5357 = vrot.lane.b32.xlu1 %v16291_v43, %s10662_s21  ;;  %5355 = vrot.lane.b32.xlu0 %v16296_v41, %s10662_s21  ;;  %v1030_v43 = vsel %vm20465_vm8, %v20434_v40, %v20463_v2  ;;  %v7161_v40 = vsel %vm20470_vm6, %v16483_v33, %v16475_v28  ;;  %v447_v29 = vsel %vm20473_vm7, %v20472_v14, %v20471_v53  ;;  %vm20475_vm8 = vmmov %vm20473_vm7  ;;  %vm20478_vm6 = vcmask 826368  }
 0x7ce   : > { %9787 = vmatprep.subr.mxu1 %v7745_v3  ;;  %9840 = vmatprep.subr.mxu0 %v1031_v56  ;;  %v16629_v39 = vpop.permute.xlu1 %6225  ;;  %v446_v11 = vsel %vm20475_vm8, %v20450_v57, %v20472_v14  ;;  %v6869_v2 = vsel %vm20476_vm5, %v16535_v38, %v16527_v18  ;;  %v4953_v56 = vld [vmem:[%s10699_s17 + $0xf0] sm:$0xff]  ;;  %vm20477_vm15 = vmmov %vm20476_vm5  ;;  %v6577_v57 = vsel %vm20478_vm6, %v16583_v26, %v16581_v55  ;;  %vm20479_vm7 = vcmask 834560  }
 0x7cf   : > { %9788 = vmatpush2.msra.mxu1 %v7744_v16  ;;  %9841 = vmatpush1.msra.mxu0 %v1030_v43  ;;  %v6224_v1 = vpop.permute.xlu0 %6223  ;;  %v16667_v16 = vld [vmem:[%s10699_s17 + $0xe8] sm:$0xff]  ;;  %v6868_v19 = vsel %vm20477_vm15, %v16169_v27, %v16535_v38  ;;  %vm20480_vm12 = vmmov %vm20478_vm6  ;;  %v7455_v12 = vsel %vm7429_vm13, %v16509_v60, %v16501_v32  ;;  %vm20482_vm5 = vcmask 687104   ;;  %vm20483_vm15 = vcmask 965632  }
 0x7d0   : > { %9789 = vmatprep.subr.mxu1 %v7453_v44  ;;  %9842 = vmatprep.subr.mxu0 %v739_v61  ;;  %v6285_v43 = vsel %vm20479_vm7, %v6224_v1, %v16629_v39  ;;  %v6576_v38 = vsel %vm20480_vm12, %v16219_v59, %v16583_v26  ;;  %v7746_v44 = vsel %vm7721_vm14, %v16396_v9, %v16454_v13  ;;  %vm20481_vm8 = vmmov %vm20479_vm7  ;;  %vm20485_vm7 = vcmask 818176  }
 0x7d1   : > { %9790 = vmatpush2.msra.mxu1 %v7452_v8  ;;  %9843 = vmatpush1.msra.mxu0 %v738_v37  ;;  %v7454_v61 = vsel %vm7429_vm13, %v16422_v23, %v16509_v60  ;;  %v6284_v59 = vsel %vm20481_vm8, %v16264_v54, %v6224_v1  ;;  %v7163_v9 = vsel %vm20482_vm5, %v16561_v5, %v16549_v62  ;;  %vm20484_vm6 = vmmov %vm20482_vm5  ;;  %v4954_v23 = vld [vmem:[%s10699_s17 + $0xf8] sm:$0xff] }
 0x7d2   : > { %5653 = vrot.lane.b32.xlu1 %v16319_v34, %s10661_s18  ;;  %5651 = vrot.lane.b32.xlu0 %v16322_v22, %s10661_s18  ;;  %v16653_v48 = vpop.permute.xlu1 %6521  ;;  %v7162_v54 = vsel %vm20484_vm6, %v16475_v28, %v16561_v5  ;;  %vm20486_vm8 = vmmov %vm20485_vm7  ;;  %vm20488_vm6 = vcmask 834560  }
 0x7d3   : > { %9791 = vmatprep.subr.mxu1 %v7161_v40  ;;  %9844 = vmatprep.subr.mxu0 %v447_v29  ;;  %v6520_v3 = vpop.permute.xlu0 %6519  ;;  %vm20487_vm5 = vmmov %vm20480_vm12 }
 0x7d4   : > { %9792 = vmatpush2.msra.mxu1 %v7160_v46  ;;  %9845 = vmatpush1.msra.mxu0 %v446_v11  ;;  %v6579_v60 = vsel %vm20480_vm12, %v6520_v3, %v16653_v48  ;;  %v6578_v28 = vsel %vm20487_vm5, %v16581_v55, %v6520_v3  ;;  %vm20490_vm12 = vcmask 973824   ;;  %vm20492_vm5 = vmmov %vm20483_vm15  ;;  %v16752_v46 = vld [vmem:[%s18500_s1 + $0x8] sm:$0xff]  ;;  %v16761_v11 = vld [vmem:[%s10699_s17 + $0x138] sm:$0xff] }
 0x7d5   : > { %9793 = vmatprep.subr.mxu1 %v6869_v2  ;;  %9846 = vmatprep.subr.mxu0 %v16233_v10  ;;  %v7747_v10 = vsel %vm7721_vm14, %v16454_v13, %v16449_v15  ;;  %v16764_v3 = vld [vmem:[%s10699_s17 + $0x130] sm:$0xff] }
 0x7d6   : > { %9794 = vmatpush2.msra.mxu1 %v6868_v19  ;;  %9847 = vmatpush1.msra.mxu0 %v195_v52  ;;  %v5934_v33 = vpop.permute.xlu1 %5933 }
 0x7d7   : > { %5065 = vrot.lane.b32.xlu1 %v4953_v56, %s10653_s7  ;;  %5063 = vrot.lane.b32.xlu0 %v16667_v16, %s10653_s7  ;;  %v5932_v27 = vpop.permute.xlu0 %5931 }
 0x7d8   : > { %9795 = vmatprep.subr.mxu1 %v6577_v57  ;;  %9858 = vmatprep.subr.mxu0 %v7747_v10  ;;  %v5993_v13 = vsel %vm20483_vm15, %v5932_v27, %v5934_v33  ;;  %v5992_v5 = vsel %vm20483_vm15, %v16307_v49, %v5932_v27  ;;  %v16736_v49 = vld [vmem:[%s10699_s17 + $0x120] sm:$0xff]  ;;  %vm20493_vm15 = vmmov %vm20492_vm5 }
 0x7d9   : > { %9796 = vmatpush2.msra.mxu1 %v6576_v38  ;;  %9859 = vmatpush2.msra.mxu0 %v7746_v44 }
 0x7da   : > { %9860 = vmatprep.subr.mxu0 %v7455_v12  ;;  %9797 = vmatprep.subr.mxu1 %v6285_v43  ;;  %v16698_v26 = vpop.permute.xlu1 %6229 }
 0x7db   : > { %9861 = vmatpush2.msra.mxu0 %v7454_v61  ;;  %5361 = vrot.lane.b32.xlu1 %v16319_v34, %s10662_s21  ;;  %v6228_v8 = vpop.permute.xlu0 %6227  ;;  %v6871_v34 = vsel %vm20485_vm7, %v16611_v7, %v16606_v20  ;;  %vm20489_vm7 = vmmov %vm20488_vm6  ;;  %v20497_v61 = vld [vmem:[#allocation564_spill] sm:$0xff] }
 0x7dc   : > { %5359 = vrot.lane.b32.xlu0 %v16322_v22, %s10662_s21  ;;  %9862 = vmatprep.subr.mxu0 %v7163_v9  ;;  %v6870_v22 = vsel %vm20486_vm8, %v16527_v18, %v16611_v7  ;;  %v6287_v37 = vsel %vm20488_vm6, %v6228_v8, %v16698_v26  ;;  %v16730_v18 = vld [vmem:[%s10699_s17 + $0x128] sm:$0xff]  ;;  %v6286_v55 = vsel %vm20489_vm7, %v16629_v39, %v6228_v8  ;;  %vm20491_vm8 = vmmov %vm20490_vm12  ;;  %vm20494_vm6 = vcmask 719872  }
 0x7dd   : > { %9798 = vmatpush2.msra.mxu1 %v6284_v59  ;;  %9863 = vmatpush2.msra.mxu0 %v7162_v54  ;;  %vm20495_vm7 = vmmov %vm20491_vm8  ;;  %v20498_v59 = vld [vmem:[#allocation8_spill] sm:$0xff]  ;;  %v20499_v54 = vld [vmem:[#allocation214_spill] sm:$0xff] }
 0x7de   : > { %9864 = vmatprep.subr.mxu0 %v6871_v34  ;;  %9799 = vmatprep.subr.mxu1 %v5993_v13  ;;  %v5642_v1 = vpop.permute.xlu1 %5641  ;;  %v4825_v9 = vsel %vm4801_vm9, %v20498_v59, %v20497_v61  ;;  %v4824_v8 = vsel %vm4801_vm9, %v20378_v4, %v20498_v59  ;;  %v20500_v34 = vld [vmem:[#allocation213_spill] sm:$0xff]  ;;  %v20511_v59 = vld [vmem:[#allocation444_spill] sm:$0xff] }
 0x7df   : > { %9865 = vmatpush2.msra.mxu0 %v6870_v22  ;;  %5069 = vrot.lane.b32.xlu1 %v16296_v41, %s10653_s7  ;;  %v5640_v40 = vpop.permute.xlu0 %5639  ;;  %v16810_v22 = vld [vmem:[%s18500_s1] sm:$0xff]  ;;  %v4536_v4 = vsel %vm4509_vm0, %v20382_v42, %v20500_v34 }
 0x7e0   : > { %5067 = vrot.lane.b32.xlu0 %v4954_v23, %s10653_s7  ;;  %9866 = vmatprep.subr.mxu0 %v6579_v60  ;;  %v5701_v7 = vsel %vm20490_vm12, %v5640_v40, %v5642_v1  ;;  %v5700_v41 = vsel %vm20491_vm8, %v16333_v63, %v5640_v40  ;;  %vm20496_vm12 = vmmov %vm20495_vm7  ;;  %v4537_v23 = vsel %vm4509_vm0, %v20500_v34, %v20499_v54  ;;  %v20513_v34 = vld [vmem:[#allocation405_spill] sm:$0xff]  ;;  %vm20515_vm8 = vcmask 482304  }
 0x7e1   : > { %9867 = vmatpush2.msra.mxu0 %v6578_v28  ;;  %9800 = vmatpush2.msra.mxu1 %v5992_v5 }
 0x7e2   : > { %9868 = vmatprep.subr.mxu0 %v6287_v37  ;;  %9801 = vmatprep.subr.mxu1 %v5701_v7  ;;  %v20502_v37 = vld [vmem:[#allocation546_spill] sm:$0xff] }
 0x7e3   : > { %7701 = vrot.lane.b32.xlu1 %v16730_v18, %s10654_s8  ;;  %9869 = vmatpush2.msra.mxu0 %v6286_v55  ;;  %v16742_v14 = vpop.permute.xlu1 %5937  ;;  %v4244_v55 = vsel %vm4217_vm1, %v20389_v31, %v20502_v37 }
 0x7e4   : > { %7699 = vrot.lane.b32.xlu0 %v16736_v49, %s10654_s8  ;;  %9802 = vmatpush2.msra.mxu1 %v5700_v41  ;;  %v5936_v39 = vpop.permute.xlu0 %5935  ;;  %v20503_v41 = vld [vmem:[#allocation518_spill] sm:$0xff] }
 0x7e5   : > { %v5995_v29 = vsel %vm20492_vm5, %v5936_v39, %v16742_v14  ;;  %v5994_v63 = vsel %vm20493_vm15, %v5934_v33, %v5936_v39  ;;  %10569 = vmatprep.mubr.msk.f32.mxu0 %vm20494_vm6, %v16752_v46  ;;  %v20504_v39 = vld [vmem:[#allocation515_spill] sm:$0xff]  ;;  %vm20518_vm5 = vmmov %vm20515_vm8  ;;  %vm20521_vm15 = vcmask 490496  }
 0x7e6   : > { %9870 = vmatprep.subr.mxu0 %v5995_v29  ;;  %v3953_v29 = vsel %vm3925_vm2, %v20504_v39, %v20503_v41  ;;  %vm20524_vm6 = vmmov %vm20521_vm15 }
 0x7e7   : > { %7409 = vrot.lane.b32.xlu1 %v16730_v18, %s10655_s9  ;;  %9871 = vmatpush2.msra.mxu0 %v5994_v63  ;;  %v3952_v63 = vsel %vm3925_vm2, %v20395_v30, %v20504_v39  ;;  %v20522_v39 = vld [vmem:[#allocation520_spill] sm:$0xff] }
 0x7e8   : > { %7407 = vrot.lane.b32.xlu0 %v16736_v49, %s10655_s9  ;;  %v5350_v52 = vpop.permute.xlu1 %5349 }
 0x7e9   : > { %v5348_v2 = vpop.permute.xlu0 %5347 }
 0x7ea   : > { %v5409_v56 = vsel %vm5385_vm10, %v5348_v2, %v5350_v52  ;;  %v5408_v19 = vsel %vm5385_vm10, %v16357_v45, %v5348_v2  ;;  %v20505_v2 = vld [vmem:[#allocation566_spill] sm:$0xff] }
 0x7eb   : > { %7705 = vrot.lane.b32.xlu1 %v16761_v11, %s10654_s8  ;;  %9803 = vmatprep.subr.mxu1 %v5409_v56  ;;  %v20506_v56 = vld [vmem:[#allocation563_spill] sm:$0xff] }
 0x7ec   : > { %7703 = vrot.lane.b32.xlu0 %v16764_v3, %s10654_s8  ;;  %9804 = vmatpush2.msra.mxu1 %v5408_v19  ;;  %v4827_v19 = vsel %vm4801_vm9, %v20506_v56, %v20505_v2 }
 0x7ed   : > { %v16773_v33 = vpop.permute.xlu1 %5645 }
 0x7ee   : > { %v5644_v57 = vpop.permute.xlu0 %5643 }
 0x7ef   : > { %7117 = vrot.lane.b32.xlu1 %v16730_v18, %s10656_s10  ;;  %v5703_v10 = vsel %vm20495_vm7, %v5644_v57, %v16773_v33  ;;  %v5702_v43 = vsel %vm20496_vm12, %v5642_v1, %v5644_v57  ;;  %v20501_v1 = vld [vmem:[#allocation549_spill] sm:$0xff]  ;;  %vm20527_vm7 = vcmask 736256  }
 0x7f0   : > { %7115 = vrot.lane.b32.xlu0 %v16736_v49, %s10656_s10  ;;  %9872 = vmatprep.subr.mxu0 %v5703_v10  ;;  %v4245_v40 = vsel %vm4217_vm1, %v20502_v37, %v20501_v1  ;;  %v20507_v57 = vld [vmem:[#allocation481_spill] sm:$0xff]  ;;  %v20508_v10 = vld [vmem:[#allocation478_spill] sm:$0xff]  ;;  %vm20530_vm12 = vmmov %vm20527_vm7 }
 0x7f1   : > { %9873 = vmatpush2.msra.mxu0 %v5702_v43  ;;  %v3661_v30 = vsel %vm3633_vm3, %v20508_v10, %v20507_v57  ;;  %v4826_v43 = vsel %vm4801_vm9, %v20497_v61, %v20506_v56 }
 0x7f2   : > { %v5058_v45 = vpop.permute.xlu1 %5057 }
 0x7f3   : > { %7413 = vrot.lane.b32.xlu1 %v16761_v11, %s10655_s9  ;;  %v5056_v27 = vpop.permute.xlu0 %5055 }
 0x7f4   : > { %7411 = vrot.lane.b32.xlu0 %v16764_v3, %s10655_s9  ;;  %v5117_v38 = vsel %vm5093_vm11, %v5056_v27, %v5058_v45  ;;  %v5116_v44 = vsel %vm5093_vm11, %v16373_v36, %v5056_v27  ;;  %v20509_v27 = vld [vmem:[#allocation171_spill] sm:$0xff] }
 0x7f5   : > { %9805 = vmatprep.subr.mxu1 %v5117_v38  ;;  %v20510_v38 = vld [vmem:[#allocation299_spill] sm:$0xff] }
 0x7f6   : > { %9806 = vmatpush2.msra.mxu1 %v5116_v44  ;;  %v16789_v12 = vpop.permute.xlu1 %5353  ;;  %v4539_v44 = vsel %vm4509_vm0, %v20510_v38, %v20509_v27 }
 0x7f7   : > { %6825 = vrot.lane.b32.xlu1 %v16730_v18, %s10657_s11  ;;  %v5352_v13 = vpop.permute.xlu0 %5351  ;;  %9807 = vmatprep.subr.mxu1 %v4825_v9  ;;  %v20512_v9 = vld [vmem:[#allocation441_spill] sm:$0xff] }
 0x7f8   : > { %6823 = vrot.lane.b32.xlu0 %v16736_v49, %s10657_s11  ;;  %9808 = vmatpush2.msra.mxu1 %v4824_v8  ;;  %v5411_v36 = vsel %vm5385_vm10, %v5352_v13, %v16789_v12  ;;  %v5410_v60 = vsel %vm5385_vm10, %v5350_v52, %v5352_v13  ;;  %v3369_v13 = vsel %vm3341_vm4, %v20512_v9, %v20511_v59 }
 0x7f9   : > { %9874 = vmatprep.subr.mxu0 %v5411_v36  ;;  %9887 = vmatprep.subr.mxu1 %v4537_v23  ;;  %v4538_v36 = vsel %vm4509_vm0, %v20499_v54, %v20510_v38  ;;  %v20514_v23 = vld [vmem:[#allocation402_spill] sm:$0xff]  ;;  %v20529_v38 = vld [vmem:[#allocation480_spill] sm:$0xff] }
 0x7fa   : > { %9810 = vmatmul.mubr.f32.vlgmr.msra.gmra.mxu1 %v16810_v22  ;;  %9875 = vmatpush2.msra.mxu0 %v5410_v60  ;;  %v16816_v28 = vpop.permute.xlu1 %5061  ;;  %v3077_v60 = vsel %vm20515_vm8, %v20514_v23, %v20513_v34  ;;  %vm20533_vm8 = vcmask 744448  }
 0x7fb   : > { %7121 = vrot.lane.b32.xlu1 %v16761_v11, %s10656_s10  ;;  %9888 = vmatpush1.msra.mxu1 %v4536_v4  ;;  %v5060_v5 = vpop.permute.xlu0 %5059  ;;  %v20516_v4 = vld [vmem:[#allocation551_spill] sm:$0xff] }
 0x7fc   : > { %7119 = vrot.lane.b32.xlu0 %v16764_v3, %s10656_s10  ;;  %9889 = vmatprep.subr.mxu1 %v4245_v40  ;;  %v5119_v42 = vsel %vm5093_vm11, %v5060_v5, %v16816_v28  ;;  %v5118_v7 = vsel %vm5093_vm11, %v5058_v45, %v5060_v5  ;;  %v3660_v45 = vsel %vm3633_vm3, %v20401_v17, %v20508_v10  ;;  %v20517_v5 = vld [vmem:[#allocation548_spill] sm:$0xff]  ;;  %v20526_v10 = vld [vmem:[#allocation323_spill] sm:$0xff] }
 0x7fd   : > { %9890 = vmatpush1.msra.mxu1 %v4244_v55  ;;  %9876 = vmatprep.subr.mxu0 %v5119_v42  ;;  %v3368_v17 = vsel %vm3341_vm4, %v20407_v51, %v20512_v9  ;;  %v4247_v37 = vsel %vm4217_vm1, %v20517_v5, %v20516_v4  ;;  %v3076_v51 = vsel %vm20518_vm5, %v20413_v21, %v20514_v23  ;;  %v20519_v42 = vld [vmem:[#allocation366_spill] sm:$0xff]  ;;  %vm20536_vm5 = vmmov %vm20533_vm8 }
 0x7fe   : > { %9891 = vmatprep.subr.mxu1 %v3953_v29  ;;  %9877 = vmatpush2.msra.mxu0 %v5118_v7  ;;  %v16837_v52 = vpop.permute.xlu1 %7693  ;;  %v4246_v54 = vsel %vm4217_vm1, %v20501_v1, %v20517_v5  ;;  %v20520_v7 = vld [vmem:[#allocation363_spill] sm:$0xff]  ;;  %v20523_v29 = vld [vmem:[#allocation517_spill] sm:$0xff]  ;;  %v3662_v9 = vsel %vm3633_vm3, %v20507_v57, %v20529_v38  ;;  %v20534_v23 = vld [vmem:[#allocation446_spill] sm:$0xff] }
 0x7ff   : > { %6533 = vrot.lane.b32.xlu1 %v16730_v18, %s10658_s14  ;;  %9892 = vmatpush1.msra.mxu1 %v3952_v63  ;;  %v16841_v31 = vpop.permute.xlu0 %7691  ;;  %v2785_v21 = vsel %vm20521_vm15, %v20520_v7, %v20519_v42  ;;  %v3955_v63 = vsel %vm3925_vm2, %v20523_v29, %v20522_v39  ;;  %v2784_v1 = vsel %vm20524_vm6, %v20421_v50, %v20520_v7  ;;  %v20538_v7 = vld [vmem:[#allocation239_spill] sm:$0xff]  ;;  %vm20539_vm15 = vcmask 752640  }
 0x800   : > { %6531 = vrot.lane.b32.xlu0 %v16736_v49, %s10658_s14  ;;  %9878 = vmatprep.subr.mxu0 %v4827_v19  ;;  %v3954_v56 = vsel %vm3925_vm2, %v20503_v41, %v20523_v29  ;;  %v20525_v19 = vld [vmem:[#allocation326_spill] sm:$0xff]  ;;  %v2492_v41 = vsel %vm20530_vm12, %v20429_v58, %v20526_v10  ;;  %v20541_v29 = vld [vmem:[#allocation404_spill] sm:$0xff]  ;;  %vm20542_vm6 = vcmask 482304  }
 0x801   : > { %9893 = vmatprep.subr.mxu1 %v3661_v30  ;;  %9879 = vmatpush2.msra.mxu0 %v4826_v43  ;;  %v2493_v30 = vsel %vm20527_vm7, %v20526_v10, %v20525_v19  ;;  %vm20543_vm7 = vmmov %vm20539_vm15  ;;  %v20546_v10 = vld [vmem:[#allocation197_spill] sm:$0xff] }
 0x802   : > { %9894 = vmatpush1.msra.mxu1 %v3660_v45  ;;  %9958 = vmatprep.subr.mxu0 %v4539_v44  ;;  %v16863_v8 = vpop.permute.xlu1 %7401  ;;  %v20528_v45 = vld [vmem:[#allocation483_spill] sm:$0xff]  ;;  %vm20544_vm12 = vmmov %vm20542_vm6 }
 0x803   : > { %6829 = vrot.lane.b32.xlu1 %v16761_v11, %s10657_s11  ;;  %9895 = vmatprep.subr.mxu1 %v3369_v13  ;;  %v16867_v61 = vpop.permute.xlu0 %7399  ;;  %v3663_v50 = vsel %vm3633_vm3, %v20529_v38, %v20528_v45  ;;  %v20531_v13 = vld [vmem:[#allocation284_spill] sm:$0xff] }
 0x804   : > { %6827 = vrot.lane.b32.xlu0 %v16764_v3, %s10657_s11  ;;  %9881 = vmatmul.mubr.f32.vlgmr.msra.gmra.mxu0 %v16810_v22 }
 0x805   : > { %9896 = vmatpush1.msra.mxu1 %v3368_v17  ;;  %9959 = vmatpush1.msra.mxu0 %v4538_v36  ;;  %v20532_v17 = vld [vmem:[#allocation281_spill] sm:$0xff] }
 0x806   : > { %9897 = vmatprep.subr.mxu1 %v3077_v60  ;;  %9960 = vmatprep.subr.mxu0 %v4247_v37  ;;  %v16887_v40 = vpop.permute.xlu1 %7697  ;;  %v2201_v36 = vsel %vm20533_vm8, %v20532_v17, %v20531_v13  ;;  %v20535_v60 = vld [vmem:[#allocation443_spill] sm:$0xff]  ;;  %v2200_v58 = vsel %vm20536_vm5, %v20437_v0, %v20532_v17  ;;  %vm20547_vm8 = vcmask 883712   ;;  %vm20550_vm5 = vcmask 490496  }
 0x807   : > { %6241 = vrot.lane.b32.xlu1 %v16730_v18, %s10659_s15  ;;  %9898 = vmatpush1.msra.mxu1 %v3076_v51  ;;  %v16894_v55 = vpop.permute.xlu0 %7695  ;;  %v3371_v5 = vsel %vm3341_vm4, %v20535_v60, %v20534_v23  ;;  %v3370_v57 = vsel %vm3341_vm4, %v20511_v59, %v20535_v60  ;;  %v1908_v59 = vsel %vm20543_vm7, %v20445_v24, %v20538_v7  ;;  %v20554_v60 = vld [vmem:[#allocation155_spill] sm:$0xff]  ;;  %vm20555_vm7 = vcmask 891904  }
 0x808   : > { %6239 = vrot.lane.b32.xlu0 %v16736_v49, %s10659_s15  ;;  %9961 = vmatpush1.msra.mxu0 %v4246_v54  ;;  %v20537_v54 = vld [vmem:[#allocation242_spill] sm:$0xff] }
 0x809   : > { %9899 = vmatprep.subr.mxu1 %v2785_v21  ;;  %9962 = vmatprep.subr.mxu0 %v3955_v63  ;;  %v1909_v0 = vsel %vm20539_vm15, %v20538_v7, %v20537_v54  ;;  %v20540_v21 = vld [vmem:[#allocation407_spill] sm:$0xff]  ;;  %vm20551_vm15 = vmmov %vm20547_vm8 }
 0x80a   : > { %9900 = vmatpush1.msra.mxu1 %v2784_v1  ;;  %9963 = vmatpush1.msra.mxu0 %v3954_v56  ;;  %v16913_v43 = vpop.permute.xlu1 %7109  ;;  %v3079_v63 = vsel %vm20542_vm6, %v20541_v29, %v20540_v21  ;;  %v3078_v1 = vsel %vm20544_vm12, %v20513_v34, %v20541_v29  ;;  %v20545_v56 = vld [vmem:[#allocation200_spill] sm:$0xff]  ;;  %v1616_v34 = vsel %vm20551_vm15, %v20453_v47, %v20546_v10  ;;  %vm20552_vm6 = vmmov %vm20550_vm5  ;;  %vm20558_vm12 = vcmask 736256  }
 0x80b   : > { %6537 = vrot.lane.b32.xlu1 %v16761_v11, %s10658_s14  ;;  %9901 = vmatprep.subr.mxu1 %v2493_v30  ;;  %v16920_v44 = vpop.permute.xlu0 %7107  ;;  %v1617_v30 = vsel %vm20547_vm8, %v20546_v10, %v20545_v56  ;;  %vm20559_vm8 = vmmov %vm20555_vm7  ;;  %vm20563_vm15 = vcmask 900096   ;;  %v20565_v10 = vld [vmem:[#allocation283_spill] sm:$0xff] }
 0x80c   : > { %6535 = vrot.lane.b32.xlu0 %v16764_v3, %s10658_s14  ;;  %9964 = vmatprep.subr.mxu0 %v3663_v50  ;;  %v20548_v50 = vld [vmem:[#allocation368_spill] sm:$0xff]  ;;  %v1324_v47 = vsel %vm20559_vm8, %v20458_v6, %v20554_v60  ;;  %vm20571_vm8 = vcmask 1031168  }
 0x80d   : > { %9902 = vmatpush1.msra.mxu1 %v2492_v41  ;;  %9965 = vmatpush1.msra.mxu0 %v3662_v9  ;;  %v20549_v41 = vld [vmem:[#allocation365_spill] sm:$0xff] }
 0x80e   : > { %9903 = vmatprep.subr.mxu1 %v2201_v36  ;;  %9966 = vmatprep.subr.mxu0 %v3371_v5  ;;  %v16939_v37 = vpop.permute.xlu1 %7405  ;;  %v2787_v24 = vsel %vm20550_vm5, %v20549_v41, %v20548_v50  ;;  %v2786_v17 = vsel %vm20552_vm6, %v20519_v42, %v20549_v41  ;;  %v20553_v36 = vld [vmem:[#allocation158_spill] sm:$0xff]  ;;  %vm20560_vm5 = vmmov %vm20558_vm12  ;;  %vm20566_vm6 = vcmask 744448  }
 0x80f   : > { %5949 = vrot.lane.b32.xlu1 %v16730_v18, %s10660_s16  ;;  %9904 = vmatpush1.msra.mxu1 %v2200_v58  ;;  %v16946_v51 = vpop.permute.xlu0 %7403  ;;  %v1325_v5 = vsel %vm20555_vm7, %v20554_v60, %v20553_v36  ;;  %v20556_v58 = vld [vmem:[#allocation328_spill] sm:$0xff]  ;;  %vm20567_vm7 = vmmov %vm20563_vm15 }
 0x810   : > { %5947 = vrot.lane.b32.xlu0 %v16736_v49, %s10660_s16  ;;  %9967 = vmatpush1.msra.mxu0 %v3370_v57  ;;  %v20557_v57 = vld [vmem:[#allocation325_spill] sm:$0xff]  ;;  %v20572_v60 = vld [vmem:[#allocation244_spill] sm:$0xff] }
 0x811   : > { %9905 = vmatprep.subr.mxu1 %v1909_v0  ;;  %9968 = vmatprep.subr.mxu0 %v3079_v63  ;;  %v2495_v7 = vsel %vm20558_vm12, %v20557_v57, %v20556_v58  ;;  %v2494_v42 = vsel %vm20560_vm5, %v20525_v19, %v20557_v57  ;;  %v20561_v63 = vld [vmem:[#allocation116_spill] sm:$0xff]  ;;  %vm20568_vm12 = vmmov %vm20566_vm6  ;;  %vm20574_vm5 = vcmask 752640  }
 0x812   : > { %9906 = vmatpush1.msra.mxu1 %v1908_v59  ;;  %9969 = vmatpush1.msra.mxu0 %v3078_v1  ;;  %v16965_v38 = vpop.permute.xlu1 %6817  ;;  %v20562_v59 = vld [vmem:[#allocation113_spill] sm:$0xff]  ;;  %v20564_v1 = vld [vmem:[#allocation286_spill] sm:$0xff]  ;;  %v2202_v41 = vsel %vm20568_vm12, %v20531_v13, %v20565_v10  ;;  %vm20582_vm12 = vcmask 883712  }
 0x813   : > { %6245 = vrot.lane.b32.xlu1 %v16761_v11, %s10659_s15  ;;  %9907 = vmatprep.subr.mxu1 %v1617_v30  ;;  %v16972_v9 = vpop.permute.xlu0 %6815  ;;  %v1033_v6 = vsel %vm20563_vm15, %v20562_v59, %v20561_v63  ;;  %v2203_v19 = vsel %vm20566_vm6, %v20565_v10, %v20564_v1  ;;  %v1032_v30 = vsel %vm20567_vm7, %v20462_v25, %v20562_v59  ;;  %vm20575_vm15 = vmmov %vm20571_vm8  ;;  %v20578_v59 = vld [vmem:[#allocation29_spill] sm:$0xff]  ;;  %vm20579_vm7 = vcmask 1039360   ;;  %v20580_v10 = vld [vmem:[#allocation202_spill] sm:$0xff] }
 0x814   : > { %6243 = vrot.lane.b32.xlu0 %v16764_v3, %s10659_s15  ;;  %9970 = vmatprep.subr.mxu0 %v2787_v24  ;;  %v20569_v24 = vld [vmem:[#allocation74_spill] sm:$0xff]  ;;  %vm20576_vm6 = vmmov %vm20574_vm5 }
 0x815   : > { %9908 = vmatpush1.msra.mxu1 %v1616_v34  ;;  %9971 = vmatpush1.msra.mxu0 %v2786_v17  ;;  %v20570_v34 = vld [vmem:[#allocation71_spill] sm:$0xff] }
 0x816   : > { %9909 = vmatprep.subr.mxu1 %v1325_v5  ;;  %9972 = vmatprep.subr.mxu0 %v2495_v7  ;;  %v16994_v0 = vpop.permute.xlu1 %7113  ;;  %v741_v17 = vsel %vm20571_vm8, %v20570_v34, %v20569_v24  ;;  %v20573_v5 = vld [vmem:[#allocation241_spill] sm:$0xff]  ;;  %v740_v25 = vsel %vm20575_vm15, %v20466_v35, %v20570_v34  ;;  %v20581_v35 = vld [vmem:[#allocation199_spill] sm:$0xff]  ;;  %vm20583_vm8 = vmmov %vm20579_vm7  ;;  %vm20587_vm15 = vcmask 891904  }
 0x817   : > { %9910 = vmatpush1.msra.mxu1 %v1324_v47  ;;  %9973 = vmatpush1.msra.mxu0 %v2494_v42  ;;  %v16996_v29 = vpop.permute.xlu0 %7111  ;;  %v1911_v57 = vsel %vm20574_vm5, %v20573_v5, %v20572_v60  ;;  %v1910_v13 = vsel %vm20576_vm6, %v20537_v54, %v20573_v5  ;;  %v20577_v42 = vld [vmem:[#allocation32_spill] sm:$0xff]  ;;  %v448_v54 = vsel %vm20583_vm8, %v20471_v53, %v20578_v59  ;;  %vm20584_vm5 = vmmov %vm20582_vm12  ;;  %v197_v34 = vld [vmem:[%s10699_s17 + $0xd0] sm:$0xff]  ;;  %vm20595_vm8 = vcmask 1031168  }
 0x818   : > { %5657 = vrot.lane.b32.xlu1 %v16730_v18, %s10661_s18  ;;  %5655 = vrot.lane.b32.xlu0 %v16736_v49, %s10661_s18  ;;  %v20585_v5 = vld [vmem:[#allocation160_spill] sm:$0xff]  ;;  %vm20588_vm6 = vmmov %vm20587_vm15 }
 0x819   : > { %9911 = vmatprep.subr.mxu1 %v1033_v6  ;;  %9974 = vmatprep.subr.mxu0 %v2203_v19  ;;  %v449_v6 = vsel %vm20579_vm7, %v20578_v59, %v20577_v42  ;;  %v1619_v19 = vsel %vm20582_vm12, %v20581_v35, %v20580_v10  ;;  %v20589_v59 = vld [vmem:[#allocation118_spill] sm:$0xff]  ;;  %vm20591_vm7 = vcmask 900096  }
 0x81a   : > { %9912 = vmatpush1.msra.mxu1 %v1032_v30  ;;  %9975 = vmatpush1.msra.mxu0 %v2202_v41  ;;  %v17020_v7 = vpop.permute.xlu1 %6525  ;;  %v198_v30 = vld [vmem:[%s10699_s17 + $0xd8] sm:$0xff]  ;;  %v1618_v41 = vsel %vm20584_vm5, %v20545_v56, %v20581_v35  ;;  %v7749_v56 = vsel %vm7721_vm14, %v16841_v31, %v16837_v52  ;;  %vm20592_vm12 = vmmov %vm20591_vm7 }
 0x81b   : > { %9913 = vmatprep.subr.mxu1 %v741_v17  ;;  %9976 = vmatprep.subr.mxu0 %v1911_v57  ;;  %v17028_v47 = vpop.permute.xlu0 %6523  ;;  %v20586_v57 = vld [vmem:[#allocation157_spill] sm:$0xff]  ;;  %vm20596_vm5 = vmmov %vm20595_vm8 }
 0x81c   : > { %9914 = vmatpush1.msra.mxu1 %v740_v25  ;;  %9977 = vmatpush1.msra.mxu0 %v1910_v13  ;;  %v1327_v25 = vsel %vm20587_vm15, %v20586_v57, %v20585_v5  ;;  %v1326_v53 = vsel %vm20588_vm6, %v20553_v36, %v20586_v57  ;;  %v7748_v36 = vsel %vm7721_vm14, %v16449_v15, %v16841_v31  ;;  %vm20597_vm15 = vcmask 687104  }
 0x81d   : > { %5953 = vrot.lane.b32.xlu1 %v16761_v11, %s10660_s16  ;;  %5951 = vrot.lane.b32.xlu0 %v16764_v3, %s10660_s16  ;;  %v7456_v15 = vsel %vm7429_vm13, %v16501_v32, %v16867_v61  ;;  %v7165_v32 = vsel %vm20597_vm15, %v16920_v44, %v16913_v43  ;;  %vm20600_vm6 = vcmask 1039360  }
 0x81e   : > { %9915 = vmatprep.subr.mxu1 %v449_v6  ;;  %9978 = vmatprep.subr.mxu0 %v1619_v19  ;;  %v17048_v17 = vpop.permute.xlu1 %6821  ;;  %v20590_v6 = vld [vmem:[#allocation115_spill] sm:$0xff] }
 0x81f   : > { %9916 = vmatpush1.msra.mxu1 %v448_v54  ;;  %9979 = vmatpush1.msra.mxu0 %v1618_v41  ;;  %v17053_v13 = vpop.permute.xlu0 %6819  ;;  %v1035_v35 = vsel %vm20591_vm7, %v20590_v6, %v20589_v59  ;;  %v7457_v54 = vsel %vm7429_vm13, %v16867_v61, %v16863_v8  ;;  %v20593_v41 = vld [vmem:[#allocation76_spill] sm:$0xff]  ;;  %v20598_v61 = vld [vmem:[#allocation34_spill] sm:$0xff]  ;;  %vm20601_vm7 = vmmov %vm20597_vm15  ;;  %vm20605_vm15 = vcmask 826368  }
 0x820   : > { %9917 = vmatprep.subr.mxu1 %v198_v30  ;;  %9980 = vmatprep.subr.mxu0 %v1327_v25  ;;  %v20599_v25 = vld [vmem:[#allocation31_spill] sm:$0xff] }
 0x821   : > { %9918 = vmatpush1.msra.mxu1 %v197_v34  ;;  %9981 = vmatpush1.msra.mxu0 %v1326_v53  ;;  %v20594_v34 = vld [vmem:[#allocation73_spill] sm:$0xff] }
 0x822   : > { %5365 = vrot.lane.b32.xlu1 %v16730_v18, %s10662_s21  ;;  %5363 = vrot.lane.b32.xlu0 %v16736_v49, %s10662_s21  ;;  %v17068_v19 = vpop.permute.xlu1 %6233  ;;  %v1034_v18 = vsel %vm20592_vm12, %v20561_v63, %v20590_v6  ;;  %v743_v57 = vsel %vm20595_vm8, %v20594_v34, %v20593_v41  ;;  %v742_v31 = vsel %vm20596_vm5, %v20569_v24, %v20594_v34  ;;  %vm20602_vm12 = vmmov %vm20600_vm6  ;;  %vm20603_vm8 = vcmask 818176  }
 0x823   : > { %9929 = vmatprep.subr.mxu1 %v7749_v56  ;;  %9982 = vmatprep.subr.mxu0 %v1035_v35  ;;  %v6232_v30 = vpop.permute.xlu0 %6231  ;;  %v451_v24 = vsel %vm20600_vm6, %v20599_v25, %v20598_v61  ;;  %v7164_v56 = vsel %vm20601_vm7, %v16549_v62, %v16920_v44  ;;  %v450_v6 = vsel %vm20602_vm12, %v20577_v42, %v20599_v25  ;;  %v199_v35 = vld [vmem:[%s10699_s17 + $0xe0] sm:$0xff]  ;;  %vm20604_vm5 = vmmov %vm20603_vm8  ;;  %vm20606_vm6 = vcmask 834560   ;;  %v17178_v25 = vld [vmem:[%s10699_s17 + $0x148] sm:$0xff] }
 0x824   : > { %9930 = vmatpush2.msra.mxu1 %v7748_v36  ;;  %9983 = vmatpush1.msra.mxu0 %v1034_v18  ;;  %v6873_v36 = vsel %vm20603_vm8, %v16972_v9, %v16965_v38  ;;  %v4957_v18 = vld [vmem:[%s10699_s17 + $0x110] sm:$0xff]  ;;  %v6872_v62 = vsel %vm20604_vm5, %v16606_v20, %v16972_v9  ;;  %v6581_v34 = vsel %vm20605_vm15, %v17028_v47, %v17020_v7  ;;  %vm20607_vm7 = vmmov %vm20605_vm15  ;;  %vm20609_vm8 = vcmask 687104  }
 0x825   : > { %9931 = vmatprep.subr.mxu1 %v7457_v54  ;;  %9984 = vmatprep.subr.mxu0 %v743_v57  ;;  %v17112_v54 = vld [vmem:[%s10699_s17 + $0x108] sm:$0xff]  ;;  %v6289_v20 = vsel %vm20606_vm6, %v6232_v30, %v17068_v19  ;;  %v6580_v9 = vsel %vm20607_vm7, %v16653_v48, %v17028_v47  ;;  %v7750_v57 = vsel %vm7721_vm14, %v16837_v52, %v16894_v55  ;;  %vm20608_vm12 = vmmov %vm20606_vm6  ;;  %vm20610_vm5 = vcmask 965632  }
 0x826   : > { %9932 = vmatpush2.msra.mxu1 %v7456_v15  ;;  %9985 = vmatpush1.msra.mxu0 %v742_v31  ;;  %v17088_v63 = vpop.permute.xlu1 %6529  ;;  %v7459_v15 = vsel %vm7429_vm13, %v16946_v51, %v16939_v37  ;;  %v7458_v31 = vsel %vm7429_vm13, %v16863_v8, %v16946_v51  ;;  %v6288_v48 = vsel %vm20608_vm12, %v16698_v26, %v6232_v30  ;;  %vm20611_vm15 = vmmov %vm20609_vm8  ;;  %vm20612_vm6 = vcmask 818176   ;;  %v4958_v8 = vld [vmem:[%s10699_s17 + $0x118] sm:$0xff] }
 0x827   : > { %5661 = vrot.lane.b32.xlu1 %v16761_v11, %s10661_s18  ;;  %5659 = vrot.lane.b32.xlu0 %v16764_v3, %s10661_s18  ;;  %v6528_v53 = vpop.permute.xlu0 %6527  ;;  %v7167_v52 = vsel %vm20609_vm8, %v16996_v29, %v16994_v0  ;;  %v7166_v26 = vsel %vm20611_vm15, %v16913_v43, %v16996_v29  ;;  %vm20613_vm12 = vmmov %vm20612_vm6  ;;  %vm20615_vm15 = vcmask 834560  }
 0x828   : > { %9933 = vmatprep.subr.mxu1 %v7165_v32  ;;  %9986 = vmatprep.subr.mxu0 %v451_v24  ;;  %v6583_v51 = vsel %vm20607_vm7, %v6528_v53, %v17088_v63  ;;  %vm20614_vm8 = vmmov %vm20607_vm7  ;;  %v17183_v24 = vld [vmem:[%s10699_s17 + $0x140] sm:$0xff]  ;;  %vm20617_vm7 = vcmask 973824  }
 0x829   : > { %9934 = vmatpush2.msra.mxu1 %v7164_v56  ;;  %9987 = vmatpush1.msra.mxu0 %v450_v6  ;;  %v6582_v43 = vsel %vm20614_vm8, %v17020_v7, %v6528_v53  ;;  %vm20619_vm8 = vcmask 719872   ;;  %v17207_v6 = vld [vmem:[%s10699_s17 + $0x158] sm:$0xff] }
 0x82a   : > { %9935 = vmatprep.subr.mxu1 %v6873_v36  ;;  %9988 = vmatprep.subr.mxu0 %v16667_v16  ;;  %v7751_v16 = vsel %vm7721_vm14, %v16894_v55, %v16887_v40 }
 0x82b   : > { %9936 = vmatpush2.msra.mxu1 %v6872_v62  ;;  %9989 = vmatpush1.msra.mxu0 %v199_v35  ;;  %v17118_v44 = vpop.permute.xlu1 %5941  ;;  %v5940_v42 = vpop.permute.xlu0 %5939  ;;  %v17210_v35 = vld [vmem:[%s10699_s17 + $0x150] sm:$0xff] }
 0x82c   : > { %5073 = vrot.lane.b32.xlu1 %v4957_v18, %s10653_s7  ;;  %5071 = vrot.lane.b32.xlu0 %v17112_v54, %s10653_s7  ;;  %v5997_v55 = vsel %vm20610_vm5, %v5940_v42, %v17118_v44  ;;  %v5996_v29 = vsel %vm20610_vm5, %v16742_v14, %v5940_v42  ;;  %vm20620_vm5 = vmmov %vm20619_vm8 }
 0x82d   : > { %9937 = vmatprep.subr.mxu1 %v6581_v34  ;;  %10000 = vmatprep.subr.mxu0 %v7751_v16 }
 0x82e   : > { %9938 = vmatpush2.msra.mxu1 %v6580_v9  ;;  %10001 = vmatpush2.msra.mxu0 %v7750_v57 }
 0x82f   : > { %10002 = vmatprep.subr.mxu0 %v7459_v15  ;;  %9939 = vmatprep.subr.mxu1 %v6289_v20 }
 0x830   : > { %10003 = vmatpush2.msra.mxu0 %v7458_v31  ;;  %5369 = vrot.lane.b32.xlu1 %v16761_v11, %s10662_s21  ;;  %v17152_v47 = vpop.permute.xlu1 %6237  ;;  %v6236_v32 = vpop.permute.xlu0 %6235  ;;  %v6875_v11 = vsel %vm20612_vm6, %v17053_v13, %v17048_v17  ;;  %vm20616_vm6 = vmmov %vm20615_vm15  ;;  %v20624_v31 = vld [vmem:[#allocation568_spill] sm:$0xff] }
 0x831   : > { %5367 = vrot.lane.b32.xlu0 %v16764_v3, %s10662_s21  ;;  %10004 = vmatprep.subr.mxu0 %v7167_v52  ;;  %v6874_v3 = vsel %vm20613_vm12, %v16965_v38, %v17053_v13  ;;  %v6291_v30 = vsel %vm20615_vm15, %v6236_v32, %v17152_v47  ;;  %v6290_v38 = vsel %vm20616_vm6, %v17068_v19, %v6236_v32  ;;  %vm20618_vm12 = vmmov %vm20617_vm7  ;;  %vm20621_vm15 = vcmask 965632  }
 0x832   : > { %9940 = vmatpush2.msra.mxu1 %v6288_v48  ;;  %10005 = vmatpush2.msra.mxu0 %v7166_v26  ;;  %vm20622_vm6 = vmmov %vm20621_vm15  ;;  %v20625_v48 = vld [vmem:[#allocation565_spill] sm:$0xff] }
 0x833   : > { %10006 = vmatprep.subr.mxu0 %v6875_v11  ;;  %9941 = vmatprep.subr.mxu1 %v5997_v55  ;;  %v4829_v52 = vsel %vm4801_vm9, %v20625_v48, %v20624_v31  ;;  %v4828_v32 = vsel %vm4801_vm9, %v20505_v2, %v20625_v48  ;;  %v20626_v26 = vld [vmem:[#allocation257_spill] sm:$0xff]  ;;  %v20627_v11 = vld [vmem:[#allocation174_spill] sm:$0xff] }
 0x834   : > { %10007 = vmatpush2.msra.mxu0 %v6874_v3  ;;  %5077 = vrot.lane.b32.xlu1 %v16736_v49, %s10653_s7  ;;  %v4540_v2 = vsel %vm4509_vm0, %v20509_v27, %v20627_v11 }
 0x835   : > { %5075 = vrot.lane.b32.xlu0 %v4958_v8, %s10653_s7  ;;  %10008 = vmatprep.subr.mxu0 %v6583_v51  ;;  %v5650_v7 = vpop.permute.xlu1 %5649  ;;  %v5648_v13 = vpop.permute.xlu0 %5647  ;;  %v4541_v8 = vsel %vm4509_vm0, %v20627_v11, %v20626_v26  ;;  %v10663_v51 = vmov 0  }
 0x836   : > { %10009 = vmatpush2.msra.mxu0 %v6582_v43  ;;  %9942 = vmatpush2.msra.mxu1 %v5996_v29  ;;  %v5705_v14 = vsel %vm20617_vm7, %v5648_v13, %v5650_v7  ;;  %v5704_v49 = vsel %vm20618_vm12, %v16773_v33, %v5648_v13  ;;  %vm20623_vm12 = vmmov %vm20617_vm7 }
 0x837   : > { %10010 = vmatprep.subr.mxu0 %v6291_v30  ;;  %9943 = vmatprep.subr.mxu1 %v5705_v14 }
 0x838   : > { %7709 = vrot.lane.b32.xlu1 %v17178_v25, %s10654_s8  ;;  %10011 = vmatpush2.msra.mxu0 %v6290_v38  ;;  %v20628_v38 = vld [vmem:[#allocation553_spill] sm:$0xff] }
 0x839   : > { %7707 = vrot.lane.b32.xlu0 %v17183_v24, %s10654_s8  ;;  %9944 = vmatpush2.msra.mxu1 %v5704_v49 }
 0x83a   : > { %v17192_v19 = vpop.permute.xlu1 %5945  ;;  %v5944_v53 = vpop.permute.xlu0 %5943  ;;  %10570 = vmatprep.mubr.msk.f32.mxu1 %vm20619_vm8, %v16752_v46  ;;  %10571 = vmatprep.mubr.msk.f32.mxu0 %vm20620_vm5, %v16752_v46  ;;  %vm20630_vm8 = vmmov %vm20620_vm5  ;;  %vm20643_vm5 = vcmask 482304  }
 0x83b   : > { %v5999_v33 = vsel %vm20621_vm15, %v5944_v53, %v17192_v19  ;;  %v5998_v56 = vsel %vm20622_vm6, %v17118_v44, %v5944_v53  ;;  %10618 = vset.pattern.permute.xlu0 %v10663_v51  ;;  %v20631_v53 = vld [vmem:[#allocation522_spill] sm:$0xff]  ;;  %vm20646_vm15 = vmmov %vm20643_vm5  ;;  %vm20649_vm6 = vcmask 490496  }
 0x83c   : > { %7417 = vrot.lane.b32.xlu1 %v17178_v25, %s10655_s9  ;;  %10012 = vmatprep.subr.mxu0 %v5999_v33  ;;  %v20642_v51 = vld [vmem:[#allocation406_spill] sm:$0xff] }
 0x83d   : > { %7415 = vrot.lane.b32.xlu0 %v17183_v24, %s10655_s9  ;;  %10013 = vmatpush2.msra.mxu0 %v5998_v56 }
 0x83f   : > { %v5358_v36 = vpop.permute.xlu1 %5357  ;;  %v5356_v18 = vpop.permute.xlu0 %5355 }
 0x840   : > { %7713 = vrot.lane.b32.xlu1 %v17207_v6, %s10654_s8  ;;  %v5413_v62 = vsel %vm5385_vm10, %v5356_v18, %v5358_v36  ;;  %v5412_v44 = vsel %vm5385_vm10, %v16789_v12, %v5356_v18  ;;  %v20633_v18 = vld [vmem:[#allocation570_spill] sm:$0xff] }
 0x841   : > { %7711 = vrot.lane.b32.xlu0 %v17210_v35, %s10654_s8  ;;  %9945 = vmatprep.subr.mxu1 %v5413_v62  ;;  %v20634_v62 = vld [vmem:[#allocation567_spill] sm:$0xff] }
 0x842   : > { %9946 = vmatpush2.msra.mxu1 %v5412_v44  ;;  %v4831_v44 = vsel %vm4801_vm9, %v20634_v62, %v20633_v18 }
 0x844   : > { %7125 = vrot.lane.b32.xlu1 %v17178_v25, %s10656_s10  ;;  %v17221_v42 = vpop.permute.xlu1 %5653  ;;  %v5652_v34 = vpop.permute.xlu0 %5651 }
 0x845   : > { %7123 = vrot.lane.b32.xlu0 %v17183_v24, %s10656_s10  ;;  %v5707_v16 = vsel %vm20617_vm7, %v5652_v34, %v17221_v42  ;;  %v5706_v20 = vsel %vm20623_vm12, %v5650_v7, %v5652_v34  ;;  %v20629_v7 = vld [vmem:[#allocation550_spill] sm:$0xff]  ;;  %v20635_v34 = vld [vmem:[#allocation485_spill] sm:$0xff]  ;;  %vm20652_vm7 = vmmov %vm20649_vm6  ;;  %vm20655_vm12 = vcmask 736256  }
 0x846   : > { %10014 = vmatprep.subr.mxu0 %v5707_v16  ;;  %v4249_v13 = vsel %vm4217_vm1, %v20629_v7, %v20628_v38  ;;  %v4248_v14 = vsel %vm4217_vm1, %v20516_v4, %v20629_v7  ;;  %v20636_v16 = vld [vmem:[#allocation482_spill] sm:$0xff] }
 0x847   : > { %10015 = vmatpush2.msra.mxu0 %v5706_v20  ;;  %v3665_v20 = vsel %vm3633_vm3, %v20636_v16, %v20635_v34 }
 0x848   : > { %7421 = vrot.lane.b32.xlu1 %v17207_v6, %s10655_s9 }
 0x849   : > { %7419 = vrot.lane.b32.xlu0 %v17210_v35, %s10655_s9  ;;  %v5066_v12 = vpop.permute.xlu1 %5065  ;;  %v5064_v9 = vpop.permute.xlu0 %5063 }
 0x84a   : > { %v5121_v57 = vsel %vm5093_vm11, %v5064_v9, %v5066_v12  ;;  %v5120_v15 = vsel %vm5093_vm11, %v16816_v28, %v5064_v9  ;;  %v20637_v9 = vld [vmem:[#allocation132_spill] sm:$0xff] }
 0x84b   : > { %9947 = vmatprep.subr.mxu1 %v5121_v57  ;;  %v20638_v57 = vld [vmem:[#allocation260_spill] sm:$0xff] }
 0x84c   : > { %6833 = vrot.lane.b32.xlu1 %v17178_v25, %s10657_s11  ;;  %9948 = vmatpush2.msra.mxu1 %v5120_v15  ;;  %v4543_v15 = vsel %vm4509_vm0, %v20638_v57, %v20637_v9  ;;  %v4542_v11 = vsel %vm4509_vm0, %v20626_v26, %v20638_v57  ;;  %v3080_v26 = vsel %vm20646_vm15, %v20540_v21, %v20642_v51 }
 0x84d   : > { %6831 = vrot.lane.b32.xlu0 %v17183_v24, %s10657_s11  ;;  %v17242_v55 = vpop.permute.xlu1 %5361  ;;  %9949 = vmatprep.subr.mxu1 %v4829_v52  ;;  %v20639_v52 = vld [vmem:[#allocation448_spill] sm:$0xff] }
 0x84e   : > { %v5360_v28 = vpop.permute.xlu0 %5359  ;;  %9950 = vmatpush2.msra.mxu1 %v4828_v32  ;;  %v20640_v32 = vld [vmem:[#allocation445_spill] sm:$0xff] }
 0x84f   : > { %v5415_v3 = vsel %vm5385_vm10, %v5360_v28, %v17242_v55  ;;  %10029 = vmatprep.subr.mxu1 %v4541_v8  ;;  %9952 = vmatmul.mubr.f32.vlgmr.msra.gmra.mxu1 %v16810_v22  ;;  %v5414_v43 = vsel %vm5385_vm10, %v5358_v36, %v5360_v28  ;;  %v3373_v28 = vsel %vm3341_vm4, %v20640_v32, %v20639_v52  ;;  %v20641_v8 = vld [vmem:[#allocation409_spill] sm:$0xff] }
 0x850   : > { %7129 = vrot.lane.b32.xlu1 %v17207_v6, %s10656_s10  ;;  %10016 = vmatprep.subr.mxu0 %v5415_v3  ;;  %v20644_v3 = vld [vmem:[#allocation555_spill] sm:$0xff] }
 0x851   : > { %7127 = vrot.lane.b32.xlu0 %v17210_v35, %s10656_s10  ;;  %10017 = vmatpush2.msra.mxu0 %v5414_v43  ;;  %v17261_v29 = vpop.permute.xlu1 %5069  ;;  %v20645_v43 = vld [vmem:[#allocation552_spill] sm:$0xff] }
 0x852   : > { %10030 = vmatpush1.msra.mxu1 %v4540_v2  ;;  %v5068_v30 = vpop.permute.xlu0 %5067  ;;  %10572 = vmatprep.mubr.msk.f32.mxu1 %vm20630_vm8, %v16752_v46  ;;  %v20632_v46 = vld [vmem:[#allocation519_spill] sm:$0xff]  ;;  %vm20658_vm8 = vmmov %vm20655_vm12 }
 0x853   : > { %10031 = vmatprep.subr.mxu1 %v4249_v13  ;;  %v5123_v49 = vsel %vm5093_vm11, %v5068_v30, %v17261_v29  ;;  %v5122_v27 = vsel %vm5093_vm11, %v5066_v12, %v5068_v30  ;;  %v3957_v33 = vsel %vm3925_vm2, %v20632_v46, %v20631_v53  ;;  %v3956_v4 = vsel %vm3925_vm2, %v20522_v39, %v20632_v46  ;;  %v20647_v13 = vld [vmem:[#allocation370_spill] sm:$0xff]  ;;  %v20651_v46 = vld [vmem:[#allocation521_spill] sm:$0xff] }
 0x854   : > { %6541 = vrot.lane.b32.xlu1 %v17178_v25, %s10658_s14  ;;  %10032 = vmatpush1.msra.mxu1 %v4248_v14  ;;  %v4830_v39 = vsel %vm4801_vm9, %v20624_v31, %v20634_v62  ;;  %v3664_v12 = vsel %vm3633_vm3, %v20528_v45, %v20636_v16  ;;  %v3372_v45 = vsel %vm3341_vm4, %v20534_v23, %v20640_v32  ;;  %v20648_v14 = vld [vmem:[#allocation367_spill] sm:$0xff]  ;;  %v20653_v62 = vld [vmem:[#allocation330_spill] sm:$0xff]  ;;  %v20660_v32 = vld [vmem:[#allocation285_spill] sm:$0xff] }
 0x855   : > { %6539 = vrot.lane.b32.xlu0 %v17183_v24, %s10658_s14  ;;  %10018 = vmatprep.subr.mxu0 %v5123_v49  ;;  %v17281_v56 = vpop.permute.xlu1 %7701  ;;  %v4251_v23 = vsel %vm4217_vm1, %v20645_v43, %v20644_v3  ;;  %v4250_v30 = vsel %vm4217_vm1, %v20628_v38, %v20645_v43  ;;  %v2789_v49 = vsel %vm20649_vm6, %v20648_v14, %v20647_v13  ;;  %vm20667_vm6 = vcmask 752640  }
 0x856   : > { %10033 = vmatprep.subr.mxu1 %v3957_v33  ;;  %10019 = vmatpush2.msra.mxu0 %v5122_v27  ;;  %v17286_v36 = vpop.permute.xlu0 %7699  ;;  %v20650_v27 = vld [vmem:[#allocation524_spill] sm:$0xff]  ;;  %v2788_v38 = vsel %vm20652_vm7, %v20548_v50, %v20648_v14  ;;  %v3958_v33 = vsel %vm3925_vm2, %v20631_v53, %v20651_v46  ;;  %v20668_v14 = vld [vmem:[#allocation411_spill] sm:$0xff]  ;;  %vm20670_vm7 = vcmask 482304  }
 0x857   : > { %10034 = vmatpush1.msra.mxu1 %v3956_v4  ;;  %10020 = vmatprep.subr.mxu0 %v4831_v44  ;;  %v3959_v21 = vsel %vm3925_vm2, %v20651_v46, %v20650_v27  ;;  %v20654_v44 = vld [vmem:[#allocation327_spill] sm:$0xff] }
 0x858   : > { %6837 = vrot.lane.b32.xlu1 %v17207_v6, %s10657_s11  ;;  %10035 = vmatprep.subr.mxu1 %v3665_v20  ;;  %v2497_v16 = vsel %vm20655_vm12, %v20654_v44, %v20653_v62  ;;  %v20656_v20 = vld [vmem:[#allocation487_spill] sm:$0xff]  ;;  %v2496_v50 = vsel %vm20658_vm8, %v20556_v58, %v20654_v44  ;;  %vm20671_vm12 = vmmov %vm20667_vm6 }
 0x859   : > { %6835 = vrot.lane.b32.xlu0 %v17210_v35, %s10657_s11  ;;  %10021 = vmatpush2.msra.mxu0 %v4830_v39  ;;  %v17307_v48 = vpop.permute.xlu1 %7409  ;;  %v20657_v39 = vld [vmem:[#allocation484_spill] sm:$0xff]  ;;  %vm20672_vm8 = vmmov %vm20670_vm7 }
 0x85a   : > { %10036 = vmatpush1.msra.mxu1 %v3664_v12  ;;  %10100 = vmatprep.subr.mxu0 %v4543_v15  ;;  %v17312_v31 = vpop.permute.xlu0 %7407  ;;  %v3667_v12 = vsel %vm3633_vm3, %v20657_v39, %v20656_v20  ;;  %v3666_v53 = vsel %vm3633_vm3, %v20635_v34, %v20657_v39  ;;  %v20659_v15 = vld [vmem:[#allocation288_spill] sm:$0xff] }
 0x85b   : > { %10037 = vmatprep.subr.mxu1 %v3373_v28  ;;  %10023 = vmatmul.mubr.f32.vlgmr.msra.gmra.mxu0 %v16810_v22  ;;  %v3081_v22 = vsel %vm20643_vm5, %v20642_v51, %v20641_v8  ;;  %vm20661_vm5 = vcmask 744448  }
 0x85c   : > { %6249 = vrot.lane.b32.xlu1 %v17178_v25, %s10659_s15  ;;  %10038 = vmatpush1.msra.mxu1 %v3372_v45  ;;  %v2205_v28 = vsel %vm20661_vm5, %v20660_v32, %v20659_v15  ;;  %v20662_v45 = vld [vmem:[#allocation450_spill] sm:$0xff]  ;;  %vm20664_vm15 = vmmov %vm20661_vm5  ;;  %vm20675_vm5 = vcmask 883712  }
 0x85d   : > { %6247 = vrot.lane.b32.xlu0 %v17183_v24, %s10659_s15  ;;  %10101 = vmatpush1.msra.mxu0 %v4542_v11  ;;  %v17331_v2 = vpop.permute.xlu1 %7705  ;;  %v20663_v11 = vld [vmem:[#allocation447_spill] sm:$0xff]  ;;  %v2204_v34 = vsel %vm20664_vm15, %v20564_v1, %v20660_v32  ;;  %vm20678_vm15 = vcmask 490496  }
 0x85e   : > { %10039 = vmatprep.subr.mxu1 %v3081_v22  ;;  %10102 = vmatprep.subr.mxu0 %v4251_v23  ;;  %v17339_v7 = vpop.permute.xlu0 %7703  ;;  %v3375_v58 = vsel %vm3341_vm4, %v20663_v11, %v20662_v45  ;;  %v3374_v22 = vsel %vm3341_vm4, %v20639_v52, %v20663_v11  ;;  %v20665_v23 = vld [vmem:[#allocation246_spill] sm:$0xff]  ;;  %v20682_v32 = vld [vmem:[#allocation159_spill] sm:$0xff]  ;;  %v20684_v11 = vld [vmem:[#allocation332_spill] sm:$0xff] }
 0x85f   : > { %10040 = vmatpush1.msra.mxu1 %v3080_v26  ;;  %10103 = vmatpush1.msra.mxu0 %v4250_v30  ;;  %v20666_v26 = vld [vmem:[#allocation243_spill] sm:$0xff] }
 0x860   : > { %6545 = vrot.lane.b32.xlu1 %v17207_v6, %s10658_s14  ;;  %10041 = vmatprep.subr.mxu1 %v2789_v49  ;;  %v1913_v30 = vsel %vm20667_vm6, %v20666_v26, %v20665_v23  ;;  %v20669_v49 = vld [vmem:[#allocation408_spill] sm:$0xff]  ;;  %v1912_v1 = vsel %vm20671_vm12, %v20572_v60, %v20666_v26  ;;  %v20677_v60 = vld [vmem:[#allocation369_spill] sm:$0xff]  ;;  %vm20679_vm6 = vmmov %vm20675_vm5  ;;  %vm20683_vm12 = vcmask 891904  }
 0x861   : > { %6543 = vrot.lane.b32.xlu0 %v17210_v35, %s10658_s14  ;;  %10104 = vmatprep.subr.mxu0 %v3959_v21  ;;  %v17357_v4 = vpop.permute.xlu1 %7117  ;;  %v3083_v46 = vsel %vm20670_vm7, %v20669_v49, %v20668_v14  ;;  %v3082_v52 = vsel %vm20672_vm8, %v20641_v8, %v20669_v49  ;;  %vm20680_vm7 = vmmov %vm20678_vm15  ;;  %vm20686_vm8 = vcmask 736256   ;;  %v20690_v49 = vld [vmem:[#allocation117_spill] sm:$0xff] }
 0x862   : > { %10042 = vmatpush1.msra.mxu1 %v2788_v38  ;;  %10105 = vmatpush1.msra.mxu0 %v3958_v33  ;;  %v17365_v57 = vpop.permute.xlu0 %7115  ;;  %v20673_v38 = vld [vmem:[#allocation204_spill] sm:$0xff]  ;;  %v20674_v33 = vld [vmem:[#allocation201_spill] sm:$0xff] }
 0x863   : > { %10043 = vmatprep.subr.mxu1 %v2497_v16  ;;  %10106 = vmatprep.subr.mxu0 %v3667_v12  ;;  %v1621_v44 = vsel %vm20675_vm5, %v20674_v33, %v20673_v38  ;;  %v20676_v16 = vld [vmem:[#allocation372_spill] sm:$0xff]  ;;  %v1620_v8 = vsel %vm20679_vm6, %v20580_v10, %v20674_v33  ;;  %vm20687_vm5 = vmmov %vm20683_vm12  ;;  %vm20691_vm6 = vcmask 900096  }
 0x864   : > { %10044 = vmatpush1.msra.mxu1 %v2496_v50  ;;  %10107 = vmatpush1.msra.mxu0 %v3666_v53  ;;  %v2791_v39 = vsel %vm20678_vm15, %v20677_v60, %v20676_v16  ;;  %v2790_v50 = vsel %vm20680_vm7, %v20647_v13, %v20677_v60  ;;  %v20681_v53 = vld [vmem:[#allocation162_spill] sm:$0xff]  ;;  %v1328_v10 = vsel %vm20687_vm5, %v20585_v5, %v20682_v32  ;;  %vm20688_vm15 = vmmov %vm20686_vm8  ;;  %vm20694_vm7 = vcmask 744448   ;;  %v20698_v60 = vld [vmem:[#allocation75_spill] sm:$0xff] }
 0x865   : > { %5957 = vrot.lane.b32.xlu1 %v17178_v25, %s10660_s16  ;;  %5955 = vrot.lane.b32.xlu0 %v17183_v24, %s10660_s16  ;;  %v17383_v51 = vpop.permute.xlu1 %7413  ;;  %vm20699_vm5 = vcmask 1031168  }
 0x866   : > { %10045 = vmatprep.subr.mxu1 %v2205_v28  ;;  %10108 = vmatprep.subr.mxu0 %v3375_v58  ;;  %v17391_v43 = vpop.permute.xlu0 %7411  ;;  %v1329_v28 = vsel %vm20683_vm12, %v20682_v32, %v20681_v53  ;;  %v20685_v58 = vld [vmem:[#allocation329_spill] sm:$0xff]  ;;  %vm20695_vm12 = vmmov %vm20691_vm6 }
 0x867   : > { %10046 = vmatpush1.msra.mxu1 %v2204_v34  ;;  %10109 = vmatpush1.msra.mxu0 %v3374_v22  ;;  %v2499_v34 = vsel %vm20686_vm8, %v20685_v58, %v20684_v11  ;;  %v2498_v13 = vsel %vm20688_vm15, %v20653_v62, %v20685_v58  ;;  %vm20696_vm8 = vmmov %vm20694_vm7  ;;  %vm20702_vm15 = vcmask 752640  }
 0x868   : > { %10047 = vmatprep.subr.mxu1 %v1913_v30  ;;  %10110 = vmatprep.subr.mxu0 %v3083_v46  ;;  %v20689_v30 = vld [vmem:[#allocation120_spill] sm:$0xff]  ;;  %v20692_v46 = vld [vmem:[#allocation290_spill] sm:$0xff] }
 0x869   : > { %10048 = vmatpush1.msra.mxu1 %v1912_v1  ;;  %10111 = vmatpush1.msra.mxu0 %v3082_v52  ;;  %v17405_v21 = vpop.permute.xlu1 %6825  ;;  %v1037_v5 = vsel %vm20691_vm6, %v20690_v49, %v20689_v30  ;;  %v20693_v1 = vld [vmem:[#allocation287_spill] sm:$0xff]  ;;  %v1036_v52 = vsel %vm20695_vm12, %v20589_v59, %v20690_v49  ;;  %vm20703_vm6 = vmmov %vm20699_vm5  ;;  %vm20707_vm12 = vcmask 1039360   ;;  %v20708_v49 = vld [vmem:[#allocation206_spill] sm:$0xff] }
 0x86a   : > { %6253 = vrot.lane.b32.xlu1 %v17207_v6, %s10659_s15  ;;  %6251 = vrot.lane.b32.xlu0 %v17210_v35, %s10659_s15  ;;  %v17417_v12 = vpop.permute.xlu0 %6823  ;;  %v2207_v62 = vsel %vm20694_vm7, %v20693_v1, %v20692_v46  ;;  %v2206_v33 = vsel %vm20696_vm8, %v20659_v15, %v20693_v1  ;;  %v744_v59 = vsel %vm20703_vm6, %v20593_v41, %v20698_v60  ;;  %vm20704_vm7 = vmmov %vm20702_vm15  ;;  %v20709_v41 = vld [vmem:[#allocation203_spill] sm:$0xff]  ;;  %vm20710_vm8 = vcmask 883712   ;;  %v202_v1 = vld [vmem:[%s10699_s17 + $0xf8] sm:$0xff] }
 0x86b   : > { %10049 = vmatprep.subr.mxu1 %v1621_v44  ;;  %10112 = vmatprep.subr.mxu0 %v2791_v39  ;;  %v20697_v44 = vld [vmem:[#allocation78_spill] sm:$0xff]  ;;  %vm20715_vm6 = vcmask 891904  }
 0x86c   : > { %10050 = vmatpush1.msra.mxu1 %v1620_v8  ;;  %10113 = vmatpush1.msra.mxu0 %v2790_v50  ;;  %v745_v39 = vsel %vm20699_vm5, %v20698_v60, %v20697_v44  ;;  %v20700_v8 = vld [vmem:[#allocation248_spill] sm:$0xff]  ;;  %v20701_v50 = vld [vmem:[#allocation245_spill] sm:$0xff]  ;;  %vm20711_vm5 = vmmov %vm20707_vm12 }
 0x86d   : > { %10051 = vmatprep.subr.mxu1 %v1329_v28  ;;  %10114 = vmatprep.subr.mxu0 %v2499_v34  ;;  %v17437_v22 = vpop.permute.xlu1 %7121  ;;  %v1915_v32 = vsel %vm20702_vm15, %v20701_v50, %v20700_v8  ;;  %v1914_v15 = vsel %vm20704_vm7, %v20665_v23, %v20701_v50  ;;  %v20705_v34 = vld [vmem:[#allocation36_spill] sm:$0xff]  ;;  %vm20712_vm15 = vmmov %vm20710_vm8 }
 0x86e   : > { %10052 = vmatpush1.msra.mxu1 %v1328_v10  ;;  %10115 = vmatpush1.msra.mxu0 %v2498_v13  ;;  %v17439_v26 = vpop.permute.xlu0 %7119  ;;  %v20706_v10 = vld [vmem:[#allocation33_spill] sm:$0xff]  ;;  %v20713_v60 = vld [vmem:[#allocation164_spill] sm:$0xff]  ;;  %vm20716_vm7 = vmmov %vm20715_vm6 }
 0x86f   : > { %5665 = vrot.lane.b32.xlu1 %v17178_v25, %s10661_s18  ;;  %5663 = vrot.lane.b32.xlu0 %v17183_v24, %s10661_s18  ;;  %v453_v13 = vsel %vm20707_vm12, %v20706_v10, %v20705_v34  ;;  %v452_v23 = vsel %vm20711_vm5, %v20598_v61, %v20706_v10  ;;  %vm20719_vm12 = vcmask 900096   ;;  %vm20723_vm5 = vcmask 1031168  }
 0x870   : > { %10053 = vmatprep.subr.mxu1 %v1037_v5  ;;  %10116 = vmatprep.subr.mxu0 %v2207_v62  ;;  %v1623_v5 = vsel %vm20710_vm8, %v20709_v41, %v20708_v49  ;;  %v1622_v62 = vsel %vm20712_vm15, %v20673_v38, %v20709_v41  ;;  %v7753_v38 = vsel %vm7721_vm14, %v17286_v36, %v17281_v56  ;;  %vm20720_vm8 = vmmov %vm20719_vm12 }
 0x871   : > { %10054 = vmatpush1.msra.mxu1 %v1036_v52  ;;  %10117 = vmatpush1.msra.mxu0 %v2206_v33  ;;  %v17463_v28 = vpop.permute.xlu1 %6533  ;;  %v201_v52 = vld [vmem:[%s10699_s17 + $0xf0] sm:$0xff]  ;;  %vm20724_vm15 = vmmov %vm20723_vm5 }
 0x872   : > { %10055 = vmatprep.subr.mxu1 %v745_v39  ;;  %10118 = vmatprep.subr.mxu0 %v1915_v32  ;;  %v17471_v58 = vpop.permute.xlu0 %6531  ;;  %v20714_v39 = vld [vmem:[#allocation161_spill] sm:$0xff] }
 0x873   : > { %10056 = vmatpush1.msra.mxu1 %v744_v59  ;;  %10119 = vmatpush1.msra.mxu0 %v1914_v15  ;;  %v1331_v50 = vsel %vm20715_vm6, %v20714_v39, %v20713_v60  ;;  %v1330_v61 = vsel %vm20716_vm7, %v20681_v53, %v20714_v39  ;;  %v20717_v59 = vld [vmem:[#allocation122_spill] sm:$0xff]  ;;  %v20718_v15 = vld [vmem:[#allocation119_spill] sm:$0xff]  ;;  %v7752_v53 = vsel %vm7721_vm14, %v16887_v40, %v17286_v36  ;;  %vm20725_vm6 = vcmask 687104  }
 0x874   : > { %5961 = vrot.lane.b32.xlu1 %v17207_v6, %s10660_s16  ;;  %5959 = vrot.lane.b32.xlu0 %v17210_v35, %s10660_s16  ;;  %v1039_v10 = vsel %vm20719_vm12, %v20718_v15, %v20717_v59  ;;  %v7460_v40 = vsel %vm7429_vm13, %v16939_v37, %v17312_v31  ;;  %v7169_v37 = vsel %vm20725_vm6, %v17365_v57, %v17357_v4  ;;  %vm20728_vm7 = vcmask 1039360   ;;  %vm20729_vm12 = vmmov %vm20725_vm6 }
 0x875   : > { %10057 = vmatprep.subr.mxu1 %v453_v13  ;;  %10120 = vmatprep.subr.mxu0 %v1623_v5  ;;  %v17491_v33 = vpop.permute.xlu1 %6829  ;;  %v7461_v5 = vsel %vm7429_vm13, %v17312_v31, %v17307_v48  ;;  %v20726_v31 = vld [vmem:[#allocation38_spill] sm:$0xff]  ;;  %vm20733_vm6 = vcmask 826368  }
 0x876   : > { %10058 = vmatpush1.msra.mxu1 %v452_v23  ;;  %10121 = vmatpush1.msra.mxu0 %v1622_v62  ;;  %v17496_v32 = vpop.permute.xlu0 %6827  ;;  %v20722_v23 = vld [vmem:[#allocation77_spill] sm:$0xff] }
 0x877   : > { %10059 = vmatprep.subr.mxu1 %v202_v1  ;;  %10122 = vmatprep.subr.mxu0 %v1331_v50  ;;  %v20721_v1 = vld [vmem:[#allocation80_spill] sm:$0xff]  ;;  %v746_v36 = vsel %vm20724_vm15, %v20697_v44, %v20722_v23  ;;  %v7168_v50 = vsel %vm20729_vm12, %v16994_v0, %v17365_v57  ;;  %vm20735_vm12 = vmmov %vm20733_vm6 }
 0x878   : > { %10060 = vmatpush1.msra.mxu1 %v201_v52  ;;  %10123 = vmatpush1.msra.mxu0 %v1330_v61  ;;  %v747_v62 = vsel %vm20723_vm5, %v20722_v23, %v20721_v1  ;;  %v20727_v52 = vld [vmem:[#allocation35_spill] sm:$0xff]  ;;  %vm20731_vm5 = vcmask 818176   ;;  %v7463_v23 = vsel %vm7429_vm13, %v17391_v43, %v17383_v51 }
 0x879   : > { %5373 = vrot.lane.b32.xlu1 %v17178_v25, %s10662_s21  ;;  %5371 = vrot.lane.b32.xlu0 %v17183_v24, %s10662_s21  ;;  %v17511_v13 = vpop.permute.xlu1 %6241  ;;  %v1038_v25 = vsel %vm20720_vm8, %v20689_v30, %v20718_v15  ;;  %v455_v44 = vsel %vm20728_vm7, %v20727_v52, %v20726_v31  ;;  %vm20730_vm8 = vmmov %vm20728_vm7  ;;  %v6877_v15 = vsel %vm20731_vm5, %v17417_v12, %v17405_v21  ;;  %vm20734_vm7 = vcmask 834560  }
 0x87a   : > { %10071 = vmatprep.subr.mxu1 %v7753_v38  ;;  %10124 = vmatprep.subr.mxu0 %v1039_v10  ;;  %v6240_v41 = vpop.permute.xlu0 %6239  ;;  %v454_v61 = vsel %vm20730_vm8, %v20705_v34, %v20727_v52  ;;  %v203_v38 = vld [vmem:[%s10699_s17 + $0x100] sm:$0xff]  ;;  %v4961_v10 = vld [vmem:[%s10699_s17 + $0x130] sm:$0xff]  ;;  %vm20732_vm15 = vmmov %vm20731_vm5  ;;  %vm20737_vm5 = vcmask 687104  }
 0x87b   : > { %10072 = vmatpush2.msra.mxu1 %v7752_v53  ;;  %10125 = vmatpush1.msra.mxu0 %v1038_v25  ;;  %v17555_v53 = vld [vmem:[%s10699_s17 + $0x128] sm:$0xff]  ;;  %v6876_v0 = vsel %vm20732_vm15, %v17048_v17, %v17417_v12  ;;  %v6585_v25 = vsel %vm20733_vm6, %v17471_v58, %v17463_v28  ;;  %v6293_v17 = vsel %vm20734_vm7, %v6240_v41, %v17511_v13  ;;  %vm20736_vm8 = vmmov %vm20734_vm7  ;;  %vm20738_vm15 = vcmask 965632  }
 0x87c   : > { %10073 = vmatprep.subr.mxu1 %v7461_v5  ;;  %10126 = vmatprep.subr.mxu0 %v747_v62  ;;  %v6584_v12 = vsel %vm20735_vm12, %v17088_v63, %v17471_v58  ;;  %v7754_v5 = vsel %vm7721_vm14, %v17281_v56, %v17339_v7  ;;  %v7462_v63 = vsel %vm7429_vm13, %v17307_v48, %v17391_v43  ;;  %vm20739_vm6 = vmmov %vm20737_vm5  ;;  %vm20740_vm7 = vcmask 818176   ;;  %v4962_v48 = vld [vmem:[%s10699_s17 + $0x138] sm:$0xff] }
 0x87d   : > { %10074 = vmatpush2.msra.mxu1 %v7460_v40  ;;  %10127 = vmatpush1.msra.mxu0 %v746_v36  ;;  %v17531_v30 = vpop.permute.xlu1 %6537  ;;  %v6292_v40 = vsel %vm20736_vm8, %v17152_v47, %v6240_v41  ;;  %v7171_v56 = vsel %vm20737_vm5, %v17439_v26, %v17437_v22  ;;  %v7170_v47 = vsel %vm20739_vm6, %v17357_v4, %v17439_v26  ;;  %vm20741_vm8 = vmmov %vm20740_vm7  ;;  %vm20743_vm6 = vcmask 834560  }
 0x87e   : > { %5669 = vrot.lane.b32.xlu1 %v17207_v6, %s10661_s18  ;;  %5667 = vrot.lane.b32.xlu0 %v17210_v35, %s10661_s18  ;;  %v6536_v39 = vpop.permute.xlu0 %6535  ;;  %vm20742_vm5 = vmmov %vm20735_vm12 }
 0x87f   : > { %10075 = vmatprep.subr.mxu1 %v7169_v37  ;;  %10128 = vmatprep.subr.mxu0 %v455_v44  ;;  %v6587_v43 = vsel %vm20735_vm12, %v6536_v39, %v17531_v30  ;;  %v6586_v41 = vsel %vm20742_vm5, %v17463_v28, %v6536_v39  ;;  %v17619_v28 = vld [vmem:[%s10699_s17 + $0x168] sm:$0xff]  ;;  %vm20745_vm12 = vmmov %vm20743_vm6 }
 0x880   : > { %10076 = vmatpush2.msra.mxu1 %v7168_v50  ;;  %10129 = vmatpush1.msra.mxu0 %v454_v61  ;;  %vm20747_vm5 = vmmov %vm20738_vm15 }
 0x881   : > { %10077 = vmatprep.subr.mxu1 %v6877_v15  ;;  %10130 = vmatprep.subr.mxu0 %v17112_v54  ;;  %v5950_v57 = vpop.permute.xlu1 %5949  ;;  %v7755_v54 = vsel %vm7721_vm14, %v17339_v7, %v17331_v2 }
 0x882   : > { %10078 = vmatpush2.msra.mxu1 %v6876_v0  ;;  %10131 = vmatpush1.msra.mxu0 %v203_v38  ;;  %v5948_v34 = vpop.permute.xlu0 %5947  ;;  %v17649_v38 = vld [vmem:[%s10699_s17 + $0x170] sm:$0xff] }
 0x883   : > { %5081 = vrot.lane.b32.xlu1 %v4961_v10, %s10653_s7  ;;  %5079 = vrot.lane.b32.xlu0 %v17555_v53, %s10653_s7  ;;  %v6001_v7 = vsel %vm20738_vm15, %v5948_v34, %v5950_v57  ;;  %v6000_v4 = vsel %vm20738_vm15, %v17192_v19, %v5948_v34  ;;  %vm20748_vm15 = vmmov %vm20747_vm5 }
 0x884   : > { %10079 = vmatprep.subr.mxu1 %v6585_v25  ;;  %10142 = vmatprep.subr.mxu0 %v7755_v54 }
 0x885   : > { %10080 = vmatpush2.msra.mxu1 %v6584_v12  ;;  %10143 = vmatpush2.msra.mxu0 %v7754_v5  ;;  %v17581_v62 = vpop.permute.xlu1 %6245  ;;  %v20751_v5 = vld [vmem:[#allocation572_spill] sm:$0xff] }
 0x886   : > { %10144 = vmatprep.subr.mxu0 %v7463_v23  ;;  %10081 = vmatprep.subr.mxu1 %v6293_v17  ;;  %v6244_v58 = vpop.permute.xlu0 %6243  ;;  %v20752_v23 = vld [vmem:[#allocation569_spill] sm:$0xff] }
 0x887   : > { %10145 = vmatpush2.msra.mxu0 %v7462_v63  ;;  %5377 = vrot.lane.b32.xlu1 %v17207_v6, %s10662_s21  ;;  %v6879_v6 = vsel %vm20740_vm7, %v17496_v32, %v17491_v33  ;;  %v6295_v37 = vsel %vm20743_vm6, %v6244_v58, %v17581_v62  ;;  %vm20744_vm7 = vcmask 973824   ;;  %v6294_v19 = vsel %vm20745_vm12, %v17511_v13, %v6244_v58 }
 0x888   : > { %5375 = vrot.lane.b32.xlu0 %v17210_v35, %s10662_s21  ;;  %10146 = vmatprep.subr.mxu0 %v7171_v56  ;;  %v6878_v35 = vsel %vm20741_vm8, %v17405_v21, %v17496_v32  ;;  %v17624_v32 = vld [vmem:[%s10699_s17 + $0x160] sm:$0xff]  ;;  %vm20746_vm8 = vmmov %vm20744_vm7  ;;  %vm20749_vm6 = vcmask 719872   ;;  %v4832_v58 = vsel %vm4801_vm9, %v20633_v18, %v20752_v23  ;;  %v20753_v56 = vld [vmem:[#allocation218_spill] sm:$0xff] }
 0x889   : > { %10082 = vmatpush2.msra.mxu1 %v6292_v40  ;;  %10147 = vmatpush2.msra.mxu0 %v7170_v47  ;;  %vm20750_vm12 = vmmov %vm20744_vm7  ;;  %v4833_v40 = vsel %vm4801_vm9, %v20752_v23, %v20751_v5  ;;  %v17695_v18 = vld [vmem:[%s18500_s1] sm:$0xff]  ;;  %v20766_v23 = vld [vmem:[#allocation129_spill] sm:$0xff] }
 0x88a   : > { %10148 = vmatprep.subr.mxu0 %v6879_v6  ;;  %10083 = vmatprep.subr.mxu1 %v6001_v7  ;;  %v5658_v26 = vpop.permute.xlu1 %5657  ;;  %v5656_v36 = vpop.permute.xlu0 %5655  ;;  %v20754_v7 = vld [vmem:[#allocation172_spill] sm:$0xff] }
 0x88b   : > { %10149 = vmatpush2.msra.mxu0 %v6878_v35  ;;  %5085 = vrot.lane.b32.xlu1 %v17183_v24, %s10653_s7  ;;  %v5709_v21 = vsel %vm20744_vm7, %v5656_v36, %v5658_v26  ;;  %v5708_v24 = vsel %vm20746_vm8, %v17221_v42, %v5656_v36  ;;  %v17640_v42 = vld [vmem:[%s18500_s1 + $0x8] sm:$0xff]  ;;  %v4545_v47 = vsel %vm4509_vm0, %v20754_v7, %v20753_v56  ;;  %vm20769_vm8 = vcmask 482304  }
 0x88c   : > { %5083 = vrot.lane.b32.xlu0 %v4962_v48, %s10653_s7  ;;  %10150 = vmatprep.subr.mxu0 %v6587_v43  ;;  %v4544_v43 = vsel %vm4509_vm0, %v20637_v9, %v20754_v7  ;;  %v20767_v7 = vld [vmem:[#allocation413_spill] sm:$0xff] }
 0x88d   : > { %10151 = vmatpush2.msra.mxu0 %v6586_v41  ;;  %10084 = vmatpush2.msra.mxu1 %v6000_v4  ;;  %v20755_v41 = vld [vmem:[#allocation557_spill] sm:$0xff]  ;;  %v20756_v4 = vld [vmem:[#allocation554_spill] sm:$0xff] }
 0x88e   : > { %10152 = vmatprep.subr.mxu0 %v6295_v37  ;;  %10085 = vmatprep.subr.mxu1 %v5709_v21  ;;  %v4252_v37 = vsel %vm4217_vm1, %v20644_v3, %v20756_v4 }
 0x88f   : > { %7717 = vrot.lane.b32.xlu1 %v17619_v28, %s10654_s8  ;;  %10153 = vmatpush2.msra.mxu0 %v6294_v19  ;;  %v17630_v52 = vpop.permute.xlu1 %5953  ;;  %v5952_v44 = vpop.permute.xlu0 %5951  ;;  %v20757_v19 = vld [vmem:[#allocation526_spill] sm:$0xff] }
 0x890   : > { %7715 = vrot.lane.b32.xlu0 %v17624_v32, %s10654_s8  ;;  %10086 = vmatpush2.msra.mxu1 %v5708_v24  ;;  %v6002_v13 = vsel %vm20747_vm5, %v5950_v57, %v5952_v44  ;;  %v6003_v39 = vsel %vm20748_vm15, %v5952_v44, %v17630_v52  ;;  %v20758_v24 = vld [vmem:[#allocation523_spill] sm:$0xff]  ;;  %vm20772_vm5 = vmmov %vm20769_vm8  ;;  %vm20775_vm15 = vcmask 490496  }
 0x891   : > { %10154 = vmatprep.subr.mxu0 %v6003_v39  ;;  %10573 = vmatprep.mubr.msk.f32.mxu0 %vm20749_vm6, %v17640_v42  ;;  %v3961_v44 = vsel %vm3925_vm2, %v20758_v24, %v20757_v19  ;;  %v20759_v39 = vld [vmem:[#allocation574_spill] sm:$0xff]  ;;  %vm20778_vm6 = vmmov %vm20775_vm15 }
 0x892   : > { %10155 = vmatpush2.msra.mxu0 %v6002_v13  ;;  %v3960_v13 = vsel %vm3925_vm2, %v20650_v27, %v20758_v24  ;;  %v20777_v24 = vld [vmem:[#allocation525_spill] sm:$0xff] }
 0x893   : > { %7425 = vrot.lane.b32.xlu1 %v17619_v28, %s10655_s9 }
 0x894   : > { %7423 = vrot.lane.b32.xlu0 %v17624_v32, %s10655_s9  ;;  %v5366_v50 = vpop.permute.xlu1 %5365  ;;  %v5364_v61 = vpop.permute.xlu0 %5363 }
 0x895   : > { %v5416_v15 = vsel %vm5385_vm10, %v17242_v55, %v5364_v61  ;;  %v5417_v10 = vsel %vm5385_vm10, %v5364_v61, %v5366_v50 }
 0x896   : > { %10087 = vmatprep.subr.mxu1 %v5417_v10  ;;  %v20761_v10 = vld [vmem:[#allocation489_spill] sm:$0xff] }
 0x897   : > { %7131 = vrot.lane.b32.xlu1 %v17624_v32, %s10656_s10  ;;  %10088 = vmatpush2.msra.mxu1 %v5416_v15 }
 0x898   : > { %7719 = vrot.lane.b32.xlu0 %v17649_v38, %s10654_s8 }
 0x899   : > { %v17658_v0 = vpop.permute.xlu1 %5661  ;;  %v5660_v57 = vpop.permute.xlu0 %5659 }
 0x89a   : > { %v5710_v34 = vsel %vm20744_vm7, %v5658_v26, %v5660_v57  ;;  %v5711_v25 = vsel %vm20750_vm12, %v5660_v57, %v17658_v0  ;;  %v4253_v26 = vsel %vm4217_vm1, %v20756_v4, %v20755_v41  ;;  %v20762_v57 = vld [vmem:[#allocation486_spill] sm:$0xff]  ;;  %vm20781_vm7 = vcmask 736256  }
 0x89b   : > { %7427 = vrot.lane.b32.xlu1 %v17649_v38, %s10655_s9  ;;  %10156 = vmatprep.subr.mxu0 %v5711_v25  ;;  %v3668_v25 = vsel %vm3633_vm3, %v20656_v20, %v20762_v57  ;;  %vm20784_vm12 = vmmov %vm20781_vm7 }
 0x89c   : > { %7133 = vrot.lane.b32.xlu0 %v17619_v28, %s10656_s10  ;;  %10157 = vmatpush2.msra.mxu0 %v5710_v34  ;;  %v3669_v34 = vsel %vm3633_vm3, %v20762_v57, %v20761_v10 }
 0x89e   : > { %v5074_v55 = vpop.permute.xlu1 %5073  ;;  %v5072_v54 = vpop.permute.xlu0 %5071 }
 0x89f   : > { %6841 = vrot.lane.b32.xlu1 %v17619_v28, %s10657_s11  ;;  %v5124_v17 = vsel %vm5093_vm11, %v17261_v29, %v5072_v54  ;;  %v5125_v12 = vsel %vm5093_vm11, %v5072_v54, %v5074_v55  ;;  %v20764_v54 = vld [vmem:[#allocation449_spill] sm:$0xff] }
 0x8a0   : > { %6839 = vrot.lane.b32.xlu0 %v17624_v32, %s10657_s11  ;;  %10089 = vmatprep.subr.mxu1 %v5125_v12  ;;  %v20765_v12 = vld [vmem:[#allocation130_spill] sm:$0xff]  ;;  %v3376_v20 = vsel %vm3341_vm4, %v20662_v45, %v20764_v54 }
 0x8a1   : > { %10090 = vmatpush2.msra.mxu1 %v5124_v17 }
 0x8a2   : > { %v17677_v63 = vpop.permute.xlu1 %5369  ;;  %10091 = vmatprep.subr.mxu1 %v4833_v40  ;;  %v4547_v40 = vsel %vm4509_vm0, %v20766_v23, %v20765_v12 }
 0x8a3   : > { %6547 = vrot.lane.b32.xlu1 %v17624_v32, %s10658_s14  ;;  %v5368_v29 = vpop.permute.xlu0 %5367  ;;  %10092 = vmatpush2.msra.mxu1 %v4832_v58 }
 0x8a4   : > { %7135 = vrot.lane.b32.xlu0 %v17649_v38, %s10656_s10  ;;  %v5418_v6 = vsel %vm5385_vm10, %v5366_v50, %v5368_v29  ;;  %v5419_v48 = vsel %vm5385_vm10, %v5368_v29, %v17677_v63  ;;  %10171 = vmatprep.subr.mxu1 %v4545_v47  ;;  %v20760_v50 = vld [vmem:[#allocation571_spill] sm:$0xff]  ;;  %v4546_v29 = vsel %vm4509_vm0, %v20753_v56, %v20766_v23  ;;  %v20768_v47 = vld [vmem:[#allocation410_spill] sm:$0xff]  ;;  %v20785_v23 = vld [vmem:[#allocation292_spill] sm:$0xff] }
 0x8a5   : > { %10158 = vmatprep.subr.mxu0 %v5419_v48  ;;  %10094 = vmatmul.mubr.f32.vlgmr.msra.gmra.mxu1 %v17695_v18  ;;  %v4835_v61 = vsel %vm4801_vm9, %v20760_v50, %v20759_v39  ;;  %v4834_v27 = vsel %vm4801_vm9, %v20751_v5, %v20760_v50  ;;  %v20770_v48 = vld [vmem:[#allocation559_spill] sm:$0xff]  ;;  %v3084_v4 = vsel %vm20772_vm5, %v20668_v14, %v20768_v47  ;;  %v20776_v14 = vld [vmem:[#allocation528_spill] sm:$0xff]  ;;  %v20779_v50 = vld [vmem:[#allocation334_spill] sm:$0xff] }
 0x8a6   : > { %10159 = vmatpush2.msra.mxu0 %v5418_v6  ;;  %10172 = vmatpush1.msra.mxu1 %v4544_v43  ;;  %v17701_v35 = vpop.permute.xlu1 %5077  ;;  %v3085_v6 = vsel %vm20769_vm8, %v20768_v47, %v20767_v7  ;;  %v20771_v43 = vld [vmem:[#allocation556_spill] sm:$0xff]  ;;  %vm20787_vm8 = vcmask 744448   ;;  %v20789_v47 = vld [vmem:[#allocation451_spill] sm:$0xff] }
 0x8a7   : > { %6843 = vrot.lane.b32.xlu1 %v17649_v38, %s10657_s11  ;;  %v5076_v36 = vpop.permute.xlu0 %5075  ;;  %10173 = vmatprep.subr.mxu1 %v4253_v26  ;;  %v4255_v45 = vsel %vm4217_vm1, %v20771_v43, %v20770_v48  ;;  %v4254_v56 = vsel %vm4217_vm1, %v20755_v41, %v20771_v43  ;;  %v3963_v41 = vsel %vm3925_vm2, %v20777_v24, %v20776_v14  ;;  %vm20790_vm5 = vmmov %vm20787_vm8 }
 0x8a8   : > { %6549 = vrot.lane.b32.xlu0 %v17619_v28, %s10658_s14  ;;  %v5126_v9 = vsel %vm5093_vm11, %v5074_v55, %v5076_v36  ;;  %10174 = vmatpush1.msra.mxu1 %v4252_v37  ;;  %v5127_v21 = vsel %vm5093_vm11, %v5076_v36, %v17701_v35  ;;  %v20763_v55 = vld [vmem:[#allocation452_spill] sm:$0xff]  ;;  %v20773_v36 = vld [vmem:[#allocation374_spill] sm:$0xff]  ;;  %v20774_v37 = vld [vmem:[#allocation371_spill] sm:$0xff] }
 0x8a9   : > { %10160 = vmatprep.subr.mxu0 %v5127_v21  ;;  %10175 = vmatprep.subr.mxu1 %v3961_v44  ;;  %v3377_v17 = vsel %vm3341_vm4, %v20764_v54, %v20763_v55  ;;  %v2792_v44 = vsel %vm20778_vm6, %v20676_v16, %v20774_v37  ;;  %vm20796_vm6 = vcmask 482304  }
 0x8aa   : > { %10161 = vmatpush2.msra.mxu0 %v5126_v9  ;;  %10176 = vmatpush1.msra.mxu1 %v3960_v13  ;;  %v17722_v3 = vpop.permute.xlu1 %7709  ;;  %v2793_v9 = vsel %vm20775_vm15, %v20774_v37, %v20773_v36  ;;  %v3962_v13 = vsel %vm3925_vm2, %v20757_v19, %v20777_v24  ;;  %vm20793_vm15 = vcmask 752640  }
 0x8ab   : > { %6257 = vrot.lane.b32.xlu1 %v17619_v28, %s10659_s15  ;;  %v17729_v15 = vpop.permute.xlu0 %7707  ;;  %10162 = vmatprep.subr.mxu0 %v4835_v61  ;;  %v20780_v61 = vld [vmem:[#allocation331_spill] sm:$0xff] }
 0x8ac   : > { %6255 = vrot.lane.b32.xlu0 %v17624_v32, %s10659_s15  ;;  %10177 = vmatprep.subr.mxu1 %v3669_v34  ;;  %v2501_v57 = vsel %vm20781_vm7, %v20780_v61, %v20779_v50  ;;  %v20782_v34 = vld [vmem:[#allocation491_spill] sm:$0xff]  ;;  %v2500_v16 = vsel %vm20784_vm12, %v20684_v11, %v20780_v61  ;;  %vm20797_vm7 = vmmov %vm20793_vm15  ;;  %v20802_v61 = vld [vmem:[#allocation376_spill] sm:$0xff] }
 0x8ad   : > { %10163 = vmatpush2.msra.mxu0 %v4834_v27  ;;  %10178 = vmatpush1.msra.mxu1 %v3668_v25  ;;  %v20783_v27 = vld [vmem:[#allocation488_spill] sm:$0xff]  ;;  %vm20798_vm12 = vmmov %vm20796_vm6 }
 0x8ae   : > { %10179 = vmatprep.subr.mxu1 %v3377_v17  ;;  %10242 = vmatprep.subr.mxu0 %v4547_v40  ;;  %v17748_v58 = vpop.permute.xlu1 %7417  ;;  %v3671_v25 = vsel %vm3633_vm3, %v20783_v27, %v20782_v34  ;;  %v3670_v17 = vsel %vm3633_vm3, %v20761_v10, %v20783_v27  ;;  %v20786_v40 = vld [vmem:[#allocation289_spill] sm:$0xff]  ;;  %v3378_v10 = vsel %vm3341_vm4, %v20763_v55, %v20789_v47 }
 0x8af   : > { %5963 = vrot.lane.b32.xlu1 %v17624_v32, %s10660_s16  ;;  %10165 = vmatmul.mubr.f32.vlgmr.msra.gmra.mxu0 %v17695_v18  ;;  %v17756_v5 = vpop.permute.xlu0 %7415 }
 0x8b0   : > { %6551 = vrot.lane.b32.xlu0 %v17649_v38, %s10658_s14  ;;  %10180 = vmatpush1.msra.mxu1 %v3376_v20  ;;  %v2209_v20 = vsel %vm20787_vm8, %v20786_v40, %v20785_v23  ;;  %vm20801_vm8 = vcmask 883712  }
 0x8b1   : > { %10243 = vmatpush1.msra.mxu0 %v4546_v29  ;;  %10181 = vmatprep.subr.mxu1 %v3085_v6  ;;  %v20788_v29 = vld [vmem:[#allocation454_spill] sm:$0xff]  ;;  %v2208_v6 = vsel %vm20790_vm5, %v20692_v46, %v20786_v40  ;;  %v20794_v46 = vld [vmem:[#allocation415_spill] sm:$0xff]  ;;  %vm20804_vm5 = vcmask 490496  }
 0x8b2   : > { %10244 = vmatprep.subr.mxu0 %v4255_v45  ;;  %10182 = vmatpush1.msra.mxu1 %v3084_v4  ;;  %v17775_v26 = vpop.permute.xlu1 %7713  ;;  %v3379_v11 = vsel %vm3341_vm4, %v20789_v47, %v20788_v29  ;;  %v20791_v45 = vld [vmem:[#allocation250_spill] sm:$0xff]  ;;  %v20792_v4 = vld [vmem:[#allocation247_spill] sm:$0xff]  ;;  %v4965_v47 = vld [vmem:[%s10699_s17 + $0x150] sm:$0xff] }
 0x8b3   : > { %6259 = vrot.lane.b32.xlu1 %v17649_v38, %s10659_s15  ;;  %10245 = vmatpush1.msra.mxu0 %v4254_v56  ;;  %v17782_v21 = vpop.permute.xlu0 %7711  ;;  %v1917_v56 = vsel %vm20793_vm15, %v20792_v4, %v20791_v45  ;;  %v1916_v24 = vsel %vm20797_vm7, %v20700_v8, %v20792_v4  ;;  %vm20805_vm15 = vmmov %vm20801_vm8  ;;  %v20808_v40 = vld [vmem:[#allocation163_spill] sm:$0xff]  ;;  %vm20809_vm7 = vcmask 891904  }
 0x8b4   : > { %5965 = vrot.lane.b32.xlu0 %v17619_v28, %s10660_s16  ;;  %10183 = vmatprep.subr.mxu1 %v2793_v9  ;;  %v20795_v9 = vld [vmem:[#allocation412_spill] sm:$0xff] }
 0x8b5   : > { %10246 = vmatprep.subr.mxu0 %v3963_v41  ;;  %10184 = vmatpush1.msra.mxu1 %v2792_v44  ;;  %v3087_v55 = vsel %vm20796_vm6, %v20795_v9, %v20794_v46  ;;  %v20799_v41 = vld [vmem:[#allocation208_spill] sm:$0xff]  ;;  %v20800_v44 = vld [vmem:[#allocation205_spill] sm:$0xff]  ;;  %vm20806_vm6 = vmmov %vm20804_vm5 }
 0x8b6   : > { %10247 = vmatpush1.msra.mxu0 %v3962_v13  ;;  %10185 = vmatprep.subr.mxu1 %v2501_v57  ;;  %v17801_v54 = vpop.permute.xlu1 %7125  ;;  %v1625_v13 = vsel %vm20801_vm8, %v20800_v44, %v20799_v41  ;;  %v20803_v57 = vld [vmem:[#allocation373_spill] sm:$0xff]  ;;  %v1624_v8 = vsel %vm20805_vm15, %v20708_v49, %v20800_v44  ;;  %vm20813_vm8 = vmmov %vm20809_vm7  ;;  %vm20817_vm15 = vcmask 900096  }
 0x8b7   : > { %5673 = vrot.lane.b32.xlu1 %v17619_v28, %s10661_s18  ;;  %10248 = vmatprep.subr.mxu0 %v3671_v25  ;;  %v17808_v19 = vpop.permute.xlu0 %7123  ;;  %v2795_v27 = vsel %vm20804_vm5, %v20803_v57, %v20802_v61 }
 0x8b8   : > { %5671 = vrot.lane.b32.xlu0 %v17624_v32, %s10661_s18  ;;  %10186 = vmatpush1.msra.mxu1 %v2500_v16  ;;  %v2794_v16 = vsel %vm20806_vm6, %v20773_v36, %v20803_v57  ;;  %vm20820_vm6 = vcmask 744448   ;;  %v20823_v57 = vld [vmem:[#allocation82_spill] sm:$0xff] }
 0x8b9   : > { %10249 = vmatpush1.msra.mxu0 %v3670_v17  ;;  %10187 = vmatprep.subr.mxu1 %v2209_v20  ;;  %v20807_v17 = vld [vmem:[#allocation166_spill] sm:$0xff] }
 0x8ba   : > { %10250 = vmatprep.subr.mxu0 %v3379_v11  ;;  %10188 = vmatpush1.msra.mxu1 %v2208_v6  ;;  %v17827_v43 = vpop.permute.xlu1 %7421  ;;  %v1333_v20 = vsel %vm20809_vm7, %v20808_v40, %v20807_v17  ;;  %v20810_v11 = vld [vmem:[#allocation336_spill] sm:$0xff]  ;;  %v20811_v6 = vld [vmem:[#allocation333_spill] sm:$0xff]  ;;  %vm20821_vm7 = vmmov %vm20817_vm15 }
 0x8bb   : > { %5379 = vrot.lane.b32.xlu1 %v17624_v32, %s10662_s21  ;;  %10251 = vmatpush1.msra.mxu0 %v3378_v10  ;;  %v17834_v37 = vpop.permute.xlu0 %7419  ;;  %v3086_v32 = vsel %vm20798_vm12, %v20767_v7, %v20795_v9  ;;  %vm20812_vm12 = vcmask 736256   ;;  %v4964_v10 = vld [vmem:[%s10699_s17 + $0x148] sm:$0xff]  ;;  %v20816_v9 = vld [vmem:[#allocation121_spill] sm:$0xff] }
 0x8bc   : > { %5967 = vrot.lane.b32.xlu0 %v17649_v38, %s10660_s16  ;;  %10189 = vmatprep.subr.mxu1 %v1917_v56  ;;  %v2503_v49 = vsel %vm20812_vm12, %v20811_v6, %v20810_v11  ;;  %vm20814_vm5 = vmmov %vm20812_vm12  ;;  %v20815_v56 = vld [vmem:[#allocation124_spill] sm:$0xff]  ;;  %s10581_s16 = smul.u32 328, %s20981_s13 }
 0x8bd   : > { %10252 = vmatprep.subr.mxu0 %v3087_v55  ;;  %10190 = vmatpush1.msra.mxu1 %v1916_v24  ;;  %v2502_v36 = vsel %vm20814_vm5, %v20779_v50, %v20811_v6  ;;  %v1041_v55 = vsel %vm20817_vm15, %v20816_v9, %v20815_v56  ;;  %v1040_v50 = vsel %vm20821_vm7, %v20717_v59, %v20816_v9  ;;  %vm20822_vm12 = vmmov %vm20820_vm6  ;;  %vm20828_vm5 = vcmask 752640   ;;  %v206_v9 = vld [vmem:[%s10699_s17 + $0x118] sm:$0xff] }
 0x8be   : > { %10253 = vmatpush1.msra.mxu0 %v3086_v32  ;;  %10191 = vmatprep.subr.mxu1 %v1625_v13  ;;  %v17853_v25 = vpop.permute.xlu1 %6833  ;;  %v20819_v32 = vld [vmem:[#allocation291_spill] sm:$0xff]  ;;  %vm20833_vm7 = vcmask 1039360   ;;  %s18397_s24 = scalar_lea.vmem %s18502_s3, %s10581_s16 }
 0x8bf   : > { %5675 = vrot.lane.b32.xlu1 %v17649_v38, %s10661_s18  ;;  %10254 = vmatprep.subr.mxu0 %v2795_v27  ;;  %v17860_v7 = vpop.permute.xlu0 %6831  ;;  %v2210_v13 = vsel %vm20822_vm12, %v20785_v23, %v20819_v32  ;;  %v20824_v27 = vld [vmem:[#allocation79_spill] sm:$0xff]  ;;  %vm20836_vm12 = vcmask 883712  }
 0x8c0   : > { %5381 = vrot.lane.b32.xlu0 %v17619_v28, %s10662_s21  ;;  %10192 = vmatpush1.msra.mxu1 %v1624_v8  ;;  %v1332_v28 = vsel %vm20813_vm8, %v20713_v60, %v20808_v40  ;;  %v20818_v60 = vld [vmem:[#allocation294_spill] sm:$0xff]  ;;  %vm20825_vm8 = vcmask 1031168   ;;  %v20826_v40 = vld [vmem:[#allocation252_spill] sm:$0xff] }
 0x8c1   : > { %10255 = vmatpush1.msra.mxu0 %v2794_v16  ;;  %10193 = vmatprep.subr.mxu1 %v1333_v20  ;;  %v2211_v44 = vsel %vm20820_vm6, %v20819_v32, %v20818_v60  ;;  %v749_v8 = vsel %vm20825_vm8, %v20824_v27, %v20823_v57  ;;  %v4966_v16 = vld [vmem:[%s10699_s17 + $0x158] sm:$0xff]  ;;  %v20827_v20 = vld [vmem:[#allocation249_spill] sm:$0xff]  ;;  %vm20829_vm15 = vmmov %vm20825_vm8 }
 0x8c2   : > { %10256 = vmatprep.subr.mxu0 %v2503_v49  ;;  %10194 = vmatpush1.msra.mxu1 %v1332_v28  ;;  %v17881_v4 = vpop.permute.xlu1 %7129  ;;  %v748_v59 = vsel %vm20829_vm15, %v20721_v1, %v20824_v27  ;;  %vm20830_vm6 = vmmov %vm20828_vm5  ;;  %v20831_v28 = vld [vmem:[#allocation40_spill] sm:$0xff]  ;;  %v20834_v1 = vld [vmem:[#allocation210_spill] sm:$0xff]  ;;  %vm20841_vm15 = vcmask 891904  }
 0x8c3   : > { %10257 = vmatpush1.msra.mxu0 %v2502_v36  ;;  %5089 = vrot.lane.b32.xlu1 %v4965_v47, %s10653_s7  ;;  %v17887_v24 = vpop.permute.xlu0 %7127  ;;  %v1919_v47 = vsel %vm20828_vm5, %v20827_v20, %v20826_v40  ;;  %v1918_v23 = vsel %vm20830_vm6, %v20791_v45, %v20827_v20  ;;  %vm20837_vm8 = vmmov %vm20833_vm7  ;;  %v20839_v27 = vld [vmem:[#allocation168_spill] sm:$0xff]  ;;  %v7757_v20 = vsel %vm7721_vm14, %v17729_v15, %v17722_v3 }
 0x8c4   : > { %5087 = vrot.lane.b32.xlu0 %v4964_v10, %s10653_s7  ;;  %10195 = vmatprep.subr.mxu1 %v1041_v55  ;;  %v20832_v10 = vld [vmem:[#allocation37_spill] sm:$0xff]  ;;  %v20835_v55 = vld [vmem:[#allocation207_spill] sm:$0xff]  ;;  %vm20838_vm5 = vmmov %vm20836_vm12 }
 0x8c5   : > { %10258 = vmatprep.subr.mxu0 %v2211_v44  ;;  %10196 = vmatpush1.msra.mxu1 %v1040_v50  ;;  %v457_v36 = vsel %vm20833_vm7, %v20832_v10, %v20831_v28  ;;  %v1627_v32 = vsel %vm20836_vm12, %v20835_v55, %v20834_v1  ;;  %v456_v45 = vsel %vm20837_vm8, %v20726_v31, %v20832_v10  ;;  %v205_v44 = vld [vmem:[%s10699_s17 + $0x110] sm:$0xff]  ;;  %vm20842_vm6 = vmmov %vm20841_vm15  ;;  %vm20845_vm7 = vcmask 900096  }
 0x8c6   : > { %10259 = vmatpush1.msra.mxu0 %v2210_v13  ;;  %10197 = vmatprep.subr.mxu1 %v749_v8  ;;  %v17909_v6 = vpop.permute.xlu1 %6541  ;;  %v1626_v50 = vsel %vm20838_vm5, %v20799_v41, %v20835_v55  ;;  %v20840_v8 = vld [vmem:[#allocation165_spill] sm:$0xff]  ;;  %v7756_v10 = vsel %vm7721_vm14, %v17331_v2, %v17729_v15  ;;  %vm20846_vm12 = vmmov %vm20845_vm7  ;;  %v20847_v55 = vld [vmem:[#allocation84_spill] sm:$0xff]  ;;  %vm20849_vm8 = vcmask 1031168   ;;  %v7464_v15 = vsel %vm7429_vm13, %v17383_v51, %v17756_v5 }
 0x8c7   : > { %10260 = vmatprep.subr.mxu0 %v1919_v47  ;;  %10198 = vmatpush1.msra.mxu1 %v748_v59  ;;  %v17914_v49 = vpop.permute.xlu0 %6539  ;;  %v1334_v41 = vsel %vm20842_vm6, %v20807_v17, %v20840_v8  ;;  %v20843_v47 = vld [vmem:[#allocation126_spill] sm:$0xff]  ;;  %v20844_v59 = vld [vmem:[#allocation123_spill] sm:$0xff]  ;;  %vm20850_vm5 = vmmov %vm20849_vm8  ;;  %vm20854_vm6 = vcmask 1039360  }
 0x8c8   : > { %10261 = vmatpush1.msra.mxu0 %v1918_v23  ;;  %5091 = vrot.lane.b32.xlu1 %v4966_v16, %s10653_s7  ;;  %v1335_v16 = vsel %vm20841_vm15, %v20840_v8, %v20839_v27  ;;  %v1043_v23 = vsel %vm20845_vm7, %v20844_v59, %v20843_v47  ;;  %v1042_v17 = vsel %vm20846_vm12, %v20815_v56, %v20844_v59  ;;  %vm20851_vm15 = vcmask 687104   ;;  %vm20856_vm12 = vmmov %vm20854_vm6 }
 0x8c9   : > { %5383 = vrot.lane.b32.xlu0 %v17649_v38, %s10662_s21  ;;  %10199 = vmatprep.subr.mxu1 %v457_v36  ;;  %v8954_v38 = vld [vmem:[%s18501_s2] sm:$0xff]  ;;  %vm20855_vm7 = vmmov %vm20851_vm15 }
 0x8ca   : > { %10262 = vmatprep.subr.mxu0 %v1627_v32  ;;  %10200 = vmatpush1.msra.mxu1 %v456_v45  ;;  %v17936_v13 = vpop.permute.xlu1 %6837  ;;  %v20848_v32 = vld [vmem:[#allocation81_spill] sm:$0xff]  ;;  %v7172_v51 = vsel %vm20855_vm7, %v17437_v22, %v17808_v19 }
 0x8cb   : > { %10263 = vmatpush1.msra.mxu0 %v1626_v50  ;;  %10201 = vmatprep.subr.mxu1 %v206_v9  ;;  %v17941_v31 = vpop.permute.xlu0 %6835  ;;  %v7465_v9 = vsel %vm7429_vm13, %v17756_v5, %v17748_v58  ;;  %v751_v45 = vsel %vm20849_vm8, %v20848_v32, %v20847_v55  ;;  %v750_v56 = vsel %vm20850_vm5, %v20823_v57, %v20848_v32  ;;  %v20852_v50 = vld [vmem:[#allocation42_spill] sm:$0xff]  ;;  %v207_v57 = vld [vmem:[%s10699_s17 + $0x120] sm:$0xff]  ;;  %vm20857_vm8 = vcmask 818176  }
 0x8cc   : > { %10264 = vmatprep.subr.mxu0 %v1335_v16  ;;  %10202 = vmatpush1.msra.mxu1 %v205_v44  ;;  %v7173_v44 = vsel %vm20851_vm15, %v17808_v19, %v17801_v54  ;;  %vm20858_vm5 = vmmov %vm20857_vm8  ;;  %vm20859_vm15 = vcmask 826368  }
 0x8cd   : > { %10265 = vmatpush1.msra.mxu0 %v1334_v41  ;;  %8957 = vperm.xlu0 %10618, %v8954_v38   ;;  %v20853_v38 = vld [vmem:[#allocation39_spill] sm:$0xff]  ;;  %v6881_v41 = vsel %vm20857_vm8, %v17860_v7, %v17853_v25  ;;  %v6880_v22 = vsel %vm20858_vm5, %v17491_v33, %v17860_v7  ;;  %v6589_v19 = vsel %vm20859_vm15, %v17914_v49, %v17909_v6  ;;  %vm20861_vm7 = vmmov %vm20859_vm15  ;;  %vm20863_vm8 = vcmask 965632  }
 0x8ce   : > { %10213 = vmatprep.subr.mxu1 %v7757_v20  ;;  %10266 = vmatprep.subr.mxu0 %v1043_v23  ;;  %v17958_v36 = vpop.permute.xlu1 %6249  ;;  %v459_v8 = vsel %vm20854_vm6, %v20853_v38, %v20852_v50  ;;  %v458_v5 = vsel %vm20856_vm12, %v20831_v28, %v20853_v38  ;;  %v7759_v28 = vsel %vm7721_vm14, %v17782_v21, %v17775_v26  ;;  %vm20860_vm6 = vcmask 834560   ;;  %vm20864_vm5 = vmmov %vm20863_vm8 }
 0x8cf   : > { %10214 = vmatpush2.msra.mxu1 %v7756_v10  ;;  %10267 = vmatpush1.msra.mxu0 %v1042_v17  ;;  %v6248_v2 = vpop.permute.xlu0 %6247  ;;  %v7758_v33 = vsel %vm7721_vm14, %v17722_v3, %v17782_v21  ;;  %vm20862_vm12 = vmmov %vm20860_vm6  ;;  %v7467_v23 = vsel %vm7429_vm13, %v17834_v37, %v17827_v43  ;;  %v7466_v3 = vsel %vm7429_vm13, %v17748_v58, %v17834_v37  ;;  %vm20865_vm15 = vcmask 687104  }
 0x8d0   : > { %10215 = vmatprep.subr.mxu1 %v7465_v9  ;;  %10268 = vmatprep.subr.mxu0 %v751_v45  ;;  %v6297_v59 = vsel %vm20860_vm6, %v6248_v2, %v17958_v36  ;;  %v6296_v7 = vsel %vm20862_vm12, %v17581_v62, %v6248_v2  ;;  %v7175_v62 = vsel %vm20865_vm15, %v17887_v24, %v17881_v4  ;;  %vm20866_vm6 = vmmov %vm20865_vm15  ;;  %vm20868_vm12 = vcmask 826368  }
 0x8d1   : > { %10216 = vmatpush2.msra.mxu1 %v7464_v15  ;;  %10269 = vmatpush1.msra.mxu0 %v750_v56  ;;  %vm20871_vm15 = vcmask 719872  }
 0x8d2   : > { %10217 = vmatprep.subr.mxu1 %v7173_v44  ;;  %10270 = vmatprep.subr.mxu0 %v459_v8  ;;  %v17985_v16 = vpop.permute.xlu1 %6545 }
 0x8d3   : > { %10218 = vmatpush2.msra.mxu1 %v7172_v51  ;;  %10271 = vmatpush1.msra.mxu0 %v458_v5  ;;  %v6544_v20 = vpop.permute.xlu0 %6543 }
 0x8d4   : > { %10219 = vmatprep.subr.mxu1 %v6881_v41  ;;  %10272 = vmatprep.subr.mxu0 %v17555_v53  ;;  %v6588_v53 = vsel %vm20861_vm7, %v17531_v30, %v17914_v49  ;;  %v7174_v49 = vsel %vm20866_vm6, %v17801_v54, %v17887_v24  ;;  %vm20867_vm7 = vcmask 818176   ;;  %vm20872_vm6 = vcmask 834560  }
 0x8d5   : > { %10220 = vmatpush2.msra.mxu1 %v6880_v22  ;;  %10273 = vmatpush1.msra.mxu0 %v207_v57  ;;  %v6883_v58 = vsel %vm20867_vm7, %v17941_v31, %v17936_v13 }
 0x8d6   : > { %10221 = vmatprep.subr.mxu1 %v6589_v19  ;;  %10284 = vmatprep.subr.mxu0 %v7759_v28 }
 0x8d7   : > { %10222 = vmatpush2.msra.mxu1 %v6588_v53  ;;  %10285 = vmatpush2.msra.mxu0 %v7758_v33  ;;  %v5958_v10 = vpop.permute.xlu1 %5957  ;;  %v5956_v17 = vpop.permute.xlu0 %5955  ;;  %v20882_v33 = vld [vmem:[#allocation573_spill] sm:$0xff] }
 0x8d8   : > { %10286 = vmatprep.subr.mxu0 %v7467_v23  ;;  %10223 = vmatprep.subr.mxu1 %v6297_v59  ;;  %v6004_v30 = vsel %vm20863_vm8, %v17630_v52, %v5956_v17  ;;  %v6005_v21 = vsel %vm20864_vm5, %v5956_v17, %v5958_v10  ;;  %v6591_v52 = vsel %vm20868_vm12, %v6544_v20, %v17985_v16  ;;  %vm20869_vm8 = vmmov %vm20867_vm7  ;;  %v20881_v59 = vld [vmem:[#allocation576_spill] sm:$0xff]  ;;  %v20883_v17 = vld [vmem:[#allocation87_spill] sm:$0xff] }
 0x8d9   : > { %10287 = vmatpush2.msra.mxu0 %v7466_v3  ;;  %10224 = vmatpush2.msra.mxu1 %v6296_v7  ;;  %v6882_v37 = vsel %vm20869_vm8, %v17853_v25, %v17941_v31  ;;  %vm20870_vm5 = vmmov %vm20868_vm12  ;;  %vm20875_vm8 = vcmask 973824   ;;  %v4837_v53 = vsel %vm4801_vm9, %v20882_v33, %v20881_v59  ;;  %v4836_v23 = vsel %vm4801_vm9, %v20759_v39, %v20882_v33  ;;  %v20884_v3 = vld [vmem:[#allocation215_spill] sm:$0xff]  ;;  %v20885_v39 = vld [vmem:[#allocation561_spill] sm:$0xff] }
 0x8da   : > { %10288 = vmatprep.subr.mxu0 %v7175_v62  ;;  %10225 = vmatprep.subr.mxu1 %v6005_v21  ;;  %v6590_v9 = vsel %vm20870_vm5, %v17909_v6, %v6544_v20  ;;  %vm20873_vm7 = vmmov %vm20871_vm15  ;;  %v4548_v62 = vsel %vm4509_vm0, %v20765_v12, %v20884_v3 }
 0x8db   : > { %10289 = vmatpush2.msra.mxu0 %v7174_v49  ;;  %10226 = vmatpush2.msra.mxu1 %v6004_v30  ;;  %vm20874_vm12 = vmmov %vm20872_vm6  ;;  %v20886_v49 = vld [vmem:[#allocation558_spill] sm:$0xff] }
 0x8dc   : > { %10290 = vmatprep.subr.mxu0 %v6883_v58  ;;  %v18035_v54 = vpop.permute.xlu1 %6253  ;;  %v6252_v24 = vpop.permute.xlu0 %6251  ;;  %10574 = vmatprep.mubr.msk.f32.mxu1 %vm20871_vm15, %v17640_v42  ;;  %vm20876_vm5 = vmmov %vm20875_vm8  ;;  %vm20877_vm15 = vcmask 965632   ;;  %v4257_v58 = vsel %vm4217_vm1, %v20886_v49, %v20885_v39 }
 0x8dd   : > { %10291 = vmatpush2.msra.mxu0 %v6882_v37  ;;  %v6299_v32 = vsel %vm20872_vm6, %v6252_v24, %v18035_v54  ;;  %10575 = vmatprep.mubr.msk.f32.mxu0 %vm20873_vm7, %v17640_v42  ;;  %v6298_v25 = vsel %vm20874_vm12, %v17958_v36, %v6252_v24  ;;  %vm20878_vm6 = vmmov %vm20877_vm15  ;;  %v4256_v37 = vsel %vm4217_vm1, %v20770_v48, %v20886_v49  ;;  %v20887_v24 = vld [vmem:[#allocation530_spill] sm:$0xff]  ;;  %v20890_v48 = vld [vmem:[#allocation493_spill] sm:$0xff] }
 0x8de   : > { %10292 = vmatprep.subr.mxu0 %v6591_v52  ;;  %vm20879_vm7 = vmmov %vm20876_vm5 }
 0x8df   : > { %10293 = vmatpush2.msra.mxu0 %v6590_v9  ;;  %vm20880_vm12 = vmmov %vm20876_vm5 }
 0x8e0   : > { %10294 = vmatprep.subr.mxu0 %v6299_v32  ;;  %v20888_v32 = vld [vmem:[#allocation527_spill] sm:$0xff] }
 0x8e1   : > { %10295 = vmatpush2.msra.mxu0 %v6298_v25  ;;  %v5666_v6 = vpop.permute.xlu1 %5665  ;;  %v5664_v31 = vpop.permute.xlu0 %5663  ;;  %v3965_v12 = vsel %vm3925_vm2, %v20888_v32, %v20887_v24 }
 0x8e2   : > { %v5712_v45 = vsel %vm20875_vm8, %v17658_v0, %v5664_v31  ;;  %v5713_v2 = vsel %vm20876_vm5, %v5664_v31, %v5666_v6  ;;  %vm20889_vm8 = vcmask 719872   ;;  %v3964_v31 = vsel %vm3925_vm2, %v20776_v14, %v20888_v32 }
 0x8e3   : > { %10227 = vmatprep.subr.mxu1 %v5713_v2  ;;  %vm20899_vm5 = vcmask 482304  }
 0x8e4   : > { %10228 = vmatpush2.msra.mxu1 %v5712_v45  ;;  %v20891_v45 = vld [vmem:[#allocation490_spill] sm:$0xff] }
 0x8e5   : > { %v3673_v2 = vsel %vm3633_vm3, %v20891_v45, %v20890_v48 }
 0x8e6   : > { %v18048_v15 = vpop.permute.xlu1 %5961  ;;  %v5960_v56 = vpop.permute.xlu0 %5959 }
 0x8e7   : > { %v6006_v44 = vsel %vm20877_vm15, %v5958_v10, %v5960_v56  ;;  %v6007_v36 = vsel %vm20878_vm6, %v5960_v56, %v18048_v15  ;;  %vm20900_vm15 = vmmov %vm20899_vm5 }
 0x8e8   : > { %10296 = vmatprep.subr.mxu0 %v6007_v36 }
 0x8e9   : > { %10297 = vmatpush2.msra.mxu0 %v6006_v44  ;;  %v20893_v44 = vld [vmem:[#allocation575_spill] sm:$0xff] }
 0x8ea   : > { %v4838_v14 = vsel %vm4801_vm9, %v20881_v59, %v20893_v44 }
 0x8eb   : > { %v5374_v38 = vpop.permute.xlu1 %5373  ;;  %v5372_v8 = vpop.permute.xlu0 %5371 }
 0x8ec   : > { %v5420_v51 = vsel %vm5385_vm10, %v17677_v63, %v5372_v8  ;;  %v5421_v0 = vsel %vm5385_vm10, %v5372_v8, %v5374_v38 }
 0x8ed   : > { %10229 = vmatprep.subr.mxu1 %v5421_v0  ;;  %v20895_v0 = vld [vmem:[#allocation453_spill] sm:$0xff] }
 0x8ee   : > { %10230 = vmatpush2.msra.mxu1 %v5420_v51  ;;  %v20894_v51 = vld [vmem:[#allocation456_spill] sm:$0xff] }
 0x8f0   : > { %v18056_v5 = vpop.permute.xlu1 %5669  ;;  %v5668_v57 = vpop.permute.xlu0 %5667 }
 0x8f1   : > { %v5714_v41 = vsel %vm20879_vm7, %v5666_v6, %v5668_v57  ;;  %v5715_v20 = vsel %vm20880_vm12, %v5668_v57, %v18056_v5  ;;  %v3381_v57 = vsel %vm3341_vm4, %v20895_v0, %v20894_v51 }
 0x8f2   : > { %10298 = vmatprep.subr.mxu0 %v5715_v20  ;;  %v20896_v20 = vld [vmem:[#allocation90_spill] sm:$0xff] }
 0x8f3   : > { %10299 = vmatpush2.msra.mxu0 %v5714_v41  ;;  %v10664_v41 = vmov 0.0  }
 0x8f5   : > { %v5082_v22 = vpop.permute.xlu1 %5081  ;;  %v5080_v19 = vpop.permute.xlu0 %5079 }
 0x8f6   : > { %v5128_v28 = vsel %vm5093_vm11, %v17701_v35, %v5080_v19  ;;  %v5129_v63 = vsel %vm5093_vm11, %v5080_v19, %v5082_v22  ;;  %v4549_v35 = vsel %vm4509_vm0, %v20884_v3, %v20883_v17 }
 0x8f7   : > { %10231 = vmatprep.subr.mxu1 %v5129_v63  ;;  %v20898_v63 = vld [vmem:[#allocation414_spill] sm:$0xff] }
 0x8f8   : > { %10232 = vmatpush2.msra.mxu1 %v5128_v28  ;;  %v20897_v28 = vld [vmem:[#allocation417_spill] sm:$0xff] }
 0x8f9   : > { %v18067_v7 = vpop.permute.xlu1 %5377  ;;  %10233 = vmatprep.subr.mxu1 %v4837_v53  ;;  %v3089_v59 = vsel %vm20899_vm5, %v20898_v63, %v20897_v28 }
 0x8fa   : > { %v5376_v10 = vpop.permute.xlu0 %5375  ;;  %10234 = vmatpush2.msra.mxu1 %v4836_v23  ;;  %v20902_v23 = vld [vmem:[#allocation378_spill] sm:$0xff] }
 0x8fb   : > { %v5422_v30 = vsel %vm5385_vm10, %v5374_v38, %v5376_v10  ;;  %v5423_v21 = vsel %vm5385_vm10, %v5376_v10, %v18067_v7  ;;  %10313 = vmatprep.subr.mxu1 %v4549_v35  ;;  %10236 = vmatmul.mubr.f32.vlgmr.msra.gmra.mxu1 %v17695_v18  ;;  %v3672_v38 = vsel %vm3633_vm3, %v20782_v34, %v20891_v45  ;;  %v20903_v10 = vld [vmem:[#allocation375_spill] sm:$0xff]  ;;  %v20906_v35 = vld [vmem:[#allocation529_spill] sm:$0xff] }
 0x8fc   : > { %10300 = vmatprep.subr.mxu0 %v5423_v21  ;;  %10314 = vmatpush1.msra.mxu1 %v4548_v62  ;;  %v3380_v34 = vsel %vm3341_vm4, %v20788_v29, %v20895_v0  ;;  %v20901_v29 = vld [vmem:[#allocation560_spill] sm:$0xff]  ;;  %v20907_v21 = vld [vmem:[#allocation338_spill] sm:$0xff]  ;;  %v20908_v62 = vld [vmem:[#allocation335_spill] sm:$0xff] }
 0x8fd   : > { %10301 = vmatpush2.msra.mxu0 %v5422_v30  ;;  %v18085_v52 = vpop.permute.xlu1 %5085  ;;  %10315 = vmatprep.subr.mxu1 %v4257_v58  ;;  %v4258_v53 = vsel %vm4217_vm1, %v20885_v39, %v20901_v29  ;;  %vm20909_vm1 = vcmask 736256   ;;  %v20911_v58 = vld [vmem:[#allocation492_spill] sm:$0xff] }
 0x8fe   : > { %v5084_v9 = vpop.permute.xlu0 %5083  ;;  %10316 = vmatpush1.msra.mxu1 %v4256_v37  ;;  %10576 = vmatprep.mubr.msk.f32.mxu1 %vm20889_vm8, %v17640_v42  ;;  %v20892_v42 = vld [vmem:[#allocation578_spill] sm:$0xff]  ;;  %v2505_v39 = vsel %vm20909_vm1, %v20908_v62, %v20907_v21  ;;  %vm20910_vm7 = vmmov %vm20909_vm1  ;;  %v3674_v37 = vsel %vm3633_vm3, %v20890_v48, %v20911_v58  ;;  %v20918_v48 = vld [vmem:[#allocation251_spill] sm:$0xff]  ;;  %vm20919_vm3 = vcmask 752640  }
 0x8ff   : > { %v5130_v25 = vsel %vm5093_vm11, %v5082_v22, %v5084_v9  ;;  %v5131_v6 = vsel %vm5093_vm11, %v5084_v9, %v18085_v52  ;;  %10317 = vmatprep.subr.mxu1 %v3965_v12  ;;  %v4839_v36 = vsel %vm4801_vm9, %v20893_v44, %v20892_v42  ;;  %v4550_v22 = vsel %vm4509_vm0, %v20883_v17, %v20896_v20  ;;  %v20912_v9 = vld [vmem:[#allocation296_spill] sm:$0xff]  ;;  %vm20920_vm8 = vmmov %vm20919_vm3  ;;  %v20928_v20 = vld [vmem:[#allocation170_spill] sm:$0xff] }
 0x900   : > { %10302 = vmatprep.subr.mxu0 %v5131_v6  ;;  %10318 = vmatpush1.msra.mxu1 %v3964_v31  ;;  %vm20904_vm0 = vcmask 490496   ;;  %v20917_v31 = vld [vmem:[#allocation254_spill] sm:$0xff]  ;;  %v20921_v44 = vld [vmem:[#allocation416_spill] sm:$0xff] }
 0x901   : > { %10303 = vmatpush2.msra.mxu0 %v5130_v25  ;;  %v18104_v56 = vpop.permute.xlu1 %7717  ;;  %10319 = vmatprep.subr.mxu1 %v3673_v2  ;;  %v2797_v17 = vsel %vm20904_vm0, %v20903_v10, %v20902_v23  ;;  %vm20905_vm6 = vmmov %vm20904_vm0  ;;  %v20916_v25 = vld [vmem:[#allocation455_spill] sm:$0xff]  ;;  %v1921_v45 = vsel %vm20919_vm3, %v20918_v48, %v20917_v31  ;;  %v20933_v29 = vld [vmem:[#allocation128_spill] sm:$0xff]  ;;  %vm20938_vm3 = vcmask 744448  }
 0x902   : > { %v18112_v8 = vpop.permute.xlu0 %7715  ;;  %10304 = vmatprep.subr.mxu0 %v4839_v36  ;;  %10320 = vmatpush1.msra.mxu1 %v3672_v38  ;;  %v2796_v3 = vsel %vm20905_vm6, %v20802_v61, %v20903_v10  ;;  %v2504_v61 = vsel %vm20910_vm7, %v20810_v11, %v20908_v62  ;;  %v3382_v11 = vsel %vm3341_vm4, %v20894_v51, %v20916_v25  ;;  %vm20922_vm4 = vmmov %vm20899_vm5  ;;  %v20923_v38 = vld [vmem:[#allocation212_spill] sm:$0xff]  ;;  %vm20925_vm5 = vcmask 883712   ;;  %v209_v25 = vld [vmem:[%s10699_s17 + $0x130] sm:$0xff] }
 0x903   : > { %10305 = vmatpush2.msra.mxu0 %v4838_v14  ;;  %10321 = vmatprep.subr.mxu1 %v3381_v57  ;;  %v3090_v36 = vsel %vm20922_vm4, %v20897_v28, %v20921_v44  ;;  %v20924_v14 = vld [vmem:[#allocation209_spill] sm:$0xff]  ;;  %vm20930_vm6 = vcmask 891904   ;;  %v20945_v58 = vld [vmem:[#allocation44_spill] sm:$0xff]  ;;  %v20952_v44 = vld [vmem:[#allocation127_spill] sm:$0xff] }
 0x904   : > { %10384 = vmatprep.subr.mxu0 %v10664_v41  ;;  %10307 = vmatmul.mubr.f32.vlgmr.msra.gmra.mxu0 %v17695_v18  ;;  %v3088_v18 = vsel %vm20900_vm15, %v20794_v46, %v20898_v63  ;;  %v3966_v46 = vsel %vm3925_vm2, %v20887_v24, %v20906_v35  ;;  %v20913_v24 = vld [vmem:[#allocation293_spill] sm:$0xff]  ;;  %vm20914_vm2 = vcmask 744448   ;;  %v1629_v51 = vsel %vm20925_vm5, %v20924_v14, %v20923_v38  ;;  %vm20926_vm15 = vmmov %vm20925_vm5  ;;  %v20939_v35 = vld [vmem:[#allocation86_spill] sm:$0xff] }
 0x905   : > { %10322 = vmatpush1.msra.mxu1 %v3380_v34  ;;  %10385 = vmatpush1.msra.mxu0 %v4550_v22  ;;  %v18128_v19 = vpop.permute.xlu1 %7425  ;;  %v2213_v32 = vsel %vm20914_vm2, %v20913_v24, %v20912_v9  ;;  %vm20915_vm12 = vmmov %vm20914_vm2  ;;  %v1628_v0 = vsel %vm20926_vm15, %v20834_v1, %v20924_v14  ;;  %v20927_v57 = vld [vmem:[#allocation377_spill] sm:$0xff]  ;;  %v20929_v22 = vld [vmem:[#allocation167_spill] sm:$0xff]  ;;  %vm20935_vm2 = vcmask 900096   ;;  %vm20944_vm5 = vcmask 752640  }
 0x906   : > { %v18133_v33 = vpop.permute.xlu0 %7423  ;;  %10323 = vmatprep.subr.mxu1 %v3089_v59  ;;  %10386 = vmatprep.subr.mxu0 %v10664_v41  ;;  %v2212_v12 = vsel %vm20915_vm12, %v20818_v60, %v20913_v24  ;;  %v1920_v60 = vsel %vm20920_vm8, %v20826_v40, %v20918_v48  ;;  %v2798_v40 = vsel %vm20904_vm0, %v20902_v23, %v20927_v57  ;;  %vm20931_vm1 = vmmov %vm20930_vm6  ;;  %v20932_v59 = vld [vmem:[#allocation337_spill] sm:$0xff]  ;;  %vm20941_vm8 = vcmask 1031168   ;;  %v210_v24 = vld [vmem:[%s10699_s17 + $0x138] sm:$0xff] }
 0x907   : > { %10324 = vmatpush1.msra.mxu1 %v3088_v18  ;;  %10387 = vmatpush1.msra.mxu0 %v4258_v53  ;;  %v1337_v28 = vsel %vm20930_vm6, %v20929_v22, %v20928_v20  ;;  %v1336_v1 = vsel %vm20931_vm1, %v20839_v27, %v20929_v22  ;;  %v2506_v18 = vsel %vm20910_vm7, %v20907_v21, %v20932_v59  ;;  %v20934_v53 = vld [vmem:[#allocation125_spill] sm:$0xff]  ;;  %vm20936_vm12 = vmmov %vm20935_vm2  ;;  %vm20947_vm15 = vcmask 1039360   ;;  %v211_v22 = vld [vmem:[%s10699_s17 + $0x140] sm:$0xff] }
 0x908   : > { %10325 = vmatprep.subr.mxu1 %v2797_v17  ;;  %10388 = vmatprep.subr.mxu0 %v10664_v41  ;;  %v1045_v23 = vsel %vm20935_vm2, %v20934_v53, %v20933_v29  ;;  %v1044_v10 = vsel %vm20936_vm12, %v20843_v47, %v20934_v53  ;;  %v20937_v17 = vld [vmem:[#allocation295_spill] sm:$0xff]  ;;  %vm20942_vm4 = vmmov %vm20941_vm8  ;;  %vm20950_vm6 = vcmask 883712   ;;  %v20951_v48 = vld [vmem:[#allocation169_spill] sm:$0xff]  ;;  %v7469_v14 = vsel %vm7429_vm13, %v18133_v33, %v18128_v19 }
 0x909   : > { %10326 = vmatpush1.msra.mxu1 %v2796_v3  ;;  %10389 = vmatpush1.msra.mxu0 %v3966_v46  ;;  %v18152_v30 = vpop.permute.xlu1 %7131  ;;  %v2214_v27 = vsel %vm20938_vm3, %v20912_v9, %v20937_v17  ;;  %v20940_v46 = vld [vmem:[#allocation83_spill] sm:$0xff]  ;;  %vm20948_vm0 = vmmov %vm20947_vm15  ;;  %vm20956_vm12 = vcmask 687104  }
 0x90a   : > { %v18157_v49 = vpop.permute.xlu0 %7719  ;;  %10327 = vmatprep.subr.mxu1 %v2505_v39  ;;  %10390 = vmatprep.subr.mxu0 %v10664_v41  ;;  %v753_v21 = vsel %vm20941_vm8, %v20940_v46, %v20939_v35  ;;  %v752_v47 = vsel %vm20942_vm4, %v20847_v55, %v20940_v46  ;;  %v20943_v39 = vld [vmem:[#allocation253_spill] sm:$0xff]  ;;  %vm20953_vm7 = vmmov %vm20935_vm2 }
 0x90b   : > { %10328 = vmatpush1.msra.mxu1 %v2504_v61  ;;  %10391 = vmatpush1.msra.mxu0 %v3674_v37  ;;  %v1922_v61 = vsel %vm20944_vm5, %v20917_v31, %v20943_v39  ;;  %v20946_v37 = vld [vmem:[#allocation41_spill] sm:$0xff]  ;;  %vm20955_vm2 = vmmov %vm20942_vm4  ;;  %vm20960_vm4 = vcmask 818176  }
 0x90c   : > { %10329 = vmatprep.subr.mxu1 %v2213_v32  ;;  %10392 = vmatprep.subr.mxu0 %v10664_v41  ;;  %v461_v9 = vsel %vm20947_vm15, %v20946_v37, %v20945_v58  ;;  %v460_v32 = vsel %vm20948_vm0, %v20852_v50, %v20946_v37  ;;  %v7761_v50 = vsel %vm7721_vm14, %v18112_v8, %v18104_v56  ;;  %vm20957_vm3 = vmmov %vm20956_vm12  ;;  %vm20962_vm15 = vcmask 826368  }
 0x90d   : > { %10330 = vmatpush1.msra.mxu1 %v2212_v12  ;;  %10393 = vmatpush1.msra.mxu0 %v3382_v11  ;;  %v18176_v6 = vpop.permute.xlu1 %7427  ;;  %v20949_v12 = vld [vmem:[#allocation211_spill] sm:$0xff]  ;;  %vm20959_vm8 = vmmov %vm20948_vm0 }
 0x90e   : > { %v18181_v2 = vpop.permute.xlu0 %7133  ;;  %10331 = vmatprep.subr.mxu1 %v1921_v45  ;;  %10394 = vmatprep.subr.mxu0 %v10664_v41  ;;  %v1630_v55 = vsel %vm20950_vm6, %v20923_v38, %v20949_v12  ;;  %v1338_v45 = vsel %vm20931_vm1, %v20928_v20, %v20951_v48  ;;  %v7176_v20 = vsel %vm20957_vm3, %v17881_v4, %v18152_v30  ;;  %vm20961_vm5 = vmmov %vm20960_vm4  ;;  %vm20964_vm6 = vcmask 834560  }
 0x90f   : > { %10332 = vmatpush1.msra.mxu1 %v1920_v60  ;;  %10395 = vmatpush1.msra.mxu0 %v3090_v36  ;;  %v7760_v60 = vsel %vm7721_vm14, %v17775_v26, %v18112_v8  ;;  %v1046_v36 = vsel %vm20953_vm7, %v20933_v29, %v20952_v44  ;;  %v7468_v26 = vsel %vm7429_vm13, %v17827_v43, %v18133_v33  ;;  %v20958_v43 = vld [vmem:[#allocation43_spill] sm:$0xff]  ;;  %vm20963_vm0 = vmmov %vm20962_vm15 }
 0x910   : > { %10333 = vmatprep.subr.mxu1 %v1629_v51  ;;  %10396 = vmatprep.subr.mxu0 %v10664_v41  ;;  %v18273_v51 = vpop.f32.mrf.mxu0  ;;  %v462_v33 = vsel %vm20959_vm8, %v20945_v58, %v20958_v43  ;;  %v7470_v17 = vsel %vm7429_vm13, %v18128_v19, %v18176_v6  ;;  %vm20965_vm1 = vmmov %vm20964_vm6 }
 0x911   : > { %10334 = vmatpush1.msra.mxu1 %v1628_v0  ;;  %10397 = vmatpush1.msra.mxu0 %v2798_v40  ;;  %v18200_v34 = vpop.permute.xlu1 %6841  ;;  %v20954_v0 = vld [vmem:[#allocation85_spill] sm:$0xff]  ;;  %v7177_v40 = vsel %vm20956_vm12, %v18152_v30, %v18181_v2  ;;  %vm20967_vm7 = vmmov %vm20957_vm3  ;;  %vm20970_vm12 = vcmask 719872   ;;  %vm20971_vm3 = vcmask 973824  }
 0x912   : > { %v18205_v63 = vpop.permute.xlu0 %6839  ;;  %10335 = vmatprep.subr.mxu1 %v1337_v28  ;;  %10398 = vmatprep.subr.mxu0 %v10664_v41  ;;  %v754_v57 = vsel %vm20955_vm2, %v20939_v35, %v20954_v0  ;;  %v18296_v59 = vpop.f32.mrf.mxu0  ;;  %vm20969_vm2 = vmmov %vm20960_vm4 }
 0x913   : > { %10336 = vmatpush1.msra.mxu1 %v1336_v1  ;;  %10399 = vmatpush1.msra.mxu0 %v2506_v18  ;;  %v6885_v1 = vsel %vm20960_vm4, %v18205_v63, %v18200_v34  ;;  %v6884_v4 = vsel %vm20961_vm5, %v17936_v13, %v18205_v63  ;;  %v18302_v18 = vpop.f32.mrf.mxu1  ;;  %vm20972_vm8 = vmmov %vm20971_vm3 }
 0x914   : > { %10337 = vmatprep.subr.mxu1 %v1045_v23  ;;  %10400 = vmatprep.subr.mxu0 %v10664_v41  ;;  %v18307_v53 = vpop.f32.mrf.mxu0  ;;  %v7762_v23 = vsel %vm7721_vm14, %v18104_v56, %v18157_v49  ;;  %vm20966_vm14 = vcmask 965632   ;;  %vm20973_vm4 = vmmov %vm20963_vm0 }
 0x915   : > { %10338 = vmatpush1.msra.mxu1 %v1044_v10  ;;  %10401 = vmatpush1.msra.mxu0 %v2214_v27  ;;  %v18224_v3 = vpop.permute.xlu1 %6547  ;;  %vm20968_vm13 = vmmov %vm20966_vm14 }
 0x916   : > { %v18229_v62 = vpop.permute.xlu0 %7135  ;;  %10339 = vmatprep.subr.mxu1 %v753_v21  ;;  %10402 = vmatprep.subr.mxu0 %v10664_v41  ;;  %v6592_v13 = vsel %vm20963_vm0, %v17985_v16, %v18224_v3  ;;  %v18324_v16 = vpop.f32.mrf.mxu1  ;;  %vm20974_vm5 = vmmov %vm20965_vm1 }
 0x917   : > { %10340 = vmatpush1.msra.mxu1 %v752_v47  ;;  %10403 = vmatpush1.msra.mxu0 %v1922_v61  ;;  %v7178_v35 = vsel %vm20967_vm7, %v18181_v2, %v18229_v62  ;;  %vm20976_vm0 = vmmov %vm20971_vm3 }
 0x918   : > { %10341 = vmatprep.subr.mxu1 %v461_v9  ;;  %10404 = vmatprep.subr.mxu0 %v10664_v41 }
 0x919   : > { %10342 = vmatpush1.msra.mxu1 %v460_v32  ;;  %10405 = vmatpush1.msra.mxu0 %v1630_v55  ;;  %v18250_v11 = vpop.permute.xlu1 %6843 }
 0x91a   : > { %v18252_v31 = vpop.permute.xlu0 %6549  ;;  %10343 = vmatprep.subr.mxu1 %v210_v24  ;;  %10406 = vmatprep.subr.mxu0 %v10664_v41  ;;  %v6886_v21 = vsel %vm20969_vm2, %v18200_v34, %v18250_v11 }
 0x91b   : > { %10344 = vmatpush1.msra.mxu1 %v209_v25  ;;  %10407 = vmatpush1.msra.mxu0 %v1338_v45  ;;  %v6593_v29 = vsel %vm20962_vm15, %v18224_v3, %v18252_v31  ;;  %v18327_v3 = vpop.f32.mrf.mxu0  ;;  %vm20975_vm15 = vmmov %vm20968_vm13 }
 0x91c   : > { %10355 = vmatprep.subr.mxu1 %v7761_v50  ;;  %10408 = vmatprep.subr.mxu0 %v10664_v41 }
 0x91d   : > { %10356 = vmatpush2.msra.mxu1 %v7760_v60  ;;  %10409 = vmatpush1.msra.mxu0 %v1046_v36  ;;  %v18268_v38 = vpop.permute.xlu1 %6257  ;;  %v18337_v46 = vpop.f32.mrf.mxu0 }
 0x91e   : > { %v6256_v8 = vpop.permute.xlu0 %6255  ;;  %10357 = vmatprep.subr.mxu1 %v7469_v14  ;;  %10410 = vmatprep.subr.mxu0 %v10664_v41 }
 0x91f   : > { %10358 = vmatpush2.msra.mxu1 %v7468_v26  ;;  %10411 = vmatpush1.msra.mxu0 %v754_v57  ;;  %v6301_v10 = vsel %vm20964_vm6, %v6256_v8, %v18268_v38  ;;  %v6300_v56 = vsel %vm20965_vm1, %v18035_v54, %v6256_v8  ;;  %v18335_v54 = vpop.f32.mrf.mxu1  ;;  %v18355_v58 = vpop.f32.mrf.mxu0  ;;  %v20977_v26 = vld [vmem:[#allocation580_spill] sm:$0xff]  ;;  %v20978_v8 = vld [vmem:[#allocation577_spill] sm:$0xff] }
 0x920   : > { %10359 = vmatprep.subr.mxu1 %v7177_v40  ;;  %10412 = vmatprep.subr.mxu0 %v10664_v41  ;;  %v4840_v40 = vsel %vm4801_vm9, %v20892_v42, %v20978_v8 }
 0x921   : > { %10360 = vmatpush2.msra.mxu1 %v7176_v20  ;;  %10413 = vmatpush1.msra.mxu0 %v462_v33  ;;  %v5964_v28 = vpop.permute.xlu1 %5963  ;;  %v18353_v34 = vpop.f32.mrf.mxu1 }
 0x922   : > { %v6552_v30 = vpop.permute.xlu0 %6551  ;;  %10361 = vmatprep.subr.mxu1 %v6885_v1  ;;  %10414 = vmatprep.subr.mxu0 %v10664_v41  ;;  %v6008_v19 = vsel %vm20968_vm13, %v18048_v15, %v5964_v28  ;;  %v10627_v15 = vld [vmem:[%s18500_s1 + $0x8] sm:$0xff]  ;;  %v18363_v32 = vpop.f32.mrf.mxu0 }
 0x923   : > { %10362 = vmatpush2.msra.mxu1 %v6884_v4  ;;  %10415 = vmatpush1.msra.mxu0 %v211_v22  ;;  %v6594_v39 = vsel %vm20973_vm4, %v18252_v31, %v6552_v30  ;;  %v18360_v9 = vpop.f32.mrf.mxu1  ;;  %v10628_v22 = vld [vmem:[%s18500_s1] sm:$0xff] }
 0x924   : > { %10363 = vmatprep.subr.mxu1 %v6593_v29  ;;  %10426 = vmatprep.subr.mxu0 %v10664_v41  ;;  %v9458_v48 = vpop.f32.mrf.mxu0  ;;  %v20979_v4 = vld [vmem:[#allocation579_spill] sm:$0xff] }
 0x925   : > { %10364 = vmatpush2.msra.mxu1 %v6592_v13  ;;  %10427 = vmatpush2.msra.mxu0 %v7762_v23  ;;  %v6260_v63 = vpop.permute.xlu1 %6259  ;;  %v9387_v11 = vpop.f32.mrf.mxu1  ;;  %v4842_v30 = vsel %vm4801_vm9, %v20977_v26, %v20979_v4 }
 0x926   : > { %v5966_v49 = vpop.permute.xlu0 %5965  ;;  %10365 = vmatprep.subr.mxu1 %v6301_v10  ;;  %10428 = vmatprep.subr.mxu0 %v10664_v41  ;;  %v6302_v37 = vsel %vm20974_vm5, %v18268_v38, %v6260_v63  ;;  %v18372_v44 = vpop.f32.mrf.mxu0 }
 0x927   : > { %10366 = vmatpush2.msra.mxu1 %v6300_v56  ;;  %10429 = vmatpush2.msra.mxu0 %v7470_v17  ;;  %v6009_v27 = vsel %vm20966_vm14, %v5964_v28, %v5966_v49  ;;  %v9527_v50 = vpop.f32.mrf.mxu1 }
 0x928   : > { %10367 = vmatprep.subr.mxu1 %v6009_v27  ;;  %10430 = vmatprep.subr.mxu0 %v10664_v41  ;;  %v9600_v57 = vpop.f32.mrf.mxu0 }
 0x929   : > { %10368 = vmatpush2.msra.mxu1 %v6008_v19  ;;  %10431 = vmatpush2.msra.mxu0 %v7178_v35  ;;  %v5674_v6 = vpop.permute.xlu1 %5673  ;;  %v9529_v0 = vpop.f32.mrf.mxu1 }
 0x92a   : > { %v5672_v47 = vpop.permute.xlu0 %5671  ;;  %10432 = vmatprep.subr.mxu0 %v10664_v41  ;;  %10577 = vmatprep.mubr.msk.f32.mxu0 %vm20970_vm12, %v10627_v15  ;;  %v9740_v28 = vpop.f32.mrf.mxu0 }
 0x92b   : > { %v5716_v2 = vsel %vm20971_vm3, %v18056_v5, %v5672_v47  ;;  %10433 = vmatpush2.msra.mxu0 %v6886_v21  ;;  %v5717_v62 = vsel %vm20972_vm8, %v5672_v47, %v5674_v6  ;;  %v9669_v33 = vpop.f32.mrf.mxu1 }
 0x92c   : > { %10369 = vmatprep.subr.mxu1 %v5717_v62  ;;  %10434 = vmatprep.subr.mxu0 %v10664_v41  ;;  %v9742_v29 = vpop.f32.mrf.mxu0 }
 0x92d   : > { %10370 = vmatpush2.msra.mxu1 %v5716_v2  ;;  %10435 = vmatpush2.msra.mxu0 %v6594_v39  ;;  %v5380_v61 = vpop.permute.xlu1 %5379  ;;  %v9671_v42 = vpop.f32.mrf.mxu1 }
 0x92e   : > { %v5968_v5 = vpop.permute.xlu0 %5967  ;;  %10436 = vmatprep.subr.mxu0 %v10664_v41  ;;  %v5424_v45 = vsel %vm5385_vm10, %v18067_v7, %v5380_v61  ;;  %v4841_v7 = vsel %vm4801_vm9, %v20978_v8, %v20977_v26  ;;  %v9882_v13 = vpop.f32.mrf.mxu0 }
 0x92f   : > { %v6010_v24 = vsel %vm20975_vm15, %v5966_v49, %v5968_v5  ;;  %10437 = vmatpush2.msra.mxu0 %v6302_v37  ;;  %v9811_v23 = vpop.f32.mrf.mxu1 }
 0x930   : > { %10438 = vmatprep.subr.mxu0 %v10664_v41  ;;  %v9884_v10 = vpop.f32.mrf.mxu0 }
 0x931   : > { %10439 = vmatpush2.msra.mxu0 %v6010_v24  ;;  %v5676_v12 = vpop.permute.xlu1 %5675  ;;  %v9813_v63 = vpop.f32.mrf.mxu1 }
 0x932   : > { %v5718_v55 = vsel %vm20976_vm0, %v5674_v6, %v5676_v12  ;;  %v5382_v25 = vpop.permute.xlu0 %5381  ;;  %10440 = vmatprep.subr.mxu0 %v10664_v41  ;;  %v10024_v19 = vpop.f32.mrf.mxu0 }
 0x933   : > { %v5425_v31 = vsel %vm5385_vm10, %v5380_v61, %v5382_v25  ;;  %10441 = vmatpush2.msra.mxu0 %v5718_v55 }
 0x934   : > { %10371 = vmatprep.subr.mxu1 %v5425_v31  ;;  %10442 = vmatprep.subr.mxu0 %v10664_v41 }
 0x935   : > { %10372 = vmatpush2.msra.mxu1 %v5424_v45  ;;  %v5090_v60 = vpop.permute.xlu1 %5089 }
 0x936   : > { %v5088_v36 = vpop.permute.xlu0 %5087 }
 0x937   : > { %v5132_v38 = vsel %vm5093_vm11, %v18085_v52, %v5088_v36  ;;  %v5133_v14 = vsel %vm5093_vm11, %v5088_v36, %v5090_v60 }
 0x938   : > { %10373 = vmatprep.subr.mxu1 %v5133_v14 }
 0x939   : > { %10374 = vmatpush2.msra.mxu1 %v5132_v38 }
 0x93a   : > { %10375 = vmatprep.subr.mxu1 %v4841_v7  ;;  %v5092_v20 = vpop.permute.xlu1 %5091 }
 0x93b   : > { %v5384_v43 = vpop.permute.xlu0 %5383  ;;  %10376 = vmatpush2.msra.mxu1 %v4840_v40  ;;  %v5134_v1 = vsel %vm5093_vm11, %v5090_v60, %v5092_v20 }
 0x93c   : > { %v5426_v52 = vsel %vm5385_vm10, %v5382_v25, %v5384_v43  ;;  %10378 = vmatmul.mubr.f32.vlgmr.msra.gmra.mxu1 %v10628_v22 }
 0x93d   : > { %10443 = vmatpush2.msra.mxu0 %v5426_v52 }
 0x93e   : > { %10444 = vmatprep.subr.mxu0 %v10664_v41 }
 0x93f   : > { %10445 = vmatpush2.msra.mxu0 %v5134_v1 }
 0x940   : > { %10446 = vmatprep.subr.mxu0 %v10664_v41  ;;  %v9953_v41 = vpop.f32.mrf.mxu1 }
 0x941   : > { %10447 = vmatpush2.msra.mxu0 %v4842_v30 }
 0x942   : > { %10449 = vmatmul.mubr.f32.vlgmr.msra.gmra.mxu0 %v10628_v22  ;;  %v9955_v2 = vpop.f32.mrf.mxu1 }
 0x948   : > { %v18399_v17 = vpop.permute.xlu0 %8957 }
 0x949   : > { %v9031_v56 = vadd.f32 %v18273_v51, %v18399_v17  ;;  %v9033_v49 = vadd.f32 %v18296_v59, %v18399_v17  ;;  %v9102_v27 = vadd.f32 %v18302_v18, %v18399_v17  ;;  %v9104_v35 = vadd.f32 %v18324_v16, %v18399_v17 }
 0x94a   : > { %v9173_v6 = vadd.f32 %v18307_v53, %v18399_v17  ;;  %v9175_v21 = vadd.f32 %v18327_v3, %v18399_v17  ;;  %v9244_v51 = vadd.f32 %v18335_v54, %v18399_v17  ;;  %v9246_v59 = vadd.f32 %v18353_v34, %v18399_v17 }
 0x94b   : > { %v9315_v18 = vadd.f32 %v18337_v46, %v18399_v17  ;;  %v9317_v16 = vadd.f32 %v18355_v58, %v18399_v17  ;;  %v9386_v53 = vadd.f32 %v18360_v9, %v18399_v17  ;;  %v9388_v3 = vadd.f32 %v9387_v11, %v18399_v17  ;;  %10454 = vst [vmem:[%s18397_s24] sm:$0xff] %v9031_v56  ;;  %v10026_v58 = vpop.f32.mrf.mxu0 }
 0x94c   : > { %10455 = vst [vmem:[%s18397_s24 + $0x8] sm:$0xff] %v9033_v49  ;;  %10456 = vst [vmem:[%s18397_s24 + $0x10] sm:$0xff] %v9102_v27  ;;  %v9457_v54 = vadd.f32 %v18363_v32, %v18399_v17  ;;  %v9459_v46 = vadd.f32 %v9458_v48, %v18399_v17  ;;  %v9528_v47 = vadd.f32 %v9527_v50, %v18399_v17 }
 0x94d   : > { %10457 = vst [vmem:[%s18397_s24 + $0x18] sm:$0xff] %v9104_v35  ;;  %v9530_v15 = vadd.f32 %v9529_v0, %v18399_v17  ;;  %10458 = vst [vmem:[%s18397_s24 + $0x20] sm:$0xff] %v9173_v6  ;;  %v9599_v62 = vadd.f32 %v18372_v44, %v18399_v17  ;;  %v9601_v39 = vadd.f32 %v9600_v57, %v18399_v17 }
 0x94e   : > { %10459 = vst [vmem:[%s18397_s24 + $0x28] sm:$0xff] %v9175_v21  ;;  %10460 = vst [vmem:[%s18397_s24 + $0x30] sm:$0xff] %v9244_v51  ;;  %v9670_v34 = vadd.f32 %v9669_v33, %v18399_v17  ;;  %v9672_v61 = vadd.f32 %v9671_v42, %v18399_v17  ;;  %v9741_v37 = vadd.f32 %v9740_v28, %v18399_v17 }
 0x94f   : > { %10461 = vst [vmem:[%s18397_s24 + $0x38] sm:$0xff] %v9246_v59  ;;  %10462 = vst [vmem:[%s18397_s24 + $0x40] sm:$0xff] %v9315_v18  ;;  %v9743_v5 = vadd.f32 %v9742_v29, %v18399_v17  ;;  %v9812_v9 = vadd.f32 %v9811_v23, %v18399_v17  ;;  %v9814_v24 = vadd.f32 %v9813_v63, %v18399_v17 }
 0x950   : > { %10463 = vst [vmem:[%s18397_s24 + $0x48] sm:$0xff] %v9317_v16  ;;  %10464 = vst [vmem:[%s18397_s24 + $0x50] sm:$0xff] %v9386_v53  ;;  %v9883_v32 = vadd.f32 %v9882_v13, %v18399_v17  ;;  %v9885_v12 = vadd.f32 %v9884_v10, %v18399_v17  ;;  %v9954_v55 = vadd.f32 %v9953_v41, %v18399_v17 }
 0x951   : > { %10465 = vst [vmem:[%s18397_s24 + $0x58] sm:$0xff] %v9388_v3  ;;  %10466 = vst [vmem:[%s18397_s24 + $0x60] sm:$0xff] %v9457_v54  ;;  %v9956_v25 = vadd.f32 %v9955_v2, %v18399_v17  ;;  %v10025_v11 = vadd.f32 %v10024_v19, %v18399_v17  ;;  %v10027_v31 = vadd.f32 %v10026_v58, %v18399_v17 }
 0x952   : > { %10467 = vst [vmem:[%s18397_s24 + $0x68] sm:$0xff] %v9459_v46  ;;  %10468 = vst [vmem:[%s18397_s24 + $0x70] sm:$0xff] %v9528_v47 }
 0x953   : > { %10469 = vst [vmem:[%s18397_s24 + $0x78] sm:$0xff] %v9530_v15  ;;  %10470 = vst [vmem:[%s18397_s24 + $0x80] sm:$0xff] %v9599_v62 }
 0x954   : > { %10471 = vst [vmem:[%s18397_s24 + $0x88] sm:$0xff] %v9601_v39  ;;  %10472 = vst [vmem:[%s18397_s24 + $0x90] sm:$0xff] %v9670_v34 }
 0x955   : > { %10473 = vst [vmem:[%s18397_s24 + $0x98] sm:$0xff] %v9672_v61  ;;  %10474 = vst [vmem:[%s18397_s24 + $0xa0] sm:$0xff] %v9741_v37 }
 0x956   : > { %10475 = vst [vmem:[%s18397_s24 + $0xa8] sm:$0xff] %v9743_v5  ;;  %10476 = vst [vmem:[%s18397_s24 + $0xb0] sm:$0xff] %v9812_v9 }
 0x957   : > { %10477 = vst [vmem:[%s18397_s24 + $0xb8] sm:$0xff] %v9814_v24  ;;  %10478 = vst [vmem:[%s18397_s24 + $0xc0] sm:$0xff] %v9883_v32 }
 0x958   : > { %10479 = vst [vmem:[%s18397_s24 + $0xc8] sm:$0xff] %v9885_v12  ;;  %10480 = vst [vmem:[%s18397_s24 + $0xd0] sm:$0xff] %v9954_v55 }
 0x959   : > { %10481 = vst [vmem:[%s18397_s24 + $0xd8] sm:$0xff] %v9956_v25  ;;  %10482 = vst [vmem:[%s18397_s24 + $0xe0] sm:$0xff] %v10025_v11 }
 0x95a   : > { %10483 = vst [vmem:[%s18397_s24 + $0xe8] sm:$0xff] %v10027_v31 }
 0x965   : > { %v10095_v48 = vpop.f32.mrf.mxu1 }
 0x966   : > { %v10096_v45 = vadd.f32 %v10095_v48, %v18399_v17 }
 0x967   : > { %v10097_v50 = vpop.f32.mrf.mxu1 }
 0x968   : > { %10484 = vst [vmem:[%s18397_s24 + $0xf0] sm:$0xff] %v10096_v45  ;;  %v10098_v60 = vadd.f32 %v10097_v50, %v18399_v17 }
 0x96a   : > { %10485 = vst [vmem:[%s18397_s24 + $0xf8] sm:$0xff] %v10098_v60 }
 0x96f   : > { %v10166_v44 = vpop.f32.mrf.mxu0 }
 0x970   : > { %v10167_v36 = vadd.f32 %v10166_v44, %v18399_v17 }
 0x971   : > { %v10168_v38 = vpop.f32.mrf.mxu0 }
 0x972   : > { %10486 = vst [vmem:[%s18397_s24 + $0x100] sm:$0xff] %v10167_v36  ;;  %v10169_v14 = vadd.f32 %v10168_v38, %v18399_v17 }
 0x974   : > { %10487 = vst [vmem:[%s18397_s24 + $0x108] sm:$0xff] %v10169_v14 }
 0x9bb   : > { %v10237_v26 = vpop.f32.mrf.mxu1 }
 0x9bc   : > { %v10238_v8 = vadd.f32 %v10237_v26, %v18399_v17 }
 0x9bd   : > { %v10239_v7 = vpop.f32.mrf.mxu1 }
 0x9be   : > { %10488 = vst [vmem:[%s18397_s24 + $0x110] sm:$0xff] %v10238_v8  ;;  %v10240_v0 = vadd.f32 %v10239_v7, %v18399_v17 }
 0x9c0   : > { %10489 = vst [vmem:[%s18397_s24 + $0x118] sm:$0xff] %v10240_v0 }
 0x9c4   : > { %v10308_v57 = vpop.f32.mrf.mxu0 }
 0x9c5   : > { %v10309_v40 = vadd.f32 %v10308_v57, %v18399_v17 }
 0x9c6   : > { %v10310_v20 = vpop.f32.mrf.mxu0 }
 0x9c7   : > { %10490 = vst [vmem:[%s18397_s24 + $0x120] sm:$0xff] %v10309_v40  ;;  %v10311_v43 = vadd.f32 %v10310_v20, %v18399_v17 }
 0x9c9   : > { %10491 = vst [vmem:[%s18397_s24 + $0x128] sm:$0xff] %v10311_v43 }
 0x9fc   : > { %v10379_v33 = vpop.f32.mrf.mxu1 }
 0x9fd   : > { %v10380_v52 = vadd.f32 %v10379_v33, %v18399_v17 }
 0x9fe   : > { %v10381_v22 = vpop.f32.mrf.mxu1 }
 0x9ff   : > { %10492 = vst [vmem:[%s18397_s24 + $0x130] sm:$0xff] %v10380_v52  ;;  %v10382_v28 = vadd.f32 %v10381_v22, %v18399_v17 }
 0xa01   : > { %10493 = vst [vmem:[%s18397_s24 + $0x138] sm:$0xff] %v10382_v28 }
 0xa02   : > { %v10450_v1 = vpop.f32.mrf.mxu0 }
 0xa03   : > { %v10451_v42 = vadd.f32 %v10450_v1, %v18399_v17 }
 0xa04   : > { %v10452_v4 = vpop.f32.mrf.mxu0 }
 0xa05   : > { %10494 = vst [vmem:[%s18397_s24 + $0x140] sm:$0xff] %v10451_v42 }
 0xa06 PF: > { %s13_s12 = sadd.s32 1, %s10635_s12  }
 0xa07   : > { %p10_p4 = scmp.ge.s32.totalorder %s13_s12, 4  }
 0xa09   :  { %12 = sbr.rel (!%p10_p4) target bundleno = 1 (0x1), region = 62 }

</bundles_post_ra>
